<compile_context>
chip_gen: v7x
topology: tpu7x:2x2x1
jax: 0.10.0
libtpu: 0.0.40
codegen_flags: <defaults>
</compile_context>

<pallas_src>
import functools

import jax
import jax.numpy as jnp
from jax.experimental import pallas as pl
from jax.experimental.pallas import tpu as pltpu

_BN_EPS = 1e-5


def _vmem_limit_bytes():
    # Generation-aware VMEM budget: ~3/4 of physical, capped (v7x has 64 MiB).
    try:
        info = pltpu.get_tpu_info()
        cap = getattr(info, "vmem_capacity_bytes", None)
        if cap:
            return int(min(cap * 3 // 4, 100 * 1024 * 1024))
    except Exception:
        pass
    return 64 * 1024 * 1024


_VMEM_LIMIT = _vmem_limit_bytes()


def _round_up(x, m):
    return ((x + m - 1) // m) * m


def _gelu_tanh(x):
    # tanh-approx GELU (EUP friendly).  TODO(synk): PyTorch nn.GELU defaults to erf.
    c = 0.7978845608028654
    return 0.5 * x * (1.0 + jnp.tanh(c * (x + 0.044715 * x * x * x)))


def _bn_affine(bn):
    scale = bn["gamma"] / jnp.sqrt(bn["var"] + _BN_EPS)
    shift = bn["beta"] - bn["mean"] * scale
    return scale, shift


def _pick_strip(h, max_strip=64):
    """Largest divisor of h that is <= max_strip (whole image if small)."""
    if h <= max_strip:
        return h
    for s in range(max_strip, 0, -1):
        if h % s == 0:
            return s
    return h


def _make_strips(x, k):
    """Split NHWC image into overlapping (halo) row strips for 'same' k x k convs.

    Returns (strip_height S, n_strips, array (B*n_strips, S+2p, W+2p, C)).
    Halo duplication costs ~2p/S extra traffic vs. k^2 for an HBM im2col."""
    B, H, W, C = x.shape
    pad = k // 2
    S = _pick_strip(H)
    ns = H // S
    xp = jnp.pad(x, ((0, 0), (pad, pad), (pad, pad), (0, 0)))
    if ns == 1:
        xs = xp[:, None]
    else:
        xs = jnp.stack([xp[:, s * S: s * S + S + 2 * pad] for s in range(ns)], axis=1)
    return S, ns, xs.reshape(B * ns, S + 2 * pad, W + 2 * pad, C)


# ----------------------------------------------------------------------------
# Pallas kernels
# ----------------------------------------------------------------------------
def _mm_kernel(act, has_affine):
    """o = affine(act(a @ w + b)); bf16 casts in-kernel, f32 accumulation."""
    def kernel(a_ref, w_ref, b_ref, *rest):
        if has_affine:
            scale_ref, shift_ref, o_ref = rest
        else:
            (o_ref,) = rest
        acc = jnp.dot(a_ref[...].astype(jnp.bfloat16),
                      w_ref[...].astype(jnp.bfloat16),
                      preferred_element_type=jnp.float32)
        acc = acc + b_ref[...]
        if act == "sigmoid":
            acc = jax.nn.sigmoid(acc)
        elif act == "gelu":
            acc = _gelu_tanh(acc)
        elif act == "relu":
            acc = jnp.maximum(acc, 0.0)
        if has_affine:
            acc = acc * scale_ref[...] + shift_ref[...]
        o_ref[...] = acc
    return kernel


def pallas_matmul_fused(a, w, bias, *, act="none", scale=None, shift=None, tm=2048):
    """(M,K)@(K,N)+bias with fused activation / BN affine, M-tiled, masked boundary."""
    M, K = a.shape
    K2, N = w.shape
    assert K == K2
    tm = min(tm, M)                      # full-dim block when M is small
    has_affine = scale is not None
    inputs = [a, w, bias.reshape(1, N).astype(jnp.float32)]
    in_specs = [pl.BlockSpec((tm, K), lambda i: (i, 0)),
                pl.BlockSpec((K, N), lambda i: (0, 0)),
                pl.BlockSpec((1, N), lambda i: (0, 0))]
    if has_affine:
        inputs += [scale.reshape(1, N).astype(jnp.float32),
                   shift.reshape(1, N).astype(jnp.float32)]
        in_specs += [pl.BlockSpec((1, N), lambda i: (0, 0)),
                     pl.BlockSpec((1, N), lambda i: (0, 0))]
    return pl.pallas_call(
        _mm_kernel(act, has_affine),
        grid=(pl.cdiv(M, tm),),
        in_specs=in_specs,
        out_specs=pl.BlockSpec((tm, N), lambda i: (i, 0)),
        out_shape=jax.ShapeDtypeStruct((M, N), jnp.float32),
        compiler_params=pltpu.CompilerParams(
            dimension_semantics=("parallel",), vmem_limit_bytes=_VMEM_LIMIT),
    )(*inputs)


def _conv_tap_kernel(k, S, W, act, has_affine):
    """Dense k x k conv on a halo strip: taps looped in-kernel (no HBM im2col)."""
    def kernel(x_ref, w_ref, b_ref, *rest):
        if has_affine:
            scale_ref, shift_ref, o_ref = rest
        else:
            (o_ref,) = rest
        Cin = x_ref.shape[-1]
        Cout = o_ref.shape[-1]
        acc = jnp.zeros((S * W, Cout), jnp.float32)
        for t in range(k * k):
            u, v = divmod(t, k)
            xt = x_ref[0, u:u + S, v:v + W, :].reshape(S * W, Cin).astype(jnp.bfloat16)
            acc = acc + jnp.dot(xt, w_ref[t].astype(jnp.bfloat16),
                                preferred_element_type=jnp.float32)
        acc = acc + b_ref[...]
        if act == "sigmoid":
            acc = jax.nn.sigmoid(acc)
        elif act == "gelu":
            acc = _gelu_tanh(acc)
        if has_affine:
            acc = acc * scale_ref[...] + shift_ref[...]
        o_ref[0] = acc.reshape(S, W, Cout)
    return kernel


def _lstm_tap_kernel(k, S, W, hd):
    """ConvLSTM: gates conv (tap loop) + gate math + cell update, fully fused."""
    def kernel(x_ref, w_ref, b_ref, c_ref, h_out, c_out):
        Cin = x_ref.shape[-1]
        g = jnp.zeros((S * W, 4 * hd), jnp.float32)
        for t in range(k * k):
            u, v = divmod(t, k)
            xt = x_ref[0, u:u + S, v:v + W, :].reshape(S * W, Cin).astype(jnp.bfloat16)
            g = g + jnp.dot(xt, w_ref[t].astype(jnp.bfloat16),
                            preferred_element_type=jnp.float32)
        g = g + b_ref[...]
        # TODO(synk): gate chunk order assumed [i, f, o, g]; confirm vs repo ConvLSTMCell.
        i_g = jax.nn.sigmoid(g[:, 0 * hd:1 * hd])
        f_g = jax.nn.sigmoid(g[:, 1 * hd:2 * hd])
        o_g = jax.nn.sigmoid(g[:, 2 * hd:3 * hd])
        c_g = jnp.tanh(g[:, 3 * hd:4 * hd])
        c_prev = c_ref[0].reshape(S * W, hd)
        c_new = f_g * c_prev + i_g * c_g
        c_out[0] = c_new.reshape(S, W, hd)
        h_out[0] = (o_g * jnp.tanh(c_new)).reshape(S, W, hd)
    return kernel


def _mixer_block_kernel(k, S, W):
    """ConvMixer block fused per strip: z = y + BN1(GELU(DW(y))); out = BN2(GELU(PW(z)))."""
    pad = k // 2

    def kernel(y_ref, wdw_ref, bdw_ref, s1_ref, t1_ref,
               wpw_ref, bpw_ref, s2_ref, t2_ref, o_ref):
        C = o_ref.shape[-1]
        acc = jnp.zeros((S, W, C), jnp.float32)
        for t in range(k * k):
            u, v = divmod(t, k)
            acc = acc + y_ref[0, u:u + S, v:v + W, :] * wdw_ref[t:t + 1, :]
        z = _gelu_tanh(acc + bdw_ref[...])
        z = z * s1_ref[...] + t1_ref[...]
        z = y_ref[0, pad:pad + S, pad:pad + W, :] + z            # residual
        pw = jnp.dot(z.reshape(S * W, C).astype(jnp.bfloat16),
                     wpw_ref[...].astype(jnp.bfloat16),
                     preferred_element_type=jnp.float32)
        pw = _gelu_tanh(pw + bpw_ref[...])
        pw = pw * s2_ref[...] + t2_ref[...]
        o_ref[0] = pw.reshape(S, W, C)
    return kernel


def _ddf_kernel(k, rr, H, W):
    """DDF apply (kernel_combine='add'): all r*r branches with the input resident,
    taps looped in-kernel, output clamp fused.  CHW layout (W on lanes)."""
    def kernel(xp_ref, sp_ref, ch_ref, o_ref):
        C = o_ref.shape[2]
        for s in range(rr):
            sp_s = sp_ref[0, s]                                   # (kk, H, W)
            ch_s = ch_ref[0, s]                                   # (C, kk)
            acc = jnp.zeros((C, H, W), jnp.float32)
            for t in range(k * k):
                u, v = divmod(t, k)
                filt = sp_s[t][None, :, :] + ch_s[:, t][:, None, None]
                acc = acc + xp_ref[0, :, u:u + H, v:v + W] * filt
            o_ref[0, s] = jnp.clip(acc, 0.0, 255.0)
    return kernel


# ----------------------------------------------------------------------------
# Conv wrappers
# ----------------------------------------------------------------------------
def conv2d_kxk(x, wt, bias, *, act="none", bn=None):
    """Dense k x k conv, stride 1, 'same' padding; halo-strip Pallas kernel."""
    B, H, W, Cin = x.shape
    Cout, Cin2, k, _ = wt.shape
    assert Cin2 == Cin
    pad = k // 2
    kk = k * k
    S, ns, xs = _make_strips(x, k)
    Sh, Wp = S + 2 * pad, W + 2 * pad
    w_taps = jnp.transpose(wt, (2, 3, 1, 0)).reshape(kk, Cin, Cout)
    scale = shift = None
    if bn is not None:
        scale, shift = _bn_affine(bn)
    has_affine = scale is not None
    inputs = [xs, w_taps, bias.reshape(1, Cout)]
    in_specs = [pl.BlockSpec((1, Sh, Wp, Cin), lambda i: (i, 0, 0, 0)),
                pl.BlockSpec((kk, Cin, Cout), lambda i: (0, 0, 0)),
                pl.BlockSpec((1, Cout), lambda i: (0, 0))]
    if has_affine:
        inputs += [scale.reshape(1, Cout), shift.reshape(1, Cout)]
        in_specs += [pl.BlockSpec((1, Cout), lambda i: (0, 0)),
                     pl.BlockSpec((1, Cout), lambda i: (0, 0))]
    out = pl.pallas_call(
        _conv_tap_kernel(k, S, W, act, has_affine),
        grid=(B * ns,),
        in_specs=in_specs,
        out_specs=pl.BlockSpec((1, S, W, Cout), lambda i: (i, 0, 0, 0)),
        out_shape=jax.ShapeDtypeStruct((B * ns, S, W, Cout), jnp.float32),
        compiler_params=pltpu.CompilerParams(
            dimension_semantics=("parallel",), vmem_limit_bytes=_VMEM_LIMIT),
    )(*inputs)
    return out.reshape(B, H, W, Cout)


def conv1x1(x, wt, bias, *, act="none", bn=None):
    B, H, W, Cin = x.shape
    Cout = wt.shape[0]
    scale = shift = None
    if bn is not None:
        scale, shift = _bn_affine(bn)
    out = pallas_matmul_fused(x.reshape(B * H * W, Cin), wt.reshape(Cout, Cin).T,
                              bias, act=act, scale=scale, shift=shift)
    return out.reshape(B, H, W, Cout)


# ----------------------------------------------------------------------------
# Sub-modules
# ----------------------------------------------------------------------------
def conv_lstm_cell(x, state, p, k, hd):
    B, H, W, _ = x.shape
    pad = k // 2
    if state is None:
        h_prev = jnp.zeros((B, H, W, hd), jnp.float32)
        c_prev = jnp.zeros((B, H, W, hd), jnp.float32)
    else:
        h_prev, c_prev = state
    xcat = jnp.concatenate([x, h_prev], axis=-1)
    Cin = xcat.shape[-1]
    S, ns, xs = _make_strips(xcat, k)
    Sh, Wp = S + 2 * pad, W + 2 * pad
    cs = c_prev.reshape(B * ns, S, W, hd)
    kk = k * k
    w_taps = jnp.transpose(p["w"], (2, 3, 1, 0)).reshape(kk, Cin, 4 * hd)
    h, c = pl.pallas_call(
        _lstm_tap_kernel(k, S, W, hd),
        grid=(B * ns,),
        in_specs=[pl.BlockSpec((1, Sh, Wp, Cin), lambda i: (i, 0, 0, 0)),
                  pl.BlockSpec((kk, Cin, 4 * hd), lambda i: (0, 0, 0)),
                  pl.BlockSpec((1, 4 * hd), lambda i: (0, 0)),
                  pl.BlockSpec((1, S, W, hd), lambda i: (i, 0, 0, 0))],
        out_specs=(pl.BlockSpec((1, S, W, hd), lambda i: (i, 0, 0, 0)),
                   pl.BlockSpec((1, S, W, hd), lambda i: (i, 0, 0, 0))),
        out_shape=(jax.ShapeDtypeStruct((B * ns, S, W, hd), jnp.float32),
                   jax.ShapeDtypeStruct((B * ns, S, W, hd), jnp.float32)),
        compiler_params=pltpu.CompilerParams(
            dimension_semantics=("parallel",), vmem_limit_bytes=_VMEM_LIMIT),
    )(xs, w_taps, p["b"].reshape(1, 4 * hd), cs)
    return h.reshape(B, H, W, hd), c.reshape(B, H, W, hd)


def deformable_conv(x, p, k, pad):
    """Modulated deformable conv: fused offset+modulator conv (in-kernel taps),
    bilinear sampling, then one fused patch matmul."""
    B, H, W, Cin = x.shape
    kk = k * k
    om = conv2d_kxk(x, p["offmod_w"], p["offmod_b"])                 # (B,H,W,3*kk)
    off = om[..., :2 * kk].reshape(B, H, W, kk, 2)                   # (dy,dx) per tap
    # TODO(synk): common DeformableConv2d wrapper uses 2*sigmoid; torchvision DCNv2 uses sigmoid.
    mod = 2.0 * jax.nn.sigmoid(om[..., 2 * kk:])                     # (B,H,W,kk)

    ii = jnp.arange(H, dtype=jnp.float32).reshape(1, H, 1, 1)
    jj = jnp.arange(W, dtype=jnp.float32).reshape(1, 1, W, 1)
    uu = (jnp.arange(kk) // k).astype(jnp.float32).reshape(1, 1, 1, kk)
    vv = (jnp.arange(kk) % k).astype(jnp.float32).reshape(1, 1, 1, kk)
    py = ii - pad + uu + off[..., 0]
    px = jj - pad + vv + off[..., 1]
    y0 = jnp.floor(py)
    x0 = jnp.floor(px)
    wy1 = py - y0
    wy0 = 1.0 - wy1
    wx1 = px - x0
    wx0 = 1.0 - wx1
    # Modulation folded into the four bilinear weights before broadcasting over Cin.
    w00 = (wy0 * wx0 * mod)[..., None]
    w01 = (wy0 * wx1 * mod)[..., None]
    w10 = (wy1 * wx0 * mod)[..., None]
    w11 = (wy1 * wx1 * mod)[..., None]

    # TODO(synk): per-pixel fractional gather has no rectangular BlockSpec; the
    # bilinear sampling stays in XLA glue (candidate for an in-VMEM gather kernel).
    def gather(yy, xx):
        valid = (yy >= 0) & (yy <= H - 1) & (xx >= 0) & (xx <= W - 1)
        yc = jnp.clip(yy, 0, H - 1).astype(jnp.int32)
        xc = jnp.clip(xx, 0, W - 1).astype(jnp.int32)
        bidx = jnp.arange(B).reshape(B, 1, 1, 1)
        g = x[bidx, yc, xc]                                          # (B,H,W,kk,Cin)
        return g * valid[..., None].astype(x.dtype)

    samp = (gather(y0, x0) * w00 + gather(y0, x0 + 1.0) * w01
            + gather(y0 + 1.0, x0) * w10 + gather(y0 + 1.0, x0 + 1.0) * w11)
    patches = samp.reshape(B * H * W, kk * Cin)                      # free reshape (no transpose)
    Cout = p["w"].shape[0]
    wm = jnp.transpose(p["w"], (2, 3, 1, 0)).reshape(kk * Cin, Cout)
    out = pallas_matmul_fused(patches, wm, p["b"])
    return out.reshape(B, H, W, Cout)


def mixer_block(y, blk, k):
    """Fused ConvMixer block (depthwise residual sub-block + pointwise), per row strip."""
    B, H, W, C = y.shape
    pad = k // 2
    kk = k * k
    S, ns, ys = _make_strips(y, k)
    Sh, Wp = S + 2 * pad, W + 2 * pad
    w_dw = jnp.transpose(blk["dw_w"][:, 0], (1, 2, 0)).reshape(kk, C)
    s1, t1 = _bn_affine(blk["bn1"])
    s2, t2 = _bn_affine(blk["bn2"])
    w_pw = blk["pw_w"].reshape(C, C).T
    out = pl.pallas_call(
        _mixer_block_kernel(k, S, W),
        grid=(B * ns,),
        in_specs=[pl.BlockSpec((1, Sh, Wp, C), lambda i: (i, 0, 0, 0)),
                  pl.BlockSpec((kk, C), lambda i: (0, 0)),
                  pl.BlockSpec((1, C), lambda i: (0, 0)),
                  pl.BlockSpec((1, C), lambda i: (0, 0)),
                  pl.BlockSpec((1, C), lambda i: (0, 0)),
                  pl.BlockSpec((C, C), lambda i: (0, 0)),
                  pl.BlockSpec((1, C), lambda i: (0, 0)),
                  pl.BlockSpec((1, C), lambda i: (0, 0)),
                  pl.BlockSpec((1, C), lambda i: (0, 0))],
        out_specs=pl.BlockSpec((1, S, W, C), lambda i: (i, 0, 0, 0)),
        out_shape=jax.ShapeDtypeStruct((B * ns, S, W, C), jnp.float32),
        compiler_params=pltpu.CompilerParams(
            dimension_semantics=("parallel",), vmem_limit_bytes=_VMEM_LIMIT),
    )(ys, w_dw, blk["dw_b"].reshape(1, C), s1.reshape(1, C), t1.reshape(1, C),
      w_pw, blk["pw_b"].reshape(1, C), s2.reshape(1, C), t2.reshape(1, C))
    return out.reshape(B, H, W, C)


def conv_mixer(x, p, mixer_k):
    # TODO(synk): upstream ConvMixer patch embedding stride/patch_size is repo specific;
    # 1x1 stride-1 embedding keeps the spatial size needed by the upsampler.
    y = conv1x1(x, p["embed_w"], p["embed_b"], act="gelu", bn=p["bn0"])
    for blk in p["blocks"]:
        y = mixer_block(y, blk, mixer_k)
    return conv1x1(y, p["out_w"], p["out_b"])


def ddf_up(x, p, k, r):
    """DDFUpPack (kernel_combine='add') + pixel shuffle; returns clamped NCHW.
    TODO(synk): original DDF channel branch uses SE + FilterNorm; simplified to GAP->MLP.
    TODO(synk): tile over H strips (halo) for production resolutions (v7x VMEM)."""
    B, H, W, C = x.shape
    kk = k * k
    pad = k // 2
    rr = r * r
    # spatial filters for all r*r branches: one fused 1x1 conv
    sp = conv1x1(x, p["sp_w"], p["sp_b"])                                 # (B,H,W,rr*kk)
    sp = jnp.transpose(sp.reshape(B, H, W, rr, kk), (0, 3, 4, 1, 2))      # (B,rr,kk,H,W)
    # channel filters: GAP -> small MLP for all branches at once
    gap = jnp.mean(x, axis=(1, 2))                                        # (B,C)
    hid = pallas_matmul_fused(gap, p["ch_w1"], p["ch_b1"], act="relu")
    ch = pallas_matmul_fused(hid, p["ch_w2"], p["ch_b2"]).reshape(B, rr, C, kk)

    x_chw = jnp.transpose(x, (0, 3, 1, 2))                                # (B,C,H,W)
    xp = jnp.pad(x_chw, ((0, 0), (0, 0), (pad, pad), (pad, pad)))
    Hp, Wp = H + 2 * pad, W + 2 * pad
    out = pl.pallas_call(
        _ddf_kernel(k, rr, H, W),
        grid=(B,),
        in_specs=[pl.BlockSpec((1, C, Hp, Wp), lambda b: (b, 0, 0, 0)),
                  pl.BlockSpec((1, rr, kk, H, W), lambda b: (b, 0, 0, 0, 0)),
                  pl.BlockSpec((1, rr, C, kk), lambda b: (b, 0, 0, 0))],
        out_specs=pl.BlockSpec((1, rr, C, H, W), lambda b: (b, 0, 0, 0, 0)),
        out_shape=jax.ShapeDtypeStruct((B, rr, C, H, W), jnp.float32),
        compiler_params=pltpu.CompilerParams(
            dimension_semantics=("parallel",), vmem_limit_bytes=_VMEM_LIMIT),
    )(xp, sp, ch)
    # pixel shuffle: branch s = dy*r + dx -> output row i*r+dy, col j*r+dx
    # TODO(synk): emit a lane-interleaved shuffle-friendly layout in-kernel to avoid
    # this extra pass over the upscaled output.
    out = out.reshape(B, r, r, C, H, W)
    out = jnp.transpose(out, (0, 3, 4, 1, 5, 2))
    return out.reshape(B, C, H * r, W * r)


# ----------------------------------------------------------------------------
# mduvsr forward
# ----------------------------------------------------------------------------
def mduvsr_forward(x_nchw, params, cfg, state=None):
    nk, k, pad = cfg["nk"], cfg["k"], cfg["pad"]
    x = jnp.transpose(x_nchw, (0, 2, 3, 1)).astype(jnp.float32)      # NCHW -> NHWC
    lr = x
    if state is not None:
        state = tuple(jnp.transpose(s, (0, 2, 3, 1)) for s in state)
    h, c = conv_lstm_cell(x, state, params["lstm"], k, nk)
    y = jnp.concatenate([h, lr], axis=-1)
    y = deformable_conv(y, params["def1"], k, pad)
    y = jnp.concatenate([y, lr], axis=-1)
    y = deformable_conv(y, params["def2"], k, pad)
    y = jnp.concatenate([y, lr], axis=-1)
    y = deformable_conv(y, params["def3"], k, pad)
    y = jnp.concatenate([y, lr], axis=-1)
    y = conv_mixer(y, params["mix"], cfg["mixer_k"])
    out = ddf_up(y, params["ddfup2"], k, cfg["scale"])               # clamp(0,255) fused in-kernel
    state_out = (jnp.transpose(h, (0, 3, 1, 2)), jnp.transpose(c, (0, 3, 1, 2)))
    return out, state_out


# ----------------------------------------------------------------------------
# Deterministic parameter initialization
# ----------------------------------------------------------------------------
class _Rng:
    def __init__(self, seed):
        self._key = jax.random.PRNGKey(seed)

    def next(self):
        self._key, sub = jax.random.split(self._key)
        return sub


def _conv_init(rng, cin, cout, k, scale=1.0):
    fan_in = cin * k * k
    bound = scale / (fan_in ** 0.5)
    w = jax.random.uniform(rng.next(), (cout, cin, k, k), jnp.float32, -bound, bound)
    b = jax.random.uniform(rng.next(), (cout,), jnp.float32, -bound, bound)
    return w, b


def _bn_init(rng, c):
    return dict(gamma=jnp.ones((c,), jnp.float32) + 0.05 * jax.random.normal(rng.next(), (c,)),
                beta=0.05 * jax.random.normal(rng.next(), (c,)),
                mean=jnp.zeros((c,), jnp.float32),
                var=jnp.ones((c,), jnp.float32))


def init_params(nc, nk, k, scale, hidden_dim, depth, mixer_kernel, seed=0):
    rng = _Rng(seed)
    p = {}
    # ConvLSTMCell gates conv: Conv2d(nc+nk, 4*nk, k, padding=k//2)
    w, b = _conv_init(rng, nc + nk, 4 * nk, k)
    p["lstm"] = dict(w=w, b=b)

    # Deformable conv blocks (offset + modulator fused into one conv, + regular conv)
    def deform(cin, cout):
        ow, ob = _conv_init(rng, cin, 2 * k * k, k, scale=0.1)
        mw, mb = _conv_init(rng, cin, k * k, k, scale=0.1)
        rw, rb = _conv_init(rng, cin, cout, k)
        return dict(offmod_w=jnp.concatenate([ow, mw], axis=0),
                    offmod_b=jnp.concatenate([ob, mb], axis=0),
                    w=rw, b=rb)

    p["def1"] = deform(nk + nc, nk)
    p["def2"] = deform(nk + nc, nk)
    p["def3"] = deform(nk + nc, nk)

    # ConvMixer(in=nk+nc, out=nc, dim=hidden_dim, depth, kernel_size=mixer_kernel)
    ew, eb = _conv_init(rng, nk + nc, hidden_dim, 1)
    blocks = []
    for _ in range(depth):
        dw_w, dw_b = _conv_init(rng, 1, hidden_dim, mixer_kernel)   # depthwise [dim,1,k,k]
        pw_w, pw_b = _conv_init(rng, hidden_dim, hidden_dim, 1)
        blocks.append(dict(dw_w=dw_w, dw_b=dw_b, bn1=_bn_init(rng, hidden_dim),
                           pw_w=pw_w, pw_b=pw_b, bn2=_bn_init(rng, hidden_dim)))
    ow, ob = _conv_init(rng, hidden_dim, nc, 1)
    p["mix"] = dict(embed_w=ew, embed_b=eb, bn0=_bn_init(rng, hidden_dim),
                    blocks=blocks, out_w=ow, out_b=ob)

    # DDFUpPack(in_channels=nc, kernel_size=k, scale_factor=scale, kernel_combine='add')
    kk = k * k
    rr = scale * scale
    sp_w, sp_b = [], []
    for _ in range(rr):
        w1, b1 = _conv_init(rng, nc, kk, 1)
        sp_w.append(w1)
        sp_b.append(b1)
    mid = max(4, nc)
    bound1 = 1.0 / (nc ** 0.5)
    bound2 = 1.0 / (mid ** 0.5)
    p["ddfup2"] = dict(
        sp_w=jnp.concatenate(sp_w, axis=0),
        sp_b=jnp.concatenate(sp_b, axis=0),
        ch_w1=jax.random.uniform(rng.next(), (nc, mid), jnp.float32, -bound1, bound1),
        ch_b1=jax.random.uniform(rng.next(), (mid,), jnp.float32, -bound1, bound1),
        ch_w2=jax.random.uniform(rng.next(), (mid, rr * nc * kk), jnp.float32, -bound2, bound2),
        ch_b2=jax.random.uniform(rng.next(), (rr * nc * kk,), jnp.float32, -bound2, bound2))

    # NOTE: self.conv, self.ddfup1 and self.batchnorm1 exist in __init__ but are
    # unused in forward(); intentionally not instantiated.
    return p


# ----------------------------------------------------------------------------
# Main
# ----------------------------------------------------------------------------
if __name__ == "__main__":
    B, NC, H, W = 2, 3, 8, 8            # batch, num_channels, spatial
    NK, KS, SCALE = 8, 3, 2             # num_kernels, kernel_size, upscale factor
    HIDDEN_DIM, DEPTH, MIXER_K = 32, 2, 3

    cfg = dict(nc=NC, nk=NK, k=KS, pad=KS // 2, scale=SCALE, mixer_k=MIXER_K)
    params = init_params(NC, NK, KS, SCALE, HIDDEN_DIM, DEPTH, MIXER_K, seed=0)
    x = jax.random.uniform(jax.random.PRNGKey(0), (B, NC, H, W), jnp.float32) * 255.0

    fwd = jax.jit(functools.partial(mduvsr_forward, cfg=cfg))
    out, (h, c) = fwd(x, params)
    jax.block_until_ready(out)

    assert out.shape == (B, NC, H * SCALE, W * SCALE), out.shape
    assert h.shape == (B, NK, H, W) and c.shape == (B, NK, H, W)
    assert bool(jnp.all(out >= 0.0)) and bool(jnp.all(out <= 255.0))
    assert bool(jnp.all(jnp.isfinite(out)))
    print("KERNEL_OK")
</pallas_src>

<mosaic_0001>
module attributes {stable_mosaic.version = 11 : i64} {
  func.func @kernel(%arg0: i32, %arg1: memref<1x10x10x11xf32, #tpu.memory_space<vmem>>, %arg2: memref<9x11x32xf32, #tpu.memory_space<vmem>>, %arg3: memref<1x32xf32, #tpu.memory_space<vmem>>, %arg4: memref<1x8x8x8xf32, #tpu.memory_space<vmem>>, %arg5: memref<1x8x8x8xf32, #tpu.memory_space<vmem>>, %arg6: memref<1x8x8x8xf32, #tpu.memory_space<vmem>>) attributes {dimension_semantics = [#tpu.dimension_semantics<parallel>], iteration_bounds = array<i64: 2>, scalar_prefetch = 0 : i64, scratch_operands = 0 : i64, tpu.core_type = #tpu.core_type<tc>, window_params = [{transform_indices = @transform_0, window_bounds = array<i64: 1, 10, 10, 11>}, {pipeline_mode = #tpu.pipeline_mode<synchronous>, transform_indices = @transform_1, window_bounds = array<i64: 9, 11, 32>}, {pipeline_mode = #tpu.pipeline_mode<synchronous>, transform_indices = @transform_2, window_bounds = array<i64: 1, 32>}, {transform_indices = @transform_3, window_bounds = array<i64: 1, 8, 8, 8>}, {transform_indices = @transform_4, window_bounds = array<i64: 1, 8, 8, 8>}, {transform_indices = @transform_5, window_bounds = array<i64: 1, 8, 8, 8>}]} {
    %cst = arith.constant 0.000000e+00 : f32
    %0 = vector.broadcast %cst : f32 to vector<64x32xf32>
    %c0 = arith.constant 0 : index
    %c0_0 = arith.constant 0 : index
    %c0_1 = arith.constant 0 : index
    %c0_2 = arith.constant 0 : index
    %1 = vector.load %arg1[%c0, %c0_0, %c0_1, %c0_2] : memref<1x10x10x11xf32, #tpu.memory_space<vmem>>, vector<1x8x8x11xf32>
    %2 = vector.shape_cast %1 : vector<1x8x8x11xf32> to vector<8x8x11xf32>
    %3 = vector.shape_cast %2 : vector<8x8x11xf32> to vector<64x11xf32>
    %4 = arith.truncf %3 : vector<64x11xf32> to vector<64x11xbf16>
    %c0_3 = arith.constant 0 : index
    %c0_4 = arith.constant 0 : index
    %c0_5 = arith.constant 0 : index
    %5 = vector.load %arg2[%c0_3, %c0_4, %c0_5] : memref<9x11x32xf32, #tpu.memory_space<vmem>>, vector<1x11x32xf32>
    %6 = vector.shape_cast %5 : vector<1x11x32xf32> to vector<11x32xf32>
    %7 = arith.truncf %6 : vector<11x32xf32> to vector<11x32xbf16>
    %cst_6 = arith.constant dense<0.000000e+00> : vector<64x32xf32>
    %8 = tpu.matmul %4, %7, %cst_6 {dimension_numbers = #tpu.dot_dimension_numbers<[1], [0], [0], [1], [0, 0, 1, 1], [], []>} : vector<64x11xbf16>, vector<11x32xbf16>, vector<64x32xf32> -> vector<64x32xf32>
    %9 = arith.addf %0, %8 : vector<64x32xf32>
    %c0_7 = arith.constant 0 : index
    %c0_8 = arith.constant 0 : index
    %c1 = arith.constant 1 : index
    %c0_9 = arith.constant 0 : index
    %10 = vector.load %arg1[%c0_7, %c0_8, %c1, %c0_9] : memref<1x10x10x11xf32, #tpu.memory_space<vmem>>, vector<1x8x8x11xf32>
    %11 = vector.shape_cast %10 : vector<1x8x8x11xf32> to vector<8x8x11xf32>
    %12 = vector.shape_cast %11 : vector<8x8x11xf32> to vector<64x11xf32>
    %13 = arith.truncf %12 : vector<64x11xf32> to vector<64x11xbf16>
    %c1_10 = arith.constant 1 : index
    %c0_11 = arith.constant 0 : index
    %c0_12 = arith.constant 0 : index
    %14 = vector.load %arg2[%c1_10, %c0_11, %c0_12] : memref<9x11x32xf32, #tpu.memory_space<vmem>>, vector<1x11x32xf32>
    %15 = vector.shape_cast %14 : vector<1x11x32xf32> to vector<11x32xf32>
    %16 = arith.truncf %15 : vector<11x32xf32> to vector<11x32xbf16>
    %cst_13 = arith.constant dense<0.000000e+00> : vector<64x32xf32>
    %17 = tpu.matmul %13, %16, %cst_13 {dimension_numbers = #tpu.dot_dimension_numbers<[1], [0], [0], [1], [0, 0, 1, 1], [], []>} : vector<64x11xbf16>, vector<11x32xbf16>, vector<64x32xf32> -> vector<64x32xf32>
    %18 = arith.addf %9, %17 : vector<64x32xf32>
    %c0_14 = arith.constant 0 : index
    %c0_15 = arith.constant 0 : index
    %c2 = arith.constant 2 : index
    %c0_16 = arith.constant 0 : index
    %19 = vector.load %arg1[%c0_14, %c0_15, %c2, %c0_16] : memref<1x10x10x11xf32, #tpu.memory_space<vmem>>, vector<1x8x8x11xf32>
    %20 = vector.shape_cast %19 : vector<1x8x8x11xf32> to vector<8x8x11xf32>
    %21 = vector.shape_cast %20 : vector<8x8x11xf32> to vector<64x11xf32>
    %22 = arith.truncf %21 : vector<64x11xf32> to vector<64x11xbf16>
    %c2_17 = arith.constant 2 : index
    %c0_18 = arith.constant 0 : index
    %c0_19 = arith.constant 0 : index
    %23 = vector.load %arg2[%c2_17, %c0_18, %c0_19] : memref<9x11x32xf32, #tpu.memory_space<vmem>>, vector<1x11x32xf32>
    %24 = vector.shape_cast %23 : vector<1x11x32xf32> to vector<11x32xf32>
    %25 = arith.truncf %24 : vector<11x32xf32> to vector<11x32xbf16>
    %cst_20 = arith.constant dense<0.000000e+00> : vector<64x32xf32>
    %26 = tpu.matmul %22, %25, %cst_20 {dimension_numbers = #tpu.dot_dimension_numbers<[1], [0], [0], [1], [0, 0, 1, 1], [], []>} : vector<64x11xbf16>, vector<11x32xbf16>, vector<64x32xf32> -> vector<64x32xf32>
    %27 = arith.addf %18, %26 : vector<64x32xf32>
    %c0_21 = arith.constant 0 : index
    %c1_22 = arith.constant 1 : index
    %c0_23 = arith.constant 0 : index
    %c0_24 = arith.constant 0 : index
    %28 = vector.load %arg1[%c0_21, %c1_22, %c0_23, %c0_24] : memref<1x10x10x11xf32, #tpu.memory_space<vmem>>, vector<1x8x8x11xf32>
    %29 = vector.shape_cast %28 : vector<1x8x8x11xf32> to vector<8x8x11xf32>
    %30 = vector.shape_cast %29 : vector<8x8x11xf32> to vector<64x11xf32>
    %31 = arith.truncf %30 : vector<64x11xf32> to vector<64x11xbf16>
    %c3 = arith.constant 3 : index
    %c0_25 = arith.constant 0 : index
    %c0_26 = arith.constant 0 : index
    %32 = vector.load %arg2[%c3, %c0_25, %c0_26] : memref<9x11x32xf32, #tpu.memory_space<vmem>>, vector<1x11x32xf32>
    %33 = vector.shape_cast %32 : vector<1x11x32xf32> to vector<11x32xf32>
    %34 = arith.truncf %33 : vector<11x32xf32> to vector<11x32xbf16>
    %cst_27 = arith.constant dense<0.000000e+00> : vector<64x32xf32>
    %35 = tpu.matmul %31, %34, %cst_27 {dimension_numbers = #tpu.dot_dimension_numbers<[1], [0], [0], [1], [0, 0, 1, 1], [], []>} : vector<64x11xbf16>, vector<11x32xbf16>, vector<64x32xf32> -> vector<64x32xf32>
    %36 = arith.addf %27, %35 : vector<64x32xf32>
    %c0_28 = arith.constant 0 : index
    %c1_29 = arith.constant 1 : index
    %c1_30 = arith.constant 1 : index
    %c0_31 = arith.constant 0 : index
    %37 = vector.load %arg1[%c0_28, %c1_29, %c1_30, %c0_31] : memref<1x10x10x11xf32, #tpu.memory_space<vmem>>, vector<1x8x8x11xf32>
    %38 = vector.shape_cast %37 : vector<1x8x8x11xf32> to vector<8x8x11xf32>
    %39 = vector.shape_cast %38 : vector<8x8x11xf32> to vector<64x11xf32>
    %40 = arith.truncf %39 : vector<64x11xf32> to vector<64x11xbf16>
    %c4 = arith.constant 4 : index
    %c0_32 = arith.constant 0 : index
    %c0_33 = arith.constant 0 : index
    %41 = vector.load %arg2[%c4, %c0_32, %c0_33] : memref<9x11x32xf32, #tpu.memory_space<vmem>>, vector<1x11x32xf32>
    %42 = vector.shape_cast %41 : vector<1x11x32xf32> to vector<11x32xf32>
    %43 = arith.truncf %42 : vector<11x32xf32> to vector<11x32xbf16>
    %cst_34 = arith.constant dense<0.000000e+00> : vector<64x32xf32>
    %44 = tpu.matmul %40, %43, %cst_34 {dimension_numbers = #tpu.dot_dimension_numbers<[1], [0], [0], [1], [0, 0, 1, 1], [], []>} : vector<64x11xbf16>, vector<11x32xbf16>, vector<64x32xf32> -> vector<64x32xf32>
    %45 = arith.addf %36, %44 : vector<64x32xf32>
    %c0_35 = arith.constant 0 : index
    %c1_36 = arith.constant 1 : index
    %c2_37 = arith.constant 2 : index
    %c0_38 = arith.constant 0 : index
    %46 = vector.load %arg1[%c0_35, %c1_36, %c2_37, %c0_38] : memref<1x10x10x11xf32, #tpu.memory_space<vmem>>, vector<1x8x8x11xf32>
    %47 = vector.shape_cast %46 : vector<1x8x8x11xf32> to vector<8x8x11xf32>
    %48 = vector.shape_cast %47 : vector<8x8x11xf32> to vector<64x11xf32>
    %49 = arith.truncf %48 : vector<64x11xf32> to vector<64x11xbf16>
    %c5 = arith.constant 5 : index
    %c0_39 = arith.constant 0 : index
    %c0_40 = arith.constant 0 : index
    %50 = vector.load %arg2[%c5, %c0_39, %c0_40] : memref<9x11x32xf32, #tpu.memory_space<vmem>>, vector<1x11x32xf32>
    %51 = vector.shape_cast %50 : vector<1x11x32xf32> to vector<11x32xf32>
    %52 = arith.truncf %51 : vector<11x32xf32> to vector<11x32xbf16>
    %cst_41 = arith.constant dense<0.000000e+00> : vector<64x32xf32>
    %53 = tpu.matmul %49, %52, %cst_41 {dimension_numbers = #tpu.dot_dimension_numbers<[1], [0], [0], [1], [0, 0, 1, 1], [], []>} : vector<64x11xbf16>, vector<11x32xbf16>, vector<64x32xf32> -> vector<64x32xf32>
    %54 = arith.addf %45, %53 : vector<64x32xf32>
    %c0_42 = arith.constant 0 : index
    %c2_43 = arith.constant 2 : index
    %c0_44 = arith.constant 0 : index
    %c0_45 = arith.constant 0 : index
    %55 = vector.load %arg1[%c0_42, %c2_43, %c0_44, %c0_45] : memref<1x10x10x11xf32, #tpu.memory_space<vmem>>, vector<1x8x8x11xf32>
    %56 = vector.shape_cast %55 : vector<1x8x8x11xf32> to vector<8x8x11xf32>
    %57 = vector.shape_cast %56 : vector<8x8x11xf32> to vector<64x11xf32>
    %58 = arith.truncf %57 : vector<64x11xf32> to vector<64x11xbf16>
    %c6 = arith.constant 6 : index
    %c0_46 = arith.constant 0 : index
    %c0_47 = arith.constant 0 : index
    %59 = vector.load %arg2[%c6, %c0_46, %c0_47] : memref<9x11x32xf32, #tpu.memory_space<vmem>>, vector<1x11x32xf32>
    %60 = vector.shape_cast %59 : vector<1x11x32xf32> to vector<11x32xf32>
    %61 = arith.truncf %60 : vector<11x32xf32> to vector<11x32xbf16>
    %cst_48 = arith.constant dense<0.000000e+00> : vector<64x32xf32>
    %62 = tpu.matmul %58, %61, %cst_48 {dimension_numbers = #tpu.dot_dimension_numbers<[1], [0], [0], [1], [0, 0, 1, 1], [], []>} : vector<64x11xbf16>, vector<11x32xbf16>, vector<64x32xf32> -> vector<64x32xf32>
    %63 = arith.addf %54, %62 : vector<64x32xf32>
    %c0_49 = arith.constant 0 : index
    %c2_50 = arith.constant 2 : index
    %c1_51 = arith.constant 1 : index
    %c0_52 = arith.constant 0 : index
    %64 = vector.load %arg1[%c0_49, %c2_50, %c1_51, %c0_52] : memref<1x10x10x11xf32, #tpu.memory_space<vmem>>, vector<1x8x8x11xf32>
    %65 = vector.shape_cast %64 : vector<1x8x8x11xf32> to vector<8x8x11xf32>
    %66 = vector.shape_cast %65 : vector<8x8x11xf32> to vector<64x11xf32>
    %67 = arith.truncf %66 : vector<64x11xf32> to vector<64x11xbf16>
    %c7 = arith.constant 7 : index
    %c0_53 = arith.constant 0 : index
    %c0_54 = arith.constant 0 : index
    %68 = vector.load %arg2[%c7, %c0_53, %c0_54] : memref<9x11x32xf32, #tpu.memory_space<vmem>>, vector<1x11x32xf32>
    %69 = vector.shape_cast %68 : vector<1x11x32xf32> to vector<11x32xf32>
    %70 = arith.truncf %69 : vector<11x32xf32> to vector<11x32xbf16>
    %cst_55 = arith.constant dense<0.000000e+00> : vector<64x32xf32>
    %71 = tpu.matmul %67, %70, %cst_55 {dimension_numbers = #tpu.dot_dimension_numbers<[1], [0], [0], [1], [0, 0, 1, 1], [], []>} : vector<64x11xbf16>, vector<11x32xbf16>, vector<64x32xf32> -> vector<64x32xf32>
    %72 = arith.addf %63, %71 : vector<64x32xf32>
    %c0_56 = arith.constant 0 : index
    %c2_57 = arith.constant 2 : index
    %c2_58 = arith.constant 2 : index
    %c0_59 = arith.constant 0 : index
    %73 = vector.load %arg1[%c0_56, %c2_57, %c2_58, %c0_59] : memref<1x10x10x11xf32, #tpu.memory_space<vmem>>, vector<1x8x8x11xf32>
    %74 = vector.shape_cast %73 : vector<1x8x8x11xf32> to vector<8x8x11xf32>
    %75 = vector.shape_cast %74 : vector<8x8x11xf32> to vector<64x11xf32>
    %76 = arith.truncf %75 : vector<64x11xf32> to vector<64x11xbf16>
    %c8 = arith.constant 8 : index
    %c0_60 = arith.constant 0 : index
    %c0_61 = arith.constant 0 : index
    %77 = vector.load %arg2[%c8, %c0_60, %c0_61] : memref<9x11x32xf32, #tpu.memory_space<vmem>>, vector<1x11x32xf32>
    %78 = vector.shape_cast %77 : vector<1x11x32xf32> to vector<11x32xf32>
    %79 = arith.truncf %78 : vector<11x32xf32> to vector<11x32xbf16>
    %cst_62 = arith.constant dense<0.000000e+00> : vector<64x32xf32>
    %80 = tpu.matmul %76, %79, %cst_62 {dimension_numbers = #tpu.dot_dimension_numbers<[1], [0], [0], [1], [0, 0, 1, 1], [], []>} : vector<64x11xbf16>, vector<11x32xbf16>, vector<64x32xf32> -> vector<64x32xf32>
    %81 = arith.addf %72, %80 : vector<64x32xf32>
    %c0_63 = arith.constant 0 : index
    %c0_64 = arith.constant 0 : index
    %82 = vector.load %arg3[%c0_63, %c0_64] : memref<1x32xf32, #tpu.memory_space<vmem>>, vector<1x32xf32>
    %83 = vector.broadcast %82 : vector<1x32xf32> to vector<64x32xf32>
    %84 = arith.addf %81, %83 : vector<64x32xf32>
    %85 = vector.extract_strided_slice %84 {offsets = [0, 0], sizes = [64, 8], strides = [1, 1]} : vector<64x32xf32> to vector<64x8xf32>
    %86 = arith.negf %85 : vector<64x8xf32>
    %87 = math.exp %86 : vector<64x8xf32>
    %cst_65 = arith.constant 1.000000e+00 : f32
    %88 = vector.broadcast %cst_65 : f32 to vector<64x8xf32>
    %89 = arith.addf %88, %87 : vector<64x8xf32>
    %90 = arith.divf %88, %89 : vector<64x8xf32>
    %91 = vector.extract_strided_slice %84 {offsets = [0, 8], sizes = [64, 8], strides = [1, 1]} : vector<64x32xf32> to vector<64x8xf32>
    %92 = arith.negf %91 : vector<64x8xf32>
    %93 = math.exp %92 : vector<64x8xf32>
    %cst_66 = arith.constant 1.000000e+00 : f32
    %94 = vector.broadcast %cst_66 : f32 to vector<64x8xf32>
    %95 = arith.addf %94, %93 : vector<64x8xf32>
    %96 = arith.divf %94, %95 : vector<64x8xf32>
    %97 = vector.extract_strided_slice %84 {offsets = [0, 16], sizes = [64, 8], strides = [1, 1]} : vector<64x32xf32> to vector<64x8xf32>
    %98 = arith.negf %97 : vector<64x8xf32>
    %99 = math.exp %98 : vector<64x8xf32>
    %cst_67 = arith.constant 1.000000e+00 : f32
    %100 = vector.broadcast %cst_67 : f32 to vector<64x8xf32>
    %101 = arith.addf %100, %99 : vector<64x8xf32>
    %102 = arith.divf %100, %101 : vector<64x8xf32>
    %103 = vector.extract_strided_slice %84 {offsets = [0, 24], sizes = [64, 8], strides = [1, 1]} : vector<64x32xf32> to vector<64x8xf32>
    %104 = math.tanh %103 : vector<64x8xf32>
    %c0_68 = arith.constant 0 : index
    %c0_69 = arith.constant 0 : index
    %c0_70 = arith.constant 0 : index
    %c0_71 = arith.constant 0 : index
    %105 = vector.load %arg4[%c0_68, %c0_69, %c0_70, %c0_71] : memref<1x8x8x8xf32, #tpu.memory_space<vmem>>, vector<1x8x8x8xf32>
    %106 = vector.shape_cast %105 : vector<1x8x8x8xf32> to vector<8x8x8xf32>
    %107 = vector.shape_cast %106 : vector<8x8x8xf32> to vector<64x8xf32>
    %108 = arith.mulf %96, %107 : vector<64x8xf32>
    %109 = arith.mulf %90, %104 : vector<64x8xf32>
    %110 = arith.addf %108, %109 : vector<64x8xf32>
    %111 = vector.shape_cast %110 : vector<64x8xf32> to vector<8x8x8xf32>
    %c0_72 = arith.constant 0 : index
    %c0_73 = arith.constant 0 : index
    %c0_74 = arith.constant 0 : index
    %c0_75 = arith.constant 0 : index
    %112 = vector.load %arg6[%c0_72, %c0_73, %c0_74, %c0_75] : memref<1x8x8x8xf32, #tpu.memory_space<vmem>>, vector<1x8x8x8xf32>
    %113 = vector.shape_cast %112 : vector<1x8x8x8xf32> to vector<8x8x8xf32>
    %114 = vector.shape_cast %111 : vector<8x8x8xf32> to vector<1x8x8x8xf32>
    tpu.vector_store %arg6[%c0_72, %c0_73, %c0_74, %c0_75], %114 {strides = array<i32>} : memref<1x8x8x8xf32, #tpu.memory_space<vmem>>, vector<1x8x8x8xf32>,
    %115 = math.tanh %110 : vector<64x8xf32>
    %116 = arith.mulf %102, %115 : vector<64x8xf32>
    %117 = vector.shape_cast %116 : vector<64x8xf32> to vector<8x8x8xf32>
    %c0_76 = arith.constant 0 : index
    %c0_77 = arith.constant 0 : index
    %c0_78 = arith.constant 0 : index
    %c0_79 = arith.constant 0 : index
    %118 = vector.load %arg5[%c0_76, %c0_77, %c0_78, %c0_79] : memref<1x8x8x8xf32, #tpu.memory_space<vmem>>, vector<1x8x8x8xf32>
    %119 = vector.shape_cast %118 : vector<1x8x8x8xf32> to vector<8x8x8xf32>
    %120 = vector.shape_cast %117 : vector<8x8x8xf32> to vector<1x8x8x8xf32>
    tpu.vector_store %arg5[%c0_76, %c0_77, %c0_78, %c0_79], %120 {strides = array<i32>} : memref<1x8x8x8xf32, #tpu.memory_space<vmem>>, vector<1x8x8x8xf32>,
    return
  }
  func.func @transform_0(%arg0: i32) -> (i32, i32, i32, i32) {
    %c0_i32 = arith.constant 0 : i32
    %c0_i32_0 = arith.constant 0 : i32
    %c0_i32_1 = arith.constant 0 : i32
    %c0_i32_2 = arith.constant 0 : i32
    return %arg0, %c0_i32, %c0_i32_0, %c0_i32_1 : i32, i32, i32, i32
  }
  func.func @transform_1(%arg0: i32) -> (i32, i32, i32) {
    %c0_i32 = arith.constant 0 : i32
    %c0_i32_0 = arith.constant 0 : i32
    %c0_i32_1 = arith.constant 0 : i32
    %c0_i32_2 = arith.constant 0 : i32
    return %c0_i32, %c0_i32_0, %c0_i32_1 : i32, i32, i32
  }
  func.func @transform_2(%arg0: i32) -> (i32, i32) {
    %c0_i32 = arith.constant 0 : i32
    %c0_i32_0 = arith.constant 0 : i32
    %c0_i32_1 = arith.constant 0 : i32
    return %c0_i32, %c0_i32_0 : i32, i32
  }
  func.func @transform_3(%arg0: i32) -> (i32, i32, i32, i32) {
    %c0_i32 = arith.constant 0 : i32
    %c0_i32_0 = arith.constant 0 : i32
    %c0_i32_1 = arith.constant 0 : i32
    %c0_i32_2 = arith.constant 0 : i32
    return %arg0, %c0_i32, %c0_i32_0, %c0_i32_1 : i32, i32, i32, i32
  }
  func.func @transform_4(%arg0: i32) -> (i32, i32, i32, i32) {
    %c0_i32 = arith.constant 0 : i32
    %c0_i32_0 = arith.constant 0 : i32
    %c0_i32_1 = arith.constant 0 : i32
    %c0_i32_2 = arith.constant 0 : i32
    return %arg0, %c0_i32, %c0_i32_0, %c0_i32_1 : i32, i32, i32, i32
  }
  func.func @transform_5(%arg0: i32) -> (i32, i32, i32, i32) {
    %c0_i32 = arith.constant 0 : i32
    %c0_i32_0 = arith.constant 0 : i32
    %c0_i32_1 = arith.constant 0 : i32
    %c0_i32_2 = arith.constant 0 : i32
    return %arg0, %c0_i32, %c0_i32_0, %c0_i32_1 : i32, i32, i32, i32
  }
}

module attributes {stable_mosaic.version = 11 : i64} {
  func.func @kernel(%arg0: i32, %arg1: memref<1x10x10x11xf32, #tpu.memory_space<vmem>>, %arg2: memref<9x11x27xf32, #tpu.memory_space<vmem>>, %arg3: memref<1x27xf32, #tpu.memory_space<vmem>>, %arg4: memref<1x8x8x27xf32, #tpu.memory_space<vmem>>) attributes {dimension_semantics = [#tpu.dimension_semantics<parallel>], iteration_bounds = array<i64: 2>, scalar_prefetch = 0 : i64, scratch_operands = 0 : i64, tpu.core_type = #tpu.core_type<tc>, window_params = [{transform_indices = @transform_0, window_bounds = array<i64: 1, 10, 10, 11>}, {pipeline_mode = #tpu.pipeline_mode<synchronous>, transform_indices = @transform_1, window_bounds = array<i64: 9, 11, 27>}, {pipeline_mode = #tpu.pipeline_mode<synchronous>, transform_indices = @transform_2, window_bounds = array<i64: 1, 27>}, {transform_indices = @transform_3, window_bounds = array<i64: 1, 8, 8, 27>}]} {
    %cst = arith.constant 0.000000e+00 : f32
    %0 = vector.broadcast %cst : f32 to vector<64x27xf32>
    %c0 = arith.constant 0 : index
    %c0_0 = arith.constant 0 : index
    %c0_1 = arith.constant 0 : index
    %c0_2 = arith.constant 0 : index
    %1 = vector.load %arg1[%c0, %c0_0, %c0_1, %c0_2] : memref<1x10x10x11xf32, #tpu.memory_space<vmem>>, vector<1x8x8x11xf32>
    %2 = vector.shape_cast %1 : vector<1x8x8x11xf32> to vector<8x8x11xf32>
    %3 = vector.shape_cast %2 : vector<8x8x11xf32> to vector<64x11xf32>
    %4 = arith.truncf %3 : vector<64x11xf32> to vector<64x11xbf16>
    %c0_3 = arith.constant 0 : index
    %c0_4 = arith.constant 0 : index
    %c0_5 = arith.constant 0 : index
    %5 = vector.load %arg2[%c0_3, %c0_4, %c0_5] : memref<9x11x27xf32, #tpu.memory_space<vmem>>, vector<1x11x27xf32>
    %6 = vector.shape_cast %5 : vector<1x11x27xf32> to vector<11x27xf32>
    %7 = arith.truncf %6 : vector<11x27xf32> to vector<11x27xbf16>
    %cst_6 = arith.constant dense<0.000000e+00> : vector<64x27xf32>
    %8 = tpu.matmul %4, %7, %cst_6 {dimension_numbers = #tpu.dot_dimension_numbers<[1], [0], [0], [1], [0, 0, 1, 1], [], []>} : vector<64x11xbf16>, vector<11x27xbf16>, vector<64x27xf32> -> vector<64x27xf32>
    %9 = arith.addf %0, %8 : vector<64x27xf32>
    %c0_7 = arith.constant 0 : index
    %c0_8 = arith.constant 0 : index
    %c1 = arith.constant 1 : index
    %c0_9 = arith.constant 0 : index
    %10 = vector.load %arg1[%c0_7, %c0_8, %c1, %c0_9] : memref<1x10x10x11xf32, #tpu.memory_space<vmem>>, vector<1x8x8x11xf32>
    %11 = vector.shape_cast %10 : vector<1x8x8x11xf32> to vector<8x8x11xf32>
    %12 = vector.shape_cast %11 : vector<8x8x11xf32> to vector<64x11xf32>
    %13 = arith.truncf %12 : vector<64x11xf32> to vector<64x11xbf16>
    %c1_10 = arith.constant 1 : index
    %c0_11 = arith.constant 0 : index
    %c0_12 = arith.constant 0 : index
    %14 = vector.load %arg2[%c1_10, %c0_11, %c0_12] : memref<9x11x27xf32, #tpu.memory_space<vmem>>, vector<1x11x27xf32>
    %15 = vector.shape_cast %14 : vector<1x11x27xf32> to vector<11x27xf32>
    %16 = arith.truncf %15 : vector<11x27xf32> to vector<11x27xbf16>
    %cst_13 = arith.constant dense<0.000000e+00> : vector<64x27xf32>
    %17 = tpu.matmul %13, %16, %cst_13 {dimension_numbers = #tpu.dot_dimension_numbers<[1], [0], [0], [1], [0, 0, 1, 1], [], []>} : vector<64x11xbf16>, vector<11x27xbf16>, vector<64x27xf32> -> vector<64x27xf32>
    %18 = arith.addf %9, %17 : vector<64x27xf32>
    %c0_14 = arith.constant 0 : index
    %c0_15 = arith.constant 0 : index
    %c2 = arith.constant 2 : index
    %c0_16 = arith.constant 0 : index
    %19 = vector.load %arg1[%c0_14, %c0_15, %c2, %c0_16] : memref<1x10x10x11xf32, #tpu.memory_space<vmem>>, vector<1x8x8x11xf32>
    %20 = vector.shape_cast %19 : vector<1x8x8x11xf32> to vector<8x8x11xf32>
    %21 = vector.shape_cast %20 : vector<8x8x11xf32> to vector<64x11xf32>
    %22 = arith.truncf %21 : vector<64x11xf32> to vector<64x11xbf16>
    %c2_17 = arith.constant 2 : index
    %c0_18 = arith.constant 0 : index
    %c0_19 = arith.constant 0 : index
    %23 = vector.load %arg2[%c2_17, %c0_18, %c0_19] : memref<9x11x27xf32, #tpu.memory_space<vmem>>, vector<1x11x27xf32>
    %24 = vector.shape_cast %23 : vector<1x11x27xf32> to vector<11x27xf32>
    %25 = arith.truncf %24 : vector<11x27xf32> to vector<11x27xbf16>
    %cst_20 = arith.constant dense<0.000000e+00> : vector<64x27xf32>
    %26 = tpu.matmul %22, %25, %cst_20 {dimension_numbers = #tpu.dot_dimension_numbers<[1], [0], [0], [1], [0, 0, 1, 1], [], []>} : vector<64x11xbf16>, vector<11x27xbf16>, vector<64x27xf32> -> vector<64x27xf32>
    %27 = arith.addf %18, %26 : vector<64x27xf32>
    %c0_21 = arith.constant 0 : index
    %c1_22 = arith.constant 1 : index
    %c0_23 = arith.constant 0 : index
    %c0_24 = arith.constant 0 : index
    %28 = vector.load %arg1[%c0_21, %c1_22, %c0_23, %c0_24] : memref<1x10x10x11xf32, #tpu.memory_space<vmem>>, vector<1x8x8x11xf32>
    %29 = vector.shape_cast %28 : vector<1x8x8x11xf32> to vector<8x8x11xf32>
    %30 = vector.shape_cast %29 : vector<8x8x11xf32> to vector<64x11xf32>
    %31 = arith.truncf %30 : vector<64x11xf32> to vector<64x11xbf16>
    %c3 = arith.constant 3 : index
    %c0_25 = arith.constant 0 : index
    %c0_26 = arith.constant 0 : index
    %32 = vector.load %arg2[%c3, %c0_25, %c0_26] : memref<9x11x27xf32, #tpu.memory_space<vmem>>, vector<1x11x27xf32>
    %33 = vector.shape_cast %32 : vector<1x11x27xf32> to vector<11x27xf32>
    %34 = arith.truncf %33 : vector<11x27xf32> to vector<11x27xbf16>
    %cst_27 = arith.constant dense<0.000000e+00> : vector<64x27xf32>
    %35 = tpu.matmul %31, %34, %cst_27 {dimension_numbers = #tpu.dot_dimension_numbers<[1], [0], [0], [1], [0, 0, 1, 1], [], []>} : vector<64x11xbf16>, vector<11x27xbf16>, vector<64x27xf32> -> vector<64x27xf32>
    %36 = arith.addf %27, %35 : vector<64x27xf32>
    %c0_28 = arith.constant 0 : index
    %c1_29 = arith.constant 1 : index
    %c1_30 = arith.constant 1 : index
    %c0_31 = arith.constant 0 : index
    %37 = vector.load %arg1[%c0_28, %c1_29, %c1_30, %c0_31] : memref<1x10x10x11xf32, #tpu.memory_space<vmem>>, vector<1x8x8x11xf32>
    %38 = vector.shape_cast %37 : vector<1x8x8x11xf32> to vector<8x8x11xf32>
    %39 = vector.shape_cast %38 : vector<8x8x11xf32> to vector<64x11xf32>
    %40 = arith.truncf %39 : vector<64x11xf32> to vector<64x11xbf16>
    %c4 = arith.constant 4 : index
    %c0_32 = arith.constant 0 : index
    %c0_33 = arith.constant 0 : index
    %41 = vector.load %arg2[%c4, %c0_32, %c0_33] : memref<9x11x27xf32, #tpu.memory_space<vmem>>, vector<1x11x27xf32>
    %42 = vector.shape_cast %41 : vector<1x11x27xf32> to vector<11x27xf32>
    %43 = arith.truncf %42 : vector<11x27xf32> to vector<11x27xbf16>
    %cst_34 = arith.constant dense<0.000000e+00> : vector<64x27xf32>
    %44 = tpu.matmul %40, %43, %cst_34 {dimension_numbers = #tpu.dot_dimension_numbers<[1], [0], [0], [1], [0, 0, 1, 1], [], []>} : vector<64x11xbf16>, vector<11x27xbf16>, vector<64x27xf32> -> vector<64x27xf32>
    %45 = arith.addf %36, %44 : vector<64x27xf32>
    %c0_35 = arith.constant 0 : index
    %c1_36 = arith.constant 1 : index
    %c2_37 = arith.constant 2 : index
    %c0_38 = arith.constant 0 : index
    %46 = vector.load %arg1[%c0_35, %c1_36, %c2_37, %c0_38] : memref<1x10x10x11xf32, #tpu.memory_space<vmem>>, vector<1x8x8x11xf32>
    %47 = vector.shape_cast %46 : vector<1x8x8x11xf32> to vector<8x8x11xf32>
    %48 = vector.shape_cast %47 : vector<8x8x11xf32> to vector<64x11xf32>
    %49 = arith.truncf %48 : vector<64x11xf32> to vector<64x11xbf16>
    %c5 = arith.constant 5 : index
    %c0_39 = arith.constant 0 : index
    %c0_40 = arith.constant 0 : index
    %50 = vector.load %arg2[%c5, %c0_39, %c0_40] : memref<9x11x27xf32, #tpu.memory_space<vmem>>, vector<1x11x27xf32>
    %51 = vector.shape_cast %50 : vector<1x11x27xf32> to vector<11x27xf32>
    %52 = arith.truncf %51 : vector<11x27xf32> to vector<11x27xbf16>
    %cst_41 = arith.constant dense<0.000000e+00> : vector<64x27xf32>
    %53 = tpu.matmul %49, %52, %cst_41 {dimension_numbers = #tpu.dot_dimension_numbers<[1], [0], [0], [1], [0, 0, 1, 1], [], []>} : vector<64x11xbf16>, vector<11x27xbf16>, vector<64x27xf32> -> vector<64x27xf32>
    %54 = arith.addf %45, %53 : vector<64x27xf32>
    %c0_42 = arith.constant 0 : index
    %c2_43 = arith.constant 2 : index
    %c0_44 = arith.constant 0 : index
    %c0_45 = arith.constant 0 : index
    %55 = vector.load %arg1[%c0_42, %c2_43, %c0_44, %c0_45] : memref<1x10x10x11xf32, #tpu.memory_space<vmem>>, vector<1x8x8x11xf32>
    %56 = vector.shape_cast %55 : vector<1x8x8x11xf32> to vector<8x8x11xf32>
    %57 = vector.shape_cast %56 : vector<8x8x11xf32> to vector<64x11xf32>
    %58 = arith.truncf %57 : vector<64x11xf32> to vector<64x11xbf16>
    %c6 = arith.constant 6 : index
    %c0_46 = arith.constant 0 : index
    %c0_47 = arith.constant 0 : index
    %59 = vector.load %arg2[%c6, %c0_46, %c0_47] : memref<9x11x27xf32, #tpu.memory_space<vmem>>, vector<1x11x27xf32>
    %60 = vector.shape_cast %59 : vector<1x11x27xf32> to vector<11x27xf32>
    %61 = arith.truncf %60 : vector<11x27xf32> to vector<11x27xbf16>
    %cst_48 = arith.constant dense<0.000000e+00> : vector<64x27xf32>
    %62 = tpu.matmul %58, %61, %cst_48 {dimension_numbers = #tpu.dot_dimension_numbers<[1], [0], [0], [1], [0, 0, 1, 1], [], []>} : vector<64x11xbf16>, vector<11x27xbf16>, vector<64x27xf32> -> vector<64x27xf32>
    %63 = arith.addf %54, %62 : vector<64x27xf32>
    %c0_49 = arith.constant 0 : index
    %c2_50 = arith.constant 2 : index
    %c1_51 = arith.constant 1 : index
    %c0_52 = arith.constant 0 : index
    %64 = vector.load %arg1[%c0_49, %c2_50, %c1_51, %c0_52] : memref<1x10x10x11xf32, #tpu.memory_space<vmem>>, vector<1x8x8x11xf32>
    %65 = vector.shape_cast %64 : vector<1x8x8x11xf32> to vector<8x8x11xf32>
    %66 = vector.shape_cast %65 : vector<8x8x11xf32> to vector<64x11xf32>
    %67 = arith.truncf %66 : vector<64x11xf32> to vector<64x11xbf16>
    %c7 = arith.constant 7 : index
    %c0_53 = arith.constant 0 : index
    %c0_54 = arith.constant 0 : index
    %68 = vector.load %arg2[%c7, %c0_53, %c0_54] : memref<9x11x27xf32, #tpu.memory_space<vmem>>, vector<1x11x27xf32>
    %69 = vector.shape_cast %68 : vector<1x11x27xf32> to vector<11x27xf32>
    %70 = arith.truncf %69 : vector<11x27xf32> to vector<11x27xbf16>
    %cst_55 = arith.constant dense<0.000000e+00> : vector<64x27xf32>
    %71 = tpu.matmul %67, %70, %cst_55 {dimension_numbers = #tpu.dot_dimension_numbers<[1], [0], [0], [1], [0, 0, 1, 1], [], []>} : vector<64x11xbf16>, vector<11x27xbf16>, vector<64x27xf32> -> vector<64x27xf32>
    %72 = arith.addf %63, %71 : vector<64x27xf32>
    %c0_56 = arith.constant 0 : index
    %c2_57 = arith.constant 2 : index
    %c2_58 = arith.constant 2 : index
    %c0_59 = arith.constant 0 : index
    %73 = vector.load %arg1[%c0_56, %c2_57, %c2_58, %c0_59] : memref<1x10x10x11xf32, #tpu.memory_space<vmem>>, vector<1x8x8x11xf32>
    %74 = vector.shape_cast %73 : vector<1x8x8x11xf32> to vector<8x8x11xf32>
    %75 = vector.shape_cast %74 : vector<8x8x11xf32> to vector<64x11xf32>
    %76 = arith.truncf %75 : vector<64x11xf32> to vector<64x11xbf16>
    %c8 = arith.constant 8 : index
    %c0_60 = arith.constant 0 : index
    %c0_61 = arith.constant 0 : index
    %77 = vector.load %arg2[%c8, %c0_60, %c0_61] : memref<9x11x27xf32, #tpu.memory_space<vmem>>, vector<1x11x27xf32>
    %78 = vector.shape_cast %77 : vector<1x11x27xf32> to vector<11x27xf32>
    %79 = arith.truncf %78 : vector<11x27xf32> to vector<11x27xbf16>
    %cst_62 = arith.constant dense<0.000000e+00> : vector<64x27xf32>
    %80 = tpu.matmul %76, %79, %cst_62 {dimension_numbers = #tpu.dot_dimension_numbers<[1], [0], [0], [1], [0, 0, 1, 1], [], []>} : vector<64x11xbf16>, vector<11x27xbf16>, vector<64x27xf32> -> vector<64x27xf32>
    %81 = arith.addf %72, %80 : vector<64x27xf32>
    %c0_63 = arith.constant 0 : index
    %c0_64 = arith.constant 0 : index
    %82 = vector.load %arg3[%c0_63, %c0_64] : memref<1x27xf32, #tpu.memory_space<vmem>>, vector<1x27xf32>
    %83 = vector.broadcast %82 : vector<1x27xf32> to vector<64x27xf32>
    %84 = arith.addf %81, %83 : vector<64x27xf32>
    %85 = vector.shape_cast %84 : vector<64x27xf32> to vector<8x8x27xf32>
    %c0_65 = arith.constant 0 : index
    %c0_66 = arith.constant 0 : index
    %c0_67 = arith.constant 0 : index
    %c0_68 = arith.constant 0 : index
    %86 = vector.load %arg4[%c0_65, %c0_66, %c0_67, %c0_68] : memref<1x8x8x27xf32, #tpu.memory_space<vmem>>, vector<1x8x8x27xf32>
    %87 = vector.shape_cast %86 : vector<1x8x8x27xf32> to vector<8x8x27xf32>
    %88 = vector.shape_cast %85 : vector<8x8x27xf32> to vector<1x8x8x27xf32>
    tpu.vector_store %arg4[%c0_65, %c0_66, %c0_67, %c0_68], %88 {strides = array<i32>} : memref<1x8x8x27xf32, #tpu.memory_space<vmem>>, vector<1x8x8x27xf32>,
    return
  }
  func.func @transform_0(%arg0: i32) -> (i32, i32, i32, i32) {
    %c0_i32 = arith.constant 0 : i32
    %c0_i32_0 = arith.constant 0 : i32
    %c0_i32_1 = arith.constant 0 : i32
    %c0_i32_2 = arith.constant 0 : i32
    return %arg0, %c0_i32, %c0_i32_0, %c0_i32_1 : i32, i32, i32, i32
  }
  func.func @transform_1(%arg0: i32) -> (i32, i32, i32) {
    %c0_i32 = arith.constant 0 : i32
    %c0_i32_0 = arith.constant 0 : i32
    %c0_i32_1 = arith.constant 0 : i32
    %c0_i32_2 = arith.constant 0 : i32
    return %c0_i32, %c0_i32_0, %c0_i32_1 : i32, i32, i32
  }
  func.func @transform_2(%arg0: i32) -> (i32, i32) {
    %c0_i32 = arith.constant 0 : i32
    %c0_i32_0 = arith.constant 0 : i32
    %c0_i32_1 = arith.constant 0 : i32
    return %c0_i32, %c0_i32_0 : i32, i32
  }
  func.func @transform_3(%arg0: i32) -> (i32, i32, i32, i32) {
    %c0_i32 = arith.constant 0 : i32
    %c0_i32_0 = arith.constant 0 : i32
    %c0_i32_1 = arith.constant 0 : i32
    %c0_i32_2 = arith.constant 0 : i32
    return %arg0, %c0_i32, %c0_i32_0, %c0_i32_1 : i32, i32, i32, i32
  }
}

module attributes {stable_mosaic.version = 11 : i64} {
  func.func @kernel(%arg0: i32, %arg1: memref<128x99xf32, #tpu.memory_space<vmem>>, %arg2: memref<99x8xf32, #tpu.memory_space<vmem>>, %arg3: memref<1x8xf32, #tpu.memory_space<vmem>>, %arg4: memref<128x8xf32, #tpu.memory_space<vmem>>) attributes {dimension_semantics = [#tpu.dimension_semantics<parallel>], iteration_bounds = array<i64: 1>, scalar_prefetch = 0 : i64, scratch_operands = 0 : i64, tpu.core_type = #tpu.core_type<tc>, window_params = [{transform_indices = @transform_0, window_bounds = array<i64: 128, 99>}, {pipeline_mode = #tpu.pipeline_mode<synchronous>, transform_indices = @transform_1, window_bounds = array<i64: 99, 8>}, {pipeline_mode = #tpu.pipeline_mode<synchronous>, transform_indices = @transform_2, window_bounds = array<i64: 1, 8>}, {transform_indices = @transform_3, window_bounds = array<i64: 128, 8>}]} {
    %c0 = arith.constant 0 : index
    %c0_0 = arith.constant 0 : index
    %0 = vector.load %arg1[%c0, %c0_0] : memref<128x99xf32, #tpu.memory_space<vmem>>, vector<128x99xf32>
    %1 = arith.truncf %0 : vector<128x99xf32> to vector<128x99xbf16>
    %c0_1 = arith.constant 0 : index
    %c0_2 = arith.constant 0 : index
    %2 = vector.load %arg2[%c0_1, %c0_2] : memref<99x8xf32, #tpu.memory_space<vmem>>, vector<99x8xf32>
    %3 = arith.truncf %2 : vector<99x8xf32> to vector<99x8xbf16>
    %cst = arith.constant dense<0.000000e+00> : vector<128x8xf32>
    %4 = tpu.matmul %1, %3, %cst {dimension_numbers = #tpu.dot_dimension_numbers<[1], [0], [0], [1], [0, 0, 1, 1], [], []>} : vector<128x99xbf16>, vector<99x8xbf16>, vector<128x8xf32> -> vector<128x8xf32>
    %c0_3 = arith.constant 0 : index
    %c0_4 = arith.constant 0 : index
    %5 = vector.load %arg3[%c0_3, %c0_4] : memref<1x8xf32, #tpu.memory_space<vmem>>, vector<1x8xf32>
    %6 = vector.broadcast %5 : vector<1x8xf32> to vector<128x8xf32>
    %7 = arith.addf %4, %6 : vector<128x8xf32>
    %c0_5 = arith.constant 0 : index
    %c0_6 = arith.constant 0 : index
    %8 = vector.load %arg4[%c0_5, %c0_6] : memref<128x8xf32, #tpu.memory_space<vmem>>, vector<128x8xf32>
    tpu.vector_store %arg4[%c0_5, %c0_6], %7 {strides = array<i32>} : memref<128x8xf32, #tpu.memory_space<vmem>>, vector<128x8xf32>,
    return
  }
  func.func @transform_0(%arg0: i32) -> (i32, i32) {
    %c0_i32 = arith.constant 0 : i32
    %c0_i32_0 = arith.constant 0 : i32
    return %arg0, %c0_i32 : i32, i32
  }
  func.func @transform_1(%arg0: i32) -> (i32, i32) {
    %c0_i32 = arith.constant 0 : i32
    %c0_i32_0 = arith.constant 0 : i32
    %c0_i32_1 = arith.constant 0 : i32
    return %c0_i32, %c0_i32_0 : i32, i32
  }
  func.func @transform_2(%arg0: i32) -> (i32, i32) {
    %c0_i32 = arith.constant 0 : i32
    %c0_i32_0 = arith.constant 0 : i32
    %c0_i32_1 = arith.constant 0 : i32
    return %c0_i32, %c0_i32_0 : i32, i32
  }
  func.func @transform_3(%arg0: i32) -> (i32, i32) {
    %c0_i32 = arith.constant 0 : i32
    %c0_i32_0 = arith.constant 0 : i32
    return %arg0, %c0_i32 : i32, i32
  }
}

module attributes {stable_mosaic.version = 11 : i64} {
  func.func @kernel(%arg0: i32, %arg1: memref<128x11xf32, #tpu.memory_space<vmem>>, %arg2: memref<11x32xf32, #tpu.memory_space<vmem>>, %arg3: memref<1x32xf32, #tpu.memory_space<vmem>>, %arg4: memref<1x32xf32, #tpu.memory_space<vmem>>, %arg5: memref<1x32xf32, #tpu.memory_space<vmem>>, %arg6: memref<128x32xf32, #tpu.memory_space<vmem>>) attributes {dimension_semantics = [#tpu.dimension_semantics<parallel>], iteration_bounds = array<i64: 1>, scalar_prefetch = 0 : i64, scratch_operands = 0 : i64, tpu.core_type = #tpu.core_type<tc>, window_params = [{transform_indices = @transform_0, window_bounds = array<i64: 128, 11>}, {pipeline_mode = #tpu.pipeline_mode<synchronous>, transform_indices = @transform_1, window_bounds = array<i64: 11, 32>}, {pipeline_mode = #tpu.pipeline_mode<synchronous>, transform_indices = @transform_2, window_bounds = array<i64: 1, 32>}, {pipeline_mode = #tpu.pipeline_mode<synchronous>, transform_indices = @transform_3, window_bounds = array<i64: 1, 32>}, {pipeline_mode = #tpu.pipeline_mode<synchronous>, transform_indices = @transform_4, window_bounds = array<i64: 1, 32>}, {transform_indices = @transform_5, window_bounds = array<i64: 128, 32>}]} {
    %c0 = arith.constant 0 : index
    %c0_0 = arith.constant 0 : index
    %0 = vector.load %arg1[%c0, %c0_0] : memref<128x11xf32, #tpu.memory_space<vmem>>, vector<128x11xf32>
    %1 = arith.truncf %0 : vector<128x11xf32> to vector<128x11xbf16>
    %c0_1 = arith.constant 0 : index
    %c0_2 = arith.constant 0 : index
    %2 = vector.load %arg2[%c0_1, %c0_2] : memref<11x32xf32, #tpu.memory_space<vmem>>, vector<11x32xf32>
    %3 = arith.truncf %2 : vector<11x32xf32> to vector<11x32xbf16>
    %cst = arith.constant dense<0.000000e+00> : vector<128x32xf32>
    %4 = tpu.matmul %1, %3, %cst {dimension_numbers = #tpu.dot_dimension_numbers<[1], [0], [0], [1], [0, 0, 1, 1], [], []>} : vector<128x11xbf16>, vector<11x32xbf16>, vector<128x32xf32> -> vector<128x32xf32>
    %c0_3 = arith.constant 0 : index
    %c0_4 = arith.constant 0 : index
    %5 = vector.load %arg3[%c0_3, %c0_4] : memref<1x32xf32, #tpu.memory_space<vmem>>, vector<1x32xf32>
    %6 = vector.broadcast %5 : vector<1x32xf32> to vector<128x32xf32>
    %7 = arith.addf %4, %6 : vector<128x32xf32>
    %cst_5 = arith.constant 5.000000e-01 : f32
    %8 = vector.broadcast %cst_5 : f32 to vector<128x32xf32>
    %9 = arith.mulf %8, %7 : vector<128x32xf32>
    %cst_6 = arith.constant 4.471500e-02 : f32
    %10 = vector.broadcast %cst_6 : f32 to vector<128x32xf32>
    %11 = arith.mulf %10, %7 : vector<128x32xf32>
    %12 = arith.mulf %11, %7 : vector<128x32xf32>
    %13 = arith.mulf %12, %7 : vector<128x32xf32>
    %14 = arith.addf %7, %13 : vector<128x32xf32>
    %cst_7 = arith.constant 0.797884583 : f32
    %15 = vector.broadcast %cst_7 : f32 to vector<128x32xf32>
    %16 = arith.mulf %15, %14 : vector<128x32xf32>
    %17 = math.tanh %16 : vector<128x32xf32>
    %cst_8 = arith.constant 1.000000e+00 : f32
    %18 = vector.broadcast %cst_8 : f32 to vector<128x32xf32>
    %19 = arith.addf %18, %17 : vector<128x32xf32>
    %20 = arith.mulf %9, %19 : vector<128x32xf32>
    %c0_9 = arith.constant 0 : index
    %c0_10 = arith.constant 0 : index
    %21 = vector.load %arg4[%c0_9, %c0_10] : memref<1x32xf32, #tpu.memory_space<vmem>>, vector<1x32xf32>
    %22 = vector.broadcast %21 : vector<1x32xf32> to vector<128x32xf32>
    %23 = arith.mulf %20, %22 : vector<128x32xf32>
    %c0_11 = arith.constant 0 : index
    %c0_12 = arith.constant 0 : index
    %24 = vector.load %arg5[%c0_11, %c0_12] : memref<1x32xf32, #tpu.memory_space<vmem>>, vector<1x32xf32>
    %25 = vector.broadcast %24 : vector<1x32xf32> to vector<128x32xf32>
    %26 = arith.addf %23, %25 : vector<128x32xf32>
    %c0_13 = arith.constant 0 : index
    %c0_14 = arith.constant 0 : index
    %27 = vector.load %arg6[%c0_13, %c0_14] : memref<128x32xf32, #tpu.memory_space<vmem>>, vector<128x32xf32>
    tpu.vector_store %arg6[%c0_13, %c0_14], %26 {strides = array<i32>} : memref<128x32xf32, #tpu.memory_space<vmem>>, vector<128x32xf32>,
    return
  }
  func.func @transform_0(%arg0: i32) -> (i32, i32) {
    %c0_i32 = arith.constant 0 : i32
    %c0_i32_0 = arith.constant 0 : i32
    return %arg0, %c0_i32 : i32, i32
  }
  func.func @transform_1(%arg0: i32) -> (i32, i32) {
    %c0_i32 = arith.constant 0 : i32
    %c0_i32_0 = arith.constant 0 : i32
    %c0_i32_1 = arith.constant 0 : i32
    return %c0_i32, %c0_i32_0 : i32, i32
  }
  func.func @transform_2(%arg0: i32) -> (i32, i32) {
    %c0_i32 = arith.constant 0 : i32
    %c0_i32_0 = arith.constant 0 : i32
    %c0_i32_1 = arith.constant 0 : i32
    return %c0_i32, %c0_i32_0 : i32, i32
  }
  func.func @transform_3(%arg0: i32) -> (i32, i32) {
    %c0_i32 = arith.constant 0 : i32
    %c0_i32_0 = arith.constant 0 : i32
    %c0_i32_1 = arith.constant 0 : i32
    return %c0_i32, %c0_i32_0 : i32, i32
  }
  func.func @transform_4(%arg0: i32) -> (i32, i32) {
    %c0_i32 = arith.constant 0 : i32
    %c0_i32_0 = arith.constant 0 : i32
    %c0_i32_1 = arith.constant 0 : i32
    return %c0_i32, %c0_i32_0 : i32, i32
  }
  func.func @transform_5(%arg0: i32) -> (i32, i32) {
    %c0_i32 = arith.constant 0 : i32
    %c0_i32_0 = arith.constant 0 : i32
    return %arg0, %c0_i32 : i32, i32
  }
}

module attributes {stable_mosaic.version = 11 : i64} {
  func.func @kernel(%arg0: i32, %arg1: memref<1x10x10x32xf32, #tpu.memory_space<vmem>>, %arg2: memref<9x32xf32, #tpu.memory_space<vmem>>, %arg3: memref<1x32xf32, #tpu.memory_space<vmem>>, %arg4: memref<1x32xf32, #tpu.memory_space<vmem>>, %arg5: memref<1x32xf32, #tpu.memory_space<vmem>>, %arg6: memref<32x32xf32, #tpu.memory_space<vmem>>, %arg7: memref<1x32xf32, #tpu.memory_space<vmem>>, %arg8: memref<1x32xf32, #tpu.memory_space<vmem>>, %arg9: memref<1x32xf32, #tpu.memory_space<vmem>>, %arg10: memref<1x8x8x32xf32, #tpu.memory_space<vmem>>) attributes {dimension_semantics = [#tpu.dimension_semantics<parallel>], iteration_bounds = array<i64: 2>, scalar_prefetch = 0 : i64, scratch_operands = 0 : i64, tpu.core_type = #tpu.core_type<tc>, window_params = [{transform_indices = @transform_0, window_bounds = array<i64: 1, 10, 10, 32>}, {pipeline_mode = #tpu.pipeline_mode<synchronous>, transform_indices = @transform_1, window_bounds = array<i64: 9, 32>}, {pipeline_mode = #tpu.pipeline_mode<synchronous>, transform_indices = @transform_2, window_bounds = array<i64: 1, 32>}, {pipeline_mode = #tpu.pipeline_mode<synchronous>, transform_indices = @transform_3, window_bounds = array<i64: 1, 32>}, {pipeline_mode = #tpu.pipeline_mode<synchronous>, transform_indices = @transform_4, window_bounds = array<i64: 1, 32>}, {pipeline_mode = #tpu.pipeline_mode<synchronous>, transform_indices = @transform_5, window_bounds = array<i64: 32, 32>}, {pipeline_mode = #tpu.pipeline_mode<synchronous>, transform_indices = @transform_6, window_bounds = array<i64: 1, 32>}, {pipeline_mode = #tpu.pipeline_mode<synchronous>, transform_indices = @transform_7, window_bounds = array<i64: 1, 32>}, {pipeline_mode = #tpu.pipeline_mode<synchronous>, transform_indices = @transform_8, window_bounds = array<i64: 1, 32>}, {transform_indices = @transform_9, window_bounds = array<i64: 1, 8, 8, 32>}]} {
    %cst = arith.constant 0.000000e+00 : f32
    %0 = vector.broadcast %cst : f32 to vector<8x8x32xf32>
    %c0 = arith.constant 0 : index
    %c0_0 = arith.constant 0 : index
    %c0_1 = arith.constant 0 : index
    %c0_2 = arith.constant 0 : index
    %1 = vector.load %arg1[%c0, %c0_0, %c0_1, %c0_2] : memref<1x10x10x32xf32, #tpu.memory_space<vmem>>, vector<1x8x8x32xf32>
    %2 = vector.shape_cast %1 : vector<1x8x8x32xf32> to vector<8x8x32xf32>
    %c0_3 = arith.constant 0 : index
    %c0_4 = arith.constant 0 : index
    %3 = vector.load %arg2[%c0_3, %c0_4] : memref<9x32xf32, #tpu.memory_space<vmem>>, vector<1x32xf32>
    %4 = vector.shape_cast %3 : vector<1x32xf32> to vector<1x1x32xf32>
    %5 = vector.broadcast %4 : vector<1x1x32xf32> to vector<8x8x32xf32>
    %6 = arith.mulf %2, %5 : vector<8x8x32xf32>
    %7 = arith.addf %0, %6 : vector<8x8x32xf32>
    %c0_5 = arith.constant 0 : index
    %c0_6 = arith.constant 0 : index
    %c1 = arith.constant 1 : index
    %c0_7 = arith.constant 0 : index
    %8 = vector.load %arg1[%c0_5, %c0_6, %c1, %c0_7] : memref<1x10x10x32xf32, #tpu.memory_space<vmem>>, vector<1x8x8x32xf32>
    %9 = vector.shape_cast %8 : vector<1x8x8x32xf32> to vector<8x8x32xf32>
    %c1_8 = arith.constant 1 : index
    %c0_9 = arith.constant 0 : index
    %10 = vector.load %arg2[%c1_8, %c0_9] : memref<9x32xf32, #tpu.memory_space<vmem>>, vector<1x32xf32>
    %11 = vector.shape_cast %10 : vector<1x32xf32> to vector<1x1x32xf32>
    %12 = vector.broadcast %11 : vector<1x1x32xf32> to vector<8x8x32xf32>
    %13 = arith.mulf %9, %12 : vector<8x8x32xf32>
    %14 = arith.addf %7, %13 : vector<8x8x32xf32>
    %c0_10 = arith.constant 0 : index
    %c0_11 = arith.constant 0 : index
    %c2 = arith.constant 2 : index
    %c0_12 = arith.constant 0 : index
    %15 = vector.load %arg1[%c0_10, %c0_11, %c2, %c0_12] : memref<1x10x10x32xf32, #tpu.memory_space<vmem>>, vector<1x8x8x32xf32>
    %16 = vector.shape_cast %15 : vector<1x8x8x32xf32> to vector<8x8x32xf32>
    %c2_13 = arith.constant 2 : index
    %c0_14 = arith.constant 0 : index
    %17 = vector.load %arg2[%c2_13, %c0_14] : memref<9x32xf32, #tpu.memory_space<vmem>>, vector<1x32xf32>
    %18 = vector.shape_cast %17 : vector<1x32xf32> to vector<1x1x32xf32>
    %19 = vector.broadcast %18 : vector<1x1x32xf32> to vector<8x8x32xf32>
    %20 = arith.mulf %16, %19 : vector<8x8x32xf32>
    %21 = arith.addf %14, %20 : vector<8x8x32xf32>
    %c0_15 = arith.constant 0 : index
    %c1_16 = arith.constant 1 : index
    %c0_17 = arith.constant 0 : index
    %c0_18 = arith.constant 0 : index
    %22 = vector.load %arg1[%c0_15, %c1_16, %c0_17, %c0_18] : memref<1x10x10x32xf32, #tpu.memory_space<vmem>>, vector<1x8x8x32xf32>
    %23 = vector.shape_cast %22 : vector<1x8x8x32xf32> to vector<8x8x32xf32>
    %c3 = arith.constant 3 : index
    %c0_19 = arith.constant 0 : index
    %24 = vector.load %arg2[%c3, %c0_19] : memref<9x32xf32, #tpu.memory_space<vmem>>, vector<1x32xf32>
    %25 = vector.shape_cast %24 : vector<1x32xf32> to vector<1x1x32xf32>
    %26 = vector.broadcast %25 : vector<1x1x32xf32> to vector<8x8x32xf32>
    %27 = arith.mulf %23, %26 : vector<8x8x32xf32>
    %28 = arith.addf %21, %27 : vector<8x8x32xf32>
    %c0_20 = arith.constant 0 : index
    %c1_21 = arith.constant 1 : index
    %c1_22 = arith.constant 1 : index
    %c0_23 = arith.constant 0 : index
    %29 = vector.load %arg1[%c0_20, %c1_21, %c1_22, %c0_23] : memref<1x10x10x32xf32, #tpu.memory_space<vmem>>, vector<1x8x8x32xf32>
    %30 = vector.shape_cast %29 : vector<1x8x8x32xf32> to vector<8x8x32xf32>
    %c4 = arith.constant 4 : index
    %c0_24 = arith.constant 0 : index
    %31 = vector.load %arg2[%c4, %c0_24] : memref<9x32xf32, #tpu.memory_space<vmem>>, vector<1x32xf32>
    %32 = vector.shape_cast %31 : vector<1x32xf32> to vector<1x1x32xf32>
    %33 = vector.broadcast %32 : vector<1x1x32xf32> to vector<8x8x32xf32>
    %34 = arith.mulf %30, %33 : vector<8x8x32xf32>
    %35 = arith.addf %28, %34 : vector<8x8x32xf32>
    %c0_25 = arith.constant 0 : index
    %c1_26 = arith.constant 1 : index
    %c2_27 = arith.constant 2 : index
    %c0_28 = arith.constant 0 : index
    %36 = vector.load %arg1[%c0_25, %c1_26, %c2_27, %c0_28] : memref<1x10x10x32xf32, #tpu.memory_space<vmem>>, vector<1x8x8x32xf32>
    %37 = vector.shape_cast %36 : vector<1x8x8x32xf32> to vector<8x8x32xf32>
    %c5 = arith.constant 5 : index
    %c0_29 = arith.constant 0 : index
    %38 = vector.load %arg2[%c5, %c0_29] : memref<9x32xf32, #tpu.memory_space<vmem>>, vector<1x32xf32>
    %39 = vector.shape_cast %38 : vector<1x32xf32> to vector<1x1x32xf32>
    %40 = vector.broadcast %39 : vector<1x1x32xf32> to vector<8x8x32xf32>
    %41 = arith.mulf %37, %40 : vector<8x8x32xf32>
    %42 = arith.addf %35, %41 : vector<8x8x32xf32>
    %c0_30 = arith.constant 0 : index
    %c2_31 = arith.constant 2 : index
    %c0_32 = arith.constant 0 : index
    %c0_33 = arith.constant 0 : index
    %43 = vector.load %arg1[%c0_30, %c2_31, %c0_32, %c0_33] : memref<1x10x10x32xf32, #tpu.memory_space<vmem>>, vector<1x8x8x32xf32>
    %44 = vector.shape_cast %43 : vector<1x8x8x32xf32> to vector<8x8x32xf32>
    %c6 = arith.constant 6 : index
    %c0_34 = arith.constant 0 : index
    %45 = vector.load %arg2[%c6, %c0_34] : memref<9x32xf32, #tpu.memory_space<vmem>>, vector<1x32xf32>
    %46 = vector.shape_cast %45 : vector<1x32xf32> to vector<1x1x32xf32>
    %47 = vector.broadcast %46 : vector<1x1x32xf32> to vector<8x8x32xf32>
    %48 = arith.mulf %44, %47 : vector<8x8x32xf32>
    %49 = arith.addf %42, %48 : vector<8x8x32xf32>
    %c0_35 = arith.constant 0 : index
    %c2_36 = arith.constant 2 : index
    %c1_37 = arith.constant 1 : index
    %c0_38 = arith.constant 0 : index
    %50 = vector.load %arg1[%c0_35, %c2_36, %c1_37, %c0_38] : memref<1x10x10x32xf32, #tpu.memory_space<vmem>>, vector<1x8x8x32xf32>
    %51 = vector.shape_cast %50 : vector<1x8x8x32xf32> to vector<8x8x32xf32>
    %c7 = arith.constant 7 : index
    %c0_39 = arith.constant 0 : index
    %52 = vector.load %arg2[%c7, %c0_39] : memref<9x32xf32, #tpu.memory_space<vmem>>, vector<1x32xf32>
    %53 = vector.shape_cast %52 : vector<1x32xf32> to vector<1x1x32xf32>
    %54 = vector.broadcast %53 : vector<1x1x32xf32> to vector<8x8x32xf32>
    %55 = arith.mulf %51, %54 : vector<8x8x32xf32>
    %56 = arith.addf %49, %55 : vector<8x8x32xf32>
    %c0_40 = arith.constant 0 : index
    %c2_41 = arith.constant 2 : index
    %c2_42 = arith.constant 2 : index
    %c0_43 = arith.constant 0 : index
    %57 = vector.load %arg1[%c0_40, %c2_41, %c2_42, %c0_43] : memref<1x10x10x32xf32, #tpu.memory_space<vmem>>, vector<1x8x8x32xf32>
    %58 = vector.shape_cast %57 : vector<1x8x8x32xf32> to vector<8x8x32xf32>
    %c8 = arith.constant 8 : index
    %c0_44 = arith.constant 0 : index
    %59 = vector.load %arg2[%c8, %c0_44] : memref<9x32xf32, #tpu.memory_space<vmem>>, vector<1x32xf32>
    %60 = vector.shape_cast %59 : vector<1x32xf32> to vector<1x1x32xf32>
    %61 = vector.broadcast %60 : vector<1x1x32xf32> to vector<8x8x32xf32>
    %62 = arith.mulf %58, %61 : vector<8x8x32xf32>
    %63 = arith.addf %56, %62 : vector<8x8x32xf32>
    %c0_45 = arith.constant 0 : index
    %c0_46 = arith.constant 0 : index
    %64 = vector.load %arg3[%c0_45, %c0_46] : memref<1x32xf32, #tpu.memory_space<vmem>>, vector<1x32xf32>
    %65 = vector.shape_cast %64 : vector<1x32xf32> to vector<1x1x32xf32>
    %66 = vector.broadcast %65 : vector<1x1x32xf32> to vector<8x8x32xf32>
    %67 = arith.addf %63, %66 : vector<8x8x32xf32>
    %cst_47 = arith.constant 5.000000e-01 : f32
    %68 = vector.broadcast %cst_47 : f32 to vector<8x8x32xf32>
    %69 = arith.mulf %68, %67 : vector<8x8x32xf32>
    %cst_48 = arith.constant 4.471500e-02 : f32
    %70 = vector.broadcast %cst_48 : f32 to vector<8x8x32xf32>
    %71 = arith.mulf %70, %67 : vector<8x8x32xf32>
    %72 = arith.mulf %71, %67 : vector<8x8x32xf32>
    %73 = arith.mulf %72, %67 : vector<8x8x32xf32>
    %74 = arith.addf %67, %73 : vector<8x8x32xf32>
    %cst_49 = arith.constant 0.797884583 : f32
    %75 = vector.broadcast %cst_49 : f32 to vector<8x8x32xf32>
    %76 = arith.mulf %75, %74 : vector<8x8x32xf32>
    %77 = math.tanh %76 : vector<8x8x32xf32>
    %cst_50 = arith.constant 1.000000e+00 : f32
    %78 = vector.broadcast %cst_50 : f32 to vector<8x8x32xf32>
    %79 = arith.addf %78, %77 : vector<8x8x32xf32>
    %80 = arith.mulf %69, %79 : vector<8x8x32xf32>
    %c0_51 = arith.constant 0 : index
    %c0_52 = arith.constant 0 : index
    %81 = vector.load %arg4[%c0_51, %c0_52] : memref<1x32xf32, #tpu.memory_space<vmem>>, vector<1x32xf32>
    %82 = vector.shape_cast %81 : vector<1x32xf32> to vector<1x1x32xf32>
    %83 = vector.broadcast %82 : vector<1x1x32xf32> to vector<8x8x32xf32>
    %84 = arith.mulf %80, %83 : vector<8x8x32xf32>
    %c0_53 = arith.constant 0 : index
    %c0_54 = arith.constant 0 : index
    %85 = vector.load %arg5[%c0_53, %c0_54] : memref<1x32xf32, #tpu.memory_space<vmem>>, vector<1x32xf32>
    %86 = vector.shape_cast %85 : vector<1x32xf32> to vector<1x1x32xf32>
    %87 = vector.broadcast %86 : vector<1x1x32xf32> to vector<8x8x32xf32>
    %88 = arith.addf %84, %87 : vector<8x8x32xf32>
    %c0_55 = arith.constant 0 : index
    %c1_56 = arith.constant 1 : index
    %c1_57 = arith.constant 1 : index
    %c0_58 = arith.constant 0 : index
    %89 = vector.load %arg1[%c0_55, %c1_56, %c1_57, %c0_58] : memref<1x10x10x32xf32, #tpu.memory_space<vmem>>, vector<1x8x8x32xf32>
    %90 = vector.shape_cast %89 : vector<1x8x8x32xf32> to vector<8x8x32xf32>
    %91 = arith.addf %90, %88 : vector<8x8x32xf32>
    %92 = vector.shape_cast %91 : vector<8x8x32xf32> to vector<64x32xf32>
    %93 = arith.truncf %92 : vector<64x32xf32> to vector<64x32xbf16>
    %c0_59 = arith.constant 0 : index
    %c0_60 = arith.constant 0 : index
    %94 = vector.load %arg6[%c0_59, %c0_60] : memref<32x32xf32, #tpu.memory_space<vmem>>, vector<32x32xf32>
    %95 = arith.truncf %94 : vector<32x32xf32> to vector<32x32xbf16>
    %cst_61 = arith.constant dense<0.000000e+00> : vector<64x32xf32>
    %96 = tpu.matmul %93, %95, %cst_61 {dimension_numbers = #tpu.dot_dimension_numbers<[1], [0], [0], [1], [0, 0, 1, 1], [], []>} : vector<64x32xbf16>, vector<32x32xbf16>, vector<64x32xf32> -> vector<64x32xf32>
    %c0_62 = arith.constant 0 : index
    %c0_63 = arith.constant 0 : index
    %97 = vector.load %arg7[%c0_62, %c0_63] : memref<1x32xf32, #tpu.memory_space<vmem>>, vector<1x32xf32>
    %98 = vector.broadcast %97 : vector<1x32xf32> to vector<64x32xf32>
    %99 = arith.addf %96, %98 : vector<64x32xf32>
    %cst_64 = arith.constant 5.000000e-01 : f32
    %100 = vector.broadcast %cst_64 : f32 to vector<64x32xf32>
    %101 = arith.mulf %100, %99 : vector<64x32xf32>
    %cst_65 = arith.constant 4.471500e-02 : f32
    %102 = vector.broadcast %cst_65 : f32 to vector<64x32xf32>
    %103 = arith.mulf %102, %99 : vector<64x32xf32>
    %104 = arith.mulf %103, %99 : vector<64x32xf32>
    %105 = arith.mulf %104, %99 : vector<64x32xf32>
    %106 = arith.addf %99, %105 : vector<64x32xf32>
    %cst_66 = arith.constant 0.797884583 : f32
    %107 = vector.broadcast %cst_66 : f32 to vector<64x32xf32>
    %108 = arith.mulf %107, %106 : vector<64x32xf32>
    %109 = math.tanh %108 : vector<64x32xf32>
    %cst_67 = arith.constant 1.000000e+00 : f32
    %110 = vector.broadcast %cst_67 : f32 to vector<64x32xf32>
    %111 = arith.addf %110, %109 : vector<64x32xf32>
    %112 = arith.mulf %101, %111 : vector<64x32xf32>
    %c0_68 = arith.constant 0 : index
    %c0_69 = arith.constant 0 : index
    %113 = vector.load %arg8[%c0_68, %c0_69] : memref<1x32xf32, #tpu.memory_space<vmem>>, vector<1x32xf32>
    %114 = vector.broadcast %113 : vector<1x32xf32> to vector<64x32xf32>
    %115 = arith.mulf %112, %114 : vector<64x32xf32>
    %c0_70 = arith.constant 0 : index
    %c0_71 = arith.constant 0 : index
    %116 = vector.load %arg9[%c0_70, %c0_71] : memref<1x32xf32, #tpu.memory_space<vmem>>, vector<1x32xf32>
    %117 = vector.broadcast %116 : vector<1x32xf32> to vector<64x32xf32>
    %118 = arith.addf %115, %117 : vector<64x32xf32>
    %119 = vector.shape_cast %118 : vector<64x32xf32> to vector<8x8x32xf32>
    %c0_72 = arith.constant 0 : index
    %c0_73 = arith.constant 0 : index
    %c0_74 = arith.constant 0 : index
    %c0_75 = arith.constant 0 : index
    %120 = vector.load %arg10[%c0_72, %c0_73, %c0_74, %c0_75] : memref<1x8x8x32xf32, #tpu.memory_space<vmem>>, vector<1x8x8x32xf32>
    %121 = vector.shape_cast %120 : vector<1x8x8x32xf32> to vector<8x8x32xf32>
    %122 = vector.shape_cast %119 : vector<8x8x32xf32> to vector<1x8x8x32xf32>
    tpu.vector_store %arg10[%c0_72, %c0_73, %c0_74, %c0_75], %122 {strides = array<i32>} : memref<1x8x8x32xf32, #tpu.memory_space<vmem>>, vector<1x8x8x32xf32>,
    return
  }
  func.func @transform_0(%arg0: i32) -> (i32, i32, i32, i32) {
    %c0_i32 = arith.constant 0 : i32
    %c0_i32_0 = arith.constant 0 : i32
    %c0_i32_1 = arith.constant 0 : i32
    %c0_i32_2 = arith.constant 0 : i32
    return %arg0, %c0_i32, %c0_i32_0, %c0_i32_1 : i32, i32, i32, i32
  }
  func.func @transform_1(%arg0: i32) -> (i32, i32) {
    %c0_i32 = arith.constant 0 : i32
    %c0_i32_0 = arith.constant 0 : i32
    %c0_i32_1 = arith.constant 0 : i32
    return %c0_i32, %c0_i32_0 : i32, i32
  }
  func.func @transform_2(%arg0: i32) -> (i32, i32) {
    %c0_i32 = arith.constant 0 : i32
    %c0_i32_0 = arith.constant 0 : i32
    %c0_i32_1 = arith.constant 0 : i32
    return %c0_i32, %c0_i32_0 : i32, i32
  }
  func.func @transform_3(%arg0: i32) -> (i32, i32) {
    %c0_i32 = arith.constant 0 : i32
    %c0_i32_0 = arith.constant 0 : i32
    %c0_i32_1 = arith.constant 0 : i32
    return %c0_i32, %c0_i32_0 : i32, i32
  }
  func.func @transform_4(%arg0: i32) -> (i32, i32) {
    %c0_i32 = arith.constant 0 : i32
    %c0_i32_0 = arith.constant 0 : i32
    %c0_i32_1 = arith.constant 0 : i32
    return %c0_i32, %c0_i32_0 : i32, i32
  }
  func.func @transform_5(%arg0: i32) -> (i32, i32) {
    %c0_i32 = arith.constant 0 : i32
    %c0_i32_0 = arith.constant 0 : i32
    %c0_i32_1 = arith.constant 0 : i32
    return %c0_i32, %c0_i32_0 : i32, i32
  }
  func.func @transform_6(%arg0: i32) -> (i32, i32) {
    %c0_i32 = arith.constant 0 : i32
    %c0_i32_0 = arith.constant 0 : i32
    %c0_i32_1 = arith.constant 0 : i32
    return %c0_i32, %c0_i32_0 : i32, i32
  }
  func.func @transform_7(%arg0: i32) -> (i32, i32) {
    %c0_i32 = arith.constant 0 : i32
    %c0_i32_0 = arith.constant 0 : i32
    %c0_i32_1 = arith.constant 0 : i32
    return %c0_i32, %c0_i32_0 : i32, i32
  }
  func.func @transform_8(%arg0: i32) -> (i32, i32) {
    %c0_i32 = arith.constant 0 : i32
    %c0_i32_0 = arith.constant 0 : i32
    %c0_i32_1 = arith.constant 0 : i32
    return %c0_i32, %c0_i32_0 : i32, i32
  }
  func.func @transform_9(%arg0: i32) -> (i32, i32, i32, i32) {
    %c0_i32 = arith.constant 0 : i32
    %c0_i32_0 = arith.constant 0 : i32
    %c0_i32_1 = arith.constant 0 : i32
    %c0_i32_2 = arith.constant 0 : i32
    return %arg0, %c0_i32, %c0_i32_0, %c0_i32_1 : i32, i32, i32, i32
  }
}

module attributes {stable_mosaic.version = 11 : i64} {
  func.func @kernel(%arg0: i32, %arg1: memref<128x32xf32, #tpu.memory_space<vmem>>, %arg2: memref<32x3xf32, #tpu.memory_space<vmem>>, %arg3: memref<1x3xf32, #tpu.memory_space<vmem>>, %arg4: memref<128x3xf32, #tpu.memory_space<vmem>>) attributes {dimension_semantics = [#tpu.dimension_semantics<parallel>], iteration_bounds = array<i64: 1>, scalar_prefetch = 0 : i64, scratch_operands = 0 : i64, tpu.core_type = #tpu.core_type<tc>, window_params = [{transform_indices = @transform_0, window_bounds = array<i64: 128, 32>}, {pipeline_mode = #tpu.pipeline_mode<synchronous>, transform_indices = @transform_1, window_bounds = array<i64: 32, 3>}, {pipeline_mode = #tpu.pipeline_mode<synchronous>, transform_indices = @transform_2, window_bounds = array<i64: 1, 3>}, {transform_indices = @transform_3, window_bounds = array<i64: 128, 3>}]} {
    %c0 = arith.constant 0 : index
    %c0_0 = arith.constant 0 : index
    %0 = vector.load %arg1[%c0, %c0_0] : memref<128x32xf32, #tpu.memory_space<vmem>>, vector<128x32xf32>
    %1 = arith.truncf %0 : vector<128x32xf32> to vector<128x32xbf16>
    %c0_1 = arith.constant 0 : index
    %c0_2 = arith.constant 0 : index
    %2 = vector.load %arg2[%c0_1, %c0_2] : memref<32x3xf32, #tpu.memory_space<vmem>>, vector<32x3xf32>
    %3 = arith.truncf %2 : vector<32x3xf32> to vector<32x3xbf16>
    %cst = arith.constant dense<0.000000e+00> : vector<128x3xf32>
    %4 = tpu.matmul %1, %3, %cst {dimension_numbers = #tpu.dot_dimension_numbers<[1], [0], [0], [1], [0, 0, 1, 1], [], []>} : vector<128x32xbf16>, vector<32x3xbf16>, vector<128x3xf32> -> vector<128x3xf32>
    %c0_3 = arith.constant 0 : index
    %c0_4 = arith.constant 0 : index
    %5 = vector.load %arg3[%c0_3, %c0_4] : memref<1x3xf32, #tpu.memory_space<vmem>>, vector<1x3xf32>
    %6 = vector.broadcast %5 : vector<1x3xf32> to vector<128x3xf32>
    %7 = arith.addf %4, %6 : vector<128x3xf32>
    %c0_5 = arith.constant 0 : index
    %c0_6 = arith.constant 0 : index
    %8 = vector.load %arg4[%c0_5, %c0_6] : memref<128x3xf32, #tpu.memory_space<vmem>>, vector<128x3xf32>
    tpu.vector_store %arg4[%c0_5, %c0_6], %7 {strides = array<i32>} : memref<128x3xf32, #tpu.memory_space<vmem>>, vector<128x3xf32>,
    return
  }
  func.func @transform_0(%arg0: i32) -> (i32, i32) {
    %c0_i32 = arith.constant 0 : i32
    %c0_i32_0 = arith.constant 0 : i32
    return %arg0, %c0_i32 : i32, i32
  }
  func.func @transform_1(%arg0: i32) -> (i32, i32) {
    %c0_i32 = arith.constant 0 : i32
    %c0_i32_0 = arith.constant 0 : i32
    %c0_i32_1 = arith.constant 0 : i32
    return %c0_i32, %c0_i32_0 : i32, i32
  }
  func.func @transform_2(%arg0: i32) -> (i32, i32) {
    %c0_i32 = arith.constant 0 : i32
    %c0_i32_0 = arith.constant 0 : i32
    %c0_i32_1 = arith.constant 0 : i32
    return %c0_i32, %c0_i32_0 : i32, i32
  }
  func.func @transform_3(%arg0: i32) -> (i32, i32) {
    %c0_i32 = arith.constant 0 : i32
    %c0_i32_0 = arith.constant 0 : i32
    return %arg0, %c0_i32 : i32, i32
  }
}

module attributes {stable_mosaic.version = 11 : i64} {
  func.func @kernel(%arg0: i32, %arg1: memref<128x3xf32, #tpu.memory_space<vmem>>, %arg2: memref<3x36xf32, #tpu.memory_space<vmem>>, %arg3: memref<1x36xf32, #tpu.memory_space<vmem>>, %arg4: memref<128x36xf32, #tpu.memory_space<vmem>>) attributes {dimension_semantics = [#tpu.dimension_semantics<parallel>], iteration_bounds = array<i64: 1>, scalar_prefetch = 0 : i64, scratch_operands = 0 : i64, tpu.core_type = #tpu.core_type<tc>, window_params = [{transform_indices = @transform_0, window_bounds = array<i64: 128, 3>}, {pipeline_mode = #tpu.pipeline_mode<synchronous>, transform_indices = @transform_1, window_bounds = array<i64: 3, 36>}, {pipeline_mode = #tpu.pipeline_mode<synchronous>, transform_indices = @transform_2, window_bounds = array<i64: 1, 36>}, {transform_indices = @transform_3, window_bounds = array<i64: 128, 36>}]} {
    %c0 = arith.constant 0 : index
    %c0_0 = arith.constant 0 : index
    %0 = vector.load %arg1[%c0, %c0_0] : memref<128x3xf32, #tpu.memory_space<vmem>>, vector<128x3xf32>
    %1 = arith.truncf %0 : vector<128x3xf32> to vector<128x3xbf16>
    %c0_1 = arith.constant 0 : index
    %c0_2 = arith.constant 0 : index
    %2 = vector.load %arg2[%c0_1, %c0_2] : memref<3x36xf32, #tpu.memory_space<vmem>>, vector<3x36xf32>
    %3 = arith.truncf %2 : vector<3x36xf32> to vector<3x36xbf16>
    %cst = arith.constant dense<0.000000e+00> : vector<128x36xf32>
    %4 = tpu.matmul %1, %3, %cst {dimension_numbers = #tpu.dot_dimension_numbers<[1], [0], [0], [1], [0, 0, 1, 1], [], []>} : vector<128x3xbf16>, vector<3x36xbf16>, vector<128x36xf32> -> vector<128x36xf32>
    %c0_3 = arith.constant 0 : index
    %c0_4 = arith.constant 0 : index
    %5 = vector.load %arg3[%c0_3, %c0_4] : memref<1x36xf32, #tpu.memory_space<vmem>>, vector<1x36xf32>
    %6 = vector.broadcast %5 : vector<1x36xf32> to vector<128x36xf32>
    %7 = arith.addf %4, %6 : vector<128x36xf32>
    %c0_5 = arith.constant 0 : index
    %c0_6 = arith.constant 0 : index
    %8 = vector.load %arg4[%c0_5, %c0_6] : memref<128x36xf32, #tpu.memory_space<vmem>>, vector<128x36xf32>
    tpu.vector_store %arg4[%c0_5, %c0_6], %7 {strides = array<i32>} : memref<128x36xf32, #tpu.memory_space<vmem>>, vector<128x36xf32>,
    return
  }
  func.func @transform_0(%arg0: i32) -> (i32, i32) {
    %c0_i32 = arith.constant 0 : i32
    %c0_i32_0 = arith.constant 0 : i32
    return %arg0, %c0_i32 : i32, i32
  }
  func.func @transform_1(%arg0: i32) -> (i32, i32) {
    %c0_i32 = arith.constant 0 : i32
    %c0_i32_0 = arith.constant 0 : i32
    %c0_i32_1 = arith.constant 0 : i32
    return %c0_i32, %c0_i32_0 : i32, i32
  }
  func.func @transform_2(%arg0: i32) -> (i32, i32) {
    %c0_i32 = arith.constant 0 : i32
    %c0_i32_0 = arith.constant 0 : i32
    %c0_i32_1 = arith.constant 0 : i32
    return %c0_i32, %c0_i32_0 : i32, i32
  }
  func.func @transform_3(%arg0: i32) -> (i32, i32) {
    %c0_i32 = arith.constant 0 : i32
    %c0_i32_0 = arith.constant 0 : i32
    return %arg0, %c0_i32 : i32, i32
  }
}

module attributes {stable_mosaic.version = 11 : i64} {
  func.func @kernel(%arg0: i32, %arg1: memref<2x3xf32, #tpu.memory_space<vmem>>, %arg2: memref<3x4xf32, #tpu.memory_space<vmem>>, %arg3: memref<1x4xf32, #tpu.memory_space<vmem>>, %arg4: memref<2x4xf32, #tpu.memory_space<vmem>>) attributes {dimension_semantics = [#tpu.dimension_semantics<parallel>], iteration_bounds = array<i64: 1>, scalar_prefetch = 0 : i64, scratch_operands = 0 : i64, tpu.core_type = #tpu.core_type<tc>, window_params = [{transform_indices = @transform_0, window_bounds = array<i64: 2, 3>}, {pipeline_mode = #tpu.pipeline_mode<synchronous>, transform_indices = @transform_1, window_bounds = array<i64: 3, 4>}, {pipeline_mode = #tpu.pipeline_mode<synchronous>, transform_indices = @transform_2, window_bounds = array<i64: 1, 4>}, {transform_indices = @transform_3, window_bounds = array<i64: 2, 4>}]} {
    %c0 = arith.constant 0 : index
    %c0_0 = arith.constant 0 : index
    %0 = vector.load %arg1[%c0, %c0_0] : memref<2x3xf32, #tpu.memory_space<vmem>>, vector<2x3xf32>
    %1 = arith.truncf %0 : vector<2x3xf32> to vector<2x3xbf16>
    %c0_1 = arith.constant 0 : index
    %c0_2 = arith.constant 0 : index
    %2 = vector.load %arg2[%c0_1, %c0_2] : memref<3x4xf32, #tpu.memory_space<vmem>>, vector<3x4xf32>
    %3 = arith.truncf %2 : vector<3x4xf32> to vector<3x4xbf16>
    %cst = arith.constant dense<0.000000e+00> : vector<2x4xf32>
    %4 = tpu.matmul %1, %3, %cst {dimension_numbers = #tpu.dot_dimension_numbers<[1], [0], [0], [1], [0, 0, 1, 1], [], []>} : vector<2x3xbf16>, vector<3x4xbf16>, vector<2x4xf32> -> vector<2x4xf32>
    %c0_3 = arith.constant 0 : index
    %c0_4 = arith.constant 0 : index
    %5 = vector.load %arg3[%c0_3, %c0_4] : memref<1x4xf32, #tpu.memory_space<vmem>>, vector<1x4xf32>
    %6 = vector.broadcast %5 : vector<1x4xf32> to vector<2x4xf32>
    %7 = arith.addf %4, %6 : vector<2x4xf32>
    %cst_5 = arith.constant 0.000000e+00 : f32
    %8 = vector.broadcast %cst_5 : f32 to vector<2x4xf32>
    %9 = arith.maximumf %7, %8 : vector<2x4xf32>
    %c0_6 = arith.constant 0 : index
    %c0_7 = arith.constant 0 : index
    %10 = vector.load %arg4[%c0_6, %c0_7] : memref<2x4xf32, #tpu.memory_space<vmem>>, vector<2x4xf32>
    tpu.vector_store %arg4[%c0_6, %c0_7], %9 {strides = array<i32>} : memref<2x4xf32, #tpu.memory_space<vmem>>, vector<2x4xf32>,
    return
  }
  func.func @transform_0(%arg0: i32) -> (i32, i32) {
    %c0_i32 = arith.constant 0 : i32
    %c0_i32_0 = arith.constant 0 : i32
    return %arg0, %c0_i32 : i32, i32
  }
  func.func @transform_1(%arg0: i32) -> (i32, i32) {
    %c0_i32 = arith.constant 0 : i32
    %c0_i32_0 = arith.constant 0 : i32
    %c0_i32_1 = arith.constant 0 : i32
    return %c0_i32, %c0_i32_0 : i32, i32
  }
  func.func @transform_2(%arg0: i32) -> (i32, i32) {
    %c0_i32 = arith.constant 0 : i32
    %c0_i32_0 = arith.constant 0 : i32
    %c0_i32_1 = arith.constant 0 : i32
    return %c0_i32, %c0_i32_0 : i32, i32
  }
  func.func @transform_3(%arg0: i32) -> (i32, i32) {
    %c0_i32 = arith.constant 0 : i32
    %c0_i32_0 = arith.constant 0 : i32
    return %arg0, %c0_i32 : i32, i32
  }
}

module attributes {stable_mosaic.version = 11 : i64} {
  func.func @kernel(%arg0: i32, %arg1: memref<2x4xf32, #tpu.memory_space<vmem>>, %arg2: memref<4x108xf32, #tpu.memory_space<vmem>>, %arg3: memref<1x108xf32, #tpu.memory_space<vmem>>, %arg4: memref<2x108xf32, #tpu.memory_space<vmem>>) attributes {dimension_semantics = [#tpu.dimension_semantics<parallel>], iteration_bounds = array<i64: 1>, scalar_prefetch = 0 : i64, scratch_operands = 0 : i64, tpu.core_type = #tpu.core_type<tc>, window_params = [{transform_indices = @transform_0, window_bounds = array<i64: 2, 4>}, {pipeline_mode = #tpu.pipeline_mode<synchronous>, transform_indices = @transform_1, window_bounds = array<i64: 4, 108>}, {pipeline_mode = #tpu.pipeline_mode<synchronous>, transform_indices = @transform_2, window_bounds = array<i64: 1, 108>}, {transform_indices = @transform_3, window_bounds = array<i64: 2, 108>}]} {
    %c0 = arith.constant 0 : index
    %c0_0 = arith.constant 0 : index
    %0 = vector.load %arg1[%c0, %c0_0] : memref<2x4xf32, #tpu.memory_space<vmem>>, vector<2x4xf32>
    %1 = arith.truncf %0 : vector<2x4xf32> to vector<2x4xbf16>
    %c0_1 = arith.constant 0 : index
    %c0_2 = arith.constant 0 : index
    %2 = vector.load %arg2[%c0_1, %c0_2] : memref<4x108xf32, #tpu.memory_space<vmem>>, vector<4x108xf32>
    %3 = arith.truncf %2 : vector<4x108xf32> to vector<4x108xbf16>
    %cst = arith.constant dense<0.000000e+00> : vector<2x108xf32>
    %4 = tpu.matmul %1, %3, %cst {dimension_numbers = #tpu.dot_dimension_numbers<[1], [0], [0], [1], [0, 0, 1, 1], [], []>} : vector<2x4xbf16>, vector<4x108xbf16>, vector<2x108xf32> -> vector<2x108xf32>
    %c0_3 = arith.constant 0 : index
    %c0_4 = arith.constant 0 : index
    %5 = vector.load %arg3[%c0_3, %c0_4] : memref<1x108xf32, #tpu.memory_space<vmem>>, vector<1x108xf32>
    %6 = vector.broadcast %5 : vector<1x108xf32> to vector<2x108xf32>
    %7 = arith.addf %4, %6 : vector<2x108xf32>
    %c0_5 = arith.constant 0 : index
    %c0_6 = arith.constant 0 : index
    %8 = vector.load %arg4[%c0_5, %c0_6] : memref<2x108xf32, #tpu.memory_space<vmem>>, vector<2x108xf32>
    tpu.vector_store %arg4[%c0_5, %c0_6], %7 {strides = array<i32>} : memref<2x108xf32, #tpu.memory_space<vmem>>, vector<2x108xf32>,
    return
  }
  func.func @transform_0(%arg0: i32) -> (i32, i32) {
    %c0_i32 = arith.constant 0 : i32
    %c0_i32_0 = arith.constant 0 : i32
    return %arg0, %c0_i32 : i32, i32
  }
  func.func @transform_1(%arg0: i32) -> (i32, i32) {
    %c0_i32 = arith.constant 0 : i32
    %c0_i32_0 = arith.constant 0 : i32
    %c0_i32_1 = arith.constant 0 : i32
    return %c0_i32, %c0_i32_0 : i32, i32
  }
  func.func @transform_2(%arg0: i32) -> (i32, i32) {
    %c0_i32 = arith.constant 0 : i32
    %c0_i32_0 = arith.constant 0 : i32
    %c0_i32_1 = arith.constant 0 : i32
    return %c0_i32, %c0_i32_0 : i32, i32
  }
  func.func @transform_3(%arg0: i32) -> (i32, i32) {
    %c0_i32 = arith.constant 0 : i32
    %c0_i32_0 = arith.constant 0 : i32
    return %arg0, %c0_i32 : i32, i32
  }
}

module attributes {stable_mosaic.version = 11 : i64} {
  func.func @kernel(%arg0: i32, %arg1: memref<1x3x10x10xf32, #tpu.memory_space<vmem>>, %arg2: memref<1x4x9x8x8xf32, #tpu.memory_space<vmem>>, %arg3: memref<1x4x3x9xf32, #tpu.memory_space<vmem>>, %arg4: memref<1x4x3x8x8xf32, #tpu.memory_space<vmem>>) attributes {dimension_semantics = [#tpu.dimension_semantics<parallel>], iteration_bounds = array<i64: 2>, scalar_prefetch = 0 : i64, scratch_operands = 0 : i64, tpu.core_type = #tpu.core_type<tc>, window_params = [{transform_indices = @transform_0, window_bounds = array<i64: 1, 3, 10, 10>}, {transform_indices = @transform_1, window_bounds = array<i64: 1, 4, 9, 8, 8>}, {transform_indices = @transform_2, window_bounds = array<i64: 1, 4, 3, 9>}, {transform_indices = @transform_3, window_bounds = array<i64: 1, 4, 3, 8, 8>}]} {
    %c0 = arith.constant 0 : index
    %c0_0 = arith.constant 0 : index
    %c0_1 = arith.constant 0 : index
    %c0_2 = arith.constant 0 : index
    %c0_3 = arith.constant 0 : index
    %0 = vector.load %arg2[%c0, %c0_0, %c0_1, %c0_2, %c0_3] : memref<1x4x9x8x8xf32, #tpu.memory_space<vmem>>, vector<1x1x9x8x8xf32>
    %1 = vector.shape_cast %0 : vector<1x1x9x8x8xf32> to vector<9x8x8xf32>
    %c0_4 = arith.constant 0 : index
    %c0_5 = arith.constant 0 : index
    %c0_6 = arith.constant 0 : index
    %c0_7 = arith.constant 0 : index
    %2 = vector.load %arg3[%c0_4, %c0_5, %c0_6, %c0_7] : memref<1x4x3x9xf32, #tpu.memory_space<vmem>>, vector<1x1x3x9xf32>
    %3 = vector.shape_cast %2 : vector<1x1x3x9xf32> to vector<3x9xf32>
    %cst = arith.constant 0.000000e+00 : f32
    %4 = vector.broadcast %cst : f32 to vector<3x8x8xf32>
    %5 = vector.extract_strided_slice %1 {offsets = [0, 0, 0], sizes = [1, 8, 8], strides = [1, 1, 1]} : vector<9x8x8xf32> to vector<1x8x8xf32>
    %6 = vector.shape_cast %5 : vector<1x8x8xf32> to vector<8x8xf32>
    %7 = vector.shape_cast %6 : vector<8x8xf32> to vector<1x8x8xf32>
    %8 = vector.extract_strided_slice %3 {offsets = [0, 0], sizes = [3, 1], strides = [1, 1]} : vector<3x9xf32> to vector<3x1xf32>
    %9 = vector.shape_cast %8 : vector<3x1xf32> to vector<3xf32>
    %10 = vector.shape_cast %9 : vector<3xf32> to vector<3x1x1xf32>
    %11 = vector.broadcast %7 : vector<1x8x8xf32> to vector<3x8x8xf32>
    %12 = vector.broadcast %10 : vector<3x1x1xf32> to vector<3x8x8xf32>
    %13 = arith.addf %11, %12 : vector<3x8x8xf32>
    %c0_8 = arith.constant 0 : index
    %c0_9 = arith.constant 0 : index
    %c0_10 = arith.constant 0 : index
    %c0_11 = arith.constant 0 : index
    %14 = vector.load %arg1[%c0_8, %c0_9, %c0_10, %c0_11] : memref<1x3x10x10xf32, #tpu.memory_space<vmem>>, vector<1x3x8x8xf32>
    %15 = vector.shape_cast %14 : vector<1x3x8x8xf32> to vector<3x8x8xf32>
    %16 = arith.mulf %15, %13 : vector<3x8x8xf32>
    %17 = arith.addf %4, %16 : vector<3x8x8xf32>
    %18 = vector.extract_strided_slice %1 {offsets = [1, 0, 0], sizes = [1, 8, 8], strides = [1, 1, 1]} : vector<9x8x8xf32> to vector<1x8x8xf32>
    %19 = vector.shape_cast %18 : vector<1x8x8xf32> to vector<8x8xf32>
    %20 = vector.shape_cast %19 : vector<8x8xf32> to vector<1x8x8xf32>
    %21 = vector.extract_strided_slice %3 {offsets = [0, 1], sizes = [3, 1], strides = [1, 1]} : vector<3x9xf32> to vector<3x1xf32>
    %22 = vector.shape_cast %21 : vector<3x1xf32> to vector<3xf32>
    %23 = vector.shape_cast %22 : vector<3xf32> to vector<3x1x1xf32>
    %24 = vector.broadcast %20 : vector<1x8x8xf32> to vector<3x8x8xf32>
    %25 = vector.broadcast %23 : vector<3x1x1xf32> to vector<3x8x8xf32>
    %26 = arith.addf %24, %25 : vector<3x8x8xf32>
    %c0_12 = arith.constant 0 : index
    %c0_13 = arith.constant 0 : index
    %c0_14 = arith.constant 0 : index
    %c1 = arith.constant 1 : index
    %27 = vector.load %arg1[%c0_12, %c0_13, %c0_14, %c1] : memref<1x3x10x10xf32, #tpu.memory_space<vmem>>, vector<1x3x8x8xf32>
    %28 = vector.shape_cast %27 : vector<1x3x8x8xf32> to vector<3x8x8xf32>
    %29 = arith.mulf %28, %26 : vector<3x8x8xf32>
    %30 = arith.addf %17, %29 : vector<3x8x8xf32>
    %31 = vector.extract_strided_slice %1 {offsets = [2, 0, 0], sizes = [1, 8, 8], strides = [1, 1, 1]} : vector<9x8x8xf32> to vector<1x8x8xf32>
    %32 = vector.shape_cast %31 : vector<1x8x8xf32> to vector<8x8xf32>
    %33 = vector.shape_cast %32 : vector<8x8xf32> to vector<1x8x8xf32>
    %34 = vector.extract_strided_slice %3 {offsets = [0, 2], sizes = [3, 1], strides = [1, 1]} : vector<3x9xf32> to vector<3x1xf32>
    %35 = vector.shape_cast %34 : vector<3x1xf32> to vector<3xf32>
    %36 = vector.shape_cast %35 : vector<3xf32> to vector<3x1x1xf32>
    %37 = vector.broadcast %33 : vector<1x8x8xf32> to vector<3x8x8xf32>
    %38 = vector.broadcast %36 : vector<3x1x1xf32> to vector<3x8x8xf32>
    %39 = arith.addf %37, %38 : vector<3x8x8xf32>
    %c0_15 = arith.constant 0 : index
    %c0_16 = arith.constant 0 : index
    %c0_17 = arith.constant 0 : index
    %c2 = arith.constant 2 : index
    %40 = vector.load %arg1[%c0_15, %c0_16, %c0_17, %c2] : memref<1x3x10x10xf32, #tpu.memory_space<vmem>>, vector<1x3x8x8xf32>
    %41 = vector.shape_cast %40 : vector<1x3x8x8xf32> to vector<3x8x8xf32>
    %42 = arith.mulf %41, %39 : vector<3x8x8xf32>
    %43 = arith.addf %30, %42 : vector<3x8x8xf32>
    %44 = vector.extract_strided_slice %1 {offsets = [3, 0, 0], sizes = [1, 8, 8], strides = [1, 1, 1]} : vector<9x8x8xf32> to vector<1x8x8xf32>
    %45 = vector.shape_cast %44 : vector<1x8x8xf32> to vector<8x8xf32>
    %46 = vector.shape_cast %45 : vector<8x8xf32> to vector<1x8x8xf32>
    %47 = vector.extract_strided_slice %3 {offsets = [0, 3], sizes = [3, 1], strides = [1, 1]} : vector<3x9xf32> to vector<3x1xf32>
    %48 = vector.shape_cast %47 : vector<3x1xf32> to vector<3xf32>
    %49 = vector.shape_cast %48 : vector<3xf32> to vector<3x1x1xf32>
    %50 = vector.broadcast %46 : vector<1x8x8xf32> to vector<3x8x8xf32>
    %51 = vector.broadcast %49 : vector<3x1x1xf32> to vector<3x8x8xf32>
    %52 = arith.addf %50, %51 : vector<3x8x8xf32>
    %c0_18 = arith.constant 0 : index
    %c0_19 = arith.constant 0 : index
    %c1_20 = arith.constant 1 : index
    %c0_21 = arith.constant 0 : index
    %53 = vector.load %arg1[%c0_18, %c0_19, %c1_20, %c0_21] : memref<1x3x10x10xf32, #tpu.memory_space<vmem>>, vector<1x3x8x8xf32>
    %54 = vector.shape_cast %53 : vector<1x3x8x8xf32> to vector<3x8x8xf32>
    %55 = arith.mulf %54, %52 : vector<3x8x8xf32>
    %56 = arith.addf %43, %55 : vector<3x8x8xf32>
    %57 = vector.extract_strided_slice %1 {offsets = [4, 0, 0], sizes = [1, 8, 8], strides = [1, 1, 1]} : vector<9x8x8xf32> to vector<1x8x8xf32>
    %58 = vector.shape_cast %57 : vector<1x8x8xf32> to vector<8x8xf32>
    %59 = vector.shape_cast %58 : vector<8x8xf32> to vector<1x8x8xf32>
    %60 = vector.extract_strided_slice %3 {offsets = [0, 4], sizes = [3, 1], strides = [1, 1]} : vector<3x9xf32> to vector<3x1xf32>
    %61 = vector.shape_cast %60 : vector<3x1xf32> to vector<3xf32>
    %62 = vector.shape_cast %61 : vector<3xf32> to vector<3x1x1xf32>
    %63 = vector.broadcast %59 : vector<1x8x8xf32> to vector<3x8x8xf32>
    %64 = vector.broadcast %62 : vector<3x1x1xf32> to vector<3x8x8xf32>
    %65 = arith.addf %63, %64 : vector<3x8x8xf32>
    %c0_22 = arith.constant 0 : index
    %c0_23 = arith.constant 0 : index
    %c1_24 = arith.constant 1 : index
    %c1_25 = arith.constant 1 : index
    %66 = vector.load %arg1[%c0_22, %c0_23, %c1_24, %c1_25] : memref<1x3x10x10xf32, #tpu.memory_space<vmem>>, vector<1x3x8x8xf32>
    %67 = vector.shape_cast %66 : vector<1x3x8x8xf32> to vector<3x8x8xf32>
    %68 = arith.mulf %67, %65 : vector<3x8x8xf32>
    %69 = arith.addf %56, %68 : vector<3x8x8xf32>
    %70 = vector.extract_strided_slice %1 {offsets = [5, 0, 0], sizes = [1, 8, 8], strides = [1, 1, 1]} : vector<9x8x8xf32> to vector<1x8x8xf32>
    %71 = vector.shape_cast %70 : vector<1x8x8xf32> to vector<8x8xf32>
    %72 = vector.shape_cast %71 : vector<8x8xf32> to vector<1x8x8xf32>
    %73 = vector.extract_strided_slice %3 {offsets = [0, 5], sizes = [3, 1], strides = [1, 1]} : vector<3x9xf32> to vector<3x1xf32>
    %74 = vector.shape_cast %73 : vector<3x1xf32> to vector<3xf32>
    %75 = vector.shape_cast %74 : vector<3xf32> to vector<3x1x1xf32>
    %76 = vector.broadcast %72 : vector<1x8x8xf32> to vector<3x8x8xf32>
    %77 = vector.broadcast %75 : vector<3x1x1xf32> to vector<3x8x8xf32>
    %78 = arith.addf %76, %77 : vector<3x8x8xf32>
    %c0_26 = arith.constant 0 : index
    %c0_27 = arith.constant 0 : index
    %c1_28 = arith.constant 1 : index
    %c2_29 = arith.constant 2 : index
    %79 = vector.load %arg1[%c0_26, %c0_27, %c1_28, %c2_29] : memref<1x3x10x10xf32, #tpu.memory_space<vmem>>, vector<1x3x8x8xf32>
    %80 = vector.shape_cast %79 : vector<1x3x8x8xf32> to vector<3x8x8xf32>
    %81 = arith.mulf %80, %78 : vector<3x8x8xf32>
    %82 = arith.addf %69, %81 : vector<3x8x8xf32>
    %83 = vector.extract_strided_slice %1 {offsets = [6, 0, 0], sizes = [1, 8, 8], strides = [1, 1, 1]} : vector<9x8x8xf32> to vector<1x8x8xf32>
    %84 = vector.shape_cast %83 : vector<1x8x8xf32> to vector<8x8xf32>
    %85 = vector.shape_cast %84 : vector<8x8xf32> to vector<1x8x8xf32>
    %86 = vector.extract_strided_slice %3 {offsets = [0, 6], sizes = [3, 1], strides = [1, 1]} : vector<3x9xf32> to vector<3x1xf32>
    %87 = vector.shape_cast %86 : vector<3x1xf32> to vector<3xf32>
    %88 = vector.shape_cast %87 : vector<3xf32> to vector<3x1x1xf32>
    %89 = vector.broadcast %85 : vector<1x8x8xf32> to vector<3x8x8xf32>
    %90 = vector.broadcast %88 : vector<3x1x1xf32> to vector<3x8x8xf32>
    %91 = arith.addf %89, %90 : vector<3x8x8xf32>
    %c0_30 = arith.constant 0 : index
    %c0_31 = arith.constant 0 : index
    %c2_32 = arith.constant 2 : index
    %c0_33 = arith.constant 0 : index
    %92 = vector.load %arg1[%c0_30, %c0_31, %c2_32, %c0_33] : memref<1x3x10x10xf32, #tpu.memory_space<vmem>>, vector<1x3x8x8xf32>
    %93 = vector.shape_cast %92 : vector<1x3x8x8xf32> to vector<3x8x8xf32>
    %94 = arith.mulf %93, %91 : vector<3x8x8xf32>
    %95 = arith.addf %82, %94 : vector<3x8x8xf32>
    %96 = vector.extract_strided_slice %1 {offsets = [7, 0, 0], sizes = [1, 8, 8], strides = [1, 1, 1]} : vector<9x8x8xf32> to vector<1x8x8xf32>
    %97 = vector.shape_cast %96 : vector<1x8x8xf32> to vector<8x8xf32>
    %98 = vector.shape_cast %97 : vector<8x8xf32> to vector<1x8x8xf32>
    %99 = vector.extract_strided_slice %3 {offsets = [0, 7], sizes = [3, 1], strides = [1, 1]} : vector<3x9xf32> to vector<3x1xf32>
    %100 = vector.shape_cast %99 : vector<3x1xf32> to vector<3xf32>
    %101 = vector.shape_cast %100 : vector<3xf32> to vector<3x1x1xf32>
    %102 = vector.broadcast %98 : vector<1x8x8xf32> to vector<3x8x8xf32>
    %103 = vector.broadcast %101 : vector<3x1x1xf32> to vector<3x8x8xf32>
    %104 = arith.addf %102, %103 : vector<3x8x8xf32>
    %c0_34 = arith.constant 0 : index
    %c0_35 = arith.constant 0 : index
    %c2_36 = arith.constant 2 : index
    %c1_37 = arith.constant 1 : index
    %105 = vector.load %arg1[%c0_34, %c0_35, %c2_36, %c1_37] : memref<1x3x10x10xf32, #tpu.memory_space<vmem>>, vector<1x3x8x8xf32>
    %106 = vector.shape_cast %105 : vector<1x3x8x8xf32> to vector<3x8x8xf32>
    %107 = arith.mulf %106, %104 : vector<3x8x8xf32>
    %108 = arith.addf %95, %107 : vector<3x8x8xf32>
    %109 = vector.extract_strided_slice %1 {offsets = [8, 0, 0], sizes = [1, 8, 8], strides = [1, 1, 1]} : vector<9x8x8xf32> to vector<1x8x8xf32>
    %110 = vector.shape_cast %109 : vector<1x8x8xf32> to vector<8x8xf32>
    %111 = vector.shape_cast %110 : vector<8x8xf32> to vector<1x8x8xf32>
    %112 = vector.extract_strided_slice %3 {offsets = [0, 8], sizes = [3, 1], strides = [1, 1]} : vector<3x9xf32> to vector<3x1xf32>
    %113 = vector.shape_cast %112 : vector<3x1xf32> to vector<3xf32>
    %114 = vector.shape_cast %113 : vector<3xf32> to vector<3x1x1xf32>
    %115 = vector.broadcast %111 : vector<1x8x8xf32> to vector<3x8x8xf32>
    %116 = vector.broadcast %114 : vector<3x1x1xf32> to vector<3x8x8xf32>
    %117 = arith.addf %115, %116 : vector<3x8x8xf32>
    %c0_38 = arith.constant 0 : index
    %c0_39 = arith.constant 0 : index
    %c2_40 = arith.constant 2 : index
    %c2_41 = arith.constant 2 : index
    %118 = vector.load %arg1[%c0_38, %c0_39, %c2_40, %c2_41] : memref<1x3x10x10xf32, #tpu.memory_space<vmem>>, vector<1x3x8x8xf32>
    %119 = vector.shape_cast %118 : vector<1x3x8x8xf32> to vector<3x8x8xf32>
    %120 = arith.mulf %119, %117 : vector<3x8x8xf32>
    %121 = arith.addf %108, %120 : vector<3x8x8xf32>
    %cst_42 = arith.constant 0.000000e+00 : f32
    %cst_43 = arith.constant 2.550000e+02 : f32
    %122 = vector.broadcast %cst_42 : f32 to vector<3x8x8xf32>
    %123 = arith.maximumf %122, %121 : vector<3x8x8xf32>
    %124 = vector.broadcast %cst_43 : f32 to vector<3x8x8xf32>
    %125 = arith.minimumf %124, %123 : vector<3x8x8xf32>
    %c0_44 = arith.constant 0 : index
    %c0_45 = arith.constant 0 : index
    %c0_46 = arith.constant 0 : index
    %c0_47 = arith.constant 0 : index
    %c0_48 = arith.constant 0 : index
    %126 = vector.load %arg4[%c0_44, %c0_45, %c0_46, %c0_47, %c0_48] : memref<1x4x3x8x8xf32, #tpu.memory_space<vmem>>, vector<1x1x3x8x8xf32>
    %127 = vector.shape_cast %126 : vector<1x1x3x8x8xf32> to vector<3x8x8xf32>
    %128 = vector.shape_cast %125 : vector<3x8x8xf32> to vector<1x1x3x8x8xf32>
    tpu.vector_store %arg4[%c0_44, %c0_45, %c0_46, %c0_47, %c0_48], %128 {strides = array<i32>} : memref<1x4x3x8x8xf32, #tpu.memory_space<vmem>>, vector<1x1x3x8x8xf32>,
    %c0_49 = arith.constant 0 : index
    %c1_50 = arith.constant 1 : index
    %c0_51 = arith.constant 0 : index
    %c0_52 = arith.constant 0 : index
    %c0_53 = arith.constant 0 : index
    %129 = vector.load %arg2[%c0_49, %c1_50, %c0_51, %c0_52, %c0_53] : memref<1x4x9x8x8xf32, #tpu.memory_space<vmem>>, vector<1x1x9x8x8xf32>
    %130 = vector.shape_cast %129 : vector<1x1x9x8x8xf32> to vector<9x8x8xf32>
    %c0_54 = arith.constant 0 : index
    %c1_55 = arith.constant 1 : index
    %c0_56 = arith.constant 0 : index
    %c0_57 = arith.constant 0 : index
    %131 = vector.load %arg3[%c0_54, %c1_55, %c0_56, %c0_57] : memref<1x4x3x9xf32, #tpu.memory_space<vmem>>, vector<1x1x3x9xf32>
    %132 = vector.shape_cast %131 : vector<1x1x3x9xf32> to vector<3x9xf32>
    %cst_58 = arith.constant 0.000000e+00 : f32
    %133 = vector.broadcast %cst_58 : f32 to vector<3x8x8xf32>
    %134 = vector.extract_strided_slice %130 {offsets = [0, 0, 0], sizes = [1, 8, 8], strides = [1, 1, 1]} : vector<9x8x8xf32> to vector<1x8x8xf32>
    %135 = vector.shape_cast %134 : vector<1x8x8xf32> to vector<8x8xf32>
    %136 = vector.shape_cast %135 : vector<8x8xf32> to vector<1x8x8xf32>
    %137 = vector.extract_strided_slice %132 {offsets = [0, 0], sizes = [3, 1], strides = [1, 1]} : vector<3x9xf32> to vector<3x1xf32>
    %138 = vector.shape_cast %137 : vector<3x1xf32> to vector<3xf32>
    %139 = vector.shape_cast %138 : vector<3xf32> to vector<3x1x1xf32>
    %140 = vector.broadcast %136 : vector<1x8x8xf32> to vector<3x8x8xf32>
    %141 = vector.broadcast %139 : vector<3x1x1xf32> to vector<3x8x8xf32>
    %142 = arith.addf %140, %141 : vector<3x8x8xf32>
    %c0_59 = arith.constant 0 : index
    %c0_60 = arith.constant 0 : index
    %c0_61 = arith.constant 0 : index
    %c0_62 = arith.constant 0 : index
    %143 = vector.load %arg1[%c0_59, %c0_60, %c0_61, %c0_62] : memref<1x3x10x10xf32, #tpu.memory_space<vmem>>, vector<1x3x8x8xf32>
    %144 = vector.shape_cast %143 : vector<1x3x8x8xf32> to vector<3x8x8xf32>
    %145 = arith.mulf %144, %142 : vector<3x8x8xf32>
    %146 = arith.addf %133, %145 : vector<3x8x8xf32>
    %147 = vector.extract_strided_slice %130 {offsets = [1, 0, 0], sizes = [1, 8, 8], strides = [1, 1, 1]} : vector<9x8x8xf32> to vector<1x8x8xf32>
    %148 = vector.shape_cast %147 : vector<1x8x8xf32> to vector<8x8xf32>
    %149 = vector.shape_cast %148 : vector<8x8xf32> to vector<1x8x8xf32>
    %150 = vector.extract_strided_slice %132 {offsets = [0, 1], sizes = [3, 1], strides = [1, 1]} : vector<3x9xf32> to vector<3x1xf32>
    %151 = vector.shape_cast %150 : vector<3x1xf32> to vector<3xf32>
    %152 = vector.shape_cast %151 : vector<3xf32> to vector<3x1x1xf32>
    %153 = vector.broadcast %149 : vector<1x8x8xf32> to vector<3x8x8xf32>
    %154 = vector.broadcast %152 : vector<3x1x1xf32> to vector<3x8x8xf32>
    %155 = arith.addf %153, %154 : vector<3x8x8xf32>
    %c0_63 = arith.constant 0 : index
    %c0_64 = arith.constant 0 : index
    %c0_65 = arith.constant 0 : index
    %c1_66 = arith.constant 1 : index
    %156 = vector.load %arg1[%c0_63, %c0_64, %c0_65, %c1_66] : memref<1x3x10x10xf32, #tpu.memory_space<vmem>>, vector<1x3x8x8xf32>
    %157 = vector.shape_cast %156 : vector<1x3x8x8xf32> to vector<3x8x8xf32>
    %158 = arith.mulf %157, %155 : vector<3x8x8xf32>
    %159 = arith.addf %146, %158 : vector<3x8x8xf32>
    %160 = vector.extract_strided_slice %130 {offsets = [2, 0, 0], sizes = [1, 8, 8], strides = [1, 1, 1]} : vector<9x8x8xf32> to vector<1x8x8xf32>
    %161 = vector.shape_cast %160 : vector<1x8x8xf32> to vector<8x8xf32>
    %162 = vector.shape_cast %161 : vector<8x8xf32> to vector<1x8x8xf32>
    %163 = vector.extract_strided_slice %132 {offsets = [0, 2], sizes = [3, 1], strides = [1, 1]} : vector<3x9xf32> to vector<3x1xf32>
    %164 = vector.shape_cast %163 : vector<3x1xf32> to vector<3xf32>
    %165 = vector.shape_cast %164 : vector<3xf32> to vector<3x1x1xf32>
    %166 = vector.broadcast %162 : vector<1x8x8xf32> to vector<3x8x8xf32>
    %167 = vector.broadcast %165 : vector<3x1x1xf32> to vector<3x8x8xf32>
    %168 = arith.addf %166, %167 : vector<3x8x8xf32>
    %c0_67 = arith.constant 0 : index
    %c0_68 = arith.constant 0 : index
    %c0_69 = arith.constant 0 : index
    %c2_70 = arith.constant 2 : index
    %169 = vector.load %arg1[%c0_67, %c0_68, %c0_69, %c2_70] : memref<1x3x10x10xf32, #tpu.memory_space<vmem>>, vector<1x3x8x8xf32>
    %170 = vector.shape_cast %169 : vector<1x3x8x8xf32> to vector<3x8x8xf32>
    %171 = arith.mulf %170, %168 : vector<3x8x8xf32>
    %172 = arith.addf %159, %171 : vector<3x8x8xf32>
    %173 = vector.extract_strided_slice %130 {offsets = [3, 0, 0], sizes = [1, 8, 8], strides = [1, 1, 1]} : vector<9x8x8xf32> to vector<1x8x8xf32>
    %174 = vector.shape_cast %173 : vector<1x8x8xf32> to vector<8x8xf32>
    %175 = vector.shape_cast %174 : vector<8x8xf32> to vector<1x8x8xf32>
    %176 = vector.extract_strided_slice %132 {offsets = [0, 3], sizes = [3, 1], strides = [1, 1]} : vector<3x9xf32> to vector<3x1xf32>
    %177 = vector.shape_cast %176 : vector<3x1xf32> to vector<3xf32>
    %178 = vector.shape_cast %177 : vector<3xf32> to vector<3x1x1xf32>
    %179 = vector.broadcast %175 : vector<1x8x8xf32> to vector<3x8x8xf32>
    %180 = vector.broadcast %178 : vector<3x1x1xf32> to vector<3x8x8xf32>
    %181 = arith.addf %179, %180 : vector<3x8x8xf32>
    %c0_71 = arith.constant 0 : index
    %c0_72 = arith.constant 0 : index
    %c1_73 = arith.constant 1 : index
    %c0_74 = arith.constant 0 : index
    %182 = vector.load %arg1[%c0_71, %c0_72, %c1_73, %c0_74] : memref<1x3x10x10xf32, #tpu.memory_space<vmem>>, vector<1x3x8x8xf32>
    %183 = vector.shape_cast %182 : vector<1x3x8x8xf32> to vector<3x8x8xf32>
    %184 = arith.mulf %183, %181 : vector<3x8x8xf32>
    %185 = arith.addf %172, %184 : vector<3x8x8xf32>
    %186 = vector.extract_strided_slice %130 {offsets = [4, 0, 0], sizes = [1, 8, 8], strides = [1, 1, 1]} : vector<9x8x8xf32> to vector<1x8x8xf32>
    %187 = vector.shape_cast %186 : vector<1x8x8xf32> to vector<8x8xf32>
    %188 = vector.shape_cast %187 : vector<8x8xf32> to vector<1x8x8xf32>
    %189 = vector.extract_strided_slice %132 {offsets = [0, 4], sizes = [3, 1], strides = [1, 1]} : vector<3x9xf32> to vector<3x1xf32>
    %190 = vector.shape_cast %189 : vector<3x1xf32> to vector<3xf32>
    %191 = vector.shape_cast %190 : vector<3xf32> to vector<3x1x1xf32>
    %192 = vector.broadcast %188 : vector<1x8x8xf32> to vector<3x8x8xf32>
    %193 = vector.broadcast %191 : vector<3x1x1xf32> to vector<3x8x8xf32>
    %194 = arith.addf %192, %193 : vector<3x8x8xf32>
    %c0_75 = arith.constant 0 : index
    %c0_76 = arith.constant 0 : index
    %c1_77 = arith.constant 1 : index
    %c1_78 = arith.constant 1 : index
    %195 = vector.load %arg1[%c0_75, %c0_76, %c1_77, %c1_78] : memref<1x3x10x10xf32, #tpu.memory_space<vmem>>, vector<1x3x8x8xf32>
    %196 = vector.shape_cast %195 : vector<1x3x8x8xf32> to vector<3x8x8xf32>
    %197 = arith.mulf %196, %194 : vector<3x8x8xf32>
    %198 = arith.addf %185, %197 : vector<3x8x8xf32>
    %199 = vector.extract_strided_slice %130 {offsets = [5, 0, 0], sizes = [1, 8, 8], strides = [1, 1, 1]} : vector<9x8x8xf32> to vector<1x8x8xf32>
    %200 = vector.shape_cast %199 : vector<1x8x8xf32> to vector<8x8xf32>
    %201 = vector.shape_cast %200 : vector<8x8xf32> to vector<1x8x8xf32>
    %202 = vector.extract_strided_slice %132 {offsets = [0, 5], sizes = [3, 1], strides = [1, 1]} : vector<3x9xf32> to vector<3x1xf32>
    %203 = vector.shape_cast %202 : vector<3x1xf32> to vector<3xf32>
    %204 = vector.shape_cast %203 : vector<3xf32> to vector<3x1x1xf32>
    %205 = vector.broadcast %201 : vector<1x8x8xf32> to vector<3x8x8xf32>
    %206 = vector.broadcast %204 : vector<3x1x1xf32> to vector<3x8x8xf32>
    %207 = arith.addf %205, %206 : vector<3x8x8xf32>
    %c0_79 = arith.constant 0 : index
    %c0_80 = arith.constant 0 : index
    %c1_81 = arith.constant 1 : index
    %c2_82 = arith.constant 2 : index
    %208 = vector.load %arg1[%c0_79, %c0_80, %c1_81, %c2_82] : memref<1x3x10x10xf32, #tpu.memory_space<vmem>>, vector<1x3x8x8xf32>
    %209 = vector.shape_cast %208 : vector<1x3x8x8xf32> to vector<3x8x8xf32>
    %210 = arith.mulf %209, %207 : vector<3x8x8xf32>
    %211 = arith.addf %198, %210 : vector<3x8x8xf32>
    %212 = vector.extract_strided_slice %130 {offsets = [6, 0, 0], sizes = [1, 8, 8], strides = [1, 1, 1]} : vector<9x8x8xf32> to vector<1x8x8xf32>
    %213 = vector.shape_cast %212 : vector<1x8x8xf32> to vector<8x8xf32>
    %214 = vector.shape_cast %213 : vector<8x8xf32> to vector<1x8x8xf32>
    %215 = vector.extract_strided_slice %132 {offsets = [0, 6], sizes = [3, 1], strides = [1, 1]} : vector<3x9xf32> to vector<3x1xf32>
    %216 = vector.shape_cast %215 : vector<3x1xf32> to vector<3xf32>
    %217 = vector.shape_cast %216 : vector<3xf32> to vector<3x1x1xf32>
    %218 = vector.broadcast %214 : vector<1x8x8xf32> to vector<3x8x8xf32>
    %219 = vector.broadcast %217 : vector<3x1x1xf32> to vector<3x8x8xf32>
    %220 = arith.addf %218, %219 : vector<3x8x8xf32>
    %c0_83 = arith.constant 0 : index
    %c0_84 = arith.constant 0 : index
    %c2_85 = arith.constant 2 : index
    %c0_86 = arith.constant 0 : index
    %221 = vector.load %arg1[%c0_83, %c0_84, %c2_85, %c0_86] : memref<1x3x10x10xf32, #tpu.memory_space<vmem>>, vector<1x3x8x8xf32>
    %222 = vector.shape_cast %221 : vector<1x3x8x8xf32> to vector<3x8x8xf32>
    %223 = arith.mulf %222, %220 : vector<3x8x8xf32>
    %224 = arith.addf %211, %223 : vector<3x8x8xf32>
    %225 = vector.extract_strided_slice %130 {offsets = [7, 0, 0], sizes = [1, 8, 8], strides = [1, 1, 1]} : vector<9x8x8xf32> to vector<1x8x8xf32>
    %226 = vector.shape_cast %225 : vector<1x8x8xf32> to vector<8x8xf32>
    %227 = vector.shape_cast %226 : vector<8x8xf32> to vector<1x8x8xf32>
    %228 = vector.extract_strided_slice %132 {offsets = [0, 7], sizes = [3, 1], strides = [1, 1]} : vector<3x9xf32> to vector<3x1xf32>
    %229 = vector.shape_cast %228 : vector<3x1xf32> to vector<3xf32>
    %230 = vector.shape_cast %229 : vector<3xf32> to vector<3x1x1xf32>
    %231 = vector.broadcast %227 : vector<1x8x8xf32> to vector<3x8x8xf32>
    %232 = vector.broadcast %230 : vector<3x1x1xf32> to vector<3x8x8xf32>
    %233 = arith.addf %231, %232 : vector<3x8x8xf32>
    %c0_87 = arith.constant 0 : index
    %c0_88 = arith.constant 0 : index
    %c2_89 = arith.constant 2 : index
    %c1_90 = arith.constant 1 : index
    %234 = vector.load %arg1[%c0_87, %c0_88, %c2_89, %c1_90] : memref<1x3x10x10xf32, #tpu.memory_space<vmem>>, vector<1x3x8x8xf32>
    %235 = vector.shape_cast %234 : vector<1x3x8x8xf32> to vector<3x8x8xf32>
    %236 = arith.mulf %235, %233 : vector<3x8x8xf32>
    %237 = arith.addf %224, %236 : vector<3x8x8xf32>
    %238 = vector.extract_strided_slice %130 {offsets = [8, 0, 0], sizes = [1, 8, 8], strides = [1, 1, 1]} : vector<9x8x8xf32> to vector<1x8x8xf32>
    %239 = vector.shape_cast %238 : vector<1x8x8xf32> to vector<8x8xf32>
    %240 = vector.shape_cast %239 : vector<8x8xf32> to vector<1x8x8xf32>
    %241 = vector.extract_strided_slice %132 {offsets = [0, 8], sizes = [3, 1], strides = [1, 1]} : vector<3x9xf32> to vector<3x1xf32>
    %242 = vector.shape_cast %241 : vector<3x1xf32> to vector<3xf32>
    %243 = vector.shape_cast %242 : vector<3xf32> to vector<3x1x1xf32>
    %244 = vector.broadcast %240 : vector<1x8x8xf32> to vector<3x8x8xf32>
    %245 = vector.broadcast %243 : vector<3x1x1xf32> to vector<3x8x8xf32>
    %246 = arith.addf %244, %245 : vector<3x8x8xf32>
    %c0_91 = arith.constant 0 : index
    %c0_92 = arith.constant 0 : index
    %c2_93 = arith.constant 2 : index
    %c2_94 = arith.constant 2 : index
    %247 = vector.load %arg1[%c0_91, %c0_92, %c2_93, %c2_94] : memref<1x3x10x10xf32, #tpu.memory_space<vmem>>, vector<1x3x8x8xf32>
    %248 = vector.shape_cast %247 : vector<1x3x8x8xf32> to vector<3x8x8xf32>
    %249 = arith.mulf %248, %246 : vector<3x8x8xf32>
    %250 = arith.addf %237, %249 : vector<3x8x8xf32>
    %cst_95 = arith.constant 0.000000e+00 : f32
    %cst_96 = arith.constant 2.550000e+02 : f32
    %251 = vector.broadcast %cst_95 : f32 to vector<3x8x8xf32>
    %252 = arith.maximumf %251, %250 : vector<3x8x8xf32>
    %253 = vector.broadcast %cst_96 : f32 to vector<3x8x8xf32>
    %254 = arith.minimumf %253, %252 : vector<3x8x8xf32>
    %c0_97 = arith.constant 0 : index
    %c1_98 = arith.constant 1 : index
    %c0_99 = arith.constant 0 : index
    %c0_100 = arith.constant 0 : index
    %c0_101 = arith.constant 0 : index
    %255 = vector.load %arg4[%c0_97, %c1_98, %c0_99, %c0_100, %c0_101] : memref<1x4x3x8x8xf32, #tpu.memory_space<vmem>>, vector<1x1x3x8x8xf32>
    %256 = vector.shape_cast %255 : vector<1x1x3x8x8xf32> to vector<3x8x8xf32>
    %257 = vector.shape_cast %254 : vector<3x8x8xf32> to vector<1x1x3x8x8xf32>
    tpu.vector_store %arg4[%c0_97, %c1_98, %c0_99, %c0_100, %c0_101], %257 {strides = array<i32>} : memref<1x4x3x8x8xf32, #tpu.memory_space<vmem>>, vector<1x1x3x8x8xf32>,
    %c0_102 = arith.constant 0 : index
    %c2_103 = arith.constant 2 : index
    %c0_104 = arith.constant 0 : index
    %c0_105 = arith.constant 0 : index
    %c0_106 = arith.constant 0 : index
    %258 = vector.load %arg2[%c0_102, %c2_103, %c0_104, %c0_105, %c0_106] : memref<1x4x9x8x8xf32, #tpu.memory_space<vmem>>, vector<1x1x9x8x8xf32>
    %259 = vector.shape_cast %258 : vector<1x1x9x8x8xf32> to vector<9x8x8xf32>
    %c0_107 = arith.constant 0 : index
    %c2_108 = arith.constant 2 : index
    %c0_109 = arith.constant 0 : index
    %c0_110 = arith.constant 0 : index
    %260 = vector.load %arg3[%c0_107, %c2_108, %c0_109, %c0_110] : memref<1x4x3x9xf32, #tpu.memory_space<vmem>>, vector<1x1x3x9xf32>
    %261 = vector.shape_cast %260 : vector<1x1x3x9xf32> to vector<3x9xf32>
    %cst_111 = arith.constant 0.000000e+00 : f32
    %262 = vector.broadcast %cst_111 : f32 to vector<3x8x8xf32>
    %263 = vector.extract_strided_slice %259 {offsets = [0, 0, 0], sizes = [1, 8, 8], strides = [1, 1, 1]} : vector<9x8x8xf32> to vector<1x8x8xf32>
    %264 = vector.shape_cast %263 : vector<1x8x8xf32> to vector<8x8xf32>
    %265 = vector.shape_cast %264 : vector<8x8xf32> to vector<1x8x8xf32>
    %266 = vector.extract_strided_slice %261 {offsets = [0, 0], sizes = [3, 1], strides = [1, 1]} : vector<3x9xf32> to vector<3x1xf32>
    %267 = vector.shape_cast %266 : vector<3x1xf32> to vector<3xf32>
    %268 = vector.shape_cast %267 : vector<3xf32> to vector<3x1x1xf32>
    %269 = vector.broadcast %265 : vector<1x8x8xf32> to vector<3x8x8xf32>
    %270 = vector.broadcast %268 : vector<3x1x1xf32> to vector<3x8x8xf32>
    %271 = arith.addf %269, %270 : vector<3x8x8xf32>
    %c0_112 = arith.constant 0 : index
    %c0_113 = arith.constant 0 : index
    %c0_114 = arith.constant 0 : index
    %c0_115 = arith.constant 0 : index
    %272 = vector.load %arg1[%c0_112, %c0_113, %c0_114, %c0_115] : memref<1x3x10x10xf32, #tpu.memory_space<vmem>>, vector<1x3x8x8xf32>
    %273 = vector.shape_cast %272 : vector<1x3x8x8xf32> to vector<3x8x8xf32>
    %274 = arith.mulf %273, %271 : vector<3x8x8xf32>
    %275 = arith.addf %262, %274 : vector<3x8x8xf32>
    %276 = vector.extract_strided_slice %259 {offsets = [1, 0, 0], sizes = [1, 8, 8], strides = [1, 1, 1]} : vector<9x8x8xf32> to vector<1x8x8xf32>
    %277 = vector.shape_cast %276 : vector<1x8x8xf32> to vector<8x8xf32>
    %278 = vector.shape_cast %277 : vector<8x8xf32> to vector<1x8x8xf32>
    %279 = vector.extract_strided_slice %261 {offsets = [0, 1], sizes = [3, 1], strides = [1, 1]} : vector<3x9xf32> to vector<3x1xf32>
    %280 = vector.shape_cast %279 : vector<3x1xf32> to vector<3xf32>
    %281 = vector.shape_cast %280 : vector<3xf32> to vector<3x1x1xf32>
    %282 = vector.broadcast %278 : vector<1x8x8xf32> to vector<3x8x8xf32>
    %283 = vector.broadcast %281 : vector<3x1x1xf32> to vector<3x8x8xf32>
    %284 = arith.addf %282, %283 : vector<3x8x8xf32>
    %c0_116 = arith.constant 0 : index
    %c0_117 = arith.constant 0 : index
    %c0_118 = arith.constant 0 : index
    %c1_119 = arith.constant 1 : index
    %285 = vector.load %arg1[%c0_116, %c0_117, %c0_118, %c1_119] : memref<1x3x10x10xf32, #tpu.memory_space<vmem>>, vector<1x3x8x8xf32>
    %286 = vector.shape_cast %285 : vector<1x3x8x8xf32> to vector<3x8x8xf32>
    %287 = arith.mulf %286, %284 : vector<3x8x8xf32>
    %288 = arith.addf %275, %287 : vector<3x8x8xf32>
    %289 = vector.extract_strided_slice %259 {offsets = [2, 0, 0], sizes = [1, 8, 8], strides = [1, 1, 1]} : vector<9x8x8xf32> to vector<1x8x8xf32>
    %290 = vector.shape_cast %289 : vector<1x8x8xf32> to vector<8x8xf32>
    %291 = vector.shape_cast %290 : vector<8x8xf32> to vector<1x8x8xf32>
    %292 = vector.extract_strided_slice %261 {offsets = [0, 2], sizes = [3, 1], strides = [1, 1]} : vector<3x9xf32> to vector<3x1xf32>
    %293 = vector.shape_cast %292 : vector<3x1xf32> to vector<3xf32>
    %294 = vector.shape_cast %293 : vector<3xf32> to vector<3x1x1xf32>
    %295 = vector.broadcast %291 : vector<1x8x8xf32> to vector<3x8x8xf32>
    %296 = vector.broadcast %294 : vector<3x1x1xf32> to vector<3x8x8xf32>
    %297 = arith.addf %295, %296 : vector<3x8x8xf32>
    %c0_120 = arith.constant 0 : index
    %c0_121 = arith.constant 0 : index
    %c0_122 = arith.constant 0 : index
    %c2_123 = arith.constant 2 : index
    %298 = vector.load %arg1[%c0_120, %c0_121, %c0_122, %c2_123] : memref<1x3x10x10xf32, #tpu.memory_space<vmem>>, vector<1x3x8x8xf32>
    %299 = vector.shape_cast %298 : vector<1x3x8x8xf32> to vector<3x8x8xf32>
    %300 = arith.mulf %299, %297 : vector<3x8x8xf32>
    %301 = arith.addf %288, %300 : vector<3x8x8xf32>
    %302 = vector.extract_strided_slice %259 {offsets = [3, 0, 0], sizes = [1, 8, 8], strides = [1, 1, 1]} : vector<9x8x8xf32> to vector<1x8x8xf32>
    %303 = vector.shape_cast %302 : vector<1x8x8xf32> to vector<8x8xf32>
    %304 = vector.shape_cast %303 : vector<8x8xf32> to vector<1x8x8xf32>
    %305 = vector.extract_strided_slice %261 {offsets = [0, 3], sizes = [3, 1], strides = [1, 1]} : vector<3x9xf32> to vector<3x1xf32>
    %306 = vector.shape_cast %305 : vector<3x1xf32> to vector<3xf32>
    %307 = vector.shape_cast %306 : vector<3xf32> to vector<3x1x1xf32>
    %308 = vector.broadcast %304 : vector<1x8x8xf32> to vector<3x8x8xf32>
    %309 = vector.broadcast %307 : vector<3x1x1xf32> to vector<3x8x8xf32>
    %310 = arith.addf %308, %309 : vector<3x8x8xf32>
    %c0_124 = arith.constant 0 : index
    %c0_125 = arith.constant 0 : index
    %c1_126 = arith.constant 1 : index
    %c0_127 = arith.constant 0 : index
    %311 = vector.load %arg1[%c0_124, %c0_125, %c1_126, %c0_127] : memref<1x3x10x10xf32, #tpu.memory_space<vmem>>, vector<1x3x8x8xf32>
    %312 = vector.shape_cast %311 : vector<1x3x8x8xf32> to vector<3x8x8xf32>
    %313 = arith.mulf %312, %310 : vector<3x8x8xf32>
    %314 = arith.addf %301, %313 : vector<3x8x8xf32>
    %315 = vector.extract_strided_slice %259 {offsets = [4, 0, 0], sizes = [1, 8, 8], strides = [1, 1, 1]} : vector<9x8x8xf32> to vector<1x8x8xf32>
    %316 = vector.shape_cast %315 : vector<1x8x8xf32> to vector<8x8xf32>
    %317 = vector.shape_cast %316 : vector<8x8xf32> to vector<1x8x8xf32>
    %318 = vector.extract_strided_slice %261 {offsets = [0, 4], sizes = [3, 1], strides = [1, 1]} : vector<3x9xf32> to vector<3x1xf32>
    %319 = vector.shape_cast %318 : vector<3x1xf32> to vector<3xf32>
    %320 = vector.shape_cast %319 : vector<3xf32> to vector<3x1x1xf32>
    %321 = vector.broadcast %317 : vector<1x8x8xf32> to vector<3x8x8xf32>
    %322 = vector.broadcast %320 : vector<3x1x1xf32> to vector<3x8x8xf32>
    %323 = arith.addf %321, %322 : vector<3x8x8xf32>
    %c0_128 = arith.constant 0 : index
    %c0_129 = arith.constant 0 : index
    %c1_130 = arith.constant 1 : index
    %c1_131 = arith.constant 1 : index
    %324 = vector.load %arg1[%c0_128, %c0_129, %c1_130, %c1_131] : memref<1x3x10x10xf32, #tpu.memory_space<vmem>>, vector<1x3x8x8xf32>
    %325 = vector.shape_cast %324 : vector<1x3x8x8xf32> to vector<3x8x8xf32>
    %326 = arith.mulf %325, %323 : vector<3x8x8xf32>
    %327 = arith.addf %314, %326 : vector<3x8x8xf32>
    %328 = vector.extract_strided_slice %259 {offsets = [5, 0, 0], sizes = [1, 8, 8], strides = [1, 1, 1]} : vector<9x8x8xf32> to vector<1x8x8xf32>
    %329 = vector.shape_cast %328 : vector<1x8x8xf32> to vector<8x8xf32>
    %330 = vector.shape_cast %329 : vector<8x8xf32> to vector<1x8x8xf32>
    %331 = vector.extract_strided_slice %261 {offsets = [0, 5], sizes = [3, 1], strides = [1, 1]} : vector<3x9xf32> to vector<3x1xf32>
    %332 = vector.shape_cast %331 : vector<3x1xf32> to vector<3xf32>
    %333 = vector.shape_cast %332 : vector<3xf32> to vector<3x1x1xf32>
    %334 = vector.broadcast %330 : vector<1x8x8xf32> to vector<3x8x8xf32>
    %335 = vector.broadcast %333 : vector<3x1x1xf32> to vector<3x8x8xf32>
    %336 = arith.addf %334, %335 : vector<3x8x8xf32>
    %c0_132 = arith.constant 0 : index
    %c0_133 = arith.constant 0 : index
    %c1_134 = arith.constant 1 : index
    %c2_135 = arith.constant 2 : index
    %337 = vector.load %arg1[%c0_132, %c0_133, %c1_134, %c2_135] : memref<1x3x10x10xf32, #tpu.memory_space<vmem>>, vector<1x3x8x8xf32>
    %338 = vector.shape_cast %337 : vector<1x3x8x8xf32> to vector<3x8x8xf32>
    %339 = arith.mulf %338, %336 : vector<3x8x8xf32>
    %340 = arith.addf %327, %339 : vector<3x8x8xf32>
    %341 = vector.extract_strided_slice %259 {offsets = [6, 0, 0], sizes = [1, 8, 8], strides = [1, 1, 1]} : vector<9x8x8xf32> to vector<1x8x8xf32>
    %342 = vector.shape_cast %341 : vector<1x8x8xf32> to vector<8x8xf32>
    %343 = vector.shape_cast %342 : vector<8x8xf32> to vector<1x8x8xf32>
    %344 = vector.extract_strided_slice %261 {offsets = [0, 6], sizes = [3, 1], strides = [1, 1]} : vector<3x9xf32> to vector<3x1xf32>
    %345 = vector.shape_cast %344 : vector<3x1xf32> to vector<3xf32>
    %346 = vector.shape_cast %345 : vector<3xf32> to vector<3x1x1xf32>
    %347 = vector.broadcast %343 : vector<1x8x8xf32> to vector<3x8x8xf32>
    %348 = vector.broadcast %346 : vector<3x1x1xf32> to vector<3x8x8xf32>
    %349 = arith.addf %347, %348 : vector<3x8x8xf32>
    %c0_136 = arith.constant 0 : index
    %c0_137 = arith.constant 0 : index
    %c2_138 = arith.constant 2 : index
    %c0_139 = arith.constant 0 : index
    %350 = vector.load %arg1[%c0_136, %c0_137, %c2_138, %c0_139] : memref<1x3x10x10xf32, #tpu.memory_space<vmem>>, vector<1x3x8x8xf32>
    %351 = vector.shape_cast %350 : vector<1x3x8x8xf32> to vector<3x8x8xf32>
    %352 = arith.mulf %351, %349 : vector<3x8x8xf32>
    %353 = arith.addf %340, %352 : vector<3x8x8xf32>
    %354 = vector.extract_strided_slice %259 {offsets = [7, 0, 0], sizes = [1, 8, 8], strides = [1, 1, 1]} : vector<9x8x8xf32> to vector<1x8x8xf32>
    %355 = vector.shape_cast %354 : vector<1x8x8xf32> to vector<8x8xf32>
    %356 = vector.shape_cast %355 : vector<8x8xf32> to vector<1x8x8xf32>
    %357 = vector.extract_strided_slice %261 {offsets = [0, 7], sizes = [3, 1], strides = [1, 1]} : vector<3x9xf32> to vector<3x1xf32>
    %358 = vector.shape_cast %357 : vector<3x1xf32> to vector<3xf32>
    %359 = vector.shape_cast %358 : vector<3xf32> to vector<3x1x1xf32>
    %360 = vector.broadcast %356 : vector<1x8x8xf32> to vector<3x8x8xf32>
    %361 = vector.broadcast %359 : vector<3x1x1xf32> to vector<3x8x8xf32>
    %362 = arith.addf %360, %361 : vector<3x8x8xf32>
    %c0_140 = arith.constant 0 : index
    %c0_141 = arith.constant 0 : index
    %c2_142 = arith.constant 2 : index
    %c1_143 = arith.constant 1 : index
    %363 = vector.load %arg1[%c0_140, %c0_141, %c2_142, %c1_143] : memref<1x3x10x10xf32, #tpu.memory_space<vmem>>, vector<1x3x8x8xf32>
    %364 = vector.shape_cast %363 : vector<1x3x8x8xf32> to vector<3x8x8xf32>
    %365 = arith.mulf %364, %362 : vector<3x8x8xf32>
    %366 = arith.addf %353, %365 : vector<3x8x8xf32>
    %367 = vector.extract_strided_slice %259 {offsets = [8, 0, 0], sizes = [1, 8, 8], strides = [1, 1, 1]} : vector<9x8x8xf32> to vector<1x8x8xf32>
    %368 = vector.shape_cast %367 : vector<1x8x8xf32> to vector<8x8xf32>
    %369 = vector.shape_cast %368 : vector<8x8xf32> to vector<1x8x8xf32>
    %370 = vector.extract_strided_slice %261 {offsets = [0, 8], sizes = [3, 1], strides = [1, 1]} : vector<3x9xf32> to vector<3x1xf32>
    %371 = vector.shape_cast %370 : vector<3x1xf32> to vector<3xf32>
    %372 = vector.shape_cast %371 : vector<3xf32> to vector<3x1x1xf32>
    %373 = vector.broadcast %369 : vector<1x8x8xf32> to vector<3x8x8xf32>
    %374 = vector.broadcast %372 : vector<3x1x1xf32> to vector<3x8x8xf32>
    %375 = arith.addf %373, %374 : vector<3x8x8xf32>
    %c0_144 = arith.constant 0 : index
    %c0_145 = arith.constant 0 : index
    %c2_146 = arith.constant 2 : index
    %c2_147 = arith.constant 2 : index
    %376 = vector.load %arg1[%c0_144, %c0_145, %c2_146, %c2_147] : memref<1x3x10x10xf32, #tpu.memory_space<vmem>>, vector<1x3x8x8xf32>
    %377 = vector.shape_cast %376 : vector<1x3x8x8xf32> to vector<3x8x8xf32>
    %378 = arith.mulf %377, %375 : vector<3x8x8xf32>
    %379 = arith.addf %366, %378 : vector<3x8x8xf32>
    %cst_148 = arith.constant 0.000000e+00 : f32
    %cst_149 = arith.constant 2.550000e+02 : f32
    %380 = vector.broadcast %cst_148 : f32 to vector<3x8x8xf32>
    %381 = arith.maximumf %380, %379 : vector<3x8x8xf32>
    %382 = vector.broadcast %cst_149 : f32 to vector<3x8x8xf32>
    %383 = arith.minimumf %382, %381 : vector<3x8x8xf32>
    %c0_150 = arith.constant 0 : index
    %c2_151 = arith.constant 2 : index
    %c0_152 = arith.constant 0 : index
    %c0_153 = arith.constant 0 : index
    %c0_154 = arith.constant 0 : index
    %384 = vector.load %arg4[%c0_150, %c2_151, %c0_152, %c0_153, %c0_154] : memref<1x4x3x8x8xf32, #tpu.memory_space<vmem>>, vector<1x1x3x8x8xf32>
    %385 = vector.shape_cast %384 : vector<1x1x3x8x8xf32> to vector<3x8x8xf32>
    %386 = vector.shape_cast %383 : vector<3x8x8xf32> to vector<1x1x3x8x8xf32>
    tpu.vector_store %arg4[%c0_150, %c2_151, %c0_152, %c0_153, %c0_154], %386 {strides = array<i32>} : memref<1x4x3x8x8xf32, #tpu.memory_space<vmem>>, vector<1x1x3x8x8xf32>,
    %c0_155 = arith.constant 0 : index
    %c3 = arith.constant 3 : index
    %c0_156 = arith.constant 0 : index
    %c0_157 = arith.constant 0 : index
    %c0_158 = arith.constant 0 : index
    %387 = vector.load %arg2[%c0_155, %c3, %c0_156, %c0_157, %c0_158] : memref<1x4x9x8x8xf32, #tpu.memory_space<vmem>>, vector<1x1x9x8x8xf32>
    %388 = vector.shape_cast %387 : vector<1x1x9x8x8xf32> to vector<9x8x8xf32>
    %c0_159 = arith.constant 0 : index
    %c3_160 = arith.constant 3 : index
    %c0_161 = arith.constant 0 : index
    %c0_162 = arith.constant 0 : index
    %389 = vector.load %arg3[%c0_159, %c3_160, %c0_161, %c0_162] : memref<1x4x3x9xf32, #tpu.memory_space<vmem>>, vector<1x1x3x9xf32>
    %390 = vector.shape_cast %389 : vector<1x1x3x9xf32> to vector<3x9xf32>
    %cst_163 = arith.constant 0.000000e+00 : f32
    %391 = vector.broadcast %cst_163 : f32 to vector<3x8x8xf32>
    %392 = vector.extract_strided_slice %388 {offsets = [0, 0, 0], sizes = [1, 8, 8], strides = [1, 1, 1]} : vector<9x8x8xf32> to vector<1x8x8xf32>
    %393 = vector.shape_cast %392 : vector<1x8x8xf32> to vector<8x8xf32>
    %394 = vector.shape_cast %393 : vector<8x8xf32> to vector<1x8x8xf32>
    %395 = vector.extract_strided_slice %390 {offsets = [0, 0], sizes = [3, 1], strides = [1, 1]} : vector<3x9xf32> to vector<3x1xf32>
    %396 = vector.shape_cast %395 : vector<3x1xf32> to vector<3xf32>
    %397 = vector.shape_cast %396 : vector<3xf32> to vector<3x1x1xf32>
    %398 = vector.broadcast %394 : vector<1x8x8xf32> to vector<3x8x8xf32>
    %399 = vector.broadcast %397 : vector<3x1x1xf32> to vector<3x8x8xf32>
    %400 = arith.addf %398, %399 : vector<3x8x8xf32>
    %c0_164 = arith.constant 0 : index
    %c0_165 = arith.constant 0 : index
    %c0_166 = arith.constant 0 : index
    %c0_167 = arith.constant 0 : index
    %401 = vector.load %arg1[%c0_164, %c0_165, %c0_166, %c0_167] : memref<1x3x10x10xf32, #tpu.memory_space<vmem>>, vector<1x3x8x8xf32>
    %402 = vector.shape_cast %401 : vector<1x3x8x8xf32> to vector<3x8x8xf32>
    %403 = arith.mulf %402, %400 : vector<3x8x8xf32>
    %404 = arith.addf %391, %403 : vector<3x8x8xf32>
    %405 = vector.extract_strided_slice %388 {offsets = [1, 0, 0], sizes = [1, 8, 8], strides = [1, 1, 1]} : vector<9x8x8xf32> to vector<1x8x8xf32>
    %406 = vector.shape_cast %405 : vector<1x8x8xf32> to vector<8x8xf32>
    %407 = vector.shape_cast %406 : vector<8x8xf32> to vector<1x8x8xf32>
    %408 = vector.extract_strided_slice %390 {offsets = [0, 1], sizes = [3, 1], strides = [1, 1]} : vector<3x9xf32> to vector<3x1xf32>
    %409 = vector.shape_cast %408 : vector<3x1xf32> to vector<3xf32>
    %410 = vector.shape_cast %409 : vector<3xf32> to vector<3x1x1xf32>
    %411 = vector.broadcast %407 : vector<1x8x8xf32> to vector<3x8x8xf32>
    %412 = vector.broadcast %410 : vector<3x1x1xf32> to vector<3x8x8xf32>
    %413 = arith.addf %411, %412 : vector<3x8x8xf32>
    %c0_168 = arith.constant 0 : index
    %c0_169 = arith.constant 0 : index
    %c0_170 = arith.constant 0 : index
    %c1_171 = arith.constant 1 : index
    %414 = vector.load %arg1[%c0_168, %c0_169, %c0_170, %c1_171] : memref<1x3x10x10xf32, #tpu.memory_space<vmem>>, vector<1x3x8x8xf32>
    %415 = vector.shape_cast %414 : vector<1x3x8x8xf32> to vector<3x8x8xf32>
    %416 = arith.mulf %415, %413 : vector<3x8x8xf32>
    %417 = arith.addf %404, %416 : vector<3x8x8xf32>
    %418 = vector.extract_strided_slice %388 {offsets = [2, 0, 0], sizes = [1, 8, 8], strides = [1, 1, 1]} : vector<9x8x8xf32> to vector<1x8x8xf32>
    %419 = vector.shape_cast %418 : vector<1x8x8xf32> to vector<8x8xf32>
    %420 = vector.shape_cast %419 : vector<8x8xf32> to vector<1x8x8xf32>
    %421 = vector.extract_strided_slice %390 {offsets = [0, 2], sizes = [3, 1], strides = [1, 1]} : vector<3x9xf32> to vector<3x1xf32>
    %422 = vector.shape_cast %421 : vector<3x1xf32> to vector<3xf32>
    %423 = vector.shape_cast %422 : vector<3xf32> to vector<3x1x1xf32>
    %424 = vector.broadcast %420 : vector<1x8x8xf32> to vector<3x8x8xf32>
    %425 = vector.broadcast %423 : vector<3x1x1xf32> to vector<3x8x8xf32>
    %426 = arith.addf %424, %425 : vector<3x8x8xf32>
    %c0_172 = arith.constant 0 : index
    %c0_173 = arith.constant 0 : index
    %c0_174 = arith.constant 0 : index
    %c2_175 = arith.constant 2 : index
    %427 = vector.load %arg1[%c0_172, %c0_173, %c0_174, %c2_175] : memref<1x3x10x10xf32, #tpu.memory_space<vmem>>, vector<1x3x8x8xf32>
    %428 = vector.shape_cast %427 : vector<1x3x8x8xf32> to vector<3x8x8xf32>
    %429 = arith.mulf %428, %426 : vector<3x8x8xf32>
    %430 = arith.addf %417, %429 : vector<3x8x8xf32>
    %431 = vector.extract_strided_slice %388 {offsets = [3, 0, 0], sizes = [1, 8, 8], strides = [1, 1, 1]} : vector<9x8x8xf32> to vector<1x8x8xf32>
    %432 = vector.shape_cast %431 : vector<1x8x8xf32> to vector<8x8xf32>
    %433 = vector.shape_cast %432 : vector<8x8xf32> to vector<1x8x8xf32>
    %434 = vector.extract_strided_slice %390 {offsets = [0, 3], sizes = [3, 1], strides = [1, 1]} : vector<3x9xf32> to vector<3x1xf32>
    %435 = vector.shape_cast %434 : vector<3x1xf32> to vector<3xf32>
    %436 = vector.shape_cast %435 : vector<3xf32> to vector<3x1x1xf32>
    %437 = vector.broadcast %433 : vector<1x8x8xf32> to vector<3x8x8xf32>
    %438 = vector.broadcast %436 : vector<3x1x1xf32> to vector<3x8x8xf32>
    %439 = arith.addf %437, %438 : vector<3x8x8xf32>
    %c0_176 = arith.constant 0 : index
    %c0_177 = arith.constant 0 : index
    %c1_178 = arith.constant 1 : index
    %c0_179 = arith.constant 0 : index
    %440 = vector.load %arg1[%c0_176, %c0_177, %c1_178, %c0_179] : memref<1x3x10x10xf32, #tpu.memory_space<vmem>>, vector<1x3x8x8xf32>
    %441 = vector.shape_cast %440 : vector<1x3x8x8xf32> to vector<3x8x8xf32>
    %442 = arith.mulf %441, %439 : vector<3x8x8xf32>
    %443 = arith.addf %430, %442 : vector<3x8x8xf32>
    %444 = vector.extract_strided_slice %388 {offsets = [4, 0, 0], sizes = [1, 8, 8], strides = [1, 1, 1]} : vector<9x8x8xf32> to vector<1x8x8xf32>
    %445 = vector.shape_cast %444 : vector<1x8x8xf32> to vector<8x8xf32>
    %446 = vector.shape_cast %445 : vector<8x8xf32> to vector<1x8x8xf32>
    %447 = vector.extract_strided_slice %390 {offsets = [0, 4], sizes = [3, 1], strides = [1, 1]} : vector<3x9xf32> to vector<3x1xf32>
    %448 = vector.shape_cast %447 : vector<3x1xf32> to vector<3xf32>
    %449 = vector.shape_cast %448 : vector<3xf32> to vector<3x1x1xf32>
    %450 = vector.broadcast %446 : vector<1x8x8xf32> to vector<3x8x8xf32>
    %451 = vector.broadcast %449 : vector<3x1x1xf32> to vector<3x8x8xf32>
    %452 = arith.addf %450, %451 : vector<3x8x8xf32>
    %c0_180 = arith.constant 0 : index
    %c0_181 = arith.constant 0 : index
    %c1_182 = arith.constant 1 : index
    %c1_183 = arith.constant 1 : index
    %453 = vector.load %arg1[%c0_180, %c0_181, %c1_182, %c1_183] : memref<1x3x10x10xf32, #tpu.memory_space<vmem>>, vector<1x3x8x8xf32>
    %454 = vector.shape_cast %453 : vector<1x3x8x8xf32> to vector<3x8x8xf32>
    %455 = arith.mulf %454, %452 : vector<3x8x8xf32>
    %456 = arith.addf %443, %455 : vector<3x8x8xf32>
    %457 = vector.extract_strided_slice %388 {offsets = [5, 0, 0], sizes = [1, 8, 8], strides = [1, 1, 1]} : vector<9x8x8xf32> to vector<1x8x8xf32>
    %458 = vector.shape_cast %457 : vector<1x8x8xf32> to vector<8x8xf32>
    %459 = vector.shape_cast %458 : vector<8x8xf32> to vector<1x8x8xf32>
    %460 = vector.extract_strided_slice %390 {offsets = [0, 5], sizes = [3, 1], strides = [1, 1]} : vector<3x9xf32> to vector<3x1xf32>
    %461 = vector.shape_cast %460 : vector<3x1xf32> to vector<3xf32>
    %462 = vector.shape_cast %461 : vector<3xf32> to vector<3x1x1xf32>
    %463 = vector.broadcast %459 : vector<1x8x8xf32> to vector<3x8x8xf32>
    %464 = vector.broadcast %462 : vector<3x1x1xf32> to vector<3x8x8xf32>
    %465 = arith.addf %463, %464 : vector<3x8x8xf32>
    %c0_184 = arith.constant 0 : index
    %c0_185 = arith.constant 0 : index
    %c1_186 = arith.constant 1 : index
    %c2_187 = arith.constant 2 : index
    %466 = vector.load %arg1[%c0_184, %c0_185, %c1_186, %c2_187] : memref<1x3x10x10xf32, #tpu.memory_space<vmem>>, vector<1x3x8x8xf32>
    %467 = vector.shape_cast %466 : vector<1x3x8x8xf32> to vector<3x8x8xf32>
    %468 = arith.mulf %467, %465 : vector<3x8x8xf32>
    %469 = arith.addf %456, %468 : vector<3x8x8xf32>
    %470 = vector.extract_strided_slice %388 {offsets = [6, 0, 0], sizes = [1, 8, 8], strides = [1, 1, 1]} : vector<9x8x8xf32> to vector<1x8x8xf32>
    %471 = vector.shape_cast %470 : vector<1x8x8xf32> to vector<8x8xf32>
    %472 = vector.shape_cast %471 : vector<8x8xf32> to vector<1x8x8xf32>
    %473 = vector.extract_strided_slice %390 {offsets = [0, 6], sizes = [3, 1], strides = [1, 1]} : vector<3x9xf32> to vector<3x1xf32>
    %474 = vector.shape_cast %473 : vector<3x1xf32> to vector<3xf32>
    %475 = vector.shape_cast %474 : vector<3xf32> to vector<3x1x1xf32>
    %476 = vector.broadcast %472 : vector<1x8x8xf32> to vector<3x8x8xf32>
    %477 = vector.broadcast %475 : vector<3x1x1xf32> to vector<3x8x8xf32>
    %478 = arith.addf %476, %477 : vector<3x8x8xf32>
    %c0_188 = arith.constant 0 : index
    %c0_189 = arith.constant 0 : index
    %c2_190 = arith.constant 2 : index
    %c0_191 = arith.constant 0 : index
    %479 = vector.load %arg1[%c0_188, %c0_189, %c2_190, %c0_191] : memref<1x3x10x10xf32, #tpu.memory_space<vmem>>, vector<1x3x8x8xf32>
    %480 = vector.shape_cast %479 : vector<1x3x8x8xf32> to vector<3x8x8xf32>
    %481 = arith.mulf %480, %478 : vector<3x8x8xf32>
    %482 = arith.addf %469, %481 : vector<3x8x8xf32>
    %483 = vector.extract_strided_slice %388 {offsets = [7, 0, 0], sizes = [1, 8, 8], strides = [1, 1, 1]} : vector<9x8x8xf32> to vector<1x8x8xf32>
    %484 = vector.shape_cast %483 : vector<1x8x8xf32> to vector<8x8xf32>
    %485 = vector.shape_cast %484 : vector<8x8xf32> to vector<1x8x8xf32>
    %486 = vector.extract_strided_slice %390 {offsets = [0, 7], sizes = [3, 1], strides = [1, 1]} : vector<3x9xf32> to vector<3x1xf32>
    %487 = vector.shape_cast %486 : vector<3x1xf32> to vector<3xf32>
    %488 = vector.shape_cast %487 : vector<3xf32> to vector<3x1x1xf32>
    %489 = vector.broadcast %485 : vector<1x8x8xf32> to vector<3x8x8xf32>
    %490 = vector.broadcast %488 : vector<3x1x1xf32> to vector<3x8x8xf32>
    %491 = arith.addf %489, %490 : vector<3x8x8xf32>
    %c0_192 = arith.constant 0 : index
    %c0_193 = arith.constant 0 : index
    %c2_194 = arith.constant 2 : index
    %c1_195 = arith.constant 1 : index
    %492 = vector.load %arg1[%c0_192, %c0_193, %c2_194, %c1_195] : memref<1x3x10x10xf32, #tpu.memory_space<vmem>>, vector<1x3x8x8xf32>
    %493 = vector.shape_cast %492 : vector<1x3x8x8xf32> to vector<3x8x8xf32>
    %494 = arith.mulf %493, %491 : vector<3x8x8xf32>
    %495 = arith.addf %482, %494 : vector<3x8x8xf32>
    %496 = vector.extract_strided_slice %388 {offsets = [8, 0, 0], sizes = [1, 8, 8], strides = [1, 1, 1]} : vector<9x8x8xf32> to vector<1x8x8xf32>
    %497 = vector.shape_cast %496 : vector<1x8x8xf32> to vector<8x8xf32>
    %498 = vector.shape_cast %497 : vector<8x8xf32> to vector<1x8x8xf32>
    %499 = vector.extract_strided_slice %390 {offsets = [0, 8], sizes = [3, 1], strides = [1, 1]} : vector<3x9xf32> to vector<3x1xf32>
    %500 = vector.shape_cast %499 : vector<3x1xf32> to vector<3xf32>
    %501 = vector.shape_cast %500 : vector<3xf32> to vector<3x1x1xf32>
    %502 = vector.broadcast %498 : vector<1x8x8xf32> to vector<3x8x8xf32>
    %503 = vector.broadcast %501 : vector<3x1x1xf32> to vector<3x8x8xf32>
    %504 = arith.addf %502, %503 : vector<3x8x8xf32>
    %c0_196 = arith.constant 0 : index
    %c0_197 = arith.constant 0 : index
    %c2_198 = arith.constant 2 : index
    %c2_199 = arith.constant 2 : index
    %505 = vector.load %arg1[%c0_196, %c0_197, %c2_198, %c2_199] : memref<1x3x10x10xf32, #tpu.memory_space<vmem>>, vector<1x3x8x8xf32>
    %506 = vector.shape_cast %505 : vector<1x3x8x8xf32> to vector<3x8x8xf32>
    %507 = arith.mulf %506, %504 : vector<3x8x8xf32>
    %508 = arith.addf %495, %507 : vector<3x8x8xf32>
    %cst_200 = arith.constant 0.000000e+00 : f32
    %cst_201 = arith.constant 2.550000e+02 : f32
    %509 = vector.broadcast %cst_200 : f32 to vector<3x8x8xf32>
    %510 = arith.maximumf %509, %508 : vector<3x8x8xf32>
    %511 = vector.broadcast %cst_201 : f32 to vector<3x8x8xf32>
    %512 = arith.minimumf %511, %510 : vector<3x8x8xf32>
    %c0_202 = arith.constant 0 : index
    %c3_203 = arith.constant 3 : index
    %c0_204 = arith.constant 0 : index
    %c0_205 = arith.constant 0 : index
    %c0_206 = arith.constant 0 : index
    %513 = vector.load %arg4[%c0_202, %c3_203, %c0_204, %c0_205, %c0_206] : memref<1x4x3x8x8xf32, #tpu.memory_space<vmem>>, vector<1x1x3x8x8xf32>
    %514 = vector.shape_cast %513 : vector<1x1x3x8x8xf32> to vector<3x8x8xf32>
    %515 = vector.shape_cast %512 : vector<3x8x8xf32> to vector<1x1x3x8x8xf32>
    tpu.vector_store %arg4[%c0_202, %c3_203, %c0_204, %c0_205, %c0_206], %515 {strides = array<i32>} : memref<1x4x3x8x8xf32, #tpu.memory_space<vmem>>, vector<1x1x3x8x8xf32>,
    return
  }
  func.func @transform_0(%arg0: i32) -> (i32, i32, i32, i32) {
    %c0_i32 = arith.constant 0 : i32
    %c0_i32_0 = arith.constant 0 : i32
    %c0_i32_1 = arith.constant 0 : i32
    %c0_i32_2 = arith.constant 0 : i32
    return %arg0, %c0_i32, %c0_i32_0, %c0_i32_1 : i32, i32, i32, i32
  }
  func.func @transform_1(%arg0: i32) -> (i32, i32, i32, i32, i32) {
    %c0_i32 = arith.constant 0 : i32
    %c0_i32_0 = arith.constant 0 : i32
    %c0_i32_1 = arith.constant 0 : i32
    %c0_i32_2 = arith.constant 0 : i32
    %c0_i32_3 = arith.constant 0 : i32
    return %arg0, %c0_i32, %c0_i32_0, %c0_i32_1, %c0_i32_2 : i32, i32, i32, i32, i32
  }
  func.func @transform_2(%arg0: i32) -> (i32, i32, i32, i32) {
    %c0_i32 = arith.constant 0 : i32
    %c0_i32_0 = arith.constant 0 : i32
    %c0_i32_1 = arith.constant 0 : i32
    %c0_i32_2 = arith.constant 0 : i32
    return %arg0, %c0_i32, %c0_i32_0, %c0_i32_1 : i32, i32, i32, i32
  }
  func.func @transform_3(%arg0: i32) -> (i32, i32, i32, i32, i32) {
    %c0_i32 = arith.constant 0 : i32
    %c0_i32_0 = arith.constant 0 : i32
    %c0_i32_1 = arith.constant 0 : i32
    %c0_i32_2 = arith.constant 0 : i32
    %c0_i32_3 = arith.constant 0 : i32
    return %arg0, %c0_i32, %c0_i32_0, %c0_i32_1, %c0_i32_2 : i32, i32, i32, i32, i32
  }
}

</mosaic_0001>

<bundles_post_ra>
// kernel: mduvsr_forward.16
= control target key start
LH: loop header
LB: loop body
LE: loop exit
PB: predicated region body
PF: predicated region fallthrough
CT: control target
= control target key end

     0   :  { %8 = vsyncpa [#allocation3], 0  ;;  %s2212_s0 = inlined_call_operand.hbm [shape: f32[2,10,10,11], index: 0, kind: input, shape index: {}]   ;;  %s2213_s1 = inlined_call_operand.hbm [shape: f32[9,11,27], index: 1, kind: input, shape index: {}]   ;;  %s2214_s2 = inlined_call_operand.hbm [shape: f32[1,27], index: 2, kind: input, shape index: {}]   ;;  %s2215_s3 = inlined_call_operand.hbm [shape: f32[2,8,8,27], index: 3, kind: output, shape index: {}]  }
   0x1   :  { %10 = vsyncpa [#allocation3 + $0x1], 0 }
   0x2   :  { %11 = vsyncpa [#allocation6], 0 }
   0x3   :  { %12 = vsyncpa [#allocation4], 0 }
   0x4   :  { %14 = vsyncpa [#allocation4 + $0x1], 0  ;;  %s1837_s12 = smov 0   ;;  %s1839_s13 = smov 0  }
   0x5   :  { %s1841_s14 = smov 0   ;;  %s1843_s15 = smov 0  }
   0x6 LB: > { %s1858_s16 = sadd.s32 4294967295, %s1806_s15   ;;  %s1273_s17 = sadd.s32 4294967294, %s1806_s15   ;;  %s1806_s15 = sphi %s1843_s15, %s2235_s15   ;;  %s1802_s14 = sphi %s1841_s14, %s2234_s14   ;;  %s1798_s13 = sphi %s1839_s13, %s2233_s13   ;;  %s1794_s12 = sphi %s1837_s12, %s2232_s12  }
   0x7   : > { %p40_p0 = scmp.ne.s32.totalorder %s1798_s13, %s1794_s12  ;;  %p2216_p1 = scmp.eq.s32.totalorder %s1858_s16, 0 }
   0x8   : > { %p112_p3 = scmp.eq.s32.totalorder %s1273_s17, 1  ;;  %p1274_p5 = scmp.ge.s32.totalorder %s1806_s15, 1 }
   0x9   : > { %p1867_p4 = por %p2216_p1, %p40_p0  ;;  %p119_p7 = scmp.lt.s32.totalorder %s1806_s15, 3 }
   0xa   : > { %p1872_p6 = por %p112_p3, %p40_p0  ;;  %s1808_s21 = smov [#allocation5]  }
   0xb   : > { %s2219_s18 = scalar_select %p1867_p4, 1, 0 }
   0xc   : > { %s2220_s19 = scalar_select %p1872_p6, 1, 0 }
   0xd   : > { %p1877_p8 = pnand %p1274_p5, %p119_p7  ;;  %s131_s22 = sshll.u32 %s1808_s21, 4  ;;  %s1881_s22 = int_to_ptr.vmem [resolvable:$true] %s131_s22 }
   0xe   : > { %s1809_s24 = smov [#allocation7]   ;;  %s1650_s28 = scalar_lea.hbm %s2213_s1, 2304 }
   0xf   : > { %p1590_p9 = pneg %p1877_p8  ;;  %s145_s25 = sshll.u32 %s1809_s24, 4  ;;  %s1892_s25 = int_to_ptr.vmem [resolvable:$true] %s145_s25 }
  0x10   : > { %p1651_p12 = scmp.ne.s32.totalorder %s2213_s1, %s1650_s28  ;;  %p1657_p5 = scmp.lt.u32.totalorder %s1650_s28, %s2213_s1 }
  0x11   : > { %p1888_p11 = pnand %p1590_p9, %p2216_p1 }
  0x13   : > { %p1652_p13 = pneg %p1888_p11 }
  0x15   : > { %p1653_p0 = pnand %p1652_p13, %p1651_p12 }
  0x17   : > { %p1654_p3 = pneg %p1653_p0 }
  0x19   : > { %p1659_p7 = pnand %p1657_p5, %p1654_p3 }
  0x1b   : > { %1662 = shalt.err (!%p1659_p7)
}
  0x1c   : > { %s1663_s6 = scalar_lea.vmem %s1881_s22, 2304  ;;  %p1671_p2 = scmp.lt.s32.totalorder %s1881_s22, %s1881_s22 }
  0x1d   : > { %p1664_p9 = scmp.ne.s32.totalorder %s1881_s22, %s1663_s6  ;;  %p1672_p12 = scmp.lt.s32.totalorder %s1663_s6, %s1663_s6 }
  0x1f   : > { %p1666_p10 = pnand %p1664_p9, %p1652_p13  ;;  %p1673_p0 = por %p1672_p12, %p1671_p2 }
  0x21   : > { %p1667_p1 = pneg %p1666_p10 }
  0x23   : > { %p1674_p6 = pnand %p1673_p0, %p1667_p1 }
  0x25   : > { %1677 = shalt.err (!%p1674_p6)
}
  0x26   : > { %s1810_s7 = smov 128   ;;  %s1811_s8 = smov 8  }
  0x27   : > { %1593 = dma.hbm_to_vmem [thread:$0]  (!%p1888_p11), %s2213_s1, 2304, %s1881_s22, [#allocation6], %s1810_s7, %s1810_s7, %s1811_s8  }
  0x28   : > { %s1678_s21 = scalar_lea.hbm %s2214_s2, 16 }
  0x29   : > { %p1679_p1 = scmp.ne.s32.totalorder %s2214_s2, %s1678_s21  ;;  %p1685_p10 = scmp.lt.u32.totalorder %s1678_s21, %s2214_s2 }
  0x2b   : > { %p1681_p2 = pnand %p1679_p1, %p1652_p13 }
  0x2d   : > { %p1682_p6 = pneg %p1681_p2 }
  0x2f   : > { %p1687_p3 = pnand %p1685_p10, %p1682_p6 }
  0x31   : > { %1690 = shalt.err (!%p1687_p3)
}
  0x32   : > { %s1691_s22 = scalar_lea.vmem %s1892_s25, 16  ;;  %s1698_s29 = scalar_lea.vmem %s1892_s25, 32 }
  0x33   : > { %p1692_p5 = scmp.ne.s32.totalorder %s1892_s25, %s1691_s22  ;;  %p1699_p12 = scmp.lt.s32.totalorder %s1892_s25, %s1892_s25 }
  0x34   : > { %p1700_p0 = scmp.lt.s32.totalorder %s1698_s29, %s1691_s22 }
  0x35   : > { %p1694_p7 = pnand %p1692_p5, %p1652_p13 }
  0x36   : > { %p1701_p1 = por %p1700_p0, %p1699_p12 }
  0x37   : > { %p1695_p9 = pneg %p1694_p7 }
  0x39   : > { %p1702_p2 = pnand %p1701_p1, %p1695_p9 }
  0x3b   : > { %1705 = shalt.err (!%p1702_p2)
}
  0x3c   : > { %1596 = dma.hbm_to_vmem [thread:$0]  (!%p1888_p11), %s2214_s2, 16, %s1892_s25, [#allocation6]  }
  0x3d   : > { %s1951_s5 = sadd.s32 1, %s1806_s15   ;;  %s27_s23 = sadd.s32 1, %s1802_s14 }
  0x3e   : > { %s24_s6 = ssub.s32 %s1806_s15, %s1951_s5  ;;  %p34_p13 = scmp.ne.s32.totalorder %s1802_s14, %s1798_s13 }
  0x3f   : > { %p25_p6 = scmp.eq.s32.totalorder %s24_s6, 0  ;;  %p35_p10 = scmp.eq.s32.totalorder %s1806_s15, 0 }
  0x40   : > { %p2223_p3 = scmp.eq.s32.totalorder %s1858_s16, 1  ;;  %p1607_p7 = scmp.lt.s32.totalorder %s1806_s15, 2 }
  0x41   : > { %s1967_s10 = scalar_select %p25_p6, %s1802_s14, %s27_s23  }
  0x42   : > { %p1961_p5 = por %p2223_p3, %p34_p13  ;;  %p36_p9 = por %p35_p10, %p34_p13 }
  0x43   : > { %s156_s11 = sand.u32 1, %s1802_s14   ;;  %s1576_s25 = smul.u32 2560, %s1806_s15 }
  0x44   : > { %s2224_s9 = scalar_select %p1961_p5, 1, 0 }
  0x45   : > { %s1575_s17 = smul.u32 160, %s156_s11  ;;  %p1971_p11 = pnand %p1607_p7, %p36_p9 }
  0x46   : > { %s1978_s27 = scalar_lea.hbm %s2212_s0, %s1576_s25  ;;  %s1982_s29 = scalar_lea.sflag [#allocation3], %s156_s11 }
  0x47   : > { %s160_s28 = scalar_lea.vmem [#allocation2], %s1575_s17  ;;  %s1706_s30 = scalar_lea.hbm %s1978_s27, 2560 }
  0x48   : > { %s167_s22 = sshll.u32 %s160_s28, 4  ;;  %p1707_p12 = scmp.ne.s32.totalorder %s1978_s27, %s1706_s30  ;;  %s1980_s22 = int_to_ptr.vmem [resolvable:$true] %s167_s22 }
  0x49   : > { %p1708_p0 = pneg %p1971_p11  ;;  %s1711_s6 = scalar_lea.hbm %s2212_s0, 5120 }
  0x4a   : > { %p1712_p13 = scmp.lt.u32.totalorder %s1978_s27, %s2212_s0  ;;  %p1713_p6 = scmp.lt.u32.totalorder %s1711_s6, %s1706_s30 }
  0x4b   : > { %p1709_p1 = pnand %p1708_p0, %p1707_p12  ;;  %p1715_p3 = scmp.lt.u32.totalorder %s1706_s30, %s1978_s27 }
  0x4c   : > { %p1714_p10 = por %p1713_p6, %p1712_p13 }
  0x4d   : > { %p1710_p2 = pneg %p1709_p1 }
  0x4e   : > { %p1716_p7 = por %p1715_p3, %p1714_p10 }
  0x50   : > { %p1717_p9 = pnand %p1716_p7, %p1710_p2 }
  0x52   : > { %1720 = shalt.err (!%p1717_p9)
}
  0x53   : > { %s1721_s11 = scalar_lea.vmem %s1980_s22, 2560  ;;  %s1812_s17 = smov [#allocation2]  }
  0x54   : > { %p1722_p12 = scmp.ne.s32.totalorder %s1980_s22, %s1721_s11  ;;  %s1726_s26 = sshll.u32 %s1812_s17, 4  ;;  %s1727_s26 = int_to_ptr.vmem [resolvable:$false] %s1726_s26 }
  0x55   : > { %s1728_s28 = scalar_lea.vmem %s1727_s26, 5120  ;;  %p1729_p4 = scmp.lt.s32.totalorder %s1980_s22, %s1727_s26 }
  0x56   : > { %p1724_p1 = pnand %p1722_p12, %p1708_p0  ;;  %p1730_p13 = scmp.lt.s32.totalorder %s1728_s28, %s1721_s11 }
  0x58   : > { %p1725_p5 = pneg %p1724_p1  ;;  %p1731_p6 = por %p1730_p13, %p1729_p4 }
  0x5a   : > { %p1732_p10 = pnand %p1731_p6, %p1725_p5 }
  0x5c   : > { %1735 = shalt.err (!%p1732_p10)
}
  0x5d   : > { %1600 = dma.hbm_to_vmem [thread:$0]  (!%p1971_p11), %s1978_s27, 2560, %s1980_s22, %s1982_s29, %s1810_s7, %s1810_s7, %s1811_s8  }
  0x5e   : > { %179 = sbr.rel (%p1877_p8) target bundleno = 418 (0x1a2), region = 32  ;;  %s2016_s30 = sand.u32 (!%p1877_p8), 1, %s1798_s13  }
  0x5f   : > { %s1577_s4 = smul.u32 (!%p1877_p8), 160, %s2016_s30  ;;  %s182_s23 = scalar_lea.sflag (!%p1877_p8), [#allocation3], %s2016_s30 }
  0x60   : > { %p2226_p4 = scmp.ne.s32.totalorder (!%p1877_p8), %s2219_s18, 0 }
  0x61   : > { %s2020_s6 = scalar_lea.vmem (!%p1877_p8), [#allocation2], %s1577_s4 }
  0x65   : > { %1781 = dma.done.wait (%p2226_p4), %s182_s23, 2560  }
  0x66   : > { %1783 = vsyncadd (%p2226_p4), %s182_s23, 4294964736  ;;  %p2227_p5 = scmp.eq.s32.totalorder %s1858_s16, 0 }
  0x68   : > { %1785 = dma.done.wait (%p2227_p5), [#allocation6], 2320   ;;  %p2228_p8 = pmov %p2227_p5 }
  0x69   : > { %vm261_vm0 = vcmask 1044480   ;;  %vm262_vm1 = vcmask 1045504   ;;  %v1813_v0 = vmov 65535   ;;  %v245_v2 = vld [vmem:[#allocation5 + $0x10] sm:$0xff]  ;;  %v246_v3 = vld [vmem:[#allocation5 + $0x18] sm:$0x7] }
  0x6a   : > { %1787 = vsyncadd (%p2228_p8), [#allocation6], 4294964976  ;;  %v263_v1 = vsel %vm261_vm0, 4294967295, %v1813_v0  ;;  %v635_v5 = vld [vmem:[#allocation5 + $0x40] sm:$0xff]  ;;  %v247_v6 = vpack.c.bf16 %v246_v3, %v245_v2  ;;  %v636_v7 = vld [vmem:[#allocation5 + $0x48] sm:$0x7] }
  0x6b   : > { %v2030_v4 = vsel %vm262_vm1, %v263_v1, 0  ;;  %v232_v8 = vld [vmem:[%s2020_s6 + $0x1] sm:$0xff]  ;;  %v233_v9 = vld [vmem:[%s2020_s6 + $0x11] sm:$0xff]  ;;  %vm248_vm2 = vcmask 89088   ;;  %v637_v10 = vpack.c.bf16 %v636_v7, %v635_v5  ;;  %s1282_s18 = sshll.u32 %s2016_s30, 6  ;;  %vm1158_vm3 = vcmask 220160  }
  0x6c   : > { %v240_v11 = vpack.c.bf16 %v233_v9, %v232_v8  ;;  %v1308_v12 = vld [vmem:[%s2020_s6 + $0x21] sm:$0xff]  ;;  %v235_v13 = vld [vmem:[%s2020_s6 + $0x31] sm:$0xff]  ;;  %v266_v15 = vand.u32 %v2030_v4, %v247_v6  ;;  %s215_s20 = scalar_lea.vmem [#allocation8], %s1282_s18  ;;  %s1373_s7 = sshll.u32 %s1858_s16, 10 }
  0x6d   : > { %v229_v14 = vld [vmem:[#allocation5] sm:$0xff]  ;;  %v630_v16 = vpack.c.bf16 %v1308_v12, %v233_v9  ;;  %v230_v17 = vld [vmem:[#allocation5 + $0x8] sm:$0x7]  ;;  %v739_v19 = vld [vmem:[#allocation5 + $0x50] sm:$0xff]  ;;  %v2039_v20 = vand.u32 %v637_v10, %v2030_v4  ;;  %v2046_v24 = vpack.c.bf16 %v235_v13, %v1308_v12  ;;  %s1181_s8 = sshll.u32 %s215_s20, 4  ;;  %s2163_s22 = scalar_lea.hbm %s2215_s3, %s1373_s7  ;;  %s2165_s8 = int_to_ptr.vmem [resolvable:$true] %s1181_s8 }
  0x6e   : > { %v1310_v18 = vld [vmem:[%s2020_s6 + $0x41] sm:$0xff]  ;;  %1421 = vmatprep.mubr.msk.bf16.mxu1 %vm248_vm2, %v240_v11  ;;  %v231_v21 = vpack.c.bf16 %v230_v17, %v229_v14  ;;  %v740_v22 = vld [vmem:[#allocation5 + $0x58] sm:$0x7]  ;;  %1419 = vmatprep.subr.bf16.mxu1 %v266_v15  ;;  %v2077_v43 = vld [vmem:[%s2020_s6 + $0x10] sm:$0xff]  ;;  %s1168_s16 = scalar_lea.sflag [#allocation4], %s2016_s30  ;;  %s1736_s29 = scalar_lea.vmem %s2165_s8, 1024 }
  0x6f   : > { %v2043_v23 = vld [vmem:[%s2020_s6 + $0x51] sm:$0xff]  ;;  %1461 = vmatprep.mubr.msk.bf16.mxu0 %vm248_vm2, %v630_v16  ;;  %v741_v25 = vpack.c.bf16 %v740_v22, %v739_v19  ;;  %v2052_v27 = vld [vmem:[%s2020_s6 + $0x22] sm:$0xff]  ;;  %1459 = vmatprep.subr.bf16.mxu0 %v2039_v20  ;;  %v631_v29 = vpack.c.bf16 %v1310_v18, %v235_v13  ;;  %p1737_p11 = scmp.ne.s32.totalorder %s2165_s8, %s1736_s29  ;;  %p2229_p0 = scmp.ne.s32.totalorder %s2224_s9, 0 }
  0x70   : > { %v2049_v26 = vld [vmem:[%s2020_s6 + $0x12] sm:$0xff]  ;;  %1420 = vmatpush3.bf16.msra.mxu1 %v266_v15  ;;  %v346_v28 = vand.u32 %v2030_v4, %v231_v21  ;;  %v844_v30 = vld [vmem:[#allocation5 + $0x60] sm:$0xff]  ;;  %1460 = vmatpush3.bf16.msra.mxu0 %v2039_v20  ;;  %v2059_v32 = vpack.c.bf16 %v2043_v23, %v1310_v18  ;;  %v845_v33 = vld [vmem:[#allocation5 + $0x68] sm:$0x7]  ;;  %s1814_s25 = smov [#allocation8]  }
  0x71   : > { %v755_v31 = vand.u32 %v741_v25, %v2030_v4  ;;  %v734_v34 = vpack.c.bf16 %v2052_v27, %v2049_v26  ;;  %v846_v35 = vpack.c.bf16 %v845_v33, %v844_v30  ;;  %v426_v36 = vld [vmem:[#allocation5 + $0x20] sm:$0xff]  ;;  %v427_v37 = vld [vmem:[#allocation5 + $0x28] sm:$0x7]  ;;  %v2070_v39 = vld [vmem:[%s2020_s6 + $0x71] sm:$0xff]  ;;  %p1738_p2 = pnand %p1737_p11, %p2229_p0  ;;  %s1740_s24 = sshll.u32 %s1814_s25, 4  ;;  %s1741_s24 = int_to_ptr.vmem [resolvable:$false] %s1740_s24 }
  0x72   : > { %1429 = vmatprep.subr.bf16.mxu1 %v346_v28  ;;  %v2067_v38 = vld [vmem:[%s2020_s6 + $0x61] sm:$0xff]  ;;  %v428_v41 = vpack.c.bf16 %v427_v37, %v426_v36  ;;  %v948_v46 = vld [vmem:[#allocation5 + $0x70] sm:$0xff]  ;;  %v949_v47 = vld [vmem:[#allocation5 + $0x78] sm:$0x7]  ;;  %s1742_s11 = scalar_lea.vmem %s1741_s24, 2048  ;;  %p1743_p7 = scmp.lt.s32.totalorder %s2165_s8, %s1741_s24 }
  0x73   : > { %1422 = vmatmul.mubr.msk.bf16.vlgmr.msra.gmra.mrb[0].mxu1 %vm248_vm2, %v2046_v24  ;;  %1469 = vmatprep.subr.bf16.mxu0 %v755_v31  ;;  %v860_v40 = vand.u32 %v846_v35, %v2030_v4  ;;  %v217_v42 = vld [vmem:[%s2020_s6] sm:$0xff]  ;;  %v2083_v45 = vpack.c.bf16 %v2070_v39, %v2067_v38  ;;  %v1321_v49 = vld [vmem:[%s2020_s6 + $0x32] sm:$0xff]  ;;  %v950_v53 = vpack.c.bf16 %v949_v47, %v948_v46  ;;  %v1053_v12 = vld [vmem:[#allocation5 + $0x88] sm:$0x7]  ;;  %p1739_p3 = pneg %p1738_p2  ;;  %p1744_p9 = scmp.lt.s32.totalorder %s1742_s11, %s1736_s29 }
  0x74   : > { %1462 = vmatmul.mubr.msk.bf16.vlgmr.msra.gmra.mrb[0].mxu0 %vm248_vm2, %v631_v29  ;;  %1430 = vmatpush3.bf16.msra.mxu1 %v346_v28  ;;  %v442_v44 = vand.u32 %v428_v41, %v2030_v4  ;;  %v225_v48 = vpack.c.bf16 %v2077_v43, %v217_v42  ;;  %v1322_v50 = vld [vmem:[%s2020_s6 + $0x42] sm:$0xff]  ;;  %v1323_v51 = vld [vmem:[%s2020_s6 + $0x52] sm:$0xff]  ;;  %v422_v16 = vpack.c.bf16 %v1321_v49, %v2052_v27  ;;  %v1367_v37 = vld [vmem:[#allocation7] ss:$0 sm:$0xff] }
  0x75   : > { %1470 = vmatpush3.bf16.msra.mxu0 %v755_v31  ;;  %1425 = vmatprep.mubr.msk.bf16.mxu1 %vm248_vm2, %v2059_v32  ;;  %v1324_v52 = vld [vmem:[%s2020_s6 + $0x62] sm:$0xff]  ;;  %v531_v54 = vld [vmem:[#allocation5 + $0x30] sm:$0xff]  ;;  %v532_v55 = vld [vmem:[#allocation5 + $0x38] sm:$0x7]  ;;  %v735_v56 = vpack.c.bf16 %v1322_v50, %v1321_v49  ;;  %v964_v63 = vand.u32 %v950_v53, %v2030_v4  ;;  %v423_v17 = vpack.c.bf16 %v1323_v51, %v1322_v50  ;;  %p1745_p12 = por %p1744_p9, %p1743_p7 }
  0x76   : > { %1471 = vmatprep.mubr.msk.bf16.mxu0 %vm248_vm2, %v734_v34  ;;  %1479 = vmatprep.subr.bf16.mxu0 %v860_v40  ;;  %v219_v57 = vld [vmem:[%s2020_s6 + $0x20] sm:$0xff]  ;;  %v220_v58 = vld [vmem:[%s2020_s6 + $0x30] sm:$0xff]  ;;  %v736_v59 = vpack.c.bf16 %v1324_v52, %v1323_v51  ;;  %v533_v62 = vpack.c.bf16 %v532_v55, %v531_v54  ;;  %v632_v30 = vpack.c.bf16 %v2067_v38, %v2043_v23 }
  0x77   : > { %1439 = vmatprep.subr.bf16.mxu1 %v442_v44  ;;  %v221_v60 = vld [vmem:[%s2020_s6 + $0x40] sm:$0xff]  ;;  %v222_v61 = vld [vmem:[%s2020_s6 + $0x50] sm:$0xff]  ;;  %v226_v0 = vpack.c.bf16 %v220_v58, %v219_v57  ;;  %v526_v22 = vpack.c.bf16 %v219_v57, %v2077_v43  ;;  %p1746_p1 = pnand %p1745_p12, %p1739_p3 }
  0x78   : > { %v227_v1 = vpack.c.bf16 %v222_v61, %v221_v60  ;;  %v1325_v2 = vld [vmem:[%s2020_s6 + $0x72] sm:$0xff]  ;;  %v2102_v3 = vld [vmem:[%s2020_s6 + $0x82] sm:$0xff]  ;;  %v547_v5 = vand.u32 %v533_v62, %v2030_v4  ;;  %v527_v25 = vpack.c.bf16 %v221_v60, %v220_v58 }
  0x79   : > { %v737_v6 = vpack.c.bf16 %v2102_v3, %v1325_v2  ;;  %v223_v7 = vld [vmem:[%s2020_s6 + $0x60] sm:$0xff]  ;;  %v224_v8 = vld [vmem:[%s2020_s6 + $0x70] sm:$0xff] }
  0x7a   : > { %v413_v9 = vld [vmem:[%s2020_s6 + $0x2] sm:$0xff]  ;;  %v228_v10 = vpack.c.bf16 %v224_v8, %v223_v7  ;;  %v1338_v19 = vld [vmem:[%s2020_s6 + $0x90] sm:$0xff] }
  0x7b   : > { %1426 = vmatmul.mubr.msk.bf16.gmra.mrb[4].mxu1 %vm248_vm2, %v2083_v45  ;;  %v1052_v11 = vld [vmem:[#allocation5 + $0x80] sm:$0xff]  ;;  %v421_v13 = vpack.c.bf16 %v2049_v26, %v413_v9  ;;  %v528_v26 = vpack.c.bf16 %v223_v7, %v222_v61  ;;  %v1350_v28 = vld [vmem:[%s2020_s6 + $0x91] sm:$0xff] }
  0x7c   : > { %1431 = vmatprep.mubr.msk.bf16.mxu1 %vm248_vm2, %v225_v48  ;;  %v1054_v14 = vpack.c.bf16 %v1053_v12, %v1052_v11  ;;  %v1337_v18 = vld [vmem:[%s2020_s6 + $0x80] sm:$0xff] }
  0x7d   : > { %v842_v21 = vpack.c.bf16 %v1338_v19, %v1337_v18  ;;  %v1349_v27 = vld [vmem:[%s2020_s6 + $0x81] sm:$0xff]  ;;  %v529_v29 = vpack.c.bf16 %v1337_v18, %v224_v8 }
  0x7e   : > { %v1068_v15 = vand.u32 %v1054_v14, %v2030_v4  ;;  %v424_v4 = vpack.c.bf16 %v1325_v2, %v1324_v52  ;;  %v633_v31 = vpack.c.bf16 %v1349_v27, %v2070_v39 }
  0x80   : > { %1472 = vmatmul.mubr.msk.bf16.vlgmr.msra.gmra.mrb[0].mxu0 %vm248_vm2, %v735_v56 }
  0x81   : > { %1480 = vmatpush3.bf16.msra.mxu0 %v860_v40  ;;  %1475 = vmatprep.mubr.msk.bf16.mxu0 %vm248_vm2, %v736_v59 }
  0x82   : > { %1489 = vmatprep.subr.bf16.mxu0 %v964_v63 }
  0x83   : > { %1432 = vmatmul.mubr.msk.bf16.vlgmr.msra.gmra.mrb[0].mxu1 %vm248_vm2, %v226_v0 }
  0x84   : > { %1440 = vmatpush3.bf16.msra.mxu1 %v442_v44  ;;  %1435 = vmatprep.mubr.msk.bf16.mxu1 %vm248_vm2, %v227_v1 }
  0x85   : > { %1449 = vmatprep.subr.bf16.mxu1 %v547_v5 }
  0x88   : > { %1476 = vmatmul.mubr.msk.bf16.gmra.mrb[4].mxu0 %vm248_vm2, %v737_v6 }
  0x89   : > { %1481 = vmatprep.mubr.msk.bf16.mxu0 %vm248_vm2, %v226_v0 }
  0x8b   : > { %1436 = vmatmul.mubr.msk.bf16.gmra.mrb[4].mxu1 %vm248_vm2, %v228_v10 }
  0x8c   : > { %1441 = vmatprep.mubr.msk.bf16.mxu1 %vm248_vm2, %v421_v13 }
  0x90   : > { %1482 = vmatmul.mubr.msk.bf16.vlgmr.msra.gmra.mrb[0].mxu0 %vm248_vm2, %v227_v1 }
  0x91   : > { %1490 = vmatpush3.bf16.msra.mxu0 %v964_v63  ;;  %1485 = vmatprep.mubr.msk.bf16.mxu0 %vm248_vm2, %v228_v10 }
  0x92   : > { %1499 = vmatprep.subr.bf16.mxu0 %v1068_v15 }
  0x93   : > { %1442 = vmatmul.mubr.msk.bf16.vlgmr.msra.gmra.mrb[0].mxu1 %vm248_vm2, %v422_v16 }
  0x94   : > { %1450 = vmatpush3.bf16.msra.mxu1 %v547_v5  ;;  %1445 = vmatprep.mubr.msk.bf16.mxu1 %vm248_vm2, %v423_v17 }
  0x95   : > { %1509 = vmatprep.subr.bf16.mxu1 %v2039_v20 }
  0x98   : > { %1486 = vmatmul.mubr.msk.bf16.gmra.mrb[4].mxu0 %vm248_vm2, %v842_v21 }
  0x99   : > { %1491 = vmatprep.mubr.msk.bf16.mxu0 %vm248_vm2, %v2046_v24  ;;  %v946_v24 = vpack.c.bf16 %v1350_v28, %v1349_v27 }
  0x9b   : > { %1446 = vmatmul.mubr.msk.bf16.gmra.mrb[4].mxu1 %vm248_vm2, %v424_v4 }
  0x9c   : > { %1451 = vmatprep.mubr.msk.bf16.mxu1 %vm248_vm2, %v526_v22 }
  0xa0   : > { %1492 = vmatmul.mubr.msk.bf16.vlgmr.msra.gmra.mrb[0].mxu0 %vm248_vm2, %v2059_v32 }
  0xa1   : > { %1500 = vmatpush3.bf16.msra.mxu0 %v1068_v15  ;;  %1495 = vmatprep.mubr.msk.bf16.mxu0 %vm248_vm2, %v2083_v45 }
  0xa3   : > { %1452 = vmatmul.mubr.msk.bf16.vlgmr.msra.gmra.mrb[0].mxu1 %vm248_vm2, %v527_v25 }
  0xa4   : > { %1510 = vmatpush3.bf16.msra.mxu1 %v2039_v20  ;;  %1455 = vmatprep.mubr.msk.bf16.mxu1 %vm248_vm2, %v528_v26  ;;  %v1362_v20 = vld [vmem:[%s2020_s6 + $0x92] sm:$0xff] }
  0xa5   : > { %v1050_v32 = vpack.c.bf16 %v1362_v20, %v2102_v3 }
  0xa8   : > { %1496 = vmatmul.mubr.msk.bf16.gmra.mrb[4].mxu0 %vm248_vm2, %v946_v24 }
  0xa9   : > { %1501 = vmatprep.mubr.msk.bf16.mxu0 %vm248_vm2, %v422_v16 }
  0xab   : > { %1456 = vmatmul.mubr.msk.bf16.gmra.mrb[4].mxu1 %vm248_vm2, %v529_v29 }
  0xac   : > { %1465 = vmatprep.mubr.msk.bf16.mxu1 %vm248_vm2, %v632_v30 }
  0xb0   : > { %1502 = vmatmul.mubr.msk.bf16.vlgmr.msra.gmra.mrb[0].mxu0 %vm248_vm2, %v423_v17 }
  0xb1   : > { %1505 = vmatprep.mubr.msk.bf16.mxu0 %vm248_vm2, %v424_v4 }
  0xb7   : > { %1466 = vmatmul.mubr.msk.bf16.vlgmr.msra.gmra.mrb[4].mxu1 %vm248_vm2, %v633_v31 }
  0xb8   : > { %1506 = vmatmul.mubr.msk.bf16.gmra.mrb[4].mxu0 %vm248_vm2, %v1050_v32 }
 0x176   : > { %v1453_v23 = vpop.f32.mrb[0].mxu1 }
 0x177   : > { %v583_v33 = vpop.f32.mrb[1].mxu1 }
 0x178   : > { %v1454_v34 = vpop.f32.mrb[2].mxu1 }
 0x179   : > { %v586_v35 = vpop.f32.mrb[3].mxu1 }
 0x183   : > { %v1503_v36 = vpop.f32.mrb[0].mxu0 }
 0x184   : > { %v1511_v38 = vadd.f32 %v1503_v36, %v1453_v23  ;;  %v1104_v40 = vpop.f32.mrb[1].mxu0 }
 0x185   : > { %v1512_v41 = vadd.f32 %v1104_v40, %v583_v33  ;;  %v1504_v42 = vpop.f32.mrb[2].mxu0 }
 0x186   : > { %v1152_v43 = vadd.f32 %v1511_v38, %v1367_v37  ;;  %v1513_v39 = vadd.f32 %v1504_v42, %v1454_v34  ;;  %v1107_v44 = vpop.f32.mrb[3].mxu0 }
 0x187   : > { %v1150_v45 = vadd.f32 %v1512_v41, %v1367_v37  ;;  %v1514_v46 = vadd.f32 %v1107_v44, %v586_v35 }
 0x188   : > { %1161 = vst.msk [vmem:[%s215_s20 + $0x10] sm:$0xff] %vm1158_vm3, %v1152_v43  ;;  %v1153_v47 = vadd.f32 %v1513_v39, %v1367_v37 }
 0x189   : > { %1159 = vst.msk [vmem:[%s215_s20] sm:$0xff] %vm1158_vm3, %v1150_v45  ;;  %v1151_v48 = vadd.f32 %v1514_v46, %v1367_v37 }
 0x18a   : > { %1162 = vst.msk [vmem:[%s215_s20 + $0x18] sm:$0xff] %vm1158_vm3, %v1153_v47  ;;  %v1467_v49 = vpop.f32.mrb[4].mxu1 }
 0x18b   : > { %1160 = vst.msk [vmem:[%s215_s20 + $0x8] sm:$0xff] %vm1158_vm3, %v1151_v48  ;;  %v1507_v50 = vpop.f32.mrb[4].mxu0  ;;  %v703_v51 = vpop.f32.mrb[5].mxu1 }
 0x18c   : > { %v1515_v52 = vadd.f32 %v1507_v50, %v1467_v49  ;;  %v1120_v53 = vpop.f32.mrb[5].mxu0  ;;  %v1468_v54 = vpop.f32.mrb[6].mxu1 }
 0x18d   : > { %v1516_v55 = vadd.f32 %v1120_v53, %v703_v51  ;;  %v1508_v56 = vpop.f32.mrb[6].mxu0  ;;  %v706_v57 = vpop.f32.mrb[7].mxu1 }
 0x18e   : > { %v1156_v58 = vadd.f32 %v1515_v52, %v1367_v37  ;;  %v1517_v59 = vadd.f32 %v1508_v56, %v1468_v54  ;;  %v1123_v60 = vpop.f32.mrb[7].mxu0 }
 0x18f   : > { %v1154_v61 = vadd.f32 %v1516_v55, %v1367_v37  ;;  %v1518_v62 = vadd.f32 %v1123_v60, %v706_v57 }
 0x190   : > { %1165 = vst.msk [vmem:[%s215_s20 + $0x30] sm:$0xff] %vm1158_vm3, %v1156_v58  ;;  %v1157_v63 = vadd.f32 %v1517_v59, %v1367_v37 }
 0x191   : > { %1163 = vst.msk [vmem:[%s215_s20 + $0x20] sm:$0xff] %vm1158_vm3, %v1154_v61  ;;  %v1155_v0 = vadd.f32 %v1518_v62, %v1367_v37 }
 0x192   : > { %1166 = vst.msk [vmem:[%s215_s20 + $0x38] sm:$0xff] %vm1158_vm3, %v1157_v63 }
 0x193   : > { %1164 = vst.msk [vmem:[%s215_s20 + $0x28] sm:$0xff] %vm1158_vm3, %v1155_v0 }
 0x194   : > { %1749 = shalt.err (!%p1746_p1)
}
 0x195   : > { %s1750_s17 = scalar_lea.hbm %s2163_s22, 1024  ;;  %s1754_s4 = scalar_lea.hbm %s2215_s3, 2048 }
 0x196   : > { %p1751_p13 = scmp.ne.s32.totalorder %s2163_s22, %s1750_s17  ;;  %p1755_p4 = scmp.lt.u32.totalorder %s2163_s22, %s2215_s3 }
 0x197   : > { %p1756_p5 = scmp.lt.u32.totalorder %s1754_s4, %s1750_s17  ;;  %p1758_p11 = scmp.lt.u32.totalorder %s1750_s17, %s2163_s22 }
 0x198   : > { %p1752_p6 = pnand %p1751_p13, %p2229_p0 }
 0x199   : > { %p1757_p8 = por %p1756_p5, %p1755_p4 }
 0x19a   : > { %p1753_p10 = pneg %p1752_p6 }
 0x19b   : > { %p1759_p2 = por %p1758_p11, %p1757_p8 }
 0x19d   : > { %p1760_p3 = pnand %p1759_p2, %p1753_p10 }
 0x19f   : > { %1763 = shalt.err (!%p1760_p3)
}
 0x1a0   : > { %s1815_s18 = smov 128   ;;  %s1816_s20 = smov 8  }
 0x1a1   : > { %1588 = dma.vmem_to_hbm [thread:$0]  (%p2229_p0), %s2165_s8, 1024, %s2163_s22, %s1168_s16, %s1815_s18, %s1815_s18, %s1816_s20  }
 0x1a2 PF: > { %s1196_s7 = sand.u32 1, %s1794_s12   ;;  %p2230_p7 = scmp.ne.s32.totalorder %s2220_s19, 0 }
 0x1a3   : > { %p2231_p9 = scmp.ge.s32.totalorder %s1806_s15, 2  ;;  %s1197_s21 = scalar_lea.sflag [#allocation4], %s1196_s7 }
 0x1a5   : > { %p1602_p12 = pnand %p2231_p9, %p2230_p7 }
 0x1a7   : > { %1789 = dma.done.wait (!%p1602_p12), %s1197_s21, 1024  }
 0x1a8   : > { %1791 = vsyncadd (!%p1602_p12), %s1197_s21, 4294966272  ;;  %p17_p1 = scmp.ge.s32.totalorder %s1951_s5, 4   ;;  %s2232_s12 = smov %s1798_s13 }
 0x1a9   : > { %s2233_s13 = smov %s1802_s14  ;;  %s2234_s14 = smov %s1967_s10 }
 0x1aa   : > { %s2235_s15 = smov %s1951_s5  ;;  %19 = sbr.rel (!%p17_p1) target bundleno = 6 (0x6), region = 95 }
 0x1b1   :  { %1202 = vsyncpa [#allocation3], 1 }
 0x1b2   :  { %1204 = vsyncpa [#allocation3 + $0x1], 1 }
 0x1b3   :  { %1205 = vsyncpa [#allocation6], 1 }
 0x1b4   :  { %1206 = vsyncpa [#allocation4], 1 }
 0x1b5   :  { %1208 = vsyncpa [#allocation4 + $0x1], 1 }

// kernel: mduvsr_forward.15
= control target key start
LH: loop header
LB: loop body
LE: loop exit
PB: predicated region body
PF: predicated region fallthrough
CT: control target
= control target key end

     0   :  { %11 = vsyncpa [#allocation3], 0  ;;  %s3046_s0 = inlined_call_operand.hbm [shape: f32[2,10,10,11], index: 0, kind: input, shape index: {}]   ;;  %s3047_s1 = inlined_call_operand.hbm [shape: f32[9,11,32], index: 1, kind: input, shape index: {}]   ;;  %s3048_s2 = inlined_call_operand.hbm [shape: f32[1,32], index: 2, kind: input, shape index: {}]   ;;  %s3049_s3 = inlined_call_operand.hbm [shape: f32[2,8,8,8], index: 3, kind: input, shape index: {}]   ;;  %s3050_s4 = inlined_call_operand.hbm [shape: f32[2,8,8,8], index: 4, kind: output, shape index: {0}]   ;;  %s3051_s5 = inlined_call_operand.hbm [shape: f32[2,8,8,8], index: 5, kind: output, shape index: {1}]  }
   0x1   :  { %13 = vsyncpa [#allocation3 + $0x1], 0 }
   0x2   :  { %14 = vsyncpa [#allocation6], 0 }
   0x3   :  { %15 = vsyncpa [#allocation9], 0 }
   0x4   :  { %17 = vsyncpa [#allocation9 + $0x1], 0 }
   0x5   :  { %18 = vsyncpa [#allocation4], 0 }
   0x6   :  { %20 = vsyncpa [#allocation4 + $0x1], 0 }
   0x7   :  { %21 = vsyncpa [#allocation12], 0 }
   0x8   :  { %23 = vsyncpa [#allocation12 + $0x1], 0  ;;  %s2498_s18 = smov 0   ;;  %s2500_s19 = smov 0  }
   0x9   :  { %s2502_s20 = smov 0   ;;  %s2504_s21 = smov 0  }
   0xa LB: > { %s2519_s22 = sadd.s32 4294967295, %s2452_s21   ;;  %s1758_s23 = sadd.s32 4294967294, %s2452_s21   ;;  %s2452_s21 = sphi %s2504_s21, %s3076_s21   ;;  %s2448_s20 = sphi %s2502_s20, %s3080_s20   ;;  %s2444_s19 = sphi %s2500_s19, %s3079_s19   ;;  %s2440_s18 = sphi %s2498_s18, %s3078_s18  }
   0xb   : > { %s2523_s24 = sadd.s32 1, %s2452_s21   ;;  %s36_s25 = sadd.s32 1, %s2448_s20 }
   0xc   : > { %3058 = sst [smem:[#allocation18_spill]] %s2523_s24  ;;  %s33_s26 = ssub.s32 %s2452_s21, %s2523_s24 }
   0xd   : > { %p43_p0 = scmp.ne.s32.totalorder %s2448_s20, %s2444_s19  ;;  %p34_p1 = scmp.eq.s32.totalorder %s33_s26, 0 }
   0xe   : > { %p44_p2 = scmp.eq.s32.totalorder %s2452_s21, 0  ;;  %p49_p3 = scmp.ne.s32.totalorder %s2444_s19, %s2440_s18 }
   0xf   : > { %p3052_p4 = scmp.eq.s32.totalorder %s2519_s22, 0  ;;  %p141_p7 = scmp.eq.s32.totalorder %s2519_s22, 1 }
  0x10   : > { %s2535_s27 = scalar_select %p34_p1, %s2448_s20, %s36_s25  }
  0x11   : > { %p2537_p5 = por %p44_p2, %p43_p0  ;;  %p2543_p6 = por %p3052_p4, %p49_p3 }
  0x12   : > { %3059 = sst [smem:[#allocation19_spill]] %s2535_s27  ;;  %p147_p8 = scmp.eq.s32.totalorder %s1758_s23, 1 }
  0x13   : > { %s3060_s28 = scalar_select %p2537_p5, 1, 0 }
  0x14   : > { %s3061_s29 = scalar_select %p2543_p6, 1, 0 }
  0x15   : > { %p1759_p9 = scmp.ge.s32.totalorder %s2452_s21, 1  ;;  %p180_p10 = scmp.lt.s32.totalorder %s2452_s21, 3 }
  0x16   : > { %p2550_p11 = por %p141_p7, %p43_p0  ;;  %p2554_p12 = por %p147_p8, %p49_p3 }
  0x17   : > { %p2558_p13 = pnand %p1759_p9, %p180_p10  ;;  %s2454_s8 = smov [#allocation5]  }
  0x18   : > { %s3062_s30 = scalar_select %p2550_p11, 1, 0 }
  0x19   : > { %s3063_s6 = scalar_select %p2554_p12, 1, 0 }
  0x1a   : > { %s3064_s7 = scalar_select %p2558_p13, 1, 0 }
  0x1b   : > { %p2097_p1 = pneg %p2558_p13  ;;  %s192_s9 = sshll.u32 %s2454_s8, 4  ;;  %s193_s9 = int_to_ptr.vmem [resolvable:$true] %s192_s9 }
  0x1c   : > { %s2455_s11 = smov [#allocation7]   ;;  %s2230_s15 = scalar_lea.hbm %s3047_s1, 2304 }
  0x1d   : > { %p2566_p2 = pnand %p2097_p1, %p3052_p4  ;;  %s206_s12 = sshll.u32 %s2455_s11, 4  ;;  %s207_s12 = int_to_ptr.vmem [resolvable:$true] %s206_s12 }
  0x1e   : > { %p2231_p7 = scmp.ne.s32.totalorder %s3047_s1, %s2230_s15  ;;  %p2237_p1 = scmp.lt.u32.totalorder %s2230_s15, %s3047_s1 }
  0x1f   : > { %p2232_p8 = pneg %p2566_p2 }
  0x21   : > { %p2233_p9 = pnand %p2232_p8, %p2231_p7 }
  0x23   : > { %p2234_p10 = pneg %p2233_p9 }
  0x25   : > { %p2239_p0 = pnand %p2237_p1, %p2234_p10 }
  0x27   : > { %2242 = shalt.err (!%p2239_p0)
}
  0x28   : > { %s2243_s26 = scalar_lea.vmem %s193_s9, 2304  ;;  %p2251_p11 = scmp.lt.s32.totalorder %s193_s9, %s193_s9 }
  0x29   : > { %p2244_p4 = scmp.ne.s32.totalorder %s193_s9, %s2243_s26  ;;  %p2252_p6 = scmp.lt.s32.totalorder %s2243_s26, %s2243_s26 }
  0x2b   : > { %p2246_p3 = pnand %p2244_p4, %p2232_p8  ;;  %p2253_p13 = por %p2252_p6, %p2251_p11 }
  0x2d   : > { %p2247_p12 = pneg %p2246_p3 }
  0x2f   : > { %p2254_p5 = pnand %p2253_p13, %p2247_p12 }
  0x31   : > { %2257 = shalt.err (!%p2254_p5)
}
  0x32   : > { %s2456_s8 = smov 128   ;;  %s2457_s11 = smov 8  }
  0x33   : > { %2100 = dma.hbm_to_vmem [thread:$0]  (!%p2566_p2), %s3047_s1, 2304, %s193_s9, [#allocation6], %s2456_s8, %s2456_s8, %s2457_s11  }
  0x34   : > { %s2598_s15 = sand.u32 1, %s2448_s20   ;;  %s2258_s23 = scalar_lea.hbm %s3048_s2, 16 }
  0x35   : > { %p2259_p4 = scmp.ne.s32.totalorder %s3048_s2, %s2258_s23  ;;  %p2265_p11 = scmp.lt.u32.totalorder %s2258_s23, %s3048_s2 }
  0x37   : > { %p2261_p5 = pnand %p2259_p4, %p2232_p8 }
  0x39   : > { %p2262_p6 = pneg %p2261_p5 }
  0x3b   : > { %p2267_p12 = pnand %p2265_p11, %p2262_p6 }
  0x3d   : > { %2270 = shalt.err (!%p2267_p12)
}
  0x3e   : > { %s2271_s9 = scalar_lea.vmem %s207_s12, 16  ;;  %s2278_s13 = scalar_lea.vmem %s207_s12, 32 }
  0x3f   : > { %p2272_p13 = scmp.ne.s32.totalorder %s207_s12, %s2271_s9  ;;  %p2279_p7 = scmp.lt.s32.totalorder %s207_s12, %s207_s12 }
  0x40   : > { %p2280_p9 = scmp.lt.s32.totalorder %s2278_s13, %s2271_s9 }
  0x41   : > { %p2274_p0 = pnand %p2272_p13, %p2232_p8 }
  0x42   : > { %p2281_p10 = por %p2280_p9, %p2279_p7 }
  0x43   : > { %p2275_p3 = pneg %p2274_p0 }
  0x45   : > { %p2282_p1 = pnand %p2281_p10, %p2275_p3 }
  0x47   : > { %2285 = shalt.err (!%p2282_p1)
}
  0x48   : > { %2103 = dma.hbm_to_vmem [thread:$0]  (!%p2566_p2), %s3048_s2, 16, %s207_s12, [#allocation6]  }
  0x49   : > { %s2078_s27 = smul.u32 160, %s2598_s15  ;;  %p3066_p8 = scmp.ne.s32.totalorder %s3060_s28, 0 }
  0x4a   : > { %s2079_s16 = smul.u32 2560, %s2452_s21  ;;  %p3067_p4 = scmp.lt.s32.totalorder %s2452_s21, 2 }
  0x4b   : > { %s221_s12 = scalar_lea.vmem [#allocation2], %s2078_s27  ;;  %s218_s28 = scalar_lea.sflag [#allocation3], %s2598_s15 }
  0x4c   : > { %p2626_p5 = pnand %p3067_p4, %p3066_p8  ;;  %s2633_s10 = scalar_lea.hbm %s3046_s0, %s2079_s16 }
  0x4d   : > { %s228_s26 = sshll.u32 %s221_s12, 4  ;;  %s2286_s9 = scalar_lea.hbm %s2633_s10, 2560  ;;  %s2635_s26 = int_to_ptr.vmem [resolvable:$true] %s228_s26 }
  0x4e   : > { %p2287_p2 = scmp.ne.s32.totalorder %s2633_s10, %s2286_s9  ;;  %p2288_p6 = pneg %p2626_p5 }
  0x4f   : > { %s2291_s24 = scalar_lea.hbm %s3046_s0, 5120  ;;  %p2292_p13 = scmp.lt.u32.totalorder %s2633_s10, %s3046_s0 }
  0x50   : > { %p2289_p11 = pnand %p2288_p6, %p2287_p2  ;;  %p2293_p0 = scmp.lt.u32.totalorder %s2291_s24, %s2286_s9 }
  0x51   : > { %p2295_p7 = scmp.lt.u32.totalorder %s2286_s9, %s2633_s10 }
  0x52   : > { %p2290_p12 = pneg %p2289_p11  ;;  %p2294_p3 = por %p2293_p0, %p2292_p13 }
  0x54   : > { %p2296_p9 = por %p2295_p7, %p2294_p3 }
  0x56   : > { %p2297_p10 = pnand %p2296_p9, %p2290_p12 }
  0x58   : > { %2300 = shalt.err (!%p2297_p10)
}
  0x59   : > { %s2301_s27 = scalar_lea.vmem %s2635_s26, 2560  ;;  %s2458_s25 = smov [#allocation2]  }
  0x5a   : > { %p2302_p1 = scmp.ne.s32.totalorder %s2635_s26, %s2301_s27  ;;  %s2306_s12 = sshll.u32 %s2458_s25, 4  ;;  %s2307_s12 = int_to_ptr.vmem [resolvable:$false] %s2306_s12 }
  0x5b   : > { %s2308_s13 = scalar_lea.vmem %s2307_s12, 5120  ;;  %p2309_p2 = scmp.lt.s32.totalorder %s2635_s26, %s2307_s12 }
  0x5c   : > { %p2304_p8 = pnand %p2302_p1, %p2288_p6  ;;  %p2310_p11 = scmp.lt.s32.totalorder %s2308_s13, %s2301_s27 }
  0x5e   : > { %p2305_p4 = pneg %p2304_p8  ;;  %p2311_p13 = por %p2310_p11, %p2309_p2 }
  0x60   : > { %p2312_p0 = pnand %p2311_p13, %p2305_p4 }
  0x62   : > { %2315 = shalt.err (!%p2312_p0)
}
  0x63   : > { %2107 = dma.hbm_to_vmem [thread:$0]  (!%p2626_p5), %s2633_s10, 2560, %s2635_s26, %s218_s28, %s2456_s8, %s2456_s8, %s2457_s11  }
  0x64   : > { %s1764_s9 = sshll.u32 %s2598_s15, 6  ;;  %s1874_s14 = sshll.u32 %s2452_s21, 10 }
  0x65   : > { %s2673_s23 = scalar_lea.hbm %s3049_s3, %s1874_s14  ;;  %s242_s27 = scalar_lea.vmem [#allocation8], %s1764_s9 }
  0x66   : > { %s249_s25 = sshll.u32 %s242_s27, 4  ;;  %s239_s12 = scalar_lea.sflag [#allocation9], %s2598_s15  ;;  %s2675_s25 = int_to_ptr.vmem [resolvable:$true] %s249_s25 }
  0x67   : > { %s2316_s13 = scalar_lea.hbm %s2673_s23, 1024  ;;  %s2321_s28 = scalar_lea.hbm %s3049_s3, 2048 }
  0x68   : > { %p2317_p12 = scmp.ne.s32.totalorder %s2673_s23, %s2316_s13  ;;  %p2322_p9 = scmp.lt.u32.totalorder %s2673_s23, %s3049_s3 }
  0x69   : > { %p2323_p10 = scmp.lt.u32.totalorder %s2321_s28, %s2316_s13  ;;  %p2325_p8 = scmp.lt.u32.totalorder %s2316_s13, %s2673_s23 }
  0x6a   : > { %p2319_p3 = pnand %p2317_p12, %p2288_p6 }
  0x6b   : > { %p2324_p1 = por %p2323_p10, %p2322_p9 }
  0x6c   : > { %p2320_p7 = pneg %p2319_p3 }
  0x6d   : > { %p2326_p4 = por %p2325_p8, %p2324_p1 }
  0x6f   : > { %p2327_p2 = pnand %p2326_p4, %p2320_p7 }
  0x71   : > { %2330 = shalt.err (!%p2327_p2)
}
  0x72   : > { %s2331_s9 = scalar_lea.vmem %s2675_s25, 1024  ;;  %s2459_s16 = smov [#allocation8]  }
  0x73   : > { %p2332_p11 = scmp.ne.s32.totalorder %s2675_s25, %s2331_s9  ;;  %s2336_s27 = sshll.u32 %s2459_s16, 4  ;;  %s2337_s27 = int_to_ptr.vmem [resolvable:$false] %s2336_s27 }
  0x74   : > { %s2338_s10 = scalar_lea.vmem %s2337_s27, 2048  ;;  %p2339_p12 = scmp.lt.s32.totalorder %s2675_s25, %s2337_s27 }
  0x75   : > { %p2334_p13 = pnand %p2332_p11, %p2288_p6  ;;  %p2340_p3 = scmp.lt.s32.totalorder %s2338_s10, %s2331_s9 }
  0x77   : > { %p2335_p0 = pneg %p2334_p13  ;;  %p2341_p9 = por %p2340_p3, %p2339_p12 }
  0x79   : > { %p2342_p10 = pnand %p2341_p9, %p2335_p0 }
  0x7b   : > { %2345 = shalt.err (!%p2342_p10)
}
  0x7c   : > { %2110 = dma.hbm_to_vmem [thread:$0]  (!%p2626_p5), %s2673_s23, 1024, %s2675_s25, %s239_s12, %s2456_s8, %s2456_s8, %s2457_s11  }
  0x7d   : > { %p3069_p6 = scmp.ne.s32.totalorder %s3064_s7, 0 }
  0x7e   : > { %s2709_s13 = sand.u32 (!%p3069_p6), 1, %s2444_s19   ;;  %p3070_p7 = scmp.ne.s32.totalorder (!%p3069_p6), %s3061_s29, 0 }
  0x7f   : > { %261 = sbr.rel (%p3069_p6) target bundleno = 948 (0x3b4), region = 36  ;;  %s264_s28 = scalar_lea.sflag (!%p3069_p6), [#allocation3], %s2709_s13 }
  0x80   : > { %s2080_s26 = smul.u32 (!%p3069_p6), 160, %s2709_s13 }
  0x82   : > { %s2713_s17 = scalar_lea.vmem (!%p3069_p6), [#allocation2], %s2080_s26 }
  0x86   : > { %2419 = dma.done.wait (%p3070_p7), %s264_s28, 2560  }
  0x87   : > { %2421 = vsyncadd (%p3070_p7), %s264_s28, 4294964736  ;;  %p3071_p5 = scmp.eq.s32.totalorder %s2519_s22, 0 }
  0x89   : > { %2423 = dma.done.wait (%p3071_p5), [#allocation6], 2320   ;;  %p3072_p1 = pmov %p3071_p5 }
  0x8a   : > { %s2724_s7 = sshll.u32 %s2709_s13, 6  ;;  %s281_s8 = scalar_lea.sflag [#allocation9], %s2709_s13 }
  0x8b   : > { %2425 = vsyncadd (%p3072_p1), [#allocation6], 4294964976  ;;  %s2728_s11 = scalar_lea.vmem [#allocation8], %s2724_s7 }
  0x8c   : > { %2427 = dma.done.wait (%p3070_p7), %s281_s8, 1024  }
  0x8d   : > { %2429 = vsyncadd (%p3070_p7), %s281_s8, 4294966272  ;;  %vm366_vm0 = vcmask 1044480   ;;  %vm367_vm1 = vcmask 1045504   ;;  %v2460_v0 = vmov 65535   ;;  %v350_v2 = vld [vmem:[#allocation5 + $0x10] sm:$0xff]  ;;  %v740_v5 = vld [vmem:[#allocation5 + $0x40] sm:$0xff] }
  0x8e   : > { %v368_v1 = vsel %vm366_vm0, 4294967295, %v2460_v0  ;;  %v351_v3 = vld [vmem:[#allocation5 + $0x18] sm:$0x7]  ;;  %v741_v7 = vld [vmem:[#allocation5 + $0x48] sm:$0x7]  ;;  %vm353_vm2 = vcmask 89088  }
  0x8f   : > { %v2734_v4 = vsel %vm367_vm1, %v368_v1, 0  ;;  %v352_v6 = vpack.c.bf16 %v351_v3, %v350_v2  ;;  %v337_v8 = vld [vmem:[%s2713_s17 + $0x1] sm:$0xff]  ;;  %v338_v9 = vld [vmem:[%s2713_s17 + $0x11] sm:$0xff]  ;;  %v742_v10 = vpack.c.bf16 %v741_v7, %v740_v5  ;;  %s2461_s29 = smov 104   ;;  %s2462_s15 = smov 8   ;;  %vm1479_vm3 = vcmask 64512  }
  0x90   : > { %v345_v11 = vpack.c.bf16 %v338_v9, %v337_v8  ;;  %v1798_v12 = vld [vmem:[%s2713_s17 + $0x21] sm:$0xff]  ;;  %v340_v13 = vld [vmem:[%s2713_s17 + $0x31] sm:$0xff]  ;;  %s2463_s23 = smov 120   ;;  %s2464_s25 = smov 112  }
  0x91   : > { %v1800_v14 = vld [vmem:[%s2713_s17 + $0x41] sm:$0xff]  ;;  %v371_v15 = vand.u32 %v2734_v4, %v352_v6  ;;  %v735_v16 = vpack.c.bf16 %v1798_v12, %v338_v9  ;;  %v844_v17 = vld [vmem:[#allocation5 + $0x50] sm:$0xff]  ;;  %v845_v18 = vld [vmem:[#allocation5 + $0x58] sm:$0x7]  ;;  %v2743_v20 = vand.u32 %v742_v10, %v2734_v4  ;;  %v2750_v24 = vpack.c.bf16 %v340_v13, %v1798_v12  ;;  %s320_s12 = scalar_lea.vmem [#allocation11], %s2724_s7  ;;  %s1875_s24 = sshll.u32 %s2519_s22, 10 }
  0x92   : > { %v334_v19 = vld [vmem:[#allocation5] sm:$0xff]  ;;  %1924 = vmatprep.mubr.msk.bf16.mxu1 %vm353_vm2, %v345_v11  ;;  %v846_v21 = vpack.c.bf16 %v845_v18, %v844_v17  ;;  %v335_v22 = vld [vmem:[#allocation5 + $0x8] sm:$0x7]  ;;  %v2747_v23 = vld [vmem:[%s2713_s17 + $0x51] sm:$0xff]  ;;  %v736_v28 = vpack.c.bf16 %v1800_v14, %v340_v13  ;;  %s1611_s14 = sshll.u32 %s320_s12, 4  ;;  %s2953_s27 = scalar_lea.hbm %s3051_s5, %s1875_s24  ;;  %s2946_s14 = int_to_ptr.vmem [resolvable:$true] %s1611_s14 }
  0x93   : > { %1922 = vmatprep.subr.bf16.mxu1 %v371_v15  ;;  %1964 = vmatprep.mubr.msk.bf16.mxu0 %vm353_vm2, %v735_v16  ;;  %v336_v25 = vpack.c.bf16 %v335_v22, %v334_v19  ;;  %v2753_v26 = vld [vmem:[%s2713_s17 + $0x12] sm:$0xff]  ;;  %v2756_v27 = vld [vmem:[%s2713_s17 + $0x22] sm:$0xff]  ;;  %v2763_v32 = vpack.c.bf16 %v2747_v23, %v1800_v14  ;;  %s1582_s10 = scalar_lea.sflag [#allocation12], %s2709_s13  ;;  %s2346_s26 = scalar_lea.vmem %s2946_s14, 1024 }
  0x94   : > { %1962 = vmatprep.subr.bf16.mxu0 %v2743_v20  ;;  %1923 = vmatpush3.bf16.msra.mxu1 %v371_v15  ;;  %v860_v29 = vand.u32 %v846_v21, %v2734_v4  ;;  %v949_v30 = vld [vmem:[#allocation5 + $0x60] sm:$0xff]  ;;  %v950_v33 = vld [vmem:[#allocation5 + $0x68] sm:$0x7]  ;;  %v839_v34 = vpack.c.bf16 %v2756_v27, %v2753_v26  ;;  %v2774_v39 = vld [vmem:[%s2713_s17 + $0x71] sm:$0xff]  ;;  %p2347_p8 = scmp.ne.s32.totalorder %s2946_s14, %s2346_s26  ;;  %p3073_p4 = scmp.ne.s32.totalorder %s3062_s30, 0 }
  0x95   : > { %1963 = vmatpush3.bf16.msra.mxu0 %v2743_v20  ;;  %v451_v31 = vand.u32 %v2734_v4, %v336_v25  ;;  %v951_v35 = vpack.c.bf16 %v950_v33, %v949_v30  ;;  %v531_v36 = vld [vmem:[#allocation5 + $0x20] sm:$0xff]  ;;  %v532_v37 = vld [vmem:[#allocation5 + $0x28] sm:$0x7]  ;;  %v2781_v43 = vld [vmem:[%s2713_s17 + $0x10] sm:$0xff]  ;;  %s2465_s28 = smov [#allocation11]  }
  0x96   : > { %1972 = vmatprep.subr.bf16.mxu0 %v860_v29  ;;  %v2771_v38 = vld [vmem:[%s2713_s17 + $0x61] sm:$0xff]  ;;  %v533_v41 = vpack.c.bf16 %v532_v37, %v531_v36  ;;  %v1053_v46 = vld [vmem:[#allocation5 + $0x70] sm:$0xff]  ;;  %v1054_v47 = vld [vmem:[#allocation5 + $0x78] sm:$0x7]  ;;  %p2348_p2 = pnand %p2347_p8, %p3073_p4 }
  0x97   : > { %1925 = vmatmul.mubr.msk.bf16.vlgmr.msra.gmra.mrb[0].mxu1 %vm353_vm2, %v2750_v24  ;;  %1932 = vmatprep.subr.bf16.mxu1 %v451_v31  ;;  %v965_v40 = vand.u32 %v951_v35, %v2734_v4  ;;  %v322_v42 = vld [vmem:[%s2713_s17] sm:$0xff]  ;;  %v2787_v45 = vpack.c.bf16 %v2774_v39, %v2771_v38  ;;  %v1811_v49 = vld [vmem:[%s2713_s17 + $0x32] sm:$0xff]  ;;  %v1055_v53 = vpack.c.bf16 %v1054_v47, %v1053_v46  ;;  %v1158_v12 = vld [vmem:[#allocation5 + $0x88] sm:$0x7] }
  0x98   : > { %1965 = vmatmul.mubr.msk.bf16.vlgmr.msra.gmra.mrb[0].mxu0 %vm353_vm2, %v736_v28  ;;  %1933 = vmatpush3.bf16.msra.mxu1 %v451_v31  ;;  %v547_v44 = vand.u32 %v533_v41, %v2734_v4  ;;  %v330_v48 = vpack.c.bf16 %v2781_v43, %v322_v42  ;;  %v1812_v50 = vld [vmem:[%s2713_s17 + $0x42] sm:$0xff]  ;;  %v1813_v51 = vld [vmem:[%s2713_s17 + $0x52] sm:$0xff]  ;;  %v527_v16 = vpack.c.bf16 %v1811_v49, %v2756_v27  ;;  %v1857_v37 = vld [vmem:[#allocation7] ss:$0 sm:$0xff]  ;;  %p2349_p11 = pneg %p2348_p2 }
  0x99   : > { %1973 = vmatpush3.bf16.msra.mxu0 %v860_v29  ;;  %1928 = vmatprep.mubr.msk.bf16.mxu1 %vm353_vm2, %v2763_v32  ;;  %v1814_v52 = vld [vmem:[%s2713_s17 + $0x62] sm:$0xff]  ;;  %v636_v54 = vld [vmem:[#allocation5 + $0x30] sm:$0xff]  ;;  %v637_v55 = vld [vmem:[#allocation5 + $0x38] sm:$0x7]  ;;  %v840_v56 = vpack.c.bf16 %v1812_v50, %v1811_v49  ;;  %v1069_v63 = vand.u32 %v1055_v53, %v2734_v4  ;;  %v528_v17 = vpack.c.bf16 %v1813_v51, %v1812_v50 }
  0x9a   : > { %1974 = vmatprep.mubr.msk.bf16.mxu0 %vm353_vm2, %v839_v34  ;;  %1982 = vmatprep.subr.bf16.mxu0 %v965_v40  ;;  %v324_v57 = vld [vmem:[%s2713_s17 + $0x20] sm:$0xff]  ;;  %v325_v58 = vld [vmem:[%s2713_s17 + $0x30] sm:$0xff]  ;;  %v841_v59 = vpack.c.bf16 %v1814_v52, %v1813_v51  ;;  %v638_v62 = vpack.c.bf16 %v637_v55, %v636_v54  ;;  %v737_v30 = vpack.c.bf16 %v2771_v38, %v2747_v23 }
  0x9b   : > { %1942 = vmatprep.subr.bf16.mxu1 %v547_v44  ;;  %v326_v60 = vld [vmem:[%s2713_s17 + $0x40] sm:$0xff]  ;;  %v327_v61 = vld [vmem:[%s2713_s17 + $0x50] sm:$0xff]  ;;  %v331_v0 = vpack.c.bf16 %v325_v58, %v324_v57  ;;  %v631_v22 = vpack.c.bf16 %v324_v57, %v2781_v43 }
  0x9c   : > { %v332_v1 = vpack.c.bf16 %v327_v61, %v326_v60  ;;  %v1815_v2 = vld [vmem:[%s2713_s17 + $0x72] sm:$0xff]  ;;  %v2806_v3 = vld [vmem:[%s2713_s17 + $0x82] sm:$0xff]  ;;  %v652_v5 = vand.u32 %v638_v62, %v2734_v4  ;;  %v632_v25 = vpack.c.bf16 %v326_v60, %v325_v58 }
  0x9d   : > { %v842_v6 = vpack.c.bf16 %v2806_v3, %v1815_v2  ;;  %v328_v7 = vld [vmem:[%s2713_s17 + $0x60] sm:$0xff]  ;;  %v329_v8 = vld [vmem:[%s2713_s17 + $0x70] sm:$0xff] }
  0x9e   : > { %v518_v9 = vld [vmem:[%s2713_s17 + $0x2] sm:$0xff]  ;;  %v333_v10 = vpack.c.bf16 %v329_v8, %v328_v7  ;;  %v1828_v19 = vld [vmem:[%s2713_s17 + $0x90] sm:$0xff] }
  0x9f   : > { %1929 = vmatmul.mubr.msk.bf16.gmra.mrb[4].mxu1 %vm353_vm2, %v2787_v45  ;;  %v1157_v11 = vld [vmem:[#allocation5 + $0x80] sm:$0xff]  ;;  %v526_v13 = vpack.c.bf16 %v2753_v26, %v518_v9  ;;  %v633_v26 = vpack.c.bf16 %v328_v7, %v327_v61  ;;  %v1840_v28 = vld [vmem:[%s2713_s17 + $0x91] sm:$0xff] }
  0xa0   : > { %1934 = vmatprep.mubr.msk.bf16.mxu1 %vm353_vm2, %v330_v48  ;;  %v1159_v14 = vpack.c.bf16 %v1158_v12, %v1157_v11  ;;  %v1827_v18 = vld [vmem:[%s2713_s17 + $0x80] sm:$0xff] }
  0xa1   : > { %v947_v21 = vpack.c.bf16 %v1828_v19, %v1827_v18  ;;  %v1839_v27 = vld [vmem:[%s2713_s17 + $0x81] sm:$0xff]  ;;  %v634_v29 = vpack.c.bf16 %v1827_v18, %v329_v8  ;;  %v1319_v8 = vld [vmem:[%s2728_s11] sm:$0xff] }
  0xa2   : > { %v1173_v15 = vand.u32 %v1159_v14, %v2734_v4  ;;  %v529_v4 = vpack.c.bf16 %v1815_v2, %v1814_v52  ;;  %v738_v31 = vpack.c.bf16 %v1839_v27, %v2774_v39  ;;  %v1320_v12 = vld [vmem:[%s2728_s11 + $0x8] sm:$0xff]  ;;  %v1322_v14 = vld [vmem:[%s2728_s11 + $0x18] sm:$0xff] }
  0xa4   : > { %1975 = vmatmul.mubr.msk.bf16.vlgmr.msra.gmra.mrb[0].mxu0 %vm353_vm2, %v840_v56 }
  0xa5   : > { %1983 = vmatpush3.bf16.msra.mxu0 %v965_v40  ;;  %1978 = vmatprep.mubr.msk.bf16.mxu0 %vm353_vm2, %v841_v59 }
  0xa6   : > { %1992 = vmatprep.subr.bf16.mxu0 %v1069_v63 }
  0xa7   : > { %1935 = vmatmul.mubr.msk.bf16.vlgmr.msra.gmra.mrb[0].mxu1 %vm353_vm2, %v331_v0 }
  0xa8   : > { %1943 = vmatpush3.bf16.msra.mxu1 %v547_v44  ;;  %1938 = vmatprep.mubr.msk.bf16.mxu1 %vm353_vm2, %v332_v1 }
  0xa9   : > { %1952 = vmatprep.subr.bf16.mxu1 %v652_v5 }
  0xac   : > { %1979 = vmatmul.mubr.msk.bf16.gmra.mrb[4].mxu0 %vm353_vm2, %v842_v6 }
  0xad   : > { %1984 = vmatprep.mubr.msk.bf16.mxu0 %vm353_vm2, %v331_v0 }
  0xaf   : > { %1939 = vmatmul.mubr.msk.bf16.gmra.mrb[4].mxu1 %vm353_vm2, %v333_v10 }
  0xb0   : > { %1944 = vmatprep.mubr.msk.bf16.mxu1 %vm353_vm2, %v526_v13  ;;  %v1323_v13 = vld [vmem:[%s2728_s11 + $0x20] sm:$0xff] }
  0xb4   : > { %1985 = vmatmul.mubr.msk.bf16.vlgmr.msra.gmra.mrb[0].mxu0 %vm353_vm2, %v332_v1 }
  0xb5   : > { %1993 = vmatpush3.bf16.msra.mxu0 %v1069_v63  ;;  %1988 = vmatprep.mubr.msk.bf16.mxu0 %vm353_vm2, %v333_v10  ;;  %v1321_v10 = vld [vmem:[%s2728_s11 + $0x10] sm:$0xff] }
  0xb6   : > { %2002 = vmatprep.subr.bf16.mxu0 %v1173_v15 }
  0xb7   : > { %1945 = vmatmul.mubr.msk.bf16.vlgmr.msra.gmra.mrb[0].mxu1 %vm353_vm2, %v527_v16 }
  0xb8   : > { %1953 = vmatpush3.bf16.msra.mxu1 %v652_v5  ;;  %1948 = vmatprep.mubr.msk.bf16.mxu1 %vm353_vm2, %v528_v17 }
  0xb9   : > { %2012 = vmatprep.subr.bf16.mxu1 %v2743_v20 }
  0xbc   : > { %1989 = vmatmul.mubr.msk.bf16.gmra.mrb[4].mxu0 %vm353_vm2, %v947_v21 }
  0xbd   : > { %1994 = vmatprep.mubr.msk.bf16.mxu0 %vm353_vm2, %v2750_v24  ;;  %v1051_v24 = vpack.c.bf16 %v1840_v28, %v1839_v27 }
  0xbf   : > { %1949 = vmatmul.mubr.msk.bf16.gmra.mrb[4].mxu1 %vm353_vm2, %v529_v4 }
  0xc0   : > { %1954 = vmatprep.mubr.msk.bf16.mxu1 %vm353_vm2, %v631_v22 }
  0xc4   : > { %1995 = vmatmul.mubr.msk.bf16.vlgmr.msra.gmra.mrb[0].mxu0 %vm353_vm2, %v2763_v32 }
  0xc5   : > { %2003 = vmatpush3.bf16.msra.mxu0 %v1173_v15  ;;  %1998 = vmatprep.mubr.msk.bf16.mxu0 %vm353_vm2, %v2787_v45  ;;  %v1325_v15 = vld [vmem:[%s2728_s11 + $0x30] sm:$0xff] }
  0xc7   : > { %1955 = vmatmul.mubr.msk.bf16.vlgmr.msra.gmra.mrb[0].mxu1 %vm353_vm2, %v632_v25 }
  0xc8   : > { %2013 = vmatpush3.bf16.msra.mxu1 %v2743_v20  ;;  %1958 = vmatprep.mubr.msk.bf16.mxu1 %vm353_vm2, %v633_v26  ;;  %v1852_v20 = vld [vmem:[%s2713_s17 + $0x92] sm:$0xff]  ;;  %s2350_s17 = sshll.u32 %s2465_s28, 4  ;;  %s2351_s17 = int_to_ptr.vmem [resolvable:$false] %s2350_s17 }
  0xc9   : > { %v1155_v32 = vpack.c.bf16 %v1852_v20, %v2806_v3  ;;  %s2352_s8 = scalar_lea.vmem %s2351_s17, 2048  ;;  %p2353_p13 = scmp.lt.s32.totalorder %s2946_s14, %s2351_s17 }
  0xca   : > { %p2354_p0 = scmp.lt.s32.totalorder %s2352_s8, %s2346_s26 }
  0xcc   : > { %1999 = vmatmul.mubr.msk.bf16.gmra.mrb[4].mxu0 %vm353_vm2, %v1051_v24  ;;  %p2355_p12 = por %p2354_p0, %p2353_p13 }
  0xcd   : > { %2004 = vmatprep.mubr.msk.bf16.mxu0 %vm353_vm2, %v527_v16  ;;  %v1324_v16 = vld [vmem:[%s2728_s11 + $0x28] sm:$0xff] }
  0xce   : > { %p2356_p3 = pnand %p2355_p12, %p2349_p11 }
  0xcf   : > { %1959 = vmatmul.mubr.msk.bf16.gmra.mrb[4].mxu1 %vm353_vm2, %v634_v29 }
  0xd0   : > { %1968 = vmatprep.mubr.msk.bf16.mxu1 %vm353_vm2, %v737_v30 }
  0xd4   : > { %2005 = vmatmul.mubr.msk.bf16.vlgmr.msra.gmra.mrb[0].mxu0 %vm353_vm2, %v528_v17  ;;  %v1326_v17 = vld [vmem:[%s2728_s11 + $0x38] sm:$0xff] }
  0xd5   : > { %2008 = vmatprep.mubr.msk.bf16.mxu0 %vm353_vm2, %v529_v4 }
  0xdb   : > { %1969 = vmatmul.mubr.msk.bf16.vlgmr.msra.gmra.mrb[4].mxu1 %vm353_vm2, %v738_v31 }
  0xdc   : > { %2009 = vmatmul.mubr.msk.bf16.gmra.mrb[4].mxu0 %vm353_vm2, %v1155_v32 }
 0x19a   : > { %v1956_v23 = vpop.f32.mrb[0].mxu1 }
 0x19b   : > { %v688_v33 = vpop.f32.mrb[1].mxu1 }
 0x19c   : > { %v1957_v34 = vpop.f32.mrb[2].mxu1 }
 0x19d   : > { %v691_v35 = vpop.f32.mrb[3].mxu1 }
 0x1a7   : > { %v2006_v36 = vpop.f32.mrb[0].mxu0 }
 0x1a8   : > { %v2014_v38 = vadd.f32 %v2006_v36, %v1956_v23  ;;  %v1209_v40 = vpop.f32.mrb[1].mxu0 }
 0x1a9   : > { %v2015_v41 = vadd.f32 %v1209_v40, %v688_v33  ;;  %v2007_v42 = vpop.f32.mrb[2].mxu0 }
 0x1aa   : > { %v2857_v43 = vadd.f32 %v2014_v38, %v1857_v37  ;;  %v2016_v44 = vadd.f32 %v2007_v42, %v1957_v34  ;;  %v1212_v39 = vpop.f32.mrb[3].mxu0 }
 0x1ab   : > { %v2859_v45 = vadd.f32 %v2015_v41, %v1857_v37  ;;  %v2017_v46 = vadd.f32 %v1212_v39, %v691_v35 }
 0x1ac   : > { %2166 = vtanh.f32 %v2857_v43  ;;  %v1258_v47 = vadd.f32 %v2016_v44, %v1857_v37  ;;  %v1860_v18 = vmul.f32 -1.442695, %v2857_v43 }
 0x1ad   : > { %2168 = vtanh.f32 %v2859_v45  ;;  %v1256_v49 = vadd.f32 %v2017_v46, %v1857_v37  ;;  %v1858_v19 = vmul.f32 -1.442695, %v2859_v45 }
 0x1ae   : > { %v1970_v48 = vpop.f32.mrb[4].mxu1  ;;  %2170 = vtanh.f32 %v1258_v47  ;;  %v1861_v21 = vmul.f32 -1.442695, %v1258_v47 }
 0x1af   : > { %v2010_v50 = vpop.f32.mrb[4].mxu0  ;;  %v808_v51 = vpop.f32.mrb[5].mxu1  ;;  %2172 = vtanh.f32 %v1256_v49  ;;  %v1859_v4 = vmul.f32 -1.442695, %v1256_v49 }
 0x1b0   : > { %v2018_v52 = vadd.f32 %v2010_v50, %v1970_v48  ;;  %v1225_v53 = vpop.f32.mrb[5].mxu0  ;;  %v1971_v54 = vpop.f32.mrb[6].mxu1 }
 0x1b1   : > { %v2019_v55 = vadd.f32 %v1225_v53, %v808_v51  ;;  %v2011_v56 = vpop.f32.mrb[6].mxu0  ;;  %v811_v57 = vpop.f32.mrb[7].mxu1 }
 0x1b2   : > { %v2020_v58 = vadd.f32 %v2011_v56, %v1971_v54  ;;  %v1228_v59 = vpop.f32.mrb[7].mxu0  ;;  %v1261_v0 = vadd.f32 %v2018_v52, %v1857_v37 }
 0x1b3   : > { %v1259_v60 = vadd.f32 %v2019_v55, %v1857_v37  ;;  %v2021_v61 = vadd.f32 %v1228_v59, %v811_v57 }
 0x1b4   : > { %v1262_v5 = vadd.f32 %v2020_v58, %v1857_v37  ;;  %v1864_v26 = vmul.f32 -1.442695, %v1261_v0 }
 0x1b5   : > { %2174 = vtanh.f32 %v1259_v60  ;;  %v1260_v1 = vadd.f32 %v2021_v61, %v1857_v37  ;;  %v1862_v22 = vmul.f32 -1.442695, %v1259_v60 }
 0x1b6   : > { %v2167_v62 = vpop.eup %2166  ;;  %2176 = vtanh.f32 %v1261_v0  ;;  %v1865_v30 = vmul.f32 -1.442695, %v1262_v5 }
 0x1b7   : > { %v2169_v63 = vpop.eup %2168  ;;  %1379 = vrot.lane.b32.xlu1 %v2167_v62, %s2461_s29  ;;  %2178 = vtanh.f32 %v1260_v1  ;;  %v1863_v24 = vmul.f32 -1.442695, %v1260_v1 }
 0x1b8   : > { %1375 = vrot.lane.b32.xlu0 %v2169_v63, %s2461_s29  ;;  %v2171_v2 = vpop.eup %2170  ;;  %2180 = vtanh.f32 %v1262_v5 }
 0x1b9   : > { %v2173_v3 = vpop.eup %2172  ;;  %2182 = vpow2.f32 %v1860_v18 }
 0x1ba   : > { %2184 = vpow2.f32 %v1858_v19 }
 0x1bb   : > { %1381 = vrot.lane.b32.xlu1 %v2171_v2, %s2461_s29  ;;  %2186 = vpow2.f32 %v1861_v21 }
 0x1bc   : > { %1377 = vrot.lane.b32.xlu0 %v2173_v3, %s2461_s29  ;;  %2188 = vpow2.f32 %v1859_v4 }
 0x1bd   : > { %2190 = vpow2.f32 %v1862_v22 }
 0x1be   : > { %2192 = vpow2.f32 %v1864_v26 }
 0x1bf   : > { %v2175_v6 = vpop.eup %2174 }
 0x1c0   : > { %1383 = vrot.lane.b32.xlu0 %v2175_v6, %s2461_s29  ;;  %v2177_v7 = vpop.eup %2176 }
 0x1c1   : > { %v2179_v9 = vpop.eup %2178 }
 0x1c2   : > { %1385 = vrot.lane.b32.xlu1 %v2179_v9, %s2461_s29  ;;  %v2181_v11 = vpop.eup %2180 }
 0x1c3   : > { %v2183_v25 = vpop.eup %2182 }
 0x1c4   : > { %1387 = vrot.lane.b32.xlu0 %v2177_v7, %s2461_s29  ;;  %v1289_v27 = vadd.f32 1.0, %v2183_v25  ;;  %v2185_v28 = vpop.eup %2184 }
 0x1c5   : > { %v2187_v29 = vpop.eup %2186  ;;  %v1287_v20 = vadd.f32 1.0, %v2185_v28 }
 0x1c6   : > { %1389 = vrot.lane.b32.xlu1 %v2181_v11, %s2461_s29  ;;  %2194 = vrcp.f32 %v1289_v27  ;;  %v1290_v31 = vadd.f32 1.0, %v2187_v29  ;;  %v2189_v32 = vpop.eup %2188 }
 0x1c7   : > { %2196 = vpow2.f32 %v1863_v24  ;;  %v2191_v23 = vpop.eup %2190  ;;  %v1288_v33 = vadd.f32 1.0, %v2189_v32 }
 0x1c8   : > { %1335 = vrot.lane.b32.xlu0 %v1319_v8, %s2462_s15  ;;  %2198 = vpow2.f32 %v1865_v30  ;;  %v1291_v34 = vadd.f32 1.0, %v2191_v23  ;;  %v2193_v35 = vpop.eup %2192 }
 0x1c9   : > { %2200 = vrcp.f32 %v1287_v20  ;;  %v1293_v40 = vadd.f32 1.0, %v2193_v35 }
 0x1ca   : > { %1337 = vrot.lane.b32.xlu1 %v1320_v12, %s2462_s15  ;;  %2202 = vrcp.f32 %v1290_v31 }
 0x1cb   : > { %2204 = vrcp.f32 %v1288_v33 }
 0x1cc   : > { %1339 = vrot.lane.b32.xlu0 %v1321_v10, %s2462_s15  ;;  %2206 = vrcp.f32 %v1291_v34 }
 0x1cd   : > { %2208 = vrcp.f32 %v1293_v40 }
 0x1ce   : > { %1341 = vrot.lane.b32.xlu1 %v1322_v14, %s2462_s15 }
 0x1d0   : > { %1343 = vrot.lane.b32.xlu0 %v1323_v13, %s2462_s15  ;;  %v2881_v36 = vpop.eup %2194 }
 0x1d1   : > { %v2197_v38 = vpop.eup %2196 }
 0x1d2   : > { %1345 = vrot.lane.b32.xlu1 %v1324_v16, %s2462_s15  ;;  %v2199_v43 = vpop.eup %2198  ;;  %v1292_v39 = vadd.f32 1.0, %v2197_v38 }
 0x1d3   : > { %v2885_v44 = vpop.eup %2200  ;;  %v1294_v50 = vadd.f32 1.0, %v2199_v43 }
 0x1d4   : > { %1347 = vrot.lane.b32.xlu0 %v1325_v15, %s2462_s15  ;;  %v2887_v45 = vpop.eup %2202  ;;  %2210 = vrcp.f32 %v1292_v39 }
 0x1d5   : > { %v2893_v51 = vpop.eup %2204  ;;  %2212 = vrcp.f32 %v1294_v50 }
 0x1d6   : > { %1349 = vrot.lane.b32.xlu1 %v1326_v17, %s2462_s15  ;;  %v2896_v53 = vpop.eup %2206 }
 0x1d7   : > { %v2901_v56 = vpop.eup %2208 }
 0x1de   : > { %v2904_v59 = vpop.eup %2210 }
 0x1df   : > { %v2909_v62 = vpop.eup %2212 }
 0x229   : > { %v1380_v37 = vpop.permute.xlu1 %1379 }
 0x22a   : > { %v1401_v41 = vmul.f32 %v2881_v36, %v1380_v37  ;;  %v1376_v42 = vpop.permute.xlu0 %1375 }
 0x22b   : > { %v1399_v46 = vmul.f32 %v2885_v44, %v1376_v42 }
 0x22c   : > { %1419 = vrot.lane.b32.xlu0 %v1401_v41, %s2462_s15 }
 0x22d   : > { %v1382_v47 = vpop.permute.xlu1 %1381 }
 0x22e   : > { %v1402_v48 = vmul.f32 %v2887_v45, %v1382_v47  ;;  %v1378_v49 = vpop.permute.xlu0 %1377 }
 0x22f   : > { %v1400_v52 = vmul.f32 %v2893_v51, %v1378_v49 }
 0x230   : > { %1415 = vrot.lane.b32.xlu0 %v1399_v46, %s2462_s15  ;;  %1421 = vrot.lane.b32.xlu1 %v1402_v48, %s2462_s15 }
 0x232   : > { %v1384_v54 = vpop.permute.xlu0 %1383 }
 0x233   : > { %v1403_v55 = vmul.f32 %v2896_v53, %v1384_v54 }
 0x234   : > { %1417 = vrot.lane.b32.xlu1 %v1400_v52, %s2462_s15  ;;  %v1386_v60 = vpop.permute.xlu1 %1385 }
 0x235   : > { %1423 = vrot.lane.b32.xlu0 %v1403_v55, %s2462_s15  ;;  %v1404_v61 = vmul.f32 %v2904_v59, %v1386_v60 }
 0x236   : > { %v1388_v57 = vpop.permute.xlu0 %1387 }
 0x237   : > { %v1405_v58 = vmul.f32 %v2901_v56, %v1388_v57 }
 0x238   : > { %1425 = vrot.lane.b32.xlu1 %v1404_v61, %s2462_s15  ;;  %v1390_v63 = vpop.permute.xlu1 %1389 }
 0x239   : > { %1427 = vrot.lane.b32.xlu0 %v1405_v58, %s2462_s15  ;;  %v1406_v0 = vmul.f32 %v2909_v62, %v1390_v63 }
 0x23a   : > { %v1336_v1 = vpop.permute.xlu0 %1335 }
 0x23b   : > { %v1359_v13 = vmul.f32 %v2885_v44, %v1336_v1 }
 0x23c   : > { %1429 = vrot.lane.b32.xlu1 %v1406_v0, %s2462_s15  ;;  %v1338_v2 = vpop.permute.xlu1 %1337 }
 0x23d   : > { %v1360_v19 = vmul.f32 %v2893_v51, %v1338_v2 }
 0x23e   : > { %v1340_v3 = vpop.permute.xlu0 %1339 }
 0x23f   : > { %v1361_v9 = vmul.f32 %v2881_v36, %v1340_v3 }
 0x240   : > { %v1342_v5 = vpop.permute.xlu1 %1341 }
 0x241   : > { %v1362_v14 = vmul.f32 %v2887_v45, %v1342_v5 }
 0x242   : > { %v1344_v6 = vpop.permute.xlu0 %1343 }
 0x243   : > { %v1363_v4 = vmul.f32 %v2896_v53, %v1344_v6 }
 0x244   : > { %v1346_v7 = vpop.permute.xlu1 %1345 }
 0x245   : > { %v1364_v20 = vmul.f32 %v2904_v59, %v1346_v7 }
 0x246   : > { %v1348_v8 = vpop.permute.xlu0 %1347 }
 0x247   : > { %v1365_v28 = vmul.f32 %v2901_v56, %v1348_v8 }
 0x248   : > { %v1350_v11 = vpop.permute.xlu1 %1349 }
 0x249   : > { %v1366_v33 = vmul.f32 %v2909_v62, %v1350_v11 }
 0x29e   : > { %v1420_v10 = vpop.permute.xlu0 %1419 }
 0x29f   : > { %v1441_v12 = vadd.f32 %v1420_v10, %v1361_v9 }
 0x2a1   : > { %2214 = vtanh.f32 %v1441_v12 }
 0x2a2   : > { %v1416_v15 = vpop.permute.xlu0 %1415  ;;  %v1422_v17 = vpop.permute.xlu1 %1421 }
 0x2a3   : > { %v1439_v16 = vadd.f32 %v1416_v15, %v1359_v13  ;;  %v1442_v18 = vadd.f32 %v1422_v17, %v1362_v14 }
 0x2a5   : > { %2216 = vtanh.f32 %v1439_v16 }
 0x2a6   : > { %2218 = vtanh.f32 %v1442_v18  ;;  %v1418_v21 = vpop.permute.xlu1 %1417 }
 0x2a7   : > { %v1440_v22 = vadd.f32 %v1418_v21, %v1360_v19  ;;  %v1424_v25 = vpop.permute.xlu0 %1423 }
 0x2a8   : > { %v1443_v26 = vadd.f32 %v1424_v25, %v1363_v4 }
 0x2a9   : > { %2220 = vtanh.f32 %v1440_v22 }
 0x2aa   : > { %2222 = vtanh.f32 %v1443_v26  ;;  %v1426_v32 = vpop.permute.xlu1 %1425 }
 0x2ab   : > { %v2215_v27 = vpop.eup %2214  ;;  %v1428_v24 = vpop.permute.xlu0 %1427  ;;  %v1444_v23 = vadd.f32 %v1426_v32, %v1364_v20 }
 0x2ac   : > { %1508 = vrot.lane.b32.xlu0 %v2215_v27, %s2462_s15  ;;  %v1445_v29 = vadd.f32 %v1428_v24, %v1365_v28 }
 0x2ae   : > { %2224 = vtanh.f32 %v1445_v29  ;;  %v1430_v35 = vpop.permute.xlu1 %1429 }
 0x2af   : > { %v2217_v30 = vpop.eup %2216  ;;  %2226 = vtanh.f32 %v1444_v23  ;;  %v1446_v37 = vadd.f32 %v1430_v35, %v1366_v33 }
 0x2b0   : > { %v2219_v31 = vpop.eup %2218  ;;  %1504 = vrot.lane.b32.xlu0 %v2217_v30, %s2462_s15 }
 0x2b1   : > { %1510 = vrot.lane.b32.xlu1 %v2219_v31, %s2462_s15  ;;  %2228 = vtanh.f32 %v1446_v37 }
 0x2b3   : > { %v2221_v34 = vpop.eup %2220 }
 0x2b4   : > { %v2223_v38 = vpop.eup %2222 }
 0x2b5   : > { %1506 = vrot.lane.b32.xlu1 %v2221_v34, %s2462_s15  ;;  %1512 = vrot.lane.b32.xlu0 %v2223_v38, %s2462_s15 }
 0x2b8   : > { %v2225_v40 = vpop.eup %2224 }
 0x2b9   : > { %1516 = vrot.lane.b32.xlu0 %v2225_v40, %s2462_s15  ;;  %v2227_v41 = vpop.eup %2226 }
 0x2ba   : > { %1514 = vrot.lane.b32.xlu1 %v2227_v41, %s2462_s15 }
 0x2bb   : > { %v2229_v42 = vpop.eup %2228 }
 0x2bd   : > { %1455 = vrot.lane.b32.xlu0 %v1439_v16, %s2463_s23 }
 0x2be   : > { %1518 = vrot.lane.b32.xlu1 %v2229_v42, %s2462_s15 }
 0x2c1   : > { %1459 = vrot.lane.b32.xlu0 %v1441_v12, %s2463_s23 }
 0x2c2   : > { %1457 = vrot.lane.b32.xlu1 %v1440_v22, %s2463_s23 }
 0x2c5   : > { %1463 = vrot.lane.b32.xlu0 %v1443_v26, %s2463_s23 }
 0x2c6   : > { %1461 = vrot.lane.b32.xlu1 %v1442_v18, %s2463_s23 }
 0x2c9   : > { %1467 = vrot.lane.b32.xlu0 %v1445_v29, %s2463_s23 }
 0x2ca   : > { %1465 = vrot.lane.b32.xlu1 %v1444_v23, %s2463_s23 }
 0x2ce   : > { %1469 = vrot.lane.b32.xlu1 %v1446_v37, %s2463_s23 }
 0x31e   : > { %v1509_v43 = vpop.permute.xlu0 %1508 }
 0x31f   : > { %v1530_v39 = vmul.f32 %v2881_v36, %v1509_v43 }
 0x321   : > { %1548 = vrot.lane.b32.xlu0 %v1530_v39, %s2464_s25 }
 0x322   : > { %v1505_v46 = vpop.permute.xlu0 %1504 }
 0x323   : > { %v1528_v47 = vmul.f32 %v2885_v44, %v1505_v46  ;;  %v1511_v48 = vpop.permute.xlu1 %1510 }
 0x324   : > { %v1531_v49 = vmul.f32 %v2887_v45, %v1511_v48 }
 0x325   : > { %1544 = vrot.lane.b32.xlu0 %v1528_v47, %s2464_s25 }
 0x326   : > { %1550 = vrot.lane.b32.xlu1 %v1531_v49, %s2464_s25 }
 0x327   : > { %v1507_v50 = vpop.permute.xlu1 %1506  ;;  %v1513_v54 = vpop.permute.xlu0 %1512 }
 0x328   : > { %v1529_v52 = vmul.f32 %v2893_v51, %v1507_v50  ;;  %v1532_v55 = vmul.f32 %v2896_v53, %v1513_v54 }
 0x32a   : > { %1546 = vrot.lane.b32.xlu1 %v1529_v52, %s2464_s25  ;;  %1552 = vrot.lane.b32.xlu0 %v1532_v55, %s2464_s25 }
 0x32b   : > { %v1517_v36 = vpop.permute.xlu0 %1516 }
 0x32c   : > { %v1534_v57 = vmul.f32 %v2901_v56, %v1517_v36  ;;  %v1515_v58 = vpop.permute.xlu1 %1514 }
 0x32d   : > { %v1533_v44 = vmul.f32 %v2904_v59, %v1515_v58 }
 0x32e   : > { %1556 = vrot.lane.b32.xlu0 %v1534_v57, %s2464_s25 }
 0x32f   : > { %v1456_v45 = vpop.permute.xlu0 %1455  ;;  %1554 = vrot.lane.b32.xlu1 %v1533_v44, %s2464_s25 }
 0x330   : > { %1480 = vst.msk [vmem:[%s320_s12] sm:$0xff] %vm1479_vm3, %v1456_v45  ;;  %v1519_v51 = vpop.permute.xlu1 %1518 }
 0x331   : > { %v1535_v60 = vmul.f32 %v2909_v62, %v1519_v51 }
 0x333   : > { %v1460_v53 = vpop.permute.xlu0 %1459  ;;  %1558 = vrot.lane.b32.xlu1 %v1535_v60, %s2464_s25 }
 0x334   : > { %1482 = vst.msk [vmem:[%s320_s12 + $0x10] sm:$0xff] %vm1479_vm3, %v1460_v53  ;;  %v1458_v56 = vpop.permute.xlu1 %1457 }
 0x335   : > { %1481 = vst.msk [vmem:[%s320_s12 + $0x8] sm:$0xff] %vm1479_vm3, %v1458_v56 }
 0x337   : > { %v1464_v61 = vpop.permute.xlu0 %1463 }
 0x338   : > { %1484 = vst.msk [vmem:[%s320_s12 + $0x20] sm:$0xff] %vm1479_vm3, %v1464_v61  ;;  %v1462_v59 = vpop.permute.xlu1 %1461 }
 0x339   : > { %1483 = vst.msk [vmem:[%s320_s12 + $0x18] sm:$0xff] %vm1479_vm3, %v1462_v59 }
 0x33b   : > { %v1468_v63 = vpop.permute.xlu0 %1467 }
 0x33c   : > { %1486 = vst.msk [vmem:[%s320_s12 + $0x30] sm:$0xff] %vm1479_vm3, %v1468_v63  ;;  %v1466_v62 = vpop.permute.xlu1 %1465 }
 0x33d   : > { %1485 = vst.msk [vmem:[%s320_s12 + $0x28] sm:$0xff] %vm1479_vm3, %v1466_v62 }
 0x340   : > { %v1470_v0 = vpop.permute.xlu1 %1469 }
 0x341   : > { %1487 = vst.msk [vmem:[%s320_s12 + $0x38] sm:$0xff] %vm1479_vm3, %v1470_v0 }
 0x342   : > { %2359 = shalt.err (!%p2356_p3)
}
 0x343   : > { %s2360_s11 = scalar_lea.hbm %s2953_s27, 1024  ;;  %s2364_s25 = scalar_lea.hbm %s3051_s5, 2048 }
 0x344   : > { %p2361_p9 = scmp.ne.s32.totalorder %s2953_s27, %s2360_s11  ;;  %p2365_p7 = scmp.lt.u32.totalorder %s2953_s27, %s3051_s5 }
 0x345   : > { %p2366_p5 = scmp.lt.u32.totalorder %s2364_s25, %s2360_s11  ;;  %p2368_p8 = scmp.lt.u32.totalorder %s2360_s11, %s2953_s27 }
 0x346   : > { %p2362_p10 = pnand %p2361_p9, %p3073_p4 }
 0x347   : > { %p2367_p1 = por %p2366_p5, %p2365_p7 }
 0x348   : > { %p2363_p6 = pneg %p2362_p10 }
 0x349   : > { %p2369_p2 = por %p2368_p8, %p2367_p1 }
 0x34b   : > { %p2370_p11 = pnand %p2369_p2, %p2363_p6 }
 0x34d   : > { %2373 = shalt.err (!%p2370_p11)
}
 0x34e   : > { %s2466_s16 = smov 128   ;;  %s313_s26 = scalar_lea.vmem [#allocation10], %s2724_s7 }
 0x34f   : > { %2094 = dma.vmem_to_hbm [thread:$0]  (%p3073_p4), %s2946_s14, 1024, %s2953_s27, %s1582_s10, %s2466_s16, %s2466_s16, %s2462_s15  }
 0x350   : > { %s1595_s7 = sshll.u32 %s313_s26, 4  ;;  %s2998_s10 = scalar_lea.hbm %s3050_s4, %s1875_s24  ;;  %s2991_s7 = int_to_ptr.vmem [resolvable:$true] %s1595_s7 }
 0x351   : > { %s1577_s28 = scalar_lea.sflag [#allocation4], %s2709_s13  ;;  %s2374_s17 = scalar_lea.vmem %s2991_s7, 1024 }
 0x352   : > { %p2375_p13 = scmp.ne.s32.totalorder %s2991_s7, %s2374_s17  ;;  %s2467_s8 = smov [#allocation10]  }
 0x353   : > { %s2378_s11 = sshll.u32 %s2467_s8, 4  ;;  %s2379_s11 = int_to_ptr.vmem [resolvable:$false] %s2378_s11 }
 0x354   : > { %p2376_p0 = pnand %p2375_p13, %p3073_p4  ;;  %s2380_s22 = scalar_lea.vmem %s2379_s11, 2048 }
 0x355   : > { %p2381_p3 = scmp.lt.s32.totalorder %s2991_s7, %s2379_s11  ;;  %p2382_p9 = scmp.lt.s32.totalorder %s2380_s22, %s2374_s17 }
 0x356   : > { %p2377_p12 = pneg %p2376_p0 }
 0x357   : > { %p2383_p10 = por %p2382_p9, %p2381_p3 }
 0x359   : > { %p2384_p6 = pnand %p2383_p10, %p2377_p12 }
 0x393   : > { %v1549_v1 = vpop.permute.xlu0 %1548 }
 0x394   : > { %1570 = vst.msk [vmem:[%s313_s26 + $0x10] sm:$0xff] %vm1479_vm3, %v1549_v1 }
 0x397   : > { %v1545_v2 = vpop.permute.xlu0 %1544 }
 0x398   : > { %1568 = vst.msk [vmem:[%s313_s26] sm:$0xff] %vm1479_vm3, %v1545_v2  ;;  %v1551_v3 = vpop.permute.xlu1 %1550 }
 0x399   : > { %1571 = vst.msk [vmem:[%s313_s26 + $0x18] sm:$0xff] %vm1479_vm3, %v1551_v3 }
 0x39c   : > { %v1547_v5 = vpop.permute.xlu1 %1546  ;;  %v1553_v6 = vpop.permute.xlu0 %1552 }
 0x39d   : > { %1569 = vst.msk [vmem:[%s313_s26 + $0x8] sm:$0xff] %vm1479_vm3, %v1547_v5  ;;  %1572 = vst.msk [vmem:[%s313_s26 + $0x20] sm:$0xff] %vm1479_vm3, %v1553_v6 }
 0x3a0   : > { %v1557_v7 = vpop.permute.xlu0 %1556 }
 0x3a1   : > { %1574 = vst.msk [vmem:[%s313_s26 + $0x30] sm:$0xff] %vm1479_vm3, %v1557_v7  ;;  %v1555_v8 = vpop.permute.xlu1 %1554 }
 0x3a2   : > { %1573 = vst.msk [vmem:[%s313_s26 + $0x28] sm:$0xff] %vm1479_vm3, %v1555_v8 }
 0x3a5   : > { %v1559_v9 = vpop.permute.xlu1 %1558 }
 0x3a6   : > { %1575 = vst.msk [vmem:[%s313_s26 + $0x38] sm:$0xff] %vm1479_vm3, %v1559_v9 }
 0x3a7   : > { %2387 = shalt.err (!%p2384_p6)
}
 0x3a8   : > { %s2388_s24 = scalar_lea.hbm %s2998_s10, 1024  ;;  %s2392_s25 = scalar_lea.hbm %s3050_s4, 2048 }
 0x3a9   : > { %p2389_p7 = scmp.ne.s32.totalorder %s2998_s10, %s2388_s24  ;;  %p2393_p8 = scmp.lt.u32.totalorder %s2998_s10, %s3050_s4 }
 0x3aa   : > { %p2394_p2 = scmp.lt.u32.totalorder %s2392_s25, %s2388_s24  ;;  %p2396_p13 = scmp.lt.u32.totalorder %s2388_s24, %s2998_s10 }
 0x3ab   : > { %p2390_p5 = pnand %p2389_p7, %p3073_p4 }
 0x3ac   : > { %p2395_p11 = por %p2394_p2, %p2393_p8 }
 0x3ad   : > { %p2391_p1 = pneg %p2390_p5 }
 0x3ae   : > { %p2397_p0 = por %p2396_p13, %p2395_p11 }
 0x3b0   : > { %p2398_p12 = pnand %p2397_p0, %p2391_p1 }
 0x3b2   : > { %2401 = shalt.err (!%p2398_p12)
}
 0x3b3   : > { %2093 = dma.vmem_to_hbm [thread:$0]  (%p3073_p4), %s2991_s7, 1024, %s2998_s10, %s1577_s28, %s2466_s16, %s2466_s16, %s2462_s15  }
 0x3b4 PF: > { %s1626_s26 = sand.u32 1, %s2440_s18   ;;  %p3074_p3 = scmp.ne.s32.totalorder %s3063_s6, 0 }
 0x3b5   : > { %p3075_p9 = scmp.ge.s32.totalorder %s2452_s21, 2  ;;  %s1627_s14 = scalar_lea.sflag [#allocation4], %s1626_s26 }
 0x3b7   : > { %p2112_p10 = pnand %p3075_p9, %p3074_p3 }
 0x3b9   : > { %2431 = dma.done.wait (!%p2112_p10), %s1627_s14, 1024  }
 0x3ba   : > { %2433 = vsyncadd (!%p2112_p10), %s1627_s14, 4294966272  ;;  %s1636_s30 = scalar_lea.sflag [#allocation12], %s1626_s26 }
 0x3bb   : > { %2435 = dma.done.wait (!%p2112_p10), %s1636_s30, 1024  }
 0x3bc   : > { %2437 = vsyncadd (!%p2112_p10), %s1636_s30, 4294966272  ;;  %s3076_s21 = sld [smem:[#allocation18_spill]]  ;;  %s3077_s13 = sld [smem:[#allocation19_spill]] }
 0x3bd   : > { %s3078_s18 = smov %s2444_s19  ;;  %s3079_s19 = smov %s2448_s20 }
 0x3c2   : > { %p26_p4 = scmp.ge.s32.totalorder %s3076_s21, 4   ;;  %s3080_s20 = smov %s3077_s13 }
 0x3c4   :  { %28 = sbr.rel (!%p26_p4) target bundleno = 10 (0xa), region = 129 }
 0x3cb   :  { %1641 = vsyncpa [#allocation3], 1 }
 0x3cc   :  { %1643 = vsyncpa [#allocation3 + $0x1], 1 }
 0x3cd   :  { %1644 = vsyncpa [#allocation6], 1 }
 0x3ce   :  { %1645 = vsyncpa [#allocation9], 1 }
 0x3cf   :  { %1647 = vsyncpa [#allocation9 + $0x1], 1 }
 0x3d0   :  { %1648 = vsyncpa [#allocation4], 1 }
 0x3d1   :  { %1650 = vsyncpa [#allocation4 + $0x1], 1 }
 0x3d2   :  { %1651 = vsyncpa [#allocation12], 1 }
 0x3d3   :  { %1653 = vsyncpa [#allocation12 + $0x1], 1 }

// kernel: mduvsr_forward.17
= control target key start
LH: loop header
LB: loop body
LE: loop exit
PB: predicated region body
PF: predicated region fallthrough
CT: control target
= control target key end

     0   :  { %8 = vsyncpa [#allocation3], 0  ;;  %s554_s0 = inlined_call_operand.hbm [shape: f32[128,99], index: 0, kind: input, shape index: {}]   ;;  %s555_s1 = inlined_call_operand.hbm [shape: f32[99,8], index: 1, kind: input, shape index: {}]   ;;  %s556_s2 = inlined_call_operand.hbm [shape: f32[1,8], index: 2, kind: input, shape index: {}]   ;;  %s557_s3 = inlined_call_operand.hbm [shape: f32[128,8], index: 3, kind: output, shape index: {}]  }
   0x1   :  { %9 = vsyncpa [#allocation6], 0 }
   0x2   :  { %10 = vsyncpa [#allocation4], 0  ;;  %s439_s12 = smov [#allocation5]   ;;  %s440_s14 = smov [#allocation2]  }
   0x3   :  { %s28_s13 = sshll.u32 %s439_s12, 4  ;;  %s16_s15 = sshll.u32 %s440_s14, 4  ;;  %s29_s13 = int_to_ptr.vmem [resolvable:$true] %s28_s13  ;;  %s466_s15 = int_to_ptr.vmem [resolvable:$true] %s16_s15 }
   0x4   :  { %s345_s18 = scalar_lea.hbm %s555_s1, 1664 }
   0x5   :  { %p346_p0 = scmp.ne.s32.totalorder %s555_s1, %s345_s18  ;;  %p349_p1 = scmp.lt.u32.totalorder %s345_s18, %s555_s1 }
   0x7   :  { %p351_p2 = pnand %p349_p1, %p346_p0 }
   0x9   :  { %354 = shalt.err (!%p351_p2)
}
   0xa   :  { %s355_s23 = scalar_lea.vmem %s29_s13, 1664  ;;  %p360_p4 = scmp.lt.s32.totalorder %s29_s13, %s29_s13 }
   0xb   :  { %p356_p3 = scmp.ne.s32.totalorder %s29_s13, %s355_s23  ;;  %p361_p5 = scmp.lt.s32.totalorder %s355_s23, %s355_s23 }
   0xd   :  { %p362_p6 = por %p361_p5, %p360_p4 }
   0xf   :  { %p363_p7 = pnand %p362_p6, %p356_p3 }
  0x11   :  { %366 = shalt.err (!%p363_p7)
}
  0x12   :  { %s441_s24 = smov 128   ;;  %s442_s25 = smov 8  }
  0x13   :  { %34 = dma.hbm_to_vmem [thread:$0]  %s555_s1, 1664, %s29_s13, [#allocation6], %s441_s24, %s441_s24, %s442_s25  }
  0x14   :  { %s367_s30 = scalar_lea.hbm %s554_s0, 2048 }
  0x15   :  { %p368_p8 = scmp.ne.s32.totalorder %s554_s0, %s367_s30  ;;  %p371_p9 = scmp.lt.u32.totalorder %s367_s30, %s554_s0 }
  0x17   :  { %p373_p10 = pnand %p371_p9, %p368_p8 }
  0x19   :  { %376 = shalt.err (!%p373_p10)
}
  0x1a   :  { %s377_s8 = scalar_lea.vmem %s466_s15, 2048  ;;  %p382_p12 = scmp.lt.s32.totalorder %s466_s15, %s466_s15 }
  0x1b   :  { %p378_p11 = scmp.ne.s32.totalorder %s466_s15, %s377_s8  ;;  %p383_p13 = scmp.lt.s32.totalorder %s377_s8, %s377_s8 }
  0x1d   :  { %p384_p0 = por %p383_p13, %p382_p12 }
  0x1f   :  { %p385_p1 = pnand %p384_p0, %p378_p11 }
  0x21   :  { %388 = shalt.err (!%p385_p1)
}
  0x22   :  { %22 = dma.hbm_to_vmem [thread:$0]  %s554_s0, 2048, %s466_s15, [#allocation3], %s441_s24, %s441_s24, %s442_s25  }
  0x23   :  { %s443_s10 = smov [#allocation7]   ;;  %s389_s14 = scalar_lea.hbm %s556_s2, 16 }
  0x24   :  { %s41_s11 = sshll.u32 %s443_s10, 4  ;;  %p390_p2 = scmp.ne.s32.totalorder %s556_s2, %s389_s14  ;;  %s42_s11 = int_to_ptr.vmem [resolvable:$true] %s41_s11 }
  0x25   :  { %p393_p3 = scmp.lt.u32.totalorder %s389_s14, %s556_s2 }
  0x27   :  { %p395_p4 = pnand %p393_p3, %p390_p2 }
  0x29   :  { %398 = shalt.err (!%p395_p4)
}
  0x2a   :  { %s399_s20 = scalar_lea.vmem %s42_s11, 16  ;;  %s403_s0 = scalar_lea.vmem %s42_s11, 32 }
  0x2b   :  { %p400_p5 = scmp.ne.s32.totalorder %s42_s11, %s399_s20  ;;  %p404_p6 = scmp.lt.s32.totalorder %s42_s11, %s42_s11 }
  0x2c   :  { %p405_p7 = scmp.lt.s32.totalorder %s403_s0, %s399_s20 }
  0x2e   :  { %p406_p8 = por %p405_p7, %p404_p6 }
  0x30   :  { %p407_p9 = pnand %p406_p8, %p400_p5 }
  0x32   :  { %410 = shalt.err (!%p407_p9)
}
  0x33   :  { %44 = dma.hbm_to_vmem [thread:$0]  %s556_s2, 16, %s42_s11, [#allocation6]  }
  0x34   :  { %433 = dma.done.wait [#allocation3], 2048  }
  0x35   :  { %434 = vsyncadd [#allocation3], 4294965248 }
  0x36   :  { %435 = dma.done.wait [#allocation6], 1680  }
  0x37   :  { %436 = vsyncadd [#allocation6], 4294965616  ;;  %v79_v0 = vld [vmem:[#allocation5] sm:$0xff]  ;;  %v80_v1 = vld [vmem:[#allocation5 + $0x8] sm:$0xff]  ;;  %vm106_vm0 = vcmask 809984   ;;  %vm131_vm1 = vcmask 1040384  }
  0x38   :  { %v81_v2 = vld [vmem:[#allocation5 + $0x10] sm:$0xff]  ;;  %v92_v3 = vpack.c.bf16 %v80_v1, %v79_v0  ;;  %v82_v4 = vld [vmem:[#allocation5 + $0x18] sm:$0xff]  ;;  %v83_v6 = vld [vmem:[#allocation5 + $0x20] sm:$0xff]  ;;  %vm132_vm2 = vcmask 1041408   ;;  %v444_v24 = vmov 65535   ;;  %vm235_vm3 = vcmask 64512  }
  0x39   :  { %v93_v5 = vpack.c.bf16 %v82_v4, %v81_v2  ;;  %v84_v7 = vld [vmem:[#allocation5 + $0x28] sm:$0xff]  ;;  %v55_v8 = vld [vmem:[#allocation2] sm:$0xff]  ;;  %v85_v14 = vld [vmem:[#allocation5 + $0x30] sm:$0xff]  ;;  %v133_v25 = vsel %vm131_vm1, 4294967295, %v444_v24  ;;  %s445_s2 = smov [#allocation8]  }
  0x3a   :  { %294 = vmatprep.subr.bf16.mxu0 %v92_v3  ;;  %324 = vmatprep.subr.bf16.mxu1 %v92_v3  ;;  %v56_v9 = vld [vmem:[#allocation2 + $0x8] sm:$0xff]  ;;  %v94_v10 = vpack.c.bf16 %v84_v7, %v83_v6  ;;  %v63_v12 = vld [vmem:[#allocation2 + $0x40] sm:$0xff]  ;;  %v86_v15 = vld [vmem:[#allocation5 + $0x38] sm:$0xff]  ;;  %v134_v28 = vsel %vm132_vm2, %v133_v25, 0  ;;  %s257_s22 = sshll.u32 %s445_s2, 4  ;;  %s258_s22 = int_to_ptr.vmem [resolvable:$true] %s257_s22 }
  0x3b   :  { %295 = vmatpush3.bf16.msra.mxu0 %v92_v3  ;;  %331 = vmatpush3.bf16.msra.mxu1 %v92_v3  ;;  %v71_v11 = vpack.c.bf16 %v56_v9, %v55_v8  ;;  %v64_v13 = vld [vmem:[#allocation2 + $0x48] sm:$0xff]  ;;  %v95_v17 = vpack.c.bf16 %v86_v15, %v85_v14  ;;  %v87_v18 = vld [vmem:[#allocation5 + $0x40] sm:$0xff]  ;;  %v89_v21 = vld [vmem:[#allocation5 + $0x50] sm:$0xff]  ;;  %s411_s23 = scalar_lea.vmem %s258_s22, 2048  ;;  %p416_p11 = scmp.lt.s32.totalorder %s258_s22, %s258_s22 }
  0x3c   :  { %296 = vmatprep.subr.bf16.mxu0 %v93_v5  ;;  %325 = vmatprep.subr.bf16.mxu1 %v93_v5  ;;  %v75_v16 = vpack.c.bf16 %v64_v13, %v63_v12  ;;  %v88_v19 = vld [vmem:[#allocation5 + $0x48] sm:$0xff]  ;;  %v90_v22 = vld [vmem:[#allocation5 + $0x58] sm:$0xff]  ;;  %v91_v23 = vld [vmem:[#allocation5 + $0x60] sm:$0x7]  ;;  %p412_p10 = scmp.ne.s32.totalorder %s258_s22, %s411_s23  ;;  %p417_p12 = scmp.lt.s32.totalorder %s411_s23, %s411_s23 }
  0x3d   :  { %308 = vmatprep.mubr.msk.bf16.mxu0 %vm106_vm0, %v71_v11  ;;  %v96_v20 = vpack.c.bf16 %v88_v19, %v87_v18  ;;  %v97_v26 = vpack.c.bf16 %v90_v22, %v89_v21  ;;  %v98_v27 = vpack.c.bf16 %v91_v23, %v91_v23  ;;  %v57_v30 = vld [vmem:[#allocation2 + $0x10] sm:$0xff]  ;;  %v58_v31 = vld [vmem:[#allocation2 + $0x18] sm:$0xff]  ;;  %v59_v34 = vld [vmem:[#allocation2 + $0x20] sm:$0xff] }
  0x3e   :  { %316 = vmatprep.mubr.msk.bf16.mxu1 %vm106_vm0, %v75_v16  ;;  %v65_v32 = vld [vmem:[#allocation2 + $0x50] sm:$0xff]  ;;  %v66_v33 = vld [vmem:[#allocation2 + $0x58] sm:$0xff]  ;;  %v60_v35 = vld [vmem:[#allocation2 + $0x28] sm:$0xff]  ;;  %v72_v38 = vpack.c.bf16 %v58_v31, %v57_v30  ;;  %p418_p13 = por %p417_p12, %p416_p11 }
  0x3f   :  { %297 = vmatpush3.bf16.msra.mxu0 %v93_v5  ;;  %332 = vmatpush3.bf16.msra.mxu1 %v93_v5  ;;  %v136_v29 = vand.u32 %v134_v28, %v98_v27  ;;  %v67_v36 = vld [vmem:[#allocation2 + $0x60] sm:$0xff]  ;;  %v68_v37 = vld [vmem:[#allocation2 + $0x68] sm:$0xff]  ;;  %v76_v39 = vpack.c.bf16 %v66_v33, %v65_v32  ;;  %v73_v40 = vpack.c.bf16 %v60_v35, %v59_v34  ;;  %v61_v42 = vld [vmem:[#allocation2 + $0x30] sm:$0xff] }
  0x40   :  { %298 = vmatprep.subr.bf16.mxu0 %v94_v10  ;;  %326 = vmatprep.subr.bf16.mxu1 %v94_v10  ;;  %v77_v41 = vpack.c.bf16 %v68_v37, %v67_v36  ;;  %v62_v43 = vld [vmem:[#allocation2 + $0x38] sm:$0xff]  ;;  %v69_v44 = vld [vmem:[#allocation2 + $0x70] sm:$0xff]  ;;  %v270_v48 = vld [vmem:[#allocation7] ss:$0 sm:$0xff]  ;;  %p419_p0 = pnand %p418_p13, %p412_p10 }
  0x41   :  { %v70_v45 = vld [vmem:[#allocation2 + $0x78] sm:$0xff]  ;;  %v74_v46 = vpack.c.bf16 %v62_v43, %v61_v42 }
  0x42   :  { %v78_v47 = vpack.c.bf16 %v70_v45, %v69_v44 }
  0x43   :  { %299 = vmatpush3.bf16.msra.mxu0 %v94_v10  ;;  %333 = vmatpush3.bf16.msra.mxu1 %v94_v10 }
  0x44   :  { %300 = vmatprep.subr.bf16.mxu0 %v95_v17  ;;  %327 = vmatprep.subr.bf16.mxu1 %v95_v17 }
  0x47   :  { %301 = vmatpush3.bf16.msra.mxu0 %v95_v17  ;;  %334 = vmatpush3.bf16.msra.mxu1 %v95_v17 }
  0x48   :  { %302 = vmatprep.subr.bf16.mxu0 %v96_v20  ;;  %328 = vmatprep.subr.bf16.mxu1 %v96_v20 }
  0x4b   :  { %303 = vmatpush3.bf16.msra.mxu0 %v96_v20  ;;  %335 = vmatpush3.bf16.msra.mxu1 %v96_v20 }
  0x4c   :  { %304 = vmatprep.subr.bf16.mxu0 %v97_v26  ;;  %329 = vmatprep.subr.bf16.mxu1 %v97_v26 }
  0x4f   :  { %305 = vmatpush3.bf16.msra.mxu0 %v97_v26  ;;  %336 = vmatpush3.bf16.msra.mxu1 %v97_v26 }
  0x50   :  { %306 = vmatprep.subr.bf16.mxu0 %v136_v29  ;;  %330 = vmatprep.subr.bf16.mxu1 %v136_v29 }
  0x53   :  { %307 = vmatpush3.bf16.msra.mxu0 %v136_v29  ;;  %337 = vmatpush3.bf16.msra.mxu1 %v136_v29 }
  0x56   :  { %309 = vmatmul.mubr.msk.bf16.vlgmr.msra.gmra.mrb[0].mxu0 %vm106_vm0, %v72_v38  ;;  %317 = vmatmul.mubr.msk.bf16.vlgmr.msra.gmra.mrb[0].mxu1 %vm106_vm0, %v76_v39 }
  0x57   :  { %312 = vmatprep.mubr.msk.bf16.mxu0 %vm106_vm0, %v73_v40  ;;  %320 = vmatprep.mubr.msk.bf16.mxu1 %vm106_vm0, %v77_v41 }
  0x5e   :  { %313 = vmatmul.mubr.msk.bf16.gmra.mrb[4].mxu0 %vm106_vm0, %v74_v46  ;;  %321 = vmatmul.mubr.msk.bf16.gmra.mrb[4].mxu1 %vm106_vm0, %v78_v47 }
 0x129   :  { %v310_v49 = vpop.f32.mrb[0].mxu0  ;;  %v318_v50 = vpop.f32.mrb[0].mxu1 }
 0x12a   :  { %v181_v51 = vadd.f32 %v310_v49, %v270_v48  ;;  %v213_v52 = vadd.f32 %v318_v50, %v270_v48  ;;  %v172_v53 = vpop.f32.mrb[1].mxu0  ;;  %v204_v54 = vpop.f32.mrb[1].mxu1 }
 0x12b   :  { %v173_v55 = vadd.f32 %v270_v48, %v172_v53  ;;  %v205_v56 = vadd.f32 %v270_v48, %v204_v54  ;;  %v311_v57 = vpop.f32.mrb[2].mxu0  ;;  %v319_v58 = vpop.f32.mrb[2].mxu1 }
 0x12c   :  { %238 = vst.msk [vmem:[#allocation8 + $0x10] sm:$0xff] %vm235_vm3, %v181_v51  ;;  %246 = vst.msk [vmem:[#allocation8 + $0x50] sm:$0xff] %vm235_vm3, %v213_v52  ;;  %v184_v59 = vadd.f32 %v311_v57, %v270_v48  ;;  %v216_v60 = vadd.f32 %v319_v58, %v270_v48  ;;  %v175_v61 = vpop.f32.mrb[3].mxu0  ;;  %v207_v62 = vpop.f32.mrb[3].mxu1 }
 0x12d   :  { %236 = vst.msk [vmem:[#allocation8] sm:$0xff] %vm235_vm3, %v173_v55  ;;  %244 = vst.msk [vmem:[#allocation8 + $0x40] sm:$0xff] %vm235_vm3, %v205_v56  ;;  %v176_v63 = vadd.f32 %v270_v48, %v175_v61  ;;  %v208_v0 = vadd.f32 %v270_v48, %v207_v62 }
 0x12e   :  { %239 = vst.msk [vmem:[#allocation8 + $0x18] sm:$0xff] %vm235_vm3, %v184_v59  ;;  %247 = vst.msk [vmem:[#allocation8 + $0x58] sm:$0xff] %vm235_vm3, %v216_v60 }
 0x12f   :  { %237 = vst.msk [vmem:[#allocation8 + $0x8] sm:$0xff] %vm235_vm3, %v176_v63  ;;  %245 = vst.msk [vmem:[#allocation8 + $0x48] sm:$0xff] %vm235_vm3, %v208_v0 }
 0x131   :  { %v314_v1 = vpop.f32.mrb[4].mxu0  ;;  %v322_v2 = vpop.f32.mrb[4].mxu1 }
 0x132   :  { %v197_v3 = vadd.f32 %v314_v1, %v270_v48  ;;  %v229_v4 = vadd.f32 %v322_v2, %v270_v48  ;;  %v188_v5 = vpop.f32.mrb[5].mxu0  ;;  %v220_v6 = vpop.f32.mrb[5].mxu1 }
 0x133   :  { %v189_v7 = vadd.f32 %v270_v48, %v188_v5  ;;  %v221_v8 = vadd.f32 %v270_v48, %v220_v6  ;;  %v315_v9 = vpop.f32.mrb[6].mxu0  ;;  %v323_v10 = vpop.f32.mrb[6].mxu1 }
 0x134   :  { %242 = vst.msk [vmem:[#allocation8 + $0x30] sm:$0xff] %vm235_vm3, %v197_v3  ;;  %250 = vst.msk [vmem:[#allocation8 + $0x70] sm:$0xff] %vm235_vm3, %v229_v4  ;;  %v200_v11 = vadd.f32 %v315_v9, %v270_v48  ;;  %v232_v12 = vadd.f32 %v323_v10, %v270_v48  ;;  %v191_v13 = vpop.f32.mrb[7].mxu0  ;;  %v223_v14 = vpop.f32.mrb[7].mxu1 }
 0x135   :  { %240 = vst.msk [vmem:[#allocation8 + $0x20] sm:$0xff] %vm235_vm3, %v189_v7  ;;  %248 = vst.msk [vmem:[#allocation8 + $0x60] sm:$0xff] %vm235_vm3, %v221_v8  ;;  %v192_v15 = vadd.f32 %v270_v48, %v191_v13  ;;  %v224_v16 = vadd.f32 %v270_v48, %v223_v14 }
 0x136   :  { %243 = vst.msk [vmem:[#allocation8 + $0x38] sm:$0xff] %vm235_vm3, %v200_v11  ;;  %251 = vst.msk [vmem:[#allocation8 + $0x78] sm:$0xff] %vm235_vm3, %v232_v12 }
 0x137   :  { %241 = vst.msk [vmem:[#allocation8 + $0x28] sm:$0xff] %vm235_vm3, %v192_v15  ;;  %249 = vst.msk [vmem:[#allocation8 + $0x68] sm:$0xff] %vm235_vm3, %v224_v16 }
 0x138   :  { %422 = shalt.err (!%p419_p0)
}
 0x139   :  { %s423_s28 = scalar_lea.hbm %s557_s3, 2048 }
 0x13a   :  { %p424_p1 = scmp.ne.s32.totalorder %s557_s3, %s423_s28  ;;  %p427_p2 = scmp.lt.u32.totalorder %s423_s28, %s557_s3 }
 0x13c   :  { %p429_p3 = pnand %p427_p2, %p424_p1 }
 0x13e   :  { %432 = shalt.err (!%p429_p3)
}
 0x13f   :  { %263 = dma.vmem_to_hbm [thread:$0]  %s258_s22, 2048, %s557_s3, [#allocation4], %s441_s24, %s441_s24, %s442_s25  }
 0x140   :  { %437 = dma.done.wait [#allocation4], 2048  }
 0x141   :  { %438 = vsyncadd [#allocation4], 4294965248 }
 0x142   :  { %267 = vsyncpa [#allocation3], 1 }
 0x143   :  { %268 = vsyncpa [#allocation6], 1 }
 0x144   :  { %269 = vsyncpa [#allocation4], 1 }

// kernel: mduvsr_forward.22
= control target key start
LH: loop header
LB: loop body
LE: loop exit
PB: predicated region body
PF: predicated region fallthrough
CT: control target
= control target key end

     0   :  { %10 = vsyncpa [#allocation3], 0  ;;  %s992_s0 = inlined_call_operand.hbm [shape: f32[128,11], index: 0, kind: input, shape index: {}]   ;;  %s993_s1 = inlined_call_operand.hbm [shape: f32[11,32], index: 1, kind: input, shape index: {}]   ;;  %s994_s2 = inlined_call_operand.hbm [shape: f32[1,32], index: 2, kind: input, shape index: {}]   ;;  %s995_s3 = inlined_call_operand.hbm [shape: f32[1,32], index: 3, kind: input, shape index: {}]   ;;  %s996_s4 = inlined_call_operand.hbm [shape: f32[1,32], index: 4, kind: input, shape index: {}]   ;;  %s997_s5 = inlined_call_operand.hbm [shape: f32[128,32], index: 5, kind: output, shape index: {}]  }
   0x1   :  { %11 = vsyncpa [#allocation6], 0 }
   0x2   :  { %12 = vsyncpa [#allocation9], 0 }
   0x3   :  { %13 = vsyncpa [#allocation4], 0  ;;  %s694_s18 = smov [#allocation5]   ;;  %s695_s20 = smov [#allocation8]  }
   0x4   :  { %s31_s19 = sshll.u32 %s694_s18, 4  ;;  %s54_s21 = sshll.u32 %s695_s20, 4  ;;  %s32_s19 = int_to_ptr.vmem [resolvable:$true] %s31_s19  ;;  %s733_s21 = int_to_ptr.vmem [resolvable:$true] %s54_s21 }
   0x5   :  { %s554_s24 = scalar_lea.hbm %s993_s1, 256 }
   0x6   :  { %p555_p0 = scmp.ne.s32.totalorder %s993_s1, %s554_s24  ;;  %p558_p1 = scmp.lt.u32.totalorder %s554_s24, %s993_s1 }
   0x8   :  { %p560_p2 = pnand %p558_p1, %p555_p0 }
   0xa   :  { %563 = shalt.err (!%p560_p2)
}
   0xb   :  { %s564_s29 = scalar_lea.vmem %s32_s19, 256  ;;  %p569_p4 = scmp.lt.s32.totalorder %s32_s19, %s32_s19 }
   0xc   :  { %p565_p3 = scmp.ne.s32.totalorder %s32_s19, %s564_s29  ;;  %p570_p5 = scmp.lt.s32.totalorder %s564_s29, %s564_s29 }
   0xe   :  { %p571_p6 = por %p570_p5, %p569_p4 }
  0x10   :  { %p572_p7 = pnand %p571_p6, %p565_p3 }
  0x12   :  { %575 = shalt.err (!%p572_p7)
}
  0x13   :  { %s696_s30 = smov 128   ;;  %s697_s6 = smov 8  }
  0x14   :  { %37 = dma.hbm_to_vmem [thread:$0]  %s993_s1, 256, %s32_s19, [#allocation6], %s696_s30, %s696_s30, %s697_s6  }
  0x15   :  { %s576_s11 = scalar_lea.hbm %s995_s3, 16 }
  0x16   :  { %p577_p8 = scmp.ne.s32.totalorder %s995_s3, %s576_s11  ;;  %p580_p9 = scmp.lt.u32.totalorder %s576_s11, %s995_s3 }
  0x18   :  { %p582_p10 = pnand %p580_p9, %p577_p8 }
  0x1a   :  { %585 = shalt.err (!%p582_p10)
}
  0x1b   :  { %s586_s16 = scalar_lea.vmem %s733_s21, 16  ;;  %s590_s1 = scalar_lea.vmem %s733_s21, 32 }
  0x1c   :  { %p587_p11 = scmp.ne.s32.totalorder %s733_s21, %s586_s16  ;;  %p591_p12 = scmp.lt.s32.totalorder %s733_s21, %s733_s21 }
  0x1d   :  { %p592_p13 = scmp.lt.s32.totalorder %s590_s1, %s586_s16 }
  0x1f   :  { %p593_p0 = por %p592_p13, %p591_p12 }
  0x21   :  { %p594_p1 = pnand %p593_p0, %p587_p11 }
  0x23   :  { %597 = shalt.err (!%p594_p1)
}
  0x24   :  { %57 = dma.hbm_to_vmem [thread:$0]  %s995_s3, 16, %s733_s21, [#allocation9]  }
  0x25   :  { %s698_s19 = smov [#allocation2]   ;;  %s699_s22 = smov [#allocation7]  }
  0x26   :  { %s19_s20 = sshll.u32 %s698_s19, 4  ;;  %s44_s23 = sshll.u32 %s699_s22, 4  ;;  %s20_s20 = int_to_ptr.vmem [resolvable:$true] %s19_s20  ;;  %s45_s23 = int_to_ptr.vmem [resolvable:$true] %s44_s23 }
  0x27   :  { %s598_s26 = scalar_lea.hbm %s992_s0, 2048 }
  0x28   :  { %p599_p2 = scmp.ne.s32.totalorder %s992_s0, %s598_s26  ;;  %p602_p3 = scmp.lt.u32.totalorder %s598_s26, %s992_s0 }
  0x2a   :  { %p604_p4 = pnand %p602_p3, %p599_p2 }
  0x2c   :  { %607 = shalt.err (!%p604_p4)
}
  0x2d   :  { %s608_s3 = scalar_lea.vmem %s20_s20, 2048  ;;  %p613_p6 = scmp.lt.s32.totalorder %s20_s20, %s20_s20 }
  0x2e   :  { %p609_p5 = scmp.ne.s32.totalorder %s20_s20, %s608_s3  ;;  %p614_p7 = scmp.lt.s32.totalorder %s608_s3, %s608_s3 }
  0x30   :  { %p615_p8 = por %p614_p7, %p613_p6 }
  0x32   :  { %p616_p9 = pnand %p615_p8, %p609_p5 }
  0x34   :  { %619 = shalt.err (!%p616_p9)
}
  0x35   :  { %25 = dma.hbm_to_vmem [thread:$0]  %s992_s0, 2048, %s20_s20, [#allocation3], %s696_s30, %s696_s30, %s697_s6  }
  0x36   :  { %s620_s11 = scalar_lea.hbm %s994_s2, 16 }
  0x37   :  { %p621_p10 = scmp.ne.s32.totalorder %s994_s2, %s620_s11  ;;  %p624_p11 = scmp.lt.u32.totalorder %s620_s11, %s994_s2 }
  0x39   :  { %p626_p12 = pnand %p624_p11, %p621_p10 }
  0x3b   :  { %629 = shalt.err (!%p626_p12)
}
  0x3c   :  { %s630_s16 = scalar_lea.vmem %s45_s23, 16  ;;  %s634_s1 = scalar_lea.vmem %s45_s23, 32 }
  0x3d   :  { %p631_p13 = scmp.ne.s32.totalorder %s45_s23, %s630_s16  ;;  %p635_p0 = scmp.lt.s32.totalorder %s45_s23, %s45_s23 }
  0x3e   :  { %p636_p1 = scmp.lt.s32.totalorder %s634_s1, %s630_s16 }
  0x40   :  { %p637_p2 = por %p636_p1, %p635_p0 }
  0x42   :  { %p638_p3 = pnand %p637_p2, %p631_p13 }
  0x44   :  { %641 = shalt.err (!%p638_p3)
}
  0x45   :  { %47 = dma.hbm_to_vmem [thread:$0]  %s994_s2, 16, %s45_s23, [#allocation6]  }
  0x46   :  { %s700_s18 = smov [#allocation10]   ;;  %s642_s24 = scalar_lea.hbm %s996_s4, 16 }
  0x47   :  { %s64_s19 = sshll.u32 %s700_s18, 4  ;;  %p643_p4 = scmp.ne.s32.totalorder %s996_s4, %s642_s24  ;;  %s65_s19 = int_to_ptr.vmem [resolvable:$true] %s64_s19 }
  0x48   :  { %p646_p5 = scmp.lt.u32.totalorder %s642_s24, %s996_s4 }
  0x4a   :  { %p648_p6 = pnand %p646_p5, %p643_p4 }
  0x4c   :  { %651 = shalt.err (!%p648_p6)
}
  0x4d   :  { %s652_s29 = scalar_lea.vmem %s65_s19, 16  ;;  %s656_s2 = scalar_lea.vmem %s65_s19, 32 }
  0x4e   :  { %p653_p7 = scmp.ne.s32.totalorder %s65_s19, %s652_s29  ;;  %p657_p8 = scmp.lt.s32.totalorder %s65_s19, %s65_s19 }
  0x4f   :  { %p658_p9 = scmp.lt.s32.totalorder %s656_s2, %s652_s29 }
  0x51   :  { %p659_p10 = por %p658_p9, %p657_p8 }
  0x53   :  { %p660_p11 = pnand %p659_p10, %p653_p7 }
  0x55   :  { %663 = shalt.err (!%p660_p11)
}
  0x56   :  { %67 = dma.hbm_to_vmem [thread:$0]  %s996_s4, 16, %s65_s19, [#allocation9]  }
  0x57   :  { %686 = dma.done.wait [#allocation3], 2048  }
  0x58   :  { %687 = vsyncadd [#allocation3], 4294965248 }
  0x59   :  { %688 = dma.done.wait [#allocation6], 272  }
  0x5a   :  { %689 = vsyncadd [#allocation6], 4294967024 }
  0x5b   :  { %690 = dma.done.wait [#allocation9], 32  }
  0x5c   :  { %691 = vsyncadd [#allocation9], 4294967264  ;;  %vm143_vm0 = vcmask 1044480   ;;  %vm144_vm1 = vcmask 1045504   ;;  %v701_v0 = vmov 65535   ;;  %v108_v2 = vld [vmem:[#allocation5] sm:$0xff] }
  0x5d   :  { %v145_v1 = vsel %vm143_vm0, 4294967295, %v701_v0  ;;  %v109_v3 = vld [vmem:[#allocation5 + $0x8] sm:$0x7]  ;;  %v84_v5 = vld [vmem:[#allocation2] sm:$0xff]  ;;  %vm118_vm2 = vcmask 89088   ;;  %v86_v12 = vld [vmem:[#allocation2 + $0x10] sm:$0xff] }
  0x5e   :  { %v146_v4 = vsel %vm144_vm1, %v145_v1, 0  ;;  %v110_v6 = vpack.c.bf16 %v109_v3, %v108_v2  ;;  %v85_v7 = vld [vmem:[#allocation2 + $0x8] sm:$0xff]  ;;  %v92_v8 = vld [vmem:[#allocation2 + $0x40] sm:$0xff]  ;;  %v87_v13 = vld [vmem:[#allocation2 + $0x18] sm:$0xff]  ;;  %vm437_vm3 = vcmask 261120   ;;  %s702_s4 = smov [#allocation11]  }
  0x5f   :  { %v93_v9 = vld [vmem:[#allocation2 + $0x48] sm:$0xff]  ;;  %v100_v10 = vpack.c.bf16 %v85_v7, %v84_v5  ;;  %v94_v14 = vld [vmem:[#allocation2 + $0x50] sm:$0xff]  ;;  %v95_v16 = vld [vmem:[#allocation2 + $0x58] sm:$0xff]  ;;  %v101_v21 = vpack.c.bf16 %v87_v13, %v86_v12  ;;  %s459_s3 = sshll.u32 %s702_s4, 4  ;;  %s460_s3 = int_to_ptr.vmem [resolvable:$true] %s459_s3 }
  0x60   :  { %v104_v11 = vpack.c.bf16 %v93_v9, %v92_v8  ;;  %v148_v15 = vand.u32 %v146_v4, %v110_v6  ;;  %v88_v17 = vld [vmem:[#allocation2 + $0x20] sm:$0xff]  ;;  %v89_v18 = vld [vmem:[#allocation2 + $0x28] sm:$0xff]  ;;  %v105_v22 = vpack.c.bf16 %v95_v16, %v94_v14  ;;  %v90_v25 = vld [vmem:[#allocation2 + $0x30] sm:$0xff]  ;;  %s664_s21 = scalar_lea.vmem %s460_s3, 2048  ;;  %p669_p13 = scmp.lt.s32.totalorder %s460_s3, %s460_s3 }
  0x61   :  { %495 = vmatprep.mubr.msk.bf16.mxu0 %vm118_vm2, %v100_v10  ;;  %v96_v19 = vld [vmem:[#allocation2 + $0x60] sm:$0xff]  ;;  %v97_v20 = vld [vmem:[#allocation2 + $0x68] sm:$0xff]  ;;  %v102_v23 = vpack.c.bf16 %v89_v18, %v88_v17  ;;  %v91_v26 = vld [vmem:[#allocation2 + $0x38] sm:$0xff]  ;;  %p665_p12 = scmp.ne.s32.totalorder %s460_s3, %s664_s21  ;;  %p670_p0 = scmp.lt.s32.totalorder %s664_s21, %s664_s21 }
  0x62   :  { %503 = vmatprep.mubr.msk.bf16.mxu1 %vm118_vm2, %v104_v11  ;;  %493 = vmatprep.subr.bf16.mxu0 %v148_v15  ;;  %v106_v24 = vpack.c.bf16 %v97_v20, %v96_v19  ;;  %v98_v27 = vld [vmem:[#allocation2 + $0x70] sm:$0xff]  ;;  %v99_v28 = vld [vmem:[#allocation2 + $0x78] sm:$0xff]  ;;  %v103_v29 = vpack.c.bf16 %v91_v26, %v90_v25 }
  0x63   :  { %511 = vmatprep.subr.bf16.mxu1 %v148_v15  ;;  %494 = vmatpush3.bf16.msra.mxu0 %v148_v15  ;;  %v107_v30 = vpack.c.bf16 %v99_v28, %v98_v27  ;;  %v815_v31 = vld [vmem:[#allocation7] ss:$0 sm:$0xff]  ;;  %p671_p1 = por %p670_p0, %p669_p13 }
  0x64   :  { %512 = vmatpush3.bf16.msra.mxu1 %v148_v15 }
  0x65   :  { %p672_p2 = pnand %p671_p1, %p665_p12 }
  0x66   :  { %496 = vmatmul.mubr.msk.bf16.vlgmr.msra.gmra.mrb[0].mxu0 %vm118_vm2, %v101_v21 }
  0x67   :  { %504 = vmatmul.mubr.msk.bf16.vlgmr.msra.gmra.mrb[0].mxu1 %vm118_vm2, %v105_v22  ;;  %499 = vmatprep.mubr.msk.bf16.mxu0 %vm118_vm2, %v102_v23 }
  0x68   :  { %507 = vmatprep.mubr.msk.bf16.mxu1 %vm118_vm2, %v106_v24 }
  0x6e   :  { %500 = vmatmul.mubr.msk.bf16.gmra.mrb[4].mxu0 %vm118_vm2, %v103_v29 }
  0x6f   :  { %508 = vmatmul.mubr.msk.bf16.gmra.mrb[4].mxu1 %vm118_vm2, %v107_v30 }
 0x139   :  { %v497_v32 = vpop.f32.mrb[0].mxu0 }
 0x13a   :  { %v505_v33 = vpop.f32.mrb[0].mxu1  ;;  %v193_v34 = vadd.f32 %v497_v32, %v815_v31  ;;  %v184_v36 = vpop.f32.mrb[1].mxu0 }
 0x13b   :  { %v225_v35 = vadd.f32 %v505_v33, %v815_v31  ;;  %v216_v37 = vpop.f32.mrb[1].mxu1  ;;  %v185_v38 = vadd.f32 %v815_v31, %v184_v36  ;;  %v498_v40 = vpop.f32.mrb[2].mxu0 }
 0x13c   :  { %v217_v39 = vadd.f32 %v815_v31, %v216_v37  ;;  %v506_v41 = vpop.f32.mrb[2].mxu1  ;;  %v265_v42 = vmul.f32 0.044715, %v193_v34  ;;  %v822_v48 = vadd.f32 %v498_v40, %v815_v31  ;;  %v187_v50 = vpop.f32.mrb[3].mxu0  ;;  %v831_v58 = vmul.f32 0.5, %v193_v34 }
 0x13d   :  { %v273_v43 = vmul.f32 0.044715, %v225_v35  ;;  %v263_v44 = vmul.f32 0.044715, %v185_v38  ;;  %v825_v49 = vadd.f32 %v506_v41, %v815_v31  ;;  %v219_v51 = vpop.f32.mrb[3].mxu1  ;;  %v828_v54 = vadd.f32 %v815_v31, %v187_v50 }
 0x13e   :  { %v271_v45 = vmul.f32 0.044715, %v217_v39  ;;  %v281_v46 = vmul.f32 %v265_v42, %v193_v34  ;;  %v266_v57 = vmul.f32 0.044715, %v822_v48  ;;  %v220_v3 = vadd.f32 %v815_v31, %v219_v51 }
 0x13f   :  { %v289_v47 = vmul.f32 %v273_v43, %v225_v35  ;;  %v279_v52 = vmul.f32 %v263_v44, %v185_v38  ;;  %v274_v61 = vmul.f32 0.044715, %v825_v49  ;;  %v264_v9 = vmul.f32 0.044715, %v828_v54 }
 0x140   :  { %v287_v53 = vmul.f32 %v271_v45, %v217_v39  ;;  %v297_v55 = vmul.f32 %v281_v46, %v193_v34  ;;  %v282_v2 = vmul.f32 %v266_v57, %v822_v48  ;;  %v838_v13 = vmul.f32 0.5, %v225_v35 }
 0x141   :  { %v305_v56 = vmul.f32 %v289_v47, %v225_v35  ;;  %v295_v59 = vmul.f32 %v279_v52, %v185_v38  ;;  %v501_v62 = vpop.f32.mrb[4].mxu0  ;;  %v290_v8 = vmul.f32 %v274_v61, %v825_v49  ;;  %v280_v20 = vmul.f32 %v264_v9, %v828_v54 }
 0x142   :  { %v303_v60 = vmul.f32 %v287_v53, %v217_v39  ;;  %v509_v63 = vpop.f32.mrb[4].mxu1  ;;  %v313_v0 = vadd.f32 %v297_v55, %v193_v34  ;;  %v200_v4 = vpop.f32.mrb[5].mxu0  ;;  %v298_v15 = vmul.f32 %v282_v2, %v822_v48  ;;  %v272_v23 = vmul.f32 0.044715, %v220_v3 }
 0x143   :  { %v321_v1 = vadd.f32 %v305_v56, %v225_v35  ;;  %v232_v5 = vpop.f32.mrb[5].mxu1  ;;  %v311_v6 = vadd.f32 %v295_v59, %v185_v38  ;;  %v502_v10 = vpop.f32.mrb[6].mxu0  ;;  %v306_v19 = vmul.f32 %v290_v8, %v825_v49  ;;  %v849_v24 = vadd.f32 %v501_v62, %v815_v31 }
 0x144   :  { %v319_v7 = vadd.f32 %v303_v60, %v217_v39  ;;  %v510_v11 = vpop.f32.mrb[6].mxu1  ;;  %v329_v12 = vmul.f32 0.7978846, %v313_v0  ;;  %v841_v16 = vpop.f32.mrb[7].mxu0  ;;  %v314_v22 = vadd.f32 %v298_v15, %v822_v48  ;;  %v296_v26 = vmul.f32 %v280_v20, %v828_v54  ;;  %v894_v15 = vld [vmem:[#allocation10] ss:$0 sm:$0xff] }
 0x145   :  { %v337_v14 = vmul.f32 0.7978846, %v321_v1  ;;  %v327_v17 = vmul.f32 0.7978846, %v311_v6  ;;  %v845_v21 = vpop.f32.mrb[7].mxu1  ;;  %v322_v25 = vadd.f32 %v306_v19, %v825_v49  ;;  %v854_v27 = vadd.f32 %v509_v63, %v815_v31 }
 0x146   :  { %v335_v18 = vmul.f32 0.7978846, %v319_v7  ;;  %522 = vtanh.f32 %v329_v12  ;;  %v247_v28 = vmul.f32 0.5, %v185_v38  ;;  %v330_v29 = vmul.f32 0.7978846, %v314_v22 }
 0x147   :  { %524 = vtanh.f32 %v337_v14  ;;  %v288_v30 = vmul.f32 %v272_v23, %v220_v3  ;;  %v338_v32 = vmul.f32 0.7978846, %v322_v25  ;;  %v312_v33 = vadd.f32 %v296_v26, %v828_v54 }
 0x148   :  { %526 = vtanh.f32 %v327_v17  ;;  %v269_v34 = vmul.f32 0.044715, %v849_v24  ;;  %v255_v35 = vmul.f32 0.5, %v217_v39  ;;  %v277_v37 = vmul.f32 0.044715, %v854_v27 }
 0x149   :  { %528 = vtanh.f32 %v335_v18  ;;  %v304_v36 = vmul.f32 %v288_v30, %v220_v3  ;;  %v328_v40 = vmul.f32 0.7978846, %v312_v33  ;;  %v861_v38 = vadd.f32 %v815_v31, %v200_v4  ;;  %v888_v4 = vld [vmem:[#allocation8] ss:$0 sm:$0xff] }
 0x14a   :  { %530 = vtanh.f32 %v330_v29  ;;  %v285_v41 = vmul.f32 %v269_v34, %v849_v24  ;;  %v293_v43 = vmul.f32 %v277_v37, %v854_v27  ;;  %v865_v44 = vadd.f32 %v815_v31, %v232_v5 }
 0x14b   :  { %532 = vtanh.f32 %v338_v32  ;;  %v320_v42 = vadd.f32 %v304_v36, %v220_v3  ;;  %v868_v45 = vadd.f32 %v502_v10, %v815_v31  ;;  %v250_v39 = vmul.f32 0.5, %v822_v48 }
 0x14c   :  { %534 = vtanh.f32 %v328_v40  ;;  %v301_v46 = vmul.f32 %v285_v41, %v849_v24  ;;  %v267_v47 = vmul.f32 0.044715, %v861_v38  ;;  %v258_v50 = vmul.f32 0.5, %v825_v49 }
 0x14d   :  { %v336_v51 = vmul.f32 0.7978846, %v320_v42  ;;  %v309_v52 = vmul.f32 %v293_v43, %v854_v27  ;;  %v275_v53 = vmul.f32 0.044715, %v865_v44  ;;  %v248_v55 = vmul.f32 0.5, %v828_v54 }
 0x14e   :  { %v317_v56 = vadd.f32 %v301_v46, %v849_v24  ;;  %v283_v57 = vmul.f32 %v267_v47, %v861_v38  ;;  %v270_v48 = vmul.f32 0.044715, %v868_v45  ;;  %v880_v60 = vmul.f32 0.5, %v220_v3 }
 0x14f   :  { %536 = vtanh.f32 %v336_v51  ;;  %v325_v61 = vadd.f32 %v309_v52, %v854_v27  ;;  %v291_v49 = vmul.f32 %v275_v53, %v865_v44  ;;  %v886_v54 = vadd.f32 %v510_v11, %v815_v31 }
 0x150   :  { %v523_v59 = vpop.eup %522  ;;  %v333_v0 = vmul.f32 0.7978846, %v317_v56  ;;  %v299_v1 = vmul.f32 %v283_v57, %v861_v38  ;;  %v286_v7 = vmul.f32 %v270_v48, %v868_v45  ;;  %v917_v56 = vadd.f32 %v815_v31, %v841_v16 }
 0x151   :  { %v525_v62 = vpop.eup %524  ;;  %v361_v63 = vadd.f32 1.0, %v523_v59  ;;  %v341_v6 = vmul.f32 0.7978846, %v325_v61  ;;  %v307_v3 = vmul.f32 %v291_v49, %v865_v44  ;;  %v925_v59 = vadd.f32 %v815_v31, %v845_v21 }
 0x152   :  { %v527_v2 = vpop.eup %526  ;;  %v369_v5 = vadd.f32 1.0, %v525_v62  ;;  %538 = vtanh.f32 %v333_v0  ;;  %v315_v12 = vadd.f32 %v299_v1, %v861_v38  ;;  %v302_v42 = vmul.f32 %v286_v7, %v868_v45 }
 0x153   :  { %v529_v8 = vpop.eup %528  ;;  %v377_v9 = vmul.f32 %v361_v63, %v831_v58  ;;  %v359_v10 = vadd.f32 1.0, %v527_v2  ;;  %540 = vtanh.f32 %v341_v6  ;;  %v323_v18 = vadd.f32 %v307_v3, %v865_v44 }
 0x154   :  { %v531_v14 = vpop.eup %530  ;;  %v385_v11 = vmul.f32 %v369_v5, %v838_v13  ;;  %v367_v17 = vadd.f32 1.0, %v529_v8  ;;  %v331_v25 = vmul.f32 0.7978846, %v315_v12  ;;  %v318_v53 = vadd.f32 %v302_v42, %v868_v45 }
 0x155   :  { %v533_v19 = vpop.eup %532  ;;  %v400_v20 = vmul.f32 %v888_v4, %v377_v9  ;;  %v375_v22 = vmul.f32 %v359_v10, %v247_v28  ;;  %v362_v23 = vadd.f32 1.0, %v531_v14  ;;  %v339_v30 = vmul.f32 0.7978846, %v323_v18 }
 0x156   :  { %v408_v58 = vmul.f32 %v888_v4, %v385_v11  ;;  %v383_v26 = vmul.f32 %v367_v17, %v255_v35  ;;  %v370_v29 = vadd.f32 1.0, %v533_v19  ;;  %v535_v32 = vpop.eup %534  ;;  %542 = vtanh.f32 %v331_v25 }
 0x157   :  { %v423_v33 = vadd.f32 %v894_v15, %v400_v20  ;;  %v398_v13 = vmul.f32 %v888_v4, %v375_v22  ;;  %v378_v34 = vmul.f32 %v362_v23, %v250_v39  ;;  %v360_v28 = vadd.f32 1.0, %v535_v32 }
 0x158   :  { %v431_v36 = vadd.f32 %v894_v15, %v408_v58  ;;  %v406_v37 = vmul.f32 %v888_v4, %v383_v26  ;;  %v386_v40 = vmul.f32 %v370_v29, %v258_v50  ;;  %544 = vtanh.f32 %v339_v30 }
 0x159   :  { %440 = vst.msk [vmem:[#allocation11 + $0x10] sm:$0xff] %vm437_vm3, %v423_v33  ;;  %v421_v41 = vadd.f32 %v894_v15, %v398_v13  ;;  %v401_v35 = vmul.f32 %v888_v4, %v378_v34  ;;  %v537_v43 = vpop.eup %536  ;;  %v376_v47 = vmul.f32 %v360_v28, %v248_v55  ;;  %v278_v50 = vmul.f32 0.044715, %v886_v54 }
 0x15a   :  { %448 = vst.msk [vmem:[#allocation11 + $0x50] sm:$0xff] %vm437_vm3, %v431_v36  ;;  %v429_v39 = vadd.f32 %v894_v15, %v406_v37  ;;  %v409_v46 = vmul.f32 %v888_v4, %v386_v40  ;;  %v368_v52 = vadd.f32 1.0, %v537_v43  ;;  %v253_v16 = vmul.f32 0.5, %v849_v24 }
 0x15b   :  { %438 = vst.msk [vmem:[#allocation11] sm:$0xff] %vm437_vm3, %v421_v41  ;;  %v424_v51 = vadd.f32 %v894_v15, %v401_v35  ;;  %v399_v48 = vmul.f32 %v888_v4, %v376_v47  ;;  %v294_v55 = vmul.f32 %v278_v50, %v886_v54  ;;  %v334_v62 = vmul.f32 0.7978846, %v318_v53 }
 0x15c   :  { %446 = vst.msk [vmem:[#allocation11 + $0x40] sm:$0xff] %vm437_vm3, %v429_v39  ;;  %v432_v57 = vadd.f32 %v894_v15, %v409_v46  ;;  %v539_v61 = vpop.eup %538  ;;  %v384_v49 = vmul.f32 %v368_v52, %v880_v60  ;;  %v268_v63 = vmul.f32 0.044715, %v917_v56  ;;  %v261_v5 = vmul.f32 0.5, %v854_v27 }
 0x15d   :  { %441 = vst.msk [vmem:[#allocation11 + $0x18] sm:$0xff] %vm437_vm3, %v424_v51  ;;  %v541_v0 = vpop.eup %540  ;;  %v422_v1 = vadd.f32 %v894_v15, %v399_v48  ;;  %v365_v2 = vadd.f32 1.0, %v539_v61  ;;  %v310_v31 = vmul.f32 %v294_v55, %v886_v54  ;;  %546 = vtanh.f32 %v334_v62 }
 0x15e   :  { %449 = vst.msk [vmem:[#allocation11 + $0x58] sm:$0xff] %vm437_vm3, %v432_v57  ;;  %v407_v21 = vmul.f32 %v888_v4, %v384_v49  ;;  %v373_v6 = vadd.f32 1.0, %v541_v0  ;;  %v284_v60 = vmul.f32 %v268_v63, %v917_v56  ;;  %v276_v7 = vmul.f32 0.044715, %v925_v59 }
 0x15f   :  { %439 = vst.msk [vmem:[#allocation11 + $0x8] sm:$0xff] %vm437_vm3, %v422_v1  ;;  %v381_v24 = vmul.f32 %v365_v2, %v253_v16  ;;  %v326_v3 = vadd.f32 %v310_v31, %v886_v54  ;;  %v251_v27 = vmul.f32 0.5, %v861_v38  ;;  %v259_v22 = vmul.f32 0.5, %v865_v44 }
 0x160   :  { %v543_v8 = vpop.eup %542  ;;  %v430_v9 = vadd.f32 %v894_v15, %v407_v21  ;;  %v389_v10 = vmul.f32 %v373_v6, %v261_v5  ;;  %v300_v12 = vmul.f32 %v284_v60, %v917_v56  ;;  %v292_v18 = vmul.f32 %v276_v7, %v925_v59 }
 0x161   :  { %v404_v14 = vmul.f32 %v888_v4, %v381_v24  ;;  %v363_v11 = vadd.f32 1.0, %v543_v8  ;;  %v342_v17 = vmul.f32 0.7978846, %v326_v3  ;;  %v254_v28 = vmul.f32 0.5, %v868_v45 }
 0x162   :  { %v545_v19 = vpop.eup %544  ;;  %447 = vst.msk [vmem:[#allocation11 + $0x48] sm:$0xff] %vm437_vm3, %v430_v9  ;;  %v412_v20 = vmul.f32 %v888_v4, %v389_v10  ;;  %v316_v23 = vadd.f32 %v300_v12, %v917_v56  ;;  %v308_v30 = vmul.f32 %v292_v18, %v925_v59  ;;  %v262_v39 = vmul.f32 0.5, %v886_v54 }
 0x163   :  { %v427_v25 = vadd.f32 %v894_v15, %v404_v14  ;;  %v379_v38 = vmul.f32 %v363_v11, %v251_v27  ;;  %v371_v58 = vadd.f32 1.0, %v545_v19  ;;  %548 = vtanh.f32 %v342_v17 }
 0x164   :  { %v435_v26 = vadd.f32 %v894_v15, %v412_v20  ;;  %v332_v29 = vmul.f32 0.7978846, %v316_v23  ;;  %v324_v44 = vadd.f32 %v308_v30, %v925_v59  ;;  %v252_v52 = vmul.f32 0.5, %v917_v56 }
 0x165   :  { %444 = vst.msk [vmem:[#allocation11 + $0x30] sm:$0xff] %vm437_vm3, %v427_v25  ;;  %v402_v32 = vmul.f32 %v888_v4, %v379_v38  ;;  %v387_v33 = vmul.f32 %v371_v58, %v259_v22  ;;  %v260_v54 = vmul.f32 0.5, %v925_v59 }
 0x166   :  { %452 = vst.msk [vmem:[#allocation11 + $0x70] sm:$0xff] %vm437_vm3, %v435_v26  ;;  %550 = vtanh.f32 %v332_v29  ;;  %v340_v37 = vmul.f32 0.7978846, %v324_v44 }
 0x167   :  { %v425_v13 = vadd.f32 %v894_v15, %v402_v32  ;;  %v410_v34 = vmul.f32 %v888_v4, %v387_v33  ;;  %v547_v36 = vpop.eup %546 }
 0x168   :  { %v366_v41 = vadd.f32 1.0, %v547_v36  ;;  %552 = vtanh.f32 %v340_v37 }
 0x169   :  { %442 = vst.msk [vmem:[#allocation11 + $0x20] sm:$0xff] %vm437_vm3, %v425_v13  ;;  %v433_v40 = vadd.f32 %v894_v15, %v410_v34 }
 0x16a   :  { %v382_v35 = vmul.f32 %v366_v41, %v254_v28 }
 0x16b   :  { %450 = vst.msk [vmem:[#allocation11 + $0x60] sm:$0xff] %vm437_vm3, %v433_v40 }
 0x16c   :  { %v405_v43 = vmul.f32 %v888_v4, %v382_v35 }
 0x16d   :  { %v549_v42 = vpop.eup %548 }
 0x16e   :  { %v374_v46 = vadd.f32 1.0, %v549_v42  ;;  %v428_v47 = vadd.f32 %v894_v15, %v405_v43 }
 0x170   :  { %v551_v50 = vpop.eup %550  ;;  %v390_v51 = vmul.f32 %v374_v46, %v262_v39  ;;  %445 = vst.msk [vmem:[#allocation11 + $0x38] sm:$0xff] %vm437_vm3, %v428_v47 }
 0x171   :  { %v364_v45 = vadd.f32 1.0, %v551_v50 }
 0x172   :  { %v413_v53 = vmul.f32 %v888_v4, %v390_v51  ;;  %v553_v48 = vpop.eup %552 }
 0x173   :  { %v380_v57 = vmul.f32 %v364_v45, %v252_v52  ;;  %v372_v49 = vadd.f32 1.0, %v553_v48 }
 0x174   :  { %v436_v55 = vadd.f32 %v894_v15, %v413_v53 }
 0x175   :  { %v403_v61 = vmul.f32 %v888_v4, %v380_v57  ;;  %v388_v62 = vmul.f32 %v372_v49, %v260_v54 }
 0x176   :  { %453 = vst.msk [vmem:[#allocation11 + $0x78] sm:$0xff] %vm437_vm3, %v436_v55 }
 0x177   :  { %v426_v16 = vadd.f32 %v894_v15, %v403_v61  ;;  %v411_v56 = vmul.f32 %v888_v4, %v388_v62 }
 0x179   :  { %443 = vst.msk [vmem:[#allocation11 + $0x28] sm:$0xff] %vm437_vm3, %v426_v16  ;;  %v434_v63 = vadd.f32 %v894_v15, %v411_v56 }
 0x17b   :  { %451 = vst.msk [vmem:[#allocation11 + $0x68] sm:$0xff] %vm437_vm3, %v434_v63 }
 0x17c   :  { %675 = shalt.err (!%p672_p2)
}
 0x17d   :  { %s676_s10 = scalar_lea.hbm %s997_s5, 2048 }
 0x17e   :  { %p677_p3 = scmp.ne.s32.totalorder %s997_s5, %s676_s10  ;;  %p680_p4 = scmp.lt.u32.totalorder %s676_s10, %s997_s5 }
 0x180   :  { %p682_p5 = pnand %p680_p4, %p677_p3 }
 0x182   :  { %685 = shalt.err (!%p682_p5)
}
 0x183   :  { %465 = dma.vmem_to_hbm [thread:$0]  %s460_s3, 2048, %s997_s5, [#allocation4], %s696_s30, %s696_s30, %s697_s6  }
 0x184   :  { %692 = dma.done.wait [#allocation4], 2048  }
 0x185   :  { %693 = vsyncadd [#allocation4], 4294965248 }
 0x186   :  { %469 = vsyncpa [#allocation3], 1 }
 0x187   :  { %470 = vsyncpa [#allocation6], 1 }
 0x188   :  { %471 = vsyncpa [#allocation9], 1 }
 0x189   :  { %472 = vsyncpa [#allocation4], 1 }

// kernel: mduvsr_forward.25
= control target key start
LH: loop header
LB: loop body
LE: loop exit
PB: predicated region body
PF: predicated region fallthrough
CT: control target
= control target key end

     0   :  { %8 = vsyncpa [#allocation3], 0  ;;  %s506_s0 = inlined_call_operand.hbm [shape: f32[128,32], index: 0, kind: input, shape index: {}]   ;;  %s507_s1 = inlined_call_operand.hbm [shape: f32[32,3], index: 1, kind: input, shape index: {}]   ;;  %s508_s2 = inlined_call_operand.hbm [shape: f32[1,3], index: 2, kind: input, shape index: {}]   ;;  %s509_s3 = inlined_call_operand.hbm [shape: f32[128,3], index: 3, kind: output, shape index: {}]  }
   0x1   :  { %9 = vsyncpa [#allocation6], 0 }
   0x2   :  { %10 = vsyncpa [#allocation4], 0  ;;  %s392_s12 = smov [#allocation5]   ;;  %s393_s14 = smov [#allocation2]  }
   0x3   :  { %s28_s13 = sshll.u32 %s392_s12, 4  ;;  %s16_s15 = sshll.u32 %s393_s14, 4  ;;  %s29_s13 = int_to_ptr.vmem [resolvable:$true] %s28_s13  ;;  %s418_s15 = int_to_ptr.vmem [resolvable:$true] %s16_s15 }
   0x4   :  { %s298_s18 = scalar_lea.hbm %s507_s1, 512 }
   0x5   :  { %p299_p0 = scmp.ne.s32.totalorder %s507_s1, %s298_s18  ;;  %p302_p1 = scmp.lt.u32.totalorder %s298_s18, %s507_s1 }
   0x7   :  { %p304_p2 = pnand %p302_p1, %p299_p0 }
   0x9   :  { %307 = shalt.err (!%p304_p2)
}
   0xa   :  { %s308_s23 = scalar_lea.vmem %s29_s13, 512  ;;  %p313_p4 = scmp.lt.s32.totalorder %s29_s13, %s29_s13 }
   0xb   :  { %p309_p3 = scmp.ne.s32.totalorder %s29_s13, %s308_s23  ;;  %p314_p5 = scmp.lt.s32.totalorder %s308_s23, %s308_s23 }
   0xd   :  { %p315_p6 = por %p314_p5, %p313_p4 }
   0xf   :  { %p316_p7 = pnand %p315_p6, %p309_p3 }
  0x11   :  { %319 = shalt.err (!%p316_p7)
}
  0x12   :  { %s394_s24 = smov 128   ;;  %s395_s25 = smov 8  }
  0x13   :  { %34 = dma.hbm_to_vmem [thread:$0]  %s507_s1, 512, %s29_s13, [#allocation6], %s394_s24, %s394_s24, %s395_s25  }
  0x14   :  { %s320_s30 = scalar_lea.hbm %s506_s0, 2048 }
  0x15   :  { %p321_p8 = scmp.ne.s32.totalorder %s506_s0, %s320_s30  ;;  %p324_p9 = scmp.lt.u32.totalorder %s320_s30, %s506_s0 }
  0x17   :  { %p326_p10 = pnand %p324_p9, %p321_p8 }
  0x19   :  { %329 = shalt.err (!%p326_p10)
}
  0x1a   :  { %s330_s8 = scalar_lea.vmem %s418_s15, 2048  ;;  %p335_p12 = scmp.lt.s32.totalorder %s418_s15, %s418_s15 }
  0x1b   :  { %p331_p11 = scmp.ne.s32.totalorder %s418_s15, %s330_s8  ;;  %p336_p13 = scmp.lt.s32.totalorder %s330_s8, %s330_s8 }
  0x1d   :  { %p337_p0 = por %p336_p13, %p335_p12 }
  0x1f   :  { %p338_p1 = pnand %p337_p0, %p331_p11 }
  0x21   :  { %341 = shalt.err (!%p338_p1)
}
  0x22   :  { %22 = dma.hbm_to_vmem [thread:$0]  %s506_s0, 2048, %s418_s15, [#allocation3], %s394_s24, %s394_s24, %s395_s25  }
  0x23   :  { %s396_s10 = smov [#allocation7]   ;;  %s342_s14 = scalar_lea.hbm %s508_s2, 16 }
  0x24   :  { %s41_s11 = sshll.u32 %s396_s10, 4  ;;  %p343_p2 = scmp.ne.s32.totalorder %s508_s2, %s342_s14  ;;  %s42_s11 = int_to_ptr.vmem [resolvable:$true] %s41_s11 }
  0x25   :  { %p346_p3 = scmp.lt.u32.totalorder %s342_s14, %s508_s2 }
  0x27   :  { %p348_p4 = pnand %p346_p3, %p343_p2 }
  0x29   :  { %351 = shalt.err (!%p348_p4)
}
  0x2a   :  { %s352_s20 = scalar_lea.vmem %s42_s11, 16  ;;  %s356_s0 = scalar_lea.vmem %s42_s11, 32 }
  0x2b   :  { %p353_p5 = scmp.ne.s32.totalorder %s42_s11, %s352_s20  ;;  %p357_p6 = scmp.lt.s32.totalorder %s42_s11, %s42_s11 }
  0x2c   :  { %p358_p7 = scmp.lt.s32.totalorder %s356_s0, %s352_s20 }
  0x2e   :  { %p359_p8 = por %p358_p7, %p357_p6 }
  0x30   :  { %p360_p9 = pnand %p359_p8, %p353_p5 }
  0x32   :  { %363 = shalt.err (!%p360_p9)
}
  0x33   :  { %44 = dma.hbm_to_vmem [thread:$0]  %s508_s2, 16, %s42_s11, [#allocation6]  }
  0x34   :  { %386 = dma.done.wait [#allocation3], 2048  }
  0x35   :  { %387 = vsyncadd [#allocation3], 4294965248 }
  0x36   :  { %388 = dma.done.wait [#allocation6], 528  }
  0x37   :  { %389 = vsyncadd [#allocation6], 4294966768  ;;  %v79_v0 = vld [vmem:[#allocation5] sm:$0xff]  ;;  %v80_v1 = vld [vmem:[#allocation5 + $0x8] sm:$0xff]  ;;  %vm92_vm0 = vcmask 261120   ;;  %vm214_vm1 = vcmask 23552  }
  0x38   :  { %v81_v2 = vld [vmem:[#allocation5 + $0x10] sm:$0xff]  ;;  %v83_v3 = vpack.c.bf16 %v80_v1, %v79_v0  ;;  %v82_v4 = vld [vmem:[#allocation5 + $0x18] sm:$0xff]  ;;  %v55_v5 = vld [vmem:[#allocation2] sm:$0xff]  ;;  %s397_s2 = smov [#allocation8]  }
  0x39   :  { %v56_v6 = vld [vmem:[#allocation2 + $0x8] sm:$0xff]  ;;  %v84_v7 = vpack.c.bf16 %v82_v4, %v81_v2  ;;  %v63_v9 = vld [vmem:[#allocation2 + $0x40] sm:$0xff]  ;;  %v57_v12 = vld [vmem:[#allocation2 + $0x10] sm:$0xff]  ;;  %s236_s22 = sshll.u32 %s397_s2, 4  ;;  %s237_s22 = int_to_ptr.vmem [resolvable:$true] %s236_s22 }
  0x3a   :  { %v71_v8 = vpack.c.bf16 %v56_v6, %v55_v5  ;;  %v64_v10 = vld [vmem:[#allocation2 + $0x48] sm:$0xff]  ;;  %268 = vmatprep.subr.bf16.mxu0 %v83_v3  ;;  %288 = vmatprep.subr.bf16.mxu1 %v83_v3  ;;  %v58_v13 = vld [vmem:[#allocation2 + $0x18] sm:$0xff]  ;;  %v65_v14 = vld [vmem:[#allocation2 + $0x50] sm:$0xff]  ;;  %s364_s23 = scalar_lea.vmem %s237_s22, 2048  ;;  %p369_p11 = scmp.lt.s32.totalorder %s237_s22, %s237_s22 }
  0x3b   :  { %v75_v11 = vpack.c.bf16 %v64_v10, %v63_v9  ;;  %269 = vmatpush3.bf16.msra.mxu0 %v83_v3  ;;  %290 = vmatpush3.bf16.msra.mxu1 %v83_v3  ;;  %v66_v15 = vld [vmem:[#allocation2 + $0x58] sm:$0xff]  ;;  %v59_v16 = vld [vmem:[#allocation2 + $0x20] sm:$0xff]  ;;  %v60_v17 = vld [vmem:[#allocation2 + $0x28] sm:$0xff]  ;;  %v72_v20 = vpack.c.bf16 %v58_v13, %v57_v12  ;;  %p365_p10 = scmp.ne.s32.totalorder %s237_s22, %s364_s23  ;;  %p370_p12 = scmp.lt.s32.totalorder %s364_s23, %s364_s23 }
  0x3c   :  { %270 = vmatprep.subr.bf16.mxu0 %v84_v7  ;;  %289 = vmatprep.subr.bf16.mxu1 %v84_v7  ;;  %v67_v18 = vld [vmem:[#allocation2 + $0x60] sm:$0xff]  ;;  %v68_v19 = vld [vmem:[#allocation2 + $0x68] sm:$0xff]  ;;  %v76_v21 = vpack.c.bf16 %v66_v15, %v65_v14  ;;  %v73_v22 = vpack.c.bf16 %v60_v17, %v59_v16  ;;  %v61_v24 = vld [vmem:[#allocation2 + $0x30] sm:$0xff] }
  0x3d   :  { %272 = vmatprep.mubr.msk.bf16.mxu0 %vm92_vm0, %v71_v8  ;;  %280 = vmatprep.mubr.msk.bf16.mxu1 %vm92_vm0, %v75_v11  ;;  %v77_v23 = vpack.c.bf16 %v68_v19, %v67_v18  ;;  %v62_v25 = vld [vmem:[#allocation2 + $0x38] sm:$0xff]  ;;  %v69_v26 = vld [vmem:[#allocation2 + $0x70] sm:$0xff]  ;;  %v249_v30 = vld [vmem:[#allocation7] ss:$0 sm:$0xff]  ;;  %p371_p13 = por %p370_p12, %p369_p11 }
  0x3e   :  { %v70_v27 = vld [vmem:[#allocation2 + $0x78] sm:$0xff]  ;;  %v74_v28 = vpack.c.bf16 %v62_v25, %v61_v24 }
  0x3f   :  { %271 = vmatpush3.bf16.msra.mxu0 %v84_v7  ;;  %291 = vmatpush3.bf16.msra.mxu1 %v84_v7  ;;  %v78_v29 = vpack.c.bf16 %v70_v27, %v69_v26  ;;  %p372_p0 = pnand %p371_p13, %p365_p10 }
  0x42   :  { %273 = vmatmul.mubr.msk.bf16.vlgmr.msra.gmra.mrb[0].mxu0 %vm92_vm0, %v72_v20  ;;  %281 = vmatmul.mubr.msk.bf16.vlgmr.msra.gmra.mrb[0].mxu1 %vm92_vm0, %v76_v21 }
  0x43   :  { %276 = vmatprep.mubr.msk.bf16.mxu0 %vm92_vm0, %v73_v22  ;;  %284 = vmatprep.mubr.msk.bf16.mxu1 %vm92_vm0, %v77_v23 }
  0x4a   :  { %277 = vmatmul.mubr.msk.bf16.gmra.mrb[4].mxu0 %vm92_vm0, %v74_v28  ;;  %285 = vmatmul.mubr.msk.bf16.gmra.mrb[4].mxu1 %vm92_vm0, %v78_v29 }
 0x115   :  { %v274_v31 = vpop.f32.mrb[0].mxu0  ;;  %v282_v32 = vpop.f32.mrb[0].mxu1 }
 0x116   :  { %v160_v33 = vadd.f32 %v274_v31, %v249_v30  ;;  %v192_v34 = vadd.f32 %v282_v32, %v249_v30  ;;  %v151_v35 = vpop.f32.mrb[1].mxu0  ;;  %v183_v36 = vpop.f32.mrb[1].mxu1 }
 0x117   :  { %v152_v37 = vadd.f32 %v249_v30, %v151_v35  ;;  %v184_v38 = vadd.f32 %v249_v30, %v183_v36  ;;  %v275_v39 = vpop.f32.mrb[2].mxu0  ;;  %v283_v40 = vpop.f32.mrb[2].mxu1 }
 0x118   :  { %217 = vst.msk [vmem:[#allocation8 + $0x10] sm:$0xff] %vm214_vm1, %v160_v33  ;;  %225 = vst.msk [vmem:[#allocation8 + $0x50] sm:$0xff] %vm214_vm1, %v192_v34  ;;  %v163_v41 = vadd.f32 %v275_v39, %v249_v30  ;;  %v195_v42 = vadd.f32 %v283_v40, %v249_v30  ;;  %v154_v43 = vpop.f32.mrb[3].mxu0  ;;  %v186_v44 = vpop.f32.mrb[3].mxu1 }
 0x119   :  { %215 = vst.msk [vmem:[#allocation8] sm:$0xff] %vm214_vm1, %v152_v37  ;;  %223 = vst.msk [vmem:[#allocation8 + $0x40] sm:$0xff] %vm214_vm1, %v184_v38  ;;  %v155_v45 = vadd.f32 %v249_v30, %v154_v43  ;;  %v187_v46 = vadd.f32 %v249_v30, %v186_v44 }
 0x11a   :  { %218 = vst.msk [vmem:[#allocation8 + $0x18] sm:$0xff] %vm214_vm1, %v163_v41  ;;  %226 = vst.msk [vmem:[#allocation8 + $0x58] sm:$0xff] %vm214_vm1, %v195_v42 }
 0x11b   :  { %216 = vst.msk [vmem:[#allocation8 + $0x8] sm:$0xff] %vm214_vm1, %v155_v45  ;;  %224 = vst.msk [vmem:[#allocation8 + $0x48] sm:$0xff] %vm214_vm1, %v187_v46 }
 0x11d   :  { %v278_v47 = vpop.f32.mrb[4].mxu0  ;;  %v286_v48 = vpop.f32.mrb[4].mxu1 }
 0x11e   :  { %v176_v49 = vadd.f32 %v278_v47, %v249_v30  ;;  %v208_v50 = vadd.f32 %v286_v48, %v249_v30  ;;  %v167_v51 = vpop.f32.mrb[5].mxu0  ;;  %v199_v52 = vpop.f32.mrb[5].mxu1 }
 0x11f   :  { %v168_v53 = vadd.f32 %v249_v30, %v167_v51  ;;  %v200_v54 = vadd.f32 %v249_v30, %v199_v52  ;;  %v279_v55 = vpop.f32.mrb[6].mxu0  ;;  %v287_v56 = vpop.f32.mrb[6].mxu1 }
 0x120   :  { %221 = vst.msk [vmem:[#allocation8 + $0x30] sm:$0xff] %vm214_vm1, %v176_v49  ;;  %229 = vst.msk [vmem:[#allocation8 + $0x70] sm:$0xff] %vm214_vm1, %v208_v50  ;;  %v179_v57 = vadd.f32 %v279_v55, %v249_v30  ;;  %v211_v58 = vadd.f32 %v287_v56, %v249_v30  ;;  %v170_v59 = vpop.f32.mrb[7].mxu0  ;;  %v202_v60 = vpop.f32.mrb[7].mxu1 }
 0x121   :  { %219 = vst.msk [vmem:[#allocation8 + $0x20] sm:$0xff] %vm214_vm1, %v168_v53  ;;  %227 = vst.msk [vmem:[#allocation8 + $0x60] sm:$0xff] %vm214_vm1, %v200_v54  ;;  %v171_v61 = vadd.f32 %v249_v30, %v170_v59  ;;  %v203_v62 = vadd.f32 %v249_v30, %v202_v60 }
 0x122   :  { %222 = vst.msk [vmem:[#allocation8 + $0x38] sm:$0xff] %vm214_vm1, %v179_v57  ;;  %230 = vst.msk [vmem:[#allocation8 + $0x78] sm:$0xff] %vm214_vm1, %v211_v58 }
 0x123   :  { %220 = vst.msk [vmem:[#allocation8 + $0x28] sm:$0xff] %vm214_vm1, %v171_v61  ;;  %228 = vst.msk [vmem:[#allocation8 + $0x68] sm:$0xff] %vm214_vm1, %v203_v62 }
 0x124   :  { %375 = shalt.err (!%p372_p0)
}
 0x125   :  { %s376_s28 = scalar_lea.hbm %s509_s3, 2048 }
 0x126   :  { %p377_p1 = scmp.ne.s32.totalorder %s509_s3, %s376_s28  ;;  %p380_p2 = scmp.lt.u32.totalorder %s376_s28, %s509_s3 }
 0x128   :  { %p382_p3 = pnand %p380_p2, %p377_p1 }
 0x12a   :  { %385 = shalt.err (!%p382_p3)
}
 0x12b   :  { %242 = dma.vmem_to_hbm [thread:$0]  %s237_s22, 2048, %s509_s3, [#allocation4], %s394_s24, %s394_s24, %s395_s25  }
 0x12c   :  { %390 = dma.done.wait [#allocation4], 2048  }
 0x12d   :  { %391 = vsyncadd [#allocation4], 4294965248 }
 0x12e   :  { %246 = vsyncpa [#allocation3], 1 }
 0x12f   :  { %247 = vsyncpa [#allocation6], 1 }
 0x130   :  { %248 = vsyncpa [#allocation4], 1 }

// kernel: mduvsr_forward.23
= control target key start
LH: loop header
LB: loop body
LE: loop exit
PB: predicated region body
PF: predicated region fallthrough
CT: control target
= control target key end

     0   :  { %s2618_s0 = inlined_call_operand.hbm [shape: f32[2,10,10,32], index: 0, kind: input, shape index: {}]   ;;  %s2619_s1 = inlined_call_operand.hbm [shape: f32[9,32], index: 1, kind: input, shape index: {}]   ;;  %s2620_s2 = inlined_call_operand.hbm [shape: f32[1,32], index: 2, kind: input, shape index: {}]   ;;  %s2621_s3 = inlined_call_operand.hbm [shape: f32[1,32], index: 3, kind: input, shape index: {}]   ;;  %s2622_s4 = inlined_call_operand.hbm [shape: f32[1,32], index: 4, kind: input, shape index: {}]   ;;  %s2623_s5 = inlined_call_operand.hbm [shape: f32[32,32], index: 5, kind: input, shape index: {}]   ;;  %s2624_s6 = inlined_call_operand.hbm [shape: f32[1,32], index: 6, kind: input, shape index: {}]   ;;  %s2625_s7 = inlined_call_operand.hbm [shape: f32[1,32], index: 7, kind: input, shape index: {}]   ;;  %s2626_s8 = inlined_call_operand.hbm [shape: f32[1,32], index: 8, kind: input, shape index: {}]   ;;  %s2627_s9 = inlined_call_operand.hbm [shape: f32[2,8,8,32], index: 9, kind: output, shape index: {}]  }
   0x1   :  { %2634 = sst [smem:[#allocation24_spill]] %s2619_s1 }
   0x2   :  { %2635 = sst [smem:[#allocation25_spill]] %s2620_s2 }
   0x3   :  { %2636 = sst [smem:[#allocation26_spill]] %s2627_s9 }
   0x4   :  { %14 = vsyncpa [#allocation3], 0 }
   0x5   :  { %16 = vsyncpa [#allocation3 + $0x1], 0 }
   0x6   :  { %17 = vsyncpa [#allocation6], 0 }
   0x7   :  { %18 = vsyncpa [#allocation9], 0 }
   0x8   :  { %19 = vsyncpa [#allocation12], 0 }
   0x9   :  { %20 = vsyncpa [#allocation15], 0 }
   0xa   :  { %21 = vsyncpa [#allocation4], 0 }
   0xb   :  { %23 = vsyncpa [#allocation4 + $0x1], 0  ;;  %s1897_s30 = smov 0   ;;  %s1899_s10 = smov 0  }
   0xc   :  { %s1901_s11 = smov 0   ;;  %s1903_s12 = smov 0  }
   0xd LB: > { %s1833_s13 = smov [#allocation5]   ;;  %s1918_s15 = sadd.s32 4294967295, %s1831_s12   ;;  %s1831_s12 = sphi %s1903_s12, %s2665_s12   ;;  %s1827_s11 = sphi %s1901_s11, %s2664_s11   ;;  %s1823_s10 = sphi %s1899_s10, %s2663_s10   ;;  %s1819_s30 = sphi %s1897_s30, %s2662_s30  }
   0xe   : > { %s266_s14 = sshll.u32 %s1833_s13, 4  ;;  %p1213_p0 = scmp.ge.s32.totalorder %s1831_s12, 1  ;;  %s1923_s14 = int_to_ptr.vmem [resolvable:$true] %s266_s14 }
   0xf   : > { %p2629_p1 = scmp.eq.s32.totalorder %s1918_s15, 0  ;;  %p254_p2 = scmp.lt.s32.totalorder %s1831_s12, 3 }
  0x10   : > { %s1834_s17 = smov [#allocation8]   ;;  %s1835_s20 = smov [#allocation11]  }
  0x11   : > { %p1925_p3 = pnand %p1213_p0, %p254_p2  ;;  %s291_s18 = sshll.u32 %s1834_s17, 4  ;;  %s1938_s18 = int_to_ptr.vmem [resolvable:$true] %s291_s18 }
  0x12   : > { %s312_s21 = sshll.u32 %s1835_s20, 4  ;;  %s2639_s1 = sld [smem:[#allocation24_spill]]  ;;  %s1940_s21 = int_to_ptr.vmem [resolvable:$true] %s312_s21 }
  0x13   : > { %s2637_s16 = scalar_select %p1925_p3, 1, 0 }
  0x14   : > { %p1368_p5 = pneg %p1925_p3 }
  0x16   : > { %p1934_p6 = pnand %p1368_p5, %p2629_p1 }
  0x18   : > { %s1495_s24 = scalar_lea.hbm %s2639_s1, 256  ;;  %p1950_p8 = pneg %p1934_p6 }
  0x19   : > { %p1496_p7 = scmp.ne.s32.totalorder %s2639_s1, %s1495_s24  ;;  %p1502_p11 = scmp.lt.u32.totalorder %s1495_s24, %s2639_s1 }
  0x1b   : > { %p1498_p9 = pnand %p1950_p8, %p1496_p7 }
  0x1d   : > { %p1499_p10 = pneg %p1498_p9 }
  0x1f   : > { %p1504_p12 = pnand %p1502_p11, %p1499_p10 }
  0x21   : > { %1507 = shalt.err (!%p1504_p12)
}
  0x22   : > { %s1508_s13 = scalar_lea.vmem %s1923_s14, 256  ;;  %p1516_p5 = scmp.lt.s32.totalorder %s1923_s14, %s1923_s14 }
  0x23   : > { %p1509_p13 = scmp.ne.s32.totalorder %s1923_s14, %s1508_s13  ;;  %p1517_p4 = scmp.lt.s32.totalorder %s1508_s13, %s1508_s13 }
  0x25   : > { %p1511_p0 = pnand %p1509_p13, %p1950_p8  ;;  %p1518_p7 = por %p1517_p4, %p1516_p5 }
  0x27   : > { %p1512_p2 = pneg %p1511_p0 }
  0x29   : > { %p1519_p9 = pnand %p1518_p7, %p1512_p2 }
  0x2b   : > { %1522 = shalt.err (!%p1519_p9)
}
  0x2c   : > { %s2631_s17 = smov 128   ;;  %s2632_s20 = smov 8  }
  0x2d   : > { %1371 = dma.hbm_to_vmem [thread:$0]  (!%p1934_p6), %s2639_s1, 256, %s1923_s14, [#allocation6], %s2631_s17, %s2631_s17, %s2632_s20  }
  0x2e   : > { %s1523_s26 = scalar_lea.hbm %s2621_s3, 16 }
  0x2f   : > { %p1524_p4 = scmp.ne.s32.totalorder %s2621_s3, %s1523_s26  ;;  %p1530_p12 = scmp.lt.u32.totalorder %s1523_s26, %s2621_s3 }
  0x31   : > { %p1526_p10 = pnand %p1524_p4, %p1950_p8 }
  0x33   : > { %p1527_p11 = pneg %p1526_p10 }
  0x35   : > { %p1532_p13 = pnand %p1530_p12, %p1527_p11 }
  0x37   : > { %1535 = shalt.err (!%p1532_p13)
}
  0x38   : > { %s1536_s14 = scalar_lea.vmem %s1938_s18, 16  ;;  %s1543_s22 = scalar_lea.vmem %s1938_s18, 32 }
  0x39   : > { %p1537_p0 = scmp.ne.s32.totalorder %s1938_s18, %s1536_s14  ;;  %p1544_p7 = scmp.lt.s32.totalorder %s1938_s18, %s1938_s18 }
  0x3a   : > { %p1545_p9 = scmp.lt.s32.totalorder %s1543_s22, %s1536_s14 }
  0x3b   : > { %p1539_p2 = pnand %p1537_p0, %p1950_p8 }
  0x3c   : > { %p1546_p4 = por %p1545_p9, %p1544_p7 }
  0x3d   : > { %p1540_p5 = pneg %p1539_p2 }
  0x3f   : > { %p1547_p10 = pnand %p1546_p4, %p1540_p5 }
  0x41   : > { %1550 = shalt.err (!%p1547_p10)
}
  0x42   : > { %1377 = dma.hbm_to_vmem [thread:$0]  (!%p1934_p6), %s2621_s3, 16, %s1938_s18, [#allocation9]  }
  0x43   : > { %s1551_s26 = scalar_lea.hbm %s2623_s5, 512 }
  0x44   : > { %p1552_p11 = scmp.ne.s32.totalorder %s2623_s5, %s1551_s26  ;;  %p1558_p0 = scmp.lt.u32.totalorder %s1551_s26, %s2623_s5 }
  0x46   : > { %p1554_p12 = pnand %p1552_p11, %p1950_p8 }
  0x48   : > { %p1555_p13 = pneg %p1554_p12 }
  0x4a   : > { %p1560_p2 = pnand %p1558_p0, %p1555_p13 }
  0x4c   : > { %1563 = shalt.err (!%p1560_p2)
}
  0x4d   : > { %s1564_s18 = scalar_lea.vmem %s1940_s21, 512  ;;  %p1572_p4 = scmp.lt.s32.totalorder %s1940_s21, %s1940_s21 }
  0x4e   : > { %p1565_p5 = scmp.ne.s32.totalorder %s1940_s21, %s1564_s18  ;;  %p1573_p10 = scmp.lt.s32.totalorder %s1564_s18, %s1564_s18 }
  0x50   : > { %p1567_p7 = pnand %p1565_p5, %p1950_p8  ;;  %p1574_p11 = por %p1573_p10, %p1572_p4 }
  0x52   : > { %p1568_p9 = pneg %p1567_p7 }
  0x54   : > { %p1575_p12 = pnand %p1574_p11, %p1568_p9 }
  0x56   : > { %1578 = shalt.err (!%p1575_p12)
}
  0x57   : > { %1383 = dma.hbm_to_vmem [thread:$0]  (!%p1934_p6), %s2623_s5, 512, %s1940_s21, [#allocation12], %s2631_s17, %s2631_s17, %s2632_s20  }
  0x58   : > { %s1838_s23 = smov [#allocation14]   ;;  %s1839_s25 = smov [#allocation7]  }
  0x59   : > { %s337_s24 = sshll.u32 %s1838_s23, 4  ;;  %s280_s26 = sshll.u32 %s1839_s25, 4  ;;  %s338_s24 = int_to_ptr.vmem [resolvable:$true] %s337_s24  ;;  %s281_s26 = int_to_ptr.vmem [resolvable:$true] %s280_s26 }
  0x5a   : > { %s1579_s13 = scalar_lea.hbm %s2625_s7, 16 }
  0x5b   : > { %p1580_p13 = scmp.ne.s32.totalorder %s2625_s7, %s1579_s13  ;;  %p1586_p5 = scmp.lt.u32.totalorder %s1579_s13, %s2625_s7 }
  0x5d   : > { %p1582_p0 = pnand %p1580_p13, %p1950_p8 }
  0x5f   : > { %p1583_p2 = pneg %p1582_p0 }
  0x61   : > { %p1588_p7 = pnand %p1586_p5, %p1583_p2 }
  0x63   : > { %1591 = shalt.err (!%p1588_p7)
}
  0x64   : > { %s1592_s21 = scalar_lea.vmem %s338_s24, 16  ;;  %s1599_s9 = scalar_lea.vmem %s338_s24, 32 }
  0x65   : > { %p1593_p9 = scmp.ne.s32.totalorder %s338_s24, %s1592_s21  ;;  %p1600_p11 = scmp.lt.s32.totalorder %s338_s24, %s338_s24 }
  0x66   : > { %p1601_p12 = scmp.lt.s32.totalorder %s1599_s9, %s1592_s21 }
  0x67   : > { %p1595_p4 = pnand %p1593_p9, %p1950_p8 }
  0x68   : > { %p1602_p1 = por %p1601_p12, %p1600_p11 }
  0x69   : > { %p1596_p10 = pneg %p1595_p4 }
  0x6b   : > { %p1603_p3 = pnand %p1602_p1, %p1596_p10 }
  0x6d   : > { %1606 = shalt.err (!%p1603_p3)
}
  0x6e   : > { %1389 = dma.hbm_to_vmem [thread:$0]  (!%p1934_p6), %s2625_s7, 16, %s338_s24, [#allocation15]  }
  0x6f   : > { %s2641_s2 = sld [smem:[#allocation25_spill]] }
  0x75   : > { %s1607_s29 = scalar_lea.hbm %s2641_s2, 16 }
  0x76   : > { %p1608_p13 = scmp.ne.s32.totalorder %s2641_s2, %s1607_s29  ;;  %p1614_p3 = scmp.lt.u32.totalorder %s1607_s29, %s2641_s2 }
  0x78   : > { %p1610_p0 = pnand %p1608_p13, %p1950_p8 }
  0x7a   : > { %p1611_p1 = pneg %p1610_p0 }
  0x7c   : > { %p1616_p2 = pnand %p1614_p3, %p1611_p1 }
  0x7e   : > { %1619 = shalt.err (!%p1616_p2)
}
  0x7f   : > { %s1620_s21 = scalar_lea.vmem %s281_s26, 16  ;;  %s1627_s24 = scalar_lea.vmem %s281_s26, 32 }
  0x80   : > { %p1621_p5 = scmp.ne.s32.totalorder %s281_s26, %s1620_s21  ;;  %p1628_p4 = scmp.lt.s32.totalorder %s281_s26, %s281_s26 }
  0x81   : > { %p1629_p10 = scmp.lt.s32.totalorder %s1627_s24, %s1620_s21 }
  0x82   : > { %p1623_p7 = pnand %p1621_p5, %p1950_p8 }
  0x83   : > { %p1630_p11 = por %p1629_p10, %p1628_p4 }
  0x84   : > { %p1624_p9 = pneg %p1623_p7 }
  0x86   : > { %p1631_p12 = pnand %p1630_p11, %p1624_p9 }
  0x88   : > { %1634 = shalt.err (!%p1631_p12)
}
  0x89   : > { %1374 = dma.hbm_to_vmem [thread:$0]  (!%p1934_p6), %s2641_s2, 16, %s281_s26, [#allocation6]  }
  0x8a   : > { %s1840_s25 = smov [#allocation10]   ;;  %s1841_s28 = smov [#allocation13]  }
  0x8b   : > { %s302_s1 = sshll.u32 %s1840_s25, 4  ;;  %s326_s29 = sshll.u32 %s1841_s28, 4  ;;  %s303_s1 = int_to_ptr.vmem [resolvable:$true] %s302_s1  ;;  %s327_s29 = int_to_ptr.vmem [resolvable:$true] %s326_s29 }
  0x8c   : > { %s1635_s18 = scalar_lea.hbm %s2622_s4, 16 }
  0x8d   : > { %p1636_p13 = scmp.ne.s32.totalorder %s2622_s4, %s1635_s18  ;;  %p1642_p3 = scmp.lt.u32.totalorder %s1635_s18, %s2622_s4 }
  0x8f   : > { %p1638_p0 = pnand %p1636_p13, %p1950_p8 }
  0x91   : > { %p1639_p1 = pneg %p1638_p0 }
  0x93   : > { %p1644_p2 = pnand %p1642_p3, %p1639_p1 }
  0x95   : > { %1647 = shalt.err (!%p1644_p2)
}
  0x96   : > { %s1648_s26 = scalar_lea.vmem %s303_s1, 16  ;;  %s1655_s23 = scalar_lea.vmem %s303_s1, 32 }
  0x97   : > { %p1649_p5 = scmp.ne.s32.totalorder %s303_s1, %s1648_s26  ;;  %p1656_p4 = scmp.lt.s32.totalorder %s303_s1, %s303_s1 }
  0x98   : > { %p1657_p10 = scmp.lt.s32.totalorder %s1655_s23, %s1648_s26 }
  0x99   : > { %p1651_p7 = pnand %p1649_p5, %p1950_p8 }
  0x9a   : > { %p1658_p11 = por %p1657_p10, %p1656_p4 }
  0x9b   : > { %p1652_p9 = pneg %p1651_p7 }
  0x9d   : > { %p1659_p12 = pnand %p1658_p11, %p1652_p9 }
  0x9f   : > { %1662 = shalt.err (!%p1659_p12)
}
  0xa0   : > { %1380 = dma.hbm_to_vmem [thread:$0]  (!%p1934_p6), %s2622_s4, 16, %s303_s1, [#allocation9]  }
  0xa1   : > { %s1663_s18 = scalar_lea.hbm %s2624_s6, 16 }
  0xa2   : > { %p1664_p13 = scmp.ne.s32.totalorder %s2624_s6, %s1663_s18  ;;  %p1670_p3 = scmp.lt.u32.totalorder %s1663_s18, %s2624_s6 }
  0xa4   : > { %p1666_p0 = pnand %p1664_p13, %p1950_p8 }
  0xa6   : > { %p1667_p1 = pneg %p1666_p0 }
  0xa8   : > { %p1672_p2 = pnand %p1670_p3, %p1667_p1 }
  0xaa   : > { %1675 = shalt.err (!%p1672_p2)
}
  0xab   : > { %s1676_s26 = scalar_lea.vmem %s327_s29, 16  ;;  %s1683_s1 = scalar_lea.vmem %s327_s29, 32 }
  0xac   : > { %p1677_p5 = scmp.ne.s32.totalorder %s327_s29, %s1676_s26  ;;  %p1684_p4 = scmp.lt.s32.totalorder %s327_s29, %s327_s29 }
  0xad   : > { %p1685_p10 = scmp.lt.s32.totalorder %s1683_s1, %s1676_s26 }
  0xae   : > { %p1679_p7 = pnand %p1677_p5, %p1950_p8 }
  0xaf   : > { %p1686_p11 = por %p1685_p10, %p1684_p4 }
  0xb0   : > { %p1680_p9 = pneg %p1679_p7 }
  0xb2   : > { %p1687_p12 = pnand %p1686_p11, %p1680_p9 }
  0xb4   : > { %1690 = shalt.err (!%p1687_p12)
}
  0xb5   : > { %1386 = dma.hbm_to_vmem [thread:$0]  (!%p1934_p6), %s2624_s6, 16, %s327_s29, [#allocation12]  }
  0xb6   : > { %s1842_s28 = smov [#allocation16]   ;;  %s1691_s22 = scalar_lea.hbm %s2626_s8, 16 }
  0xb7   : > { %s348_s13 = sshll.u32 %s1842_s28, 4  ;;  %p1692_p13 = scmp.ne.s32.totalorder %s2626_s8, %s1691_s22  ;;  %s349_s13 = int_to_ptr.vmem [resolvable:$true] %s348_s13 }
  0xb8   : > { %p1698_p3 = scmp.lt.u32.totalorder %s1691_s22, %s2626_s8 }
  0xb9   : > { %p1694_p0 = pnand %p1692_p13, %p1950_p8 }
  0xbb   : > { %p1695_p1 = pneg %p1694_p0 }
  0xbd   : > { %p1700_p2 = pnand %p1698_p3, %p1695_p1 }
  0xbf   : > { %1703 = shalt.err (!%p1700_p2)
}
  0xc0   : > { %s1704_s29 = scalar_lea.vmem %s349_s13, 16  ;;  %s1711_s1 = scalar_lea.vmem %s349_s13, 32 }
  0xc1   : > { %p1705_p5 = scmp.ne.s32.totalorder %s349_s13, %s1704_s29  ;;  %p1712_p4 = scmp.lt.s32.totalorder %s349_s13, %s349_s13 }
  0xc2   : > { %p1713_p10 = scmp.lt.s32.totalorder %s1711_s1, %s1704_s29 }
  0xc3   : > { %p1707_p7 = pnand %p1705_p5, %p1950_p8 }
  0xc4   : > { %p1714_p11 = por %p1713_p10, %p1712_p4 }
  0xc5   : > { %p1708_p9 = pneg %p1707_p7 }
  0xc7   : > { %p1715_p12 = pnand %p1714_p11, %p1708_p9 }
  0xc9   : > { %1718 = shalt.err (!%p1715_p12)
}
  0xca   : > { %1392 = dma.hbm_to_vmem [thread:$0]  (!%p1934_p6), %s2626_s8, 16, %s349_s13, [#allocation15]  }
  0xcb   : > { %s1212_s27 = sadd.s32 4294967294, %s1831_s12   ;;  %s2116_s19 = sadd.s32 1, %s1831_s12  }
  0xcc   : > { %s33_s28 = ssub.s32 %s1831_s12, %s2116_s19  ;;  %s36_s14 = sadd.s32 1, %s1827_s11 }
  0xcd   : > { %p34_p8 = scmp.eq.s32.totalorder %s33_s28, 0  ;;  %p43_p13 = scmp.ne.s32.totalorder %s1827_s11, %s1823_s10 }
  0xce   : > { %p44_p0 = scmp.eq.s32.totalorder %s1831_s12, 0  ;;  %p49_p1 = scmp.ne.s32.totalorder %s1823_s10, %s1819_s30 }
  0xcf   : > { %s2127_s18 = scalar_select %p34_p8, %s1827_s11, %s36_s14  }
  0xd0   : > { %p45_p3 = por %p44_p0, %p43_p13  ;;  %p2642_p2 = scmp.eq.s32.totalorder %s1918_s15, 0 }
  0xd1   : > { %p241_p6 = scmp.eq.s32.totalorder %s1918_s15, 1  ;;  %p247_p7 = scmp.eq.s32.totalorder %s1212_s27, 1 }
  0xd2   : > { %p2131_p5 = por %p2642_p2, %p49_p1  ;;  %p1409_p9 = scmp.lt.s32.totalorder %s1831_s12, 2 }
  0xd3   : > { %s359_s13 = sand.u32 1, %s1827_s11   ;;  %p2138_p4 = por %p241_p6, %p43_p13 }
  0xd4   : > { %p2142_p10 = por %p247_p7, %p49_p1  ;;  %s1329_s9 = smul.u32 160, %s359_s13 }
  0xd5   : > { %s2644_s21 = scalar_select %p2138_p4, 1, 0 }
  0xd6   : > { %s2645_s24 = scalar_select %p2142_p10, 1, 0 }
  0xd7   : > { %s1330_s26 = smul.u32 2560, %s1831_s12  ;;  %p2147_p11 = pnand %p1409_p9, %p45_p3 }
  0xd8   : > { %s363_s27 = scalar_lea.vmem [#allocation2], %s1329_s9  ;;  %s2158_s14 = scalar_lea.sflag [#allocation3], %s359_s13 }
  0xd9   : > { %s2154_s25 = scalar_lea.hbm %s2618_s0, %s1330_s26  ;;  %s370_s28 = sshll.u32 %s363_s27, 4  ;;  %s2156_s28 = int_to_ptr.vmem [resolvable:$true] %s370_s28 }
  0xda   : > { %s1719_s17 = scalar_lea.hbm %s2154_s25, 2560  ;;  %p1721_p8 = pneg %p2147_p11 }
  0xdb   : > { %p1720_p12 = scmp.ne.s32.totalorder %s2154_s25, %s1719_s17  ;;  %s1724_s23 = scalar_lea.hbm %s2618_s0, 5120 }
  0xdc   : > { %p1725_p1 = scmp.lt.u32.totalorder %s2154_s25, %s2618_s0  ;;  %p1726_p3 = scmp.lt.u32.totalorder %s1724_s23, %s1719_s17 }
  0xdd   : > { %p1722_p13 = pnand %p1721_p8, %p1720_p12  ;;  %p1728_p6 = scmp.lt.u32.totalorder %s1719_s17, %s2154_s25 }
  0xde   : > { %p1727_p2 = por %p1726_p3, %p1725_p1 }
  0xdf   : > { %p1723_p0 = pneg %p1722_p13 }
  0xe0   : > { %p1729_p7 = por %p1728_p6, %p1727_p2 }
  0xe2   : > { %p1730_p9 = pnand %p1729_p7, %p1723_p0 }
  0xe4   : > { %1733 = shalt.err (!%p1730_p9)
}
  0xe5   : > { %s1734_s13 = scalar_lea.vmem %s2156_s28, 2560  ;;  %s1843_s9 = smov [#allocation2]  }
  0xe6   : > { %p1735_p12 = scmp.ne.s32.totalorder %s2156_s28, %s1734_s13  ;;  %s1739_s27 = sshll.u32 %s1843_s9, 4  ;;  %s1740_s27 = int_to_ptr.vmem [resolvable:$false] %s1739_s27 }
  0xe7   : > { %s1741_s2 = scalar_lea.vmem %s1740_s27, 5120  ;;  %p1742_p4 = scmp.lt.s32.totalorder %s2156_s28, %s1740_s27 }
  0xe8   : > { %p1737_p13 = pnand %p1735_p12, %p1721_p8  ;;  %p1743_p1 = scmp.lt.s32.totalorder %s1741_s2, %s1734_s13 }
  0xea   : > { %p1738_p10 = pneg %p1737_p13  ;;  %p1744_p3 = por %p1743_p1, %p1742_p4 }
  0xec   : > { %p1745_p2 = pnand %p1744_p3, %p1738_p10 }
  0xee   : > { %1748 = shalt.err (!%p1745_p2)
}
  0xef   : > { %s2647_s17 = smov 8   ;;  %s2648_s20 = smov 128  }
  0xf0   : > { %1396 = dma.hbm_to_vmem [thread:$0]  (!%p2147_p11), %s2154_s25, 2560, %s2156_s28, %s2158_s14, %s2648_s20, %s2648_s20, %s2647_s17  }
  0xf1   : > { %p2649_p8 = scmp.ne.s32.totalorder %s2637_s16, 0 }
  0xf2   : > { %s2192_s26 = sand.u32 (!%p2649_p8), 1, %s1823_s10  }
  0xf3   : > { %382 = sbr.rel (%p2649_p8) target bundleno = 616 (0x268), region = 56  ;;  %s385_s23 = scalar_lea.sflag (!%p2649_p8), [#allocation3], %s2192_s26 }
  0xf4   : > { %s1331_s1 = smul.u32 (!%p2649_p8), 160, %s2192_s26 }
  0xf6   : > { %s2196_s13 = scalar_lea.vmem (!%p2649_p8), [#allocation2], %s1331_s1 }
  0xfa   : > { %1794 = dma.done.wait (%p2131_p5), %s385_s23, 2560  }
  0xfb   : > { %1796 = vsyncadd (%p2131_p5), %s385_s23, 4294964736  ;;  %p2650_p4 = scmp.eq.s32.totalorder %s1918_s15, 0 }
  0xfd   : > { %1798 = dma.done.wait (%p2650_p4), [#allocation6], 272   ;;  %p2651_p10 = pmov %p2650_p4 }
  0xfe   : > { %p2652_p11 = pmov %p2650_p4 }
  0xff   : > { %1800 = vsyncadd (%p2651_p10), [#allocation6], 4294967024 }
 0x100   : > { %1802 = dma.done.wait (%p2652_p11), [#allocation9], 32   ;;  %p2653_p0 = pmov %p2650_p4 }
 0x102   : > { %1804 = vsyncadd (%p2653_p0), [#allocation9], 4294967264  ;;  %p2654_p6 = pmov %p2653_p0 }
 0x103   : > { %p2655_p7 = pmov %p2653_p0 }
 0x104   : > { %1806 = dma.done.wait (%p2654_p6), [#allocation12], 528  }
 0x105   : > { %1808 = vsyncadd (%p2655_p7), [#allocation12], 4294966768  ;;  %p2656_p5 = pmov %p2653_p0 }
 0x106   : > { %p2657_p9 = pmov %p2653_p0 }
 0x107   : > { %1810 = dma.done.wait (%p2656_p5), [#allocation15], 32  }
 0x108   : > { %1812 = vsyncadd (%p2657_p9), [#allocation15], 4294967264  ;;  %v848_v0 = vld [vmem:[#allocation11] sm:$0xff]  ;;  %v849_v1 = vld [vmem:[#allocation11 + $0x8] sm:$0xff]  ;;  %vm861_vm0 = vcmask 261120   ;;  %s1233_s16 = sshll.u32 %s2192_s26, 6 }
 0x109   : > { %v850_v2 = vld [vmem:[#allocation11 + $0x10] sm:$0xff]  ;;  %v852_v3 = vpack.c.bf16 %v849_v1, %v848_v0  ;;  %v851_v4 = vld [vmem:[#allocation11 + $0x18] sm:$0xff]  ;;  %v2220_v8 = vld [vmem:[#allocation5] ss:$0 sm:$0xff]  ;;  %s2545_s22 = scalar_lea.vmem [#allocation17], %s1233_s16  ;;  %s1306_s29 = sshll.u32 %s1918_s15, 10 }
 0x10a   : > { %v456_v5 = vld [vmem:[%s2196_s13] sm:$0xff]  ;;  %v457_v6 = vld [vmem:[%s2196_s13 + $0x10] sm:$0xff]  ;;  %v853_v7 = vpack.c.bf16 %v851_v4, %v850_v2  ;;  %v2281_v44 = vld [vmem:[#allocation5 + $0x8] ss:$0 sm:$0xff]  ;;  %s1063_s25 = sshll.u32 %s2545_s22, 4  ;;  %s2658_s9 = sld [smem:[#allocation26_spill]]  ;;  %s2568_s25 = int_to_ptr.vmem [resolvable:$true] %s1063_s25 }
 0x10b   : > { %v485_v9 = vld [vmem:[%s2196_s13 + $0x1] sm:$0xff]  ;;  %v2224_v10 = vld [vmem:[%s2196_s13 + $0x11] sm:$0xff]  ;;  %1313 = vmatprep.subr.bf16.mxu0 %v852_v3  ;;  %1325 = vmatprep.subr.bf16.mxu1 %v852_v3  ;;  %v469_v11 = vmul.f32 %v2220_v8, %v456_v5  ;;  %v470_v12 = vmul.f32 %v2220_v8, %v457_v6  ;;  %s1050_s15 = scalar_lea.sflag [#allocation4], %s2192_s26  ;;  %s1749_s2 = scalar_lea.vmem %s2568_s25, 1024 }
 0x10c   : > { %v2228_v13 = vld [vmem:[#allocation5 + $0x1] ss:$0 sm:$0xff]  ;;  %v514_v14 = vld [vmem:[%s2196_s13 + $0x2] sm:$0xff]  ;;  %v515_v15 = vld [vmem:[%s2196_s13 + $0x12] sm:$0xff]  ;;  %1314 = vmatpush3.bf16.msra.mxu0 %v852_v3  ;;  %1327 = vmatpush3.bf16.msra.mxu1 %v852_v3  ;;  %p1750_p12 = scmp.ne.s32.totalorder %s2568_s25, %s1749_s2  ;;  %p2659_p13 = scmp.ne.s32.totalorder %s2644_s21, 0 }
 0x10d   : > { %v498_v16 = vmul.f32 %v2228_v13, %v485_v9  ;;  %v499_v17 = vmul.f32 %v2228_v13, %v2224_v10  ;;  %v2235_v18 = vld [vmem:[#allocation5 + $0x2] ss:$0 sm:$0xff]  ;;  %v2237_v19 = vld [vmem:[#allocation5 + $0x3] ss:$0 sm:$0xff]  ;;  %1315 = vmatprep.subr.bf16.mxu0 %v853_v7  ;;  %1326 = vmatprep.subr.bf16.mxu1 %v853_v7  ;;  %v2248_v25 = vld [vmem:[#allocation5 + $0x4] ss:$0 sm:$0xff] }
 0x10e   : > { %v527_v20 = vmul.f32 %v2235_v18, %v514_v14  ;;  %v528_v21 = vmul.f32 %v2235_v18, %v515_v15  ;;  %v2242_v22 = vld [vmem:[%s2196_s13 + $0x20] sm:$0xff]  ;;  %v557_v23 = vmul.f32 %v2237_v19, %v457_v6  ;;  %v586_v29 = vmul.f32 %v2248_v25, %v2224_v10  ;;  %v2267_v36 = vld [vmem:[%s2196_s13 + $0x30] sm:$0xff]  ;;  %p1751_p1 = pnand %p1750_p12, %p2659_p13  ;;  %s1844_s17 = smov [#allocation17]  }
 0x10f   : > { %v2246_v24 = vld [vmem:[%s2196_s13 + $0x21] sm:$0xff]  ;;  %v506_v26 = vadd.f32 %v498_v16, %v469_v11  ;;  %v507_v27 = vadd.f32 %v499_v17, %v470_v12  ;;  %v558_v28 = vmul.f32 %v2237_v19, %v2242_v22  ;;  %v2276_v42 = vld [vmem:[%s2196_s13 + $0x31] sm:$0xff]  ;;  %s1753_s20 = sshll.u32 %s1844_s17, 4  ;;  %s1754_s20 = int_to_ptr.vmem [resolvable:$false] %s1753_s20 }
 0x110   : > { %v2255_v30 = vld [vmem:[%s2196_s13 + $0x22] sm:$0xff]  ;;  %v587_v33 = vmul.f32 %v2248_v25, %v2246_v24  ;;  %1316 = vmatpush3.bf16.msra.mxu0 %v853_v7  ;;  %1328 = vmatpush3.bf16.msra.mxu1 %v853_v7  ;;  %v2279_v43 = vld [vmem:[%s2196_s13 + $0x32] sm:$0xff]  ;;  %s2566_s27 = scalar_lea.hbm %s2658_s9, %s1306_s29  ;;  %p1752_p3 = pneg %p1751_p1 }
 0x111   : > { %v2257_v31 = vld [vmem:[#allocation5 + $0x5] ss:$0 sm:$0xff]  ;;  %v2259_v32 = vld [vmem:[#allocation5 + $0x6] ss:$0 sm:$0xff]  ;;  %v2271_v38 = vld [vmem:[#allocation5 + $0x7] ss:$0 sm:$0xff]  ;;  %v535_v39 = vadd.f32 %v527_v20, %v506_v26  ;;  %v536_v40 = vadd.f32 %v528_v21, %v507_v27  ;;  %v703_v47 = vmul.f32 %v2281_v44, %v2255_v30  ;;  %v704_v48 = vmul.f32 %v2281_v44, %v2279_v43  ;;  %p1756_p2 = scmp.lt.s32.totalorder %s2568_s25, %s1754_s20 }
 0x112   : > { %v615_v34 = vmul.f32 %v2257_v31, %v515_v15  ;;  %v616_v35 = vmul.f32 %v2257_v31, %v2255_v30  ;;  %v645_v37 = vmul.f32 %v2259_v32, %v2242_v22  ;;  %v646_v41 = vmul.f32 %v2259_v32, %v2267_v36  ;;  %v2292_v49 = vld [vmem:[%s2196_s13 + $0x40] sm:$0xff]  ;;  %v2295_v50 = vld [vmem:[%s2196_s13 + $0x50] sm:$0xff]  ;;  %s1755_s1 = scalar_lea.vmem %s1754_s20, 2048 }
 0x113   : > { %v674_v45 = vmul.f32 %v2271_v38, %v2246_v24  ;;  %v675_v46 = vmul.f32 %v2271_v38, %v2276_v42  ;;  %v565_v51 = vadd.f32 %v557_v23, %v535_v39  ;;  %v566_v52 = vadd.f32 %v558_v28, %v536_v40  ;;  %v2302_v55 = vld [vmem:[%s2196_s13 + $0x41] sm:$0xff]  ;;  %v2305_v56 = vld [vmem:[%s2196_s13 + $0x51] sm:$0xff]  ;;  %p1757_p8 = scmp.lt.s32.totalorder %s1755_s1, %s1749_s2 }
 0x114   : > { %v473_v53 = vmul.f32 %v2220_v8, %v2292_v49  ;;  %v474_v54 = vmul.f32 %v2220_v8, %v2295_v50  ;;  %v2308_v57 = vld [vmem:[%s2196_s13 + $0x42] sm:$0xff]  ;;  %v502_v58 = vmul.f32 %v2228_v13, %v2302_v55  ;;  %v503_v59 = vmul.f32 %v2228_v13, %v2305_v56  ;;  %v2315_v60 = vld [vmem:[%s2196_s13 + $0x52] sm:$0xff] }
 0x115   : > { %v531_v61 = vmul.f32 %v2235_v18, %v2308_v57  ;;  %v2320_v62 = vld [vmem:[%s2196_s13 + $0x60] sm:$0xff]  ;;  %v561_v63 = vmul.f32 %v2237_v19, %v2295_v50  ;;  %v594_v0 = vadd.f32 %v586_v29, %v565_v51  ;;  %v595_v1 = vadd.f32 %v587_v33, %v566_v52  ;;  %v2343_v17 = vld [vmem:[%s2196_s13 + $0x70] sm:$0xff]  ;;  %p1758_p4 = por %p1757_p8, %p1756_p2 }
 0x116   : > { %v532_v2 = vmul.f32 %v2235_v18, %v2315_v60  ;;  %v562_v3 = vmul.f32 %v2237_v19, %v2320_v62  ;;  %v2329_v4 = vld [vmem:[%s2196_s13 + $0x61] sm:$0xff]  ;;  %v510_v5 = vadd.f32 %v502_v58, %v473_v53  ;;  %v511_v6 = vadd.f32 %v503_v59, %v474_v54  ;;  %v2350_v27 = vld [vmem:[%s2196_s13 + $0x71] sm:$0xff]  ;;  %v2367_v58 = vld [vmem:[#allocation7] ss:$0 sm:$0xff] }
 0x117   : > { %v590_v7 = vmul.f32 %v2248_v25, %v2305_v56  ;;  %v591_v9 = vmul.f32 %v2248_v25, %v2329_v4  ;;  %v2336_v11 = vld [vmem:[%s2196_s13 + $0x62] sm:$0xff]  ;;  %v623_v12 = vadd.f32 %v615_v34, %v594_v0  ;;  %v624_v14 = vadd.f32 %v616_v35, %v595_v1  ;;  %v2357_v35 = vld [vmem:[%s2196_s13 + $0x72] sm:$0xff]  ;;  %p1759_p10 = pnand %p1758_p4, %p1752_p3 }
 0x118   : > { %v619_v15 = vmul.f32 %v2257_v31, %v2315_v60  ;;  %v620_v16 = vmul.f32 %v2257_v31, %v2336_v11  ;;  %v539_v20 = vadd.f32 %v531_v61, %v510_v5  ;;  %v540_v21 = vadd.f32 %v532_v2, %v511_v6 }
 0x119   : > { %v649_v23 = vmul.f32 %v2259_v32, %v2320_v62  ;;  %v650_v26 = vmul.f32 %v2259_v32, %v2343_v17  ;;  %v653_v28 = vadd.f32 %v645_v37, %v623_v12  ;;  %v654_v29 = vadd.f32 %v646_v41, %v624_v14 }
 0x11a   : > { %v678_v33 = vmul.f32 %v2271_v38, %v2329_v4  ;;  %v679_v34 = vmul.f32 %v2271_v38, %v2350_v27  ;;  %v569_v39 = vadd.f32 %v561_v63, %v539_v20  ;;  %v570_v40 = vadd.f32 %v562_v3, %v540_v21 }
 0x11b   : > { %v707_v51 = vmul.f32 %v2281_v44, %v2336_v11  ;;  %v708_v52 = vmul.f32 %v2281_v44, %v2357_v35  ;;  %v682_v53 = vadd.f32 %v674_v45, %v653_v28  ;;  %v683_v54 = vadd.f32 %v675_v46, %v654_v29 }
 0x11c   : > { %v471_v37 = vmul.f32 %v2242_v22, %v2220_v8  ;;  %v472_v41 = vmul.f32 %v2267_v36, %v2220_v8  ;;  %v598_v59 = vadd.f32 %v590_v7, %v569_v39  ;;  %v599_v61 = vadd.f32 %v591_v9, %v570_v40 }
 0x11d   : > { %v500_v63 = vmul.f32 %v2246_v24, %v2228_v13  ;;  %v501_v0 = vmul.f32 %v2276_v42, %v2228_v13  ;;  %v711_v1 = vadd.f32 %v703_v47, %v682_v53  ;;  %v712_v2 = vadd.f32 %v704_v48, %v683_v54 }
 0x11e   : > { %v529_v45 = vmul.f32 %v2255_v30, %v2235_v18  ;;  %v530_v22 = vmul.f32 %v2279_v43, %v2235_v18  ;;  %v627_v46 = vadd.f32 %v619_v15, %v598_v59  ;;  %v628_v3 = vadd.f32 %v620_v16, %v599_v61 }
 0x11f   : > { %v508_v5 = vadd.f32 %v500_v63, %v471_v37  ;;  %v509_v6 = vadd.f32 %v501_v0, %v472_v41  ;;  %v2378_v7 = vadd.f32 %v2367_v58, %v711_v1  ;;  %v2381_v9 = vadd.f32 %v2367_v58, %v712_v2 }
 0x120   : > { %v559_v47 = vmul.f32 %v2267_v36, %v2237_v19  ;;  %v560_v48 = vmul.f32 %v2237_v19, %v2292_v49  ;;  %v657_v30 = vadd.f32 %v649_v23, %v627_v46  ;;  %v658_v12 = vadd.f32 %v650_v26, %v628_v3 }
 0x121   : > { %v537_v14 = vadd.f32 %v529_v45, %v508_v5  ;;  %v538_v20 = vadd.f32 %v530_v22, %v509_v6  ;;  %v742_v15 = vmul.f32 0.044715, %v2378_v7  ;;  %v743_v16 = vmul.f32 0.044715, %v2381_v9 }
 0x122   : > { %v686_v21 = vadd.f32 %v678_v33, %v657_v30  ;;  %v687_v28 = vadd.f32 %v679_v34, %v658_v12  ;;  %v588_v36 = vmul.f32 %v2276_v42, %v2248_v25  ;;  %v589_v23 = vmul.f32 %v2248_v25, %v2302_v55 }
 0x123   : > { %v567_v29 = vadd.f32 %v559_v47, %v537_v14  ;;  %v568_v39 = vadd.f32 %v560_v48, %v538_v20  ;;  %v750_v40 = vmul.f32 %v742_v15, %v2378_v7  ;;  %v751_v53 = vmul.f32 %v743_v16, %v2381_v9 }
 0x124   : > { %v715_v26 = vadd.f32 %v707_v51, %v686_v21  ;;  %v716_v54 = vadd.f32 %v708_v52, %v687_v28  ;;  %v617_v37 = vmul.f32 %v2279_v43, %v2257_v31  ;;  %v618_v33 = vmul.f32 %v2257_v31, %v2308_v57 }
 0x125   : > { %v758_v34 = vmul.f32 %v750_v40, %v2378_v7  ;;  %v759_v41 = vmul.f32 %v751_v53, %v2381_v9  ;;  %v596_v59 = vadd.f32 %v588_v36, %v567_v29  ;;  %v597_v61 = vadd.f32 %v589_v23, %v568_v39  ;;  %v1244_v36 = vld [vmem:[%s2196_s13 + $0x80] sm:$0xff] }
 0x126   : > { %v2402_v63 = vadd.f32 %v2367_v58, %v715_v26  ;;  %v2405_v0 = vadd.f32 %v2367_v58, %v716_v54  ;;  %v647_v51 = vmul.f32 %v2259_v32, %v2292_v49  ;;  %v648_v43 = vmul.f32 %v2259_v32, %v2295_v50 }
 0x127   : > { %v766_v52 = vadd.f32 %v758_v34, %v2378_v7  ;;  %v767_v1 = vadd.f32 %v759_v41, %v2381_v9  ;;  %v625_v2 = vadd.f32 %v617_v37, %v596_v59  ;;  %v626_v45 = vadd.f32 %v618_v33, %v597_v61 }
 0x128   : > { %v746_v22 = vmul.f32 0.044715, %v2402_v63  ;;  %v747_v46 = vmul.f32 0.044715, %v2405_v0  ;;  %v676_v50 = vmul.f32 %v2271_v38, %v2302_v55  ;;  %v677_v30 = vmul.f32 %v2271_v38, %v2305_v56 }
 0x129   : > { %v774_v3 = vmul.f32 0.7978846, %v766_v52  ;;  %v775_v5 = vmul.f32 0.7978846, %v767_v1  ;;  %v655_v6 = vadd.f32 %v647_v51, %v625_v2  ;;  %v656_v47 = vadd.f32 %v648_v43, %v626_v45  ;;  %v2452_v51 = vld [vmem:[%s2196_s13 + $0x81] sm:$0xff] }
 0x12a   : > { %v754_v48 = vmul.f32 %v746_v22, %v2402_v63  ;;  %v755_v49 = vmul.f32 %v747_v46, %v2405_v0  ;;  %v705_v12 = vmul.f32 %v2281_v44, %v2308_v57  ;;  %v706_v14 = vmul.f32 %v2281_v44, %v2315_v60  ;;  %v1262_v1 = vld [vmem:[%s2196_s13 + $0x82] sm:$0xff]  ;;  %v1271_v22 = vld [vmem:[%s2196_s13 + $0x90] sm:$0xff] }
 0x12b   : > { %1463 = vtanh.f32 %v774_v3  ;;  %v475_v20 = vmul.f32 %v2320_v62, %v2220_v8  ;;  %v684_v21 = vadd.f32 %v676_v50, %v655_v6  ;;  %v685_v28 = vadd.f32 %v677_v30, %v656_v47 }
 0x12c   : > { %1465 = vtanh.f32 %v775_v5  ;;  %v762_v15 = vmul.f32 %v754_v48, %v2402_v63  ;;  %v763_v16 = vmul.f32 %v755_v49, %v2405_v0  ;;  %v476_v29 = vmul.f32 %v2343_v17, %v2220_v8  ;;  %v1280_v49 = vld [vmem:[%s2196_s13 + $0x91] sm:$0xff] }
 0x12d   : > { %v504_v39 = vmul.f32 %v2329_v4, %v2228_v13  ;;  %v505_v57 = vmul.f32 %v2350_v27, %v2228_v13  ;;  %v713_v40 = vadd.f32 %v705_v12, %v684_v21  ;;  %v533_v53 = vmul.f32 %v2336_v11, %v2235_v18 }
 0x12e   : > { %v770_v60 = vadd.f32 %v762_v15, %v2402_v63  ;;  %v771_v62 = vadd.f32 %v763_v16, %v2405_v0  ;;  %v714_v23 = vadd.f32 %v706_v14, %v685_v28  ;;  %v534_v54 = vmul.f32 %v2357_v35, %v2235_v18  ;;  %v2473_v15 = vld [vmem:[#allocation8] ss:$0 sm:$0xff] }
 0x12f   : > { %v512_v26 = vadd.f32 %v504_v39, %v475_v20  ;;  %v513_v8 = vadd.f32 %v505_v57, %v476_v29  ;;  %v2443_v13 = vadd.f32 %v2367_v58, %v713_v40  ;;  %v563_v34 = vmul.f32 %v2343_v17, %v2237_v19 }
 0x130   : > { %v778_v37 = vmul.f32 0.7978846, %v770_v60  ;;  %v779_v33 = vmul.f32 0.7978846, %v771_v62  ;;  %v2448_v41 = vadd.f32 %v2367_v58, %v714_v23  ;;  %v564_v61 = vmul.f32 %v2237_v19, %v1244_v36  ;;  %v2481_v62 = vld [vmem:[#allocation10] ss:$0 sm:$0xff] }
 0x131   : > { %v541_v11 = vadd.f32 %v533_v53, %v512_v26  ;;  %v542_v59 = vadd.f32 %v534_v54, %v513_v8  ;;  %v734_v18 = vmul.f32 0.5, %v2378_v7  ;;  %v744_v43 = vmul.f32 0.044715, %v2443_v13 }
 0x132   : > { %1467 = vtanh.f32 %v778_v37  ;;  %v592_v52 = vmul.f32 %v2350_v27, %v2248_v25  ;;  %v735_v17 = vmul.f32 0.5, %v2381_v9  ;;  %v745_v2 = vmul.f32 0.044715, %v2448_v41 }
 0x133   : > { %1469 = vtanh.f32 %v779_v33  ;;  %v571_v45 = vadd.f32 %v563_v34, %v541_v11  ;;  %v752_v19 = vmul.f32 %v744_v43, %v2443_v13  ;;  %v572_v46 = vadd.f32 %v564_v61, %v542_v59 }
 0x134   : > { %v593_v7 = vmul.f32 %v2248_v25, %v2452_v51  ;;  %v621_v3 = vmul.f32 %v2357_v35, %v2257_v31  ;;  %v753_v6 = vmul.f32 %v745_v2, %v2448_v41  ;;  %v622_v9 = vmul.f32 %v2257_v31, %v1262_v1  ;;  %v1289_v31 = vld [vmem:[%s2196_s13 + $0x92] sm:$0xff] }
 0x135   : > { %v1464_v5 = vpop.eup %1463  ;;  %v600_v47 = vadd.f32 %v592_v52, %v571_v45  ;;  %v651_v48 = vmul.f32 %v2259_v32, %v1244_v36  ;;  %v760_v12 = vmul.f32 %v752_v19, %v2443_v13  ;;  %v652_v25 = vmul.f32 %v2259_v32, %v1271_v22 }
 0x136   : > { %v1466_v50 = vpop.eup %1465  ;;  %v790_v30 = vadd.f32 1.0, %v1464_v5  ;;  %v601_v14 = vadd.f32 %v593_v7, %v572_v46  ;;  %v761_v35 = vmul.f32 %v753_v6, %v2448_v41  ;;  %v680_v21 = vmul.f32 %v2271_v38, %v2452_v51 }
 0x137   : > { %v791_v20 = vadd.f32 1.0, %v1466_v50  ;;  %v629_v16 = vadd.f32 %v621_v3, %v600_v47  ;;  %v768_v29 = vadd.f32 %v760_v12, %v2443_v13  ;;  %v681_v57 = vmul.f32 %v2271_v38, %v1280_v49 }
 0x138   : > { %v798_v28 = vmul.f32 %v790_v30, %v734_v18  ;;  %v630_v39 = vadd.f32 %v622_v9, %v601_v14  ;;  %v769_v32 = vadd.f32 %v761_v35, %v2448_v41  ;;  %v709_v53 = vmul.f32 %v2281_v44, %v1262_v1 }
 0x139   : > { %v799_v60 = vmul.f32 %v791_v20, %v735_v17  ;;  %v659_v40 = vadd.f32 %v651_v48, %v629_v16  ;;  %v776_v23 = vmul.f32 0.7978846, %v768_v29  ;;  %v710_v8 = vmul.f32 %v2281_v44, %v1289_v31 }
 0x13a   : > { %v813_v36 = vmul.f32 %v2473_v15, %v798_v28  ;;  %v660_v26 = vadd.f32 %v652_v25, %v630_v39  ;;  %v738_v37 = vmul.f32 0.5, %v2402_v63  ;;  %v777_v33 = vmul.f32 0.7978846, %v769_v32 }
 0x13b   : > { %v814_v54 = vmul.f32 %v2473_v15, %v799_v60  ;;  %v688_v38 = vadd.f32 %v680_v21, %v659_v40  ;;  %v739_v59 = vmul.f32 0.5, %v2405_v0  ;;  %1471 = vtanh.f32 %v776_v23 }
 0x13c   : > { %v1468_v34 = vpop.eup %1467  ;;  %v828_v11 = vadd.f32 %v2481_v62, %v813_v36  ;;  %v689_v61 = vadd.f32 %v681_v57, %v660_v26  ;;  %1473 = vtanh.f32 %v777_v33  ;;  %v736_v49 = vmul.f32 0.5, %v2443_v13 }
 0x13d   : > { %v1470_v18 = vpop.eup %1469  ;;  %v829_v43 = vadd.f32 %v2481_v62, %v814_v54  ;;  %v794_v52 = vadd.f32 1.0, %v1468_v34  ;;  %v717_v1 = vadd.f32 %v709_v53, %v688_v38  ;;  %v737_v12 = vmul.f32 0.5, %v2448_v41 }
 0x13e   : > { %v836_v44 = vadd.f32 %v828_v11, %v2224_v10  ;;  %v795_v17 = vadd.f32 1.0, %v1470_v18  ;;  %v718_v2 = vadd.f32 %v710_v8, %v689_v61  ;;  %v1294_v18 = vld [vmem:[#allocation13] ss:$0 sm:$0xff] }
 0x13f   : > { %v837_v63 = vadd.f32 %v2246_v24, %v829_v43  ;;  %v802_v45 = vmul.f32 %v794_v52, %v738_v37  ;;  %v732_v22 = vadd.f32 %v2367_v58, %v717_v1 }
 0x140   : > { %v803_v19 = vmul.f32 %v795_v17, %v739_v59  ;;  %v733_v0 = vadd.f32 %v2367_v58, %v718_v2 }
 0x141   : > { %v844_v46 = vpack.c.bf16 %v837_v63, %v836_v44  ;;  %v817_v7 = vmul.f32 %v2473_v15, %v802_v45  ;;  %v748_v3 = vmul.f32 0.044715, %v732_v22  ;;  %v740_v53 = vmul.f32 0.5, %v732_v22 }
 0x142   : > { %v818_v5 = vmul.f32 %v2473_v15, %v803_v19  ;;  %v749_v6 = vmul.f32 0.044715, %v733_v0  ;;  %v741_v23 = vmul.f32 0.5, %v733_v0 }
 0x143   : > { %1317 = vmatprep.mubr.msk.bf16.mxu0 %vm861_vm0, %v844_v46  ;;  %v832_v10 = vadd.f32 %v2481_v62, %v817_v7  ;;  %v756_v47 = vmul.f32 %v748_v3, %v732_v22 }
 0x144   : > { %v833_v24 = vadd.f32 %v2481_v62, %v818_v5  ;;  %v757_v9 = vmul.f32 %v749_v6, %v733_v0 }
 0x145   : > { %v840_v48 = vadd.f32 %v832_v10, %v2305_v56  ;;  %v764_v58 = vmul.f32 %v756_v47, %v732_v22  ;;  %v1472_v50 = vpop.eup %1471 }
 0x146   : > { %v841_v30 = vadd.f32 %v2329_v4, %v833_v24  ;;  %v765_v14 = vmul.f32 %v757_v9, %v733_v0  ;;  %v1474_v25 = vpop.eup %1473  ;;  %v792_v20 = vadd.f32 1.0, %v1472_v50 }
 0x147   : > { %v772_v35 = vadd.f32 %v764_v58, %v732_v22  ;;  %v793_v21 = vadd.f32 1.0, %v1474_v25 }
 0x148   : > { %v846_v16 = vpack.c.bf16 %v841_v30, %v840_v48  ;;  %v773_v31 = vadd.f32 %v765_v14, %v733_v0  ;;  %v800_v28 = vmul.f32 %v792_v20, %v736_v49 }
 0x149   : > { %v780_v29 = vmul.f32 0.7978846, %v772_v35  ;;  %v801_v56 = vmul.f32 %v793_v21, %v737_v12 }
 0x14a   : > { %1321 = vmatprep.mubr.msk.bf16.mxu1 %vm861_vm0, %v846_v16  ;;  %v781_v39 = vmul.f32 0.7978846, %v773_v31  ;;  %v815_v13 = vmul.f32 %v2473_v15, %v800_v28 }
 0x14b   : > { %1475 = vtanh.f32 %v780_v29  ;;  %v816_v4 = vmul.f32 %v2473_v15, %v801_v56 }
 0x14c   : > { %1477 = vtanh.f32 %v781_v39  ;;  %v830_v41 = vadd.f32 %v2481_v62, %v815_v13 }
 0x14d   : > { %v831_v57 = vadd.f32 %v2481_v62, %v816_v4 }
 0x14e   : > { %v838_v60 = vadd.f32 %v2276_v42, %v830_v41 }
 0x14f   : > { %v839_v32 = vadd.f32 %v831_v57, %v2302_v55 }
 0x151   : > { %v845_v40 = vpack.c.bf16 %v839_v32, %v838_v60 }
 0x153   : > { %1318 = vmatmul.mubr.msk.bf16.vlgmr.msra.gmra.mrb[0].mxu0 %vm861_vm0, %v845_v40 }
 0x155   : > { %v1476_v36 = vpop.eup %1475 }
 0x156   : > { %v1478_v26 = vpop.eup %1477  ;;  %v796_v8 = vadd.f32 1.0, %v1476_v36 }
 0x157   : > { %v797_v54 = vadd.f32 1.0, %v1478_v26 }
 0x158   : > { %v804_v37 = vmul.f32 %v796_v8, %v740_v53 }
 0x159   : > { %v805_v33 = vmul.f32 %v797_v54, %v741_v23 }
 0x15a   : > { %v819_v38 = vmul.f32 %v2473_v15, %v804_v37 }
 0x15b   : > { %v820_v34 = vmul.f32 %v2473_v15, %v805_v33  ;;  %v1299_v33 = vld [vmem:[#allocation14] ss:$0 sm:$0xff] }
 0x15c   : > { %v834_v11 = vadd.f32 %v2481_v62, %v819_v38 }
 0x15d   : > { %v835_v42 = vadd.f32 %v2481_v62, %v820_v34 }
 0x15e   : > { %v842_v55 = vadd.f32 %v2350_v27, %v834_v11 }
 0x15f   : > { %v843_v59 = vadd.f32 %v2452_v51, %v835_v42 }
 0x161   : > { %v847_v61 = vpack.c.bf16 %v843_v59, %v842_v55 }
 0x163   : > { %1322 = vmatmul.mubr.msk.bf16.vlgmr.msra.gmra.mrb[0].mxu1 %vm861_vm0, %v847_v61 }
 0x226   : > { %v1319_v43 = vpop.f32.mrb[0].mxu0 }
 0x227   : > { %v917_v52 = vadd.f32 %v1319_v43, %v1294_v18  ;;  %v908_v1 = vpop.f32.mrb[1].mxu0 }
 0x228   : > { %v909_v44 = vadd.f32 %v1294_v18, %v908_v1  ;;  %v1320_v17 = vpop.f32.mrb[2].mxu0 }
 0x229   : > { %v949_v2 = vmul.f32 0.044715, %v917_v52  ;;  %v920_v63 = vadd.f32 %v1320_v17, %v1294_v18  ;;  %v911_v15 = vpop.f32.mrb[3].mxu0  ;;  %v941_v60 = vmul.f32 0.5, %v917_v52 }
 0x22a   : > { %v947_v45 = vmul.f32 0.044715, %v909_v44  ;;  %v912_v22 = vadd.f32 %v1294_v18, %v911_v15  ;;  %v939_v32 = vmul.f32 0.5, %v909_v44 }
 0x22b   : > { %v957_v19 = vmul.f32 %v949_v2, %v917_v52  ;;  %v950_v62 = vmul.f32 0.044715, %v920_v63  ;;  %v942_v8 = vmul.f32 0.5, %v920_v63 }
 0x22c   : > { %v955_v0 = vmul.f32 %v947_v45, %v909_v44  ;;  %v948_v27 = vmul.f32 0.044715, %v912_v22  ;;  %v940_v11 = vmul.f32 0.5, %v912_v22 }
 0x22d   : > { %v965_v46 = vmul.f32 %v957_v19, %v917_v52  ;;  %v958_v51 = vmul.f32 %v950_v62, %v920_v63 }
 0x22e   : > { %v963_v7 = vmul.f32 %v955_v0, %v909_v44  ;;  %v956_v3 = vmul.f32 %v948_v27, %v912_v22 }
 0x22f   : > { %v973_v5 = vadd.f32 %v965_v46, %v917_v52  ;;  %v966_v6 = vmul.f32 %v958_v51, %v920_v63  ;;  %v1300_v52 = vld [vmem:[#allocation16] ss:$0 sm:$0xff] }
 0x230   : > { %v971_v10 = vadd.f32 %v963_v7, %v909_v44  ;;  %v964_v47 = vmul.f32 %v956_v3, %v912_v22 }
 0x231   : > { %v981_v24 = vmul.f32 0.7978846, %v973_v5  ;;  %v974_v9 = vadd.f32 %v966_v6, %v920_v63 }
 0x232   : > { %v979_v48 = vmul.f32 0.7978846, %v971_v10  ;;  %v972_v49 = vadd.f32 %v964_v47, %v912_v22 }
 0x233   : > { %1479 = vtanh.f32 %v981_v24  ;;  %v982_v58 = vmul.f32 0.7978846, %v974_v9 }
 0x234   : > { %1481 = vtanh.f32 %v979_v48  ;;  %v980_v50 = vmul.f32 0.7978846, %v972_v49 }
 0x235   : > { %1483 = vtanh.f32 %v982_v58 }
 0x236   : > { %v1323_v30 = vpop.f32.mrb[0].mxu1  ;;  %1485 = vtanh.f32 %v980_v50 }
 0x237   : > { %v2520_v12 = vadd.f32 %v1323_v30, %v1294_v18  ;;  %v924_v14 = vpop.f32.mrb[1].mxu1 }
 0x238   : > { %v2522_v25 = vadd.f32 %v1294_v18, %v924_v14  ;;  %v1324_v20 = vpop.f32.mrb[2].mxu1 }
 0x239   : > { %v953_v35 = vmul.f32 0.044715, %v2520_v12  ;;  %v2525_v16 = vadd.f32 %v1324_v20, %v1294_v18  ;;  %v927_v21 = vpop.f32.mrb[3].mxu1  ;;  %v945_v10 = vmul.f32 0.5, %v2520_v12 }
 0x23a   : > { %v951_v31 = vmul.f32 0.044715, %v2522_v25  ;;  %v2528_v28 = vadd.f32 %v1294_v18, %v927_v21  ;;  %v943_v9 = vmul.f32 0.5, %v2522_v25 }
 0x23b   : > { %v961_v29 = vmul.f32 %v953_v35, %v2520_v12  ;;  %v954_v56 = vmul.f32 0.044715, %v2525_v16  ;;  %v946_v50 = vmul.f32 0.5, %v2525_v16 }
 0x23c   : > { %v959_v39 = vmul.f32 %v951_v31, %v2522_v25  ;;  %v952_v13 = vmul.f32 0.044715, %v2528_v28  ;;  %v944_v20 = vmul.f32 0.5, %v2528_v28 }
 0x23d   : > { %v969_v4 = vmul.f32 %v961_v29, %v2520_v12  ;;  %v962_v41 = vmul.f32 %v954_v56, %v2525_v16  ;;  %v1480_v57 = vpop.eup %1479 }
 0x23e   : > { %v967_v40 = vmul.f32 %v959_v39, %v2522_v25  ;;  %v960_v53 = vmul.f32 %v952_v13, %v2528_v28  ;;  %v1482_v36 = vpop.eup %1481  ;;  %v997_v23 = vadd.f32 1.0, %v1480_v57 }
 0x23f   : > { %v977_v26 = vadd.f32 %v969_v4, %v2520_v12  ;;  %v970_v54 = vmul.f32 %v962_v41, %v2525_v16  ;;  %v1484_v37 = vpop.eup %1483  ;;  %v995_v38 = vadd.f32 1.0, %v1482_v36 }
 0x240   : > { %v975_v34 = vadd.f32 %v967_v40, %v2522_v25  ;;  %v968_v42 = vmul.f32 %v960_v53, %v2528_v28  ;;  %v1486_v55 = vpop.eup %1485  ;;  %v1005_v59 = vmul.f32 %v997_v23, %v941_v60  ;;  %v998_v18 = vadd.f32 1.0, %v1484_v37 }
 0x241   : > { %v985_v61 = vmul.f32 0.7978846, %v977_v26  ;;  %v978_v43 = vadd.f32 %v970_v54, %v2525_v16  ;;  %v1003_v1 = vmul.f32 %v995_v38, %v939_v32  ;;  %v996_v17 = vadd.f32 1.0, %v1486_v55 }
 0x242   : > { %v983_v44 = vmul.f32 0.7978846, %v975_v34  ;;  %v976_v2 = vadd.f32 %v968_v42, %v2528_v28  ;;  %v1020_v63 = vmul.f32 %v1299_v33, %v1005_v59  ;;  %v1006_v15 = vmul.f32 %v998_v18, %v942_v8 }
 0x243   : > { %1487 = vtanh.f32 %v985_v61  ;;  %v986_v45 = vmul.f32 0.7978846, %v978_v43  ;;  %v1018_v22 = vmul.f32 %v1299_v33, %v1003_v1  ;;  %v1004_v19 = vmul.f32 %v996_v17, %v940_v11 }
 0x244   : > { %1489 = vtanh.f32 %v983_v44  ;;  %v984_v62 = vmul.f32 0.7978846, %v976_v2  ;;  %v1035_v0 = vadd.f32 %v1300_v52, %v1020_v63  ;;  %v1021_v27 = vmul.f32 %v1299_v33, %v1006_v15 }
 0x245   : > { %1491 = vtanh.f32 %v986_v45  ;;  %v1033_v46 = vadd.f32 %v1300_v52, %v1018_v22  ;;  %v1019_v51 = vmul.f32 %v1299_v33, %v1004_v19 }
 0x246   : > { %1493 = vtanh.f32 %v984_v62  ;;  %1043 = vst.msk [vmem:[%s2545_s22 + $0x10] sm:$0xff] %vm861_vm0, %v1035_v0  ;;  %v1036_v7 = vadd.f32 %v1300_v52, %v1021_v27 }
 0x247   : > { %1041 = vst.msk [vmem:[%s2545_s22] sm:$0xff] %vm861_vm0, %v1033_v46  ;;  %v1034_v3 = vadd.f32 %v1300_v52, %v1019_v51 }
 0x248   : > { %1044 = vst.msk [vmem:[%s2545_s22 + $0x18] sm:$0xff] %vm861_vm0, %v1036_v7 }
 0x249   : > { %1042 = vst.msk [vmem:[%s2545_s22 + $0x8] sm:$0xff] %vm861_vm0, %v1034_v3 }
 0x24d   : > { %v1488_v5 = vpop.eup %1487 }
 0x24e   : > { %v1490_v6 = vpop.eup %1489  ;;  %v1001_v47 = vadd.f32 1.0, %v1488_v5 }
 0x24f   : > { %v1492_v24 = vpop.eup %1491  ;;  %v999_v48 = vadd.f32 1.0, %v1490_v6 }
 0x250   : > { %v1494_v49 = vpop.eup %1493  ;;  %v1009_v58 = vmul.f32 %v1001_v47, %v945_v10  ;;  %v1002_v30 = vadd.f32 1.0, %v1492_v24 }
 0x251   : > { %v1007_v14 = vmul.f32 %v999_v48, %v943_v9  ;;  %v1000_v35 = vadd.f32 1.0, %v1494_v49 }
 0x252   : > { %v1024_v21 = vmul.f32 %v1299_v33, %v1009_v58  ;;  %v1010_v12 = vmul.f32 %v1002_v30, %v946_v50 }
 0x253   : > { %v1022_v31 = vmul.f32 %v1299_v33, %v1007_v14  ;;  %v1008_v29 = vmul.f32 %v1000_v35, %v944_v20 }
 0x254   : > { %v1039_v25 = vadd.f32 %v1300_v52, %v1024_v21  ;;  %v1025_v56 = vmul.f32 %v1299_v33, %v1010_v12 }
 0x255   : > { %v1037_v39 = vadd.f32 %v1300_v52, %v1022_v31  ;;  %v1023_v16 = vmul.f32 %v1299_v33, %v1008_v29 }
 0x256   : > { %1047 = vst.msk [vmem:[%s2545_s22 + $0x30] sm:$0xff] %vm861_vm0, %v1039_v25  ;;  %v1040_v13 = vadd.f32 %v1300_v52, %v1025_v56 }
 0x257   : > { %1045 = vst.msk [vmem:[%s2545_s22 + $0x20] sm:$0xff] %vm861_vm0, %v1037_v39  ;;  %v1038_v28 = vadd.f32 %v1300_v52, %v1023_v16 }
 0x258   : > { %1048 = vst.msk [vmem:[%s2545_s22 + $0x38] sm:$0xff] %vm861_vm0, %v1040_v13 }
 0x259   : > { %1046 = vst.msk [vmem:[%s2545_s22 + $0x28] sm:$0xff] %vm861_vm0, %v1038_v28 }
 0x25a   : > { %1762 = shalt.err (!%p1759_p10)
}
 0x25b   : > { %s1763_s23 = scalar_lea.hbm %s2566_s27, 1024  ;;  %s1767_s22 = scalar_lea.hbm %s2658_s9, 2048 }
 0x25c   : > { %p1764_p11 = scmp.ne.s32.totalorder %s2566_s27, %s1763_s23  ;;  %p1768_p7 = scmp.lt.u32.totalorder %s2566_s27, %s2658_s9 }
 0x25d   : > { %p1769_p5 = scmp.lt.u32.totalorder %s1767_s22, %s1763_s23  ;;  %p1771_p12 = scmp.lt.u32.totalorder %s1763_s23, %s2566_s27 }
 0x25e   : > { %p1765_p0 = pnand %p1764_p11, %p2659_p13 }
 0x25f   : > { %p1770_p9 = por %p1769_p5, %p1768_p7 }
 0x260   : > { %p1766_p6 = pneg %p1765_p0 }
 0x261   : > { %p1772_p1 = por %p1771_p12, %p1770_p9 }
 0x263   : > { %p1773_p3 = pnand %p1772_p1, %p1766_p6 }
 0x265   : > { %1776 = shalt.err (!%p1773_p3)
}
 0x266   : > { %s1845_s14 = smov 128   ;;  %s1846_s2 = smov 8  }
 0x267   : > { %1366 = dma.vmem_to_hbm [thread:$0]  (%p2659_p13), %s2568_s25, 1024, %s2566_s27, %s1050_s15, %s1845_s14, %s1845_s14, %s1846_s2  }
 0x268 PF: > { %s1078_s17 = sand.u32 1, %s1819_s30   ;;  %p2660_p2 = scmp.ne.s32.totalorder %s2645_s24, 0 }
 0x269   : > { %p2661_p8 = scmp.ge.s32.totalorder %s1831_s12, 2  ;;  %s1079_s20 = scalar_lea.sflag [#allocation4], %s1078_s17 }
 0x26b   : > { %p1398_p4 = pnand %p2661_p8, %p2660_p2 }
 0x26d   : > { %1814 = dma.done.wait (!%p1398_p4), %s1079_s20, 1024  }
 0x26e   : > { %1816 = vsyncadd (!%p1398_p4), %s1079_s20, 4294966272  ;;  %p26_p10 = scmp.ge.s32.totalorder %s2116_s19, 4   ;;  %s2662_s30 = smov %s1823_s10 }
 0x26f   : > { %s2663_s10 = smov %s1827_s11  ;;  %s2664_s11 = smov %s2127_s18 }
 0x270   : > { %s2665_s12 = smov %s2116_s19  ;;  %28 = sbr.rel (!%p26_p10) target bundleno = 13 (0xd), region = 135 }
 0x277   :  { %1084 = vsyncpa [#allocation3], 1 }
 0x278   :  { %1086 = vsyncpa [#allocation3 + $0x1], 1 }
 0x279   :  { %1087 = vsyncpa [#allocation6], 1 }
 0x27a   :  { %1088 = vsyncpa [#allocation9], 1 }
 0x27b   :  { %1089 = vsyncpa [#allocation12], 1 }
 0x27c   :  { %1090 = vsyncpa [#allocation15], 1 }
 0x27d   :  { %1091 = vsyncpa [#allocation4], 1 }
 0x27e   :  { %1093 = vsyncpa [#allocation4 + $0x1], 1 }

// kernel: mduvsr_forward.26
= control target key start
LH: loop header
LB: loop body
LE: loop exit
PB: predicated region body
PF: predicated region fallthrough
CT: control target
= control target key end

     0   :  { %8 = vsyncpa [#allocation3], 0  ;;  %s501_s0 = inlined_call_operand.hbm [shape: f32[128,3], index: 0, kind: input, shape index: {}]   ;;  %s502_s1 = inlined_call_operand.hbm [shape: f32[3,36], index: 1, kind: input, shape index: {}]   ;;  %s503_s2 = inlined_call_operand.hbm [shape: f32[1,36], index: 2, kind: input, shape index: {}]   ;;  %s504_s3 = inlined_call_operand.hbm [shape: f32[128,36], index: 3, kind: output, shape index: {}]  }
   0x1   :  { %9 = vsyncpa [#allocation6], 0 }
   0x2   :  { %10 = vsyncpa [#allocation4], 0  ;;  %s389_s12 = smov [#allocation5]   ;;  %s390_s14 = smov [#allocation2]  }
   0x3   :  { %s29_s13 = sshll.u32 %s389_s12, 4  ;;  %s16_s15 = sshll.u32 %s390_s14, 4  ;;  %s30_s13 = int_to_ptr.vmem [resolvable:$true] %s29_s13  ;;  %s416_s15 = int_to_ptr.vmem [resolvable:$true] %s16_s15 }
   0x4   :  { %s295_s18 = scalar_lea.hbm %s502_s1, 64 }
   0x5   :  { %p296_p0 = scmp.ne.s32.totalorder %s502_s1, %s295_s18  ;;  %p299_p1 = scmp.lt.u32.totalorder %s295_s18, %s502_s1 }
   0x7   :  { %p301_p2 = pnand %p299_p1, %p296_p0 }
   0x9   :  { %304 = shalt.err (!%p301_p2)
}
   0xa   :  { %s305_s23 = scalar_lea.vmem %s30_s13, 64  ;;  %p310_p4 = scmp.lt.s32.totalorder %s30_s13, %s30_s13 }
   0xb   :  { %p306_p3 = scmp.ne.s32.totalorder %s30_s13, %s305_s23  ;;  %p311_p5 = scmp.lt.s32.totalorder %s305_s23, %s305_s23 }
   0xd   :  { %p312_p6 = por %p311_p5, %p310_p4 }
   0xf   :  { %p313_p7 = pnand %p312_p6, %p306_p3 }
  0x11   :  { %316 = shalt.err (!%p313_p7)
}
  0x12   :  { %32 = dma.hbm_to_vmem [thread:$0]  %s502_s1, 64, %s30_s13, [#allocation6]  }
  0x13   :  { %s317_s28 = scalar_lea.hbm %s501_s0, 2048 }
  0x14   :  { %p318_p8 = scmp.ne.s32.totalorder %s501_s0, %s317_s28  ;;  %p321_p9 = scmp.lt.u32.totalorder %s317_s28, %s501_s0 }
  0x16   :  { %p323_p10 = pnand %p321_p9, %p318_p8 }
  0x18   :  { %326 = shalt.err (!%p323_p10)
}
  0x19   :  { %s327_s6 = scalar_lea.vmem %s416_s15, 2048  ;;  %p332_p12 = scmp.lt.s32.totalorder %s416_s15, %s416_s15 }
  0x1a   :  { %p328_p11 = scmp.ne.s32.totalorder %s416_s15, %s327_s6  ;;  %p333_p13 = scmp.lt.s32.totalorder %s327_s6, %s327_s6 }
  0x1c   :  { %p334_p0 = por %p333_p13, %p332_p12 }
  0x1e   :  { %p335_p1 = pnand %p334_p0, %p328_p11 }
  0x20   :  { %338 = shalt.err (!%p335_p1)
}
  0x21   :  { %s391_s1 = smov 128   ;;  %s392_s7 = smov 8  }
  0x22   :  { %22 = dma.hbm_to_vmem [thread:$0]  %s501_s0, 2048, %s416_s15, [#allocation3], %s391_s1, %s391_s1, %s392_s7  }
  0x23   :  { %s393_s10 = smov [#allocation7]   ;;  %s339_s14 = scalar_lea.hbm %s503_s2, 16 }
  0x24   :  { %s39_s11 = sshll.u32 %s393_s10, 4  ;;  %p340_p2 = scmp.ne.s32.totalorder %s503_s2, %s339_s14  ;;  %s40_s11 = int_to_ptr.vmem [resolvable:$true] %s39_s11 }
  0x25   :  { %p343_p3 = scmp.lt.u32.totalorder %s339_s14, %s503_s2 }
  0x27   :  { %p345_p4 = pnand %p343_p3, %p340_p2 }
  0x29   :  { %348 = shalt.err (!%p345_p4)
}
  0x2a   :  { %s349_s20 = scalar_lea.vmem %s40_s11, 16  ;;  %s353_s0 = scalar_lea.vmem %s40_s11, 32 }
  0x2b   :  { %p350_p5 = scmp.ne.s32.totalorder %s40_s11, %s349_s20  ;;  %p354_p6 = scmp.lt.s32.totalorder %s40_s11, %s40_s11 }
  0x2c   :  { %p355_p7 = scmp.lt.s32.totalorder %s353_s0, %s349_s20 }
  0x2e   :  { %p356_p8 = por %p355_p7, %p354_p6 }
  0x30   :  { %p357_p9 = pnand %p356_p8, %p350_p5 }
  0x32   :  { %360 = shalt.err (!%p357_p9)
}
  0x33   :  { %42 = dma.hbm_to_vmem [thread:$0]  %s503_s2, 16, %s40_s11, [#allocation6]  }
  0x34   :  { %383 = dma.done.wait [#allocation3], 2048  }
  0x35   :  { %384 = vsyncadd [#allocation3], 4294965248 }
  0x36   :  { %385 = dma.done.wait [#allocation6], 80  }
  0x37   :  { %386 = vsyncadd [#allocation6], 4294967216  ;;  %vm111_vm0 = vcmask 1040384   ;;  %vm112_vm1 = vcmask 1041408   ;;  %v394_v0 = vmov 65535   ;;  %v53_v4 = vld [vmem:[#allocation2] sm:$0xff] }
  0x38   :  { %v113_v1 = vsel %vm111_vm0, 4294967295, %v394_v0  ;;  %v77_v2 = vld [vmem:[#allocation5] sm:$0x7]  ;;  %v54_v5 = vld [vmem:[#allocation2 + $0x8] sm:$0xff]  ;;  %vm86_vm2 = vcmask 23552   ;;  %v55_v10 = vld [vmem:[#allocation2 + $0x10] sm:$0xff] }
  0x39   :  { %v114_v3 = vsel %vm112_vm1, %v113_v1, 0  ;;  %v78_v6 = vpack.c.bf16 %v77_v2, %v77_v2  ;;  %v69_v7 = vpack.c.bf16 %v54_v5, %v53_v4  ;;  %v61_v8 = vld [vmem:[#allocation2 + $0x40] sm:$0xff]  ;;  %v62_v9 = vld [vmem:[#allocation2 + $0x48] sm:$0xff]  ;;  %v56_v12 = vld [vmem:[#allocation2 + $0x18] sm:$0xff]  ;;  %vm215_vm3 = vcmask 293888   ;;  %s395_s2 = smov [#allocation8]  }
  0x3a   :  { %v73_v11 = vpack.c.bf16 %v62_v9, %v61_v8  ;;  %v63_v13 = vld [vmem:[#allocation2 + $0x50] sm:$0xff]  ;;  %v64_v14 = vld [vmem:[#allocation2 + $0x58] sm:$0xff]  ;;  %v57_v16 = vld [vmem:[#allocation2 + $0x20] sm:$0xff]  ;;  %v70_v20 = vpack.c.bf16 %v56_v12, %v55_v10  ;;  %s237_s22 = sshll.u32 %s395_s2, 4  ;;  %s238_s22 = int_to_ptr.vmem [resolvable:$true] %s237_s22 }
  0x3b   :  { %v116_v15 = vand.u32 %v114_v3, %v78_v6  ;;  %270 = vmatprep.mubr.msk.bf16.mxu0 %vm86_vm2, %v69_v7  ;;  %v58_v17 = vld [vmem:[#allocation2 + $0x28] sm:$0xff]  ;;  %v65_v18 = vld [vmem:[#allocation2 + $0x60] sm:$0xff]  ;;  %v74_v21 = vpack.c.bf16 %v64_v14, %v63_v13  ;;  %v59_v24 = vld [vmem:[#allocation2 + $0x30] sm:$0xff]  ;;  %s361_s23 = scalar_lea.vmem %s238_s22, 2048  ;;  %p366_p11 = scmp.lt.s32.totalorder %s238_s22, %s238_s22 }
  0x3c   :  { %278 = vmatprep.mubr.msk.bf16.mxu1 %vm86_vm2, %v73_v11  ;;  %v66_v19 = vld [vmem:[#allocation2 + $0x68] sm:$0xff]  ;;  %v71_v22 = vpack.c.bf16 %v58_v17, %v57_v16  ;;  %v60_v25 = vld [vmem:[#allocation2 + $0x38] sm:$0xff]  ;;  %v67_v26 = vld [vmem:[#allocation2 + $0x70] sm:$0xff]  ;;  %p362_p10 = scmp.ne.s32.totalorder %s238_s22, %s361_s23  ;;  %p367_p12 = scmp.lt.s32.totalorder %s361_s23, %s361_s23 }
  0x3d   :  { %268 = vmatprep.subr.bf16.mxu0 %v116_v15  ;;  %286 = vmatprep.subr.bf16.mxu1 %v116_v15  ;;  %v75_v23 = vpack.c.bf16 %v66_v19, %v65_v18  ;;  %v68_v27 = vld [vmem:[#allocation2 + $0x78] sm:$0xff]  ;;  %v72_v28 = vpack.c.bf16 %v60_v25, %v59_v24  ;;  %v250_v30 = vld [vmem:[#allocation7] ss:$0 sm:$0xff] }
  0x3e   :  { %269 = vmatpush3.bf16.msra.mxu0 %v116_v15  ;;  %287 = vmatpush3.bf16.msra.mxu1 %v116_v15  ;;  %v76_v29 = vpack.c.bf16 %v68_v27, %v67_v26  ;;  %p368_p13 = por %p367_p12, %p366_p11 }
  0x40   :  { %p369_p0 = pnand %p368_p13, %p362_p10 }
  0x41   :  { %271 = vmatmul.mubr.msk.bf16.vlgmr.msra.gmra.mrb[0].mxu0 %vm86_vm2, %v70_v20  ;;  %279 = vmatmul.mubr.msk.bf16.vlgmr.msra.gmra.mrb[0].mxu1 %vm86_vm2, %v74_v21 }
  0x42   :  { %274 = vmatprep.mubr.msk.bf16.mxu0 %vm86_vm2, %v71_v22  ;;  %282 = vmatprep.mubr.msk.bf16.mxu1 %vm86_vm2, %v75_v23 }
  0x49   :  { %275 = vmatmul.mubr.msk.bf16.gmra.mrb[4].mxu0 %vm86_vm2, %v72_v28  ;;  %283 = vmatmul.mubr.msk.bf16.gmra.mrb[4].mxu1 %vm86_vm2, %v76_v29 }
 0x114   :  { %v272_v31 = vpop.f32.mrb[0].mxu0  ;;  %v280_v32 = vpop.f32.mrb[0].mxu1 }
 0x115   :  { %v161_v33 = vadd.f32 %v272_v31, %v250_v30  ;;  %v193_v34 = vadd.f32 %v280_v32, %v250_v30  ;;  %v152_v35 = vpop.f32.mrb[1].mxu0  ;;  %v184_v36 = vpop.f32.mrb[1].mxu1 }
 0x116   :  { %v153_v37 = vadd.f32 %v250_v30, %v152_v35  ;;  %v185_v38 = vadd.f32 %v250_v30, %v184_v36  ;;  %v273_v39 = vpop.f32.mrb[2].mxu0  ;;  %v281_v40 = vpop.f32.mrb[2].mxu1 }
 0x117   :  { %218 = vst.msk [vmem:[#allocation8 + $0x10] sm:$0xff] %vm215_vm3, %v161_v33  ;;  %226 = vst.msk [vmem:[#allocation8 + $0x50] sm:$0xff] %vm215_vm3, %v193_v34  ;;  %v164_v41 = vadd.f32 %v273_v39, %v250_v30  ;;  %v196_v42 = vadd.f32 %v281_v40, %v250_v30  ;;  %v155_v43 = vpop.f32.mrb[3].mxu0  ;;  %v187_v44 = vpop.f32.mrb[3].mxu1 }
 0x118   :  { %216 = vst.msk [vmem:[#allocation8] sm:$0xff] %vm215_vm3, %v153_v37  ;;  %224 = vst.msk [vmem:[#allocation8 + $0x40] sm:$0xff] %vm215_vm3, %v185_v38  ;;  %v156_v45 = vadd.f32 %v250_v30, %v155_v43  ;;  %v188_v46 = vadd.f32 %v250_v30, %v187_v44 }
 0x119   :  { %219 = vst.msk [vmem:[#allocation8 + $0x18] sm:$0xff] %vm215_vm3, %v164_v41  ;;  %227 = vst.msk [vmem:[#allocation8 + $0x58] sm:$0xff] %vm215_vm3, %v196_v42 }
 0x11a   :  { %217 = vst.msk [vmem:[#allocation8 + $0x8] sm:$0xff] %vm215_vm3, %v156_v45  ;;  %225 = vst.msk [vmem:[#allocation8 + $0x48] sm:$0xff] %vm215_vm3, %v188_v46 }
 0x11c   :  { %v276_v47 = vpop.f32.mrb[4].mxu0  ;;  %v284_v48 = vpop.f32.mrb[4].mxu1 }
 0x11d   :  { %v177_v49 = vadd.f32 %v276_v47, %v250_v30  ;;  %v209_v50 = vadd.f32 %v284_v48, %v250_v30  ;;  %v168_v51 = vpop.f32.mrb[5].mxu0  ;;  %v200_v52 = vpop.f32.mrb[5].mxu1 }
 0x11e   :  { %v169_v53 = vadd.f32 %v250_v30, %v168_v51  ;;  %v201_v54 = vadd.f32 %v250_v30, %v200_v52  ;;  %v277_v55 = vpop.f32.mrb[6].mxu0  ;;  %v285_v56 = vpop.f32.mrb[6].mxu1 }
 0x11f   :  { %222 = vst.msk [vmem:[#allocation8 + $0x30] sm:$0xff] %vm215_vm3, %v177_v49  ;;  %230 = vst.msk [vmem:[#allocation8 + $0x70] sm:$0xff] %vm215_vm3, %v209_v50  ;;  %v180_v57 = vadd.f32 %v277_v55, %v250_v30  ;;  %v212_v58 = vadd.f32 %v285_v56, %v250_v30  ;;  %v171_v59 = vpop.f32.mrb[7].mxu0  ;;  %v203_v60 = vpop.f32.mrb[7].mxu1 }
 0x120   :  { %220 = vst.msk [vmem:[#allocation8 + $0x20] sm:$0xff] %vm215_vm3, %v169_v53  ;;  %228 = vst.msk [vmem:[#allocation8 + $0x60] sm:$0xff] %vm215_vm3, %v201_v54  ;;  %v172_v61 = vadd.f32 %v250_v30, %v171_v59  ;;  %v204_v62 = vadd.f32 %v250_v30, %v203_v60 }
 0x121   :  { %223 = vst.msk [vmem:[#allocation8 + $0x38] sm:$0xff] %vm215_vm3, %v180_v57  ;;  %231 = vst.msk [vmem:[#allocation8 + $0x78] sm:$0xff] %vm215_vm3, %v212_v58 }
 0x122   :  { %221 = vst.msk [vmem:[#allocation8 + $0x28] sm:$0xff] %vm215_vm3, %v172_v61  ;;  %229 = vst.msk [vmem:[#allocation8 + $0x68] sm:$0xff] %vm215_vm3, %v204_v62 }
 0x123   :  { %372 = shalt.err (!%p369_p0)
}
 0x124   :  { %s373_s26 = scalar_lea.hbm %s504_s3, 2048 }
 0x125   :  { %p374_p1 = scmp.ne.s32.totalorder %s504_s3, %s373_s26  ;;  %p377_p2 = scmp.lt.u32.totalorder %s373_s26, %s504_s3 }
 0x127   :  { %p379_p3 = pnand %p377_p2, %p374_p1 }
 0x129   :  { %382 = shalt.err (!%p379_p3)
}
 0x12a   :  { %243 = dma.vmem_to_hbm [thread:$0]  %s238_s22, 2048, %s504_s3, [#allocation4], %s391_s1, %s391_s1, %s392_s7  }
 0x12b   :  { %387 = dma.done.wait [#allocation4], 2048  }
 0x12c   :  { %388 = vsyncadd [#allocation4], 4294965248 }
 0x12d   :  { %247 = vsyncpa [#allocation3], 1 }
 0x12e   :  { %248 = vsyncpa [#allocation6], 1 }
 0x12f   :  { %249 = vsyncpa [#allocation4], 1 }

// kernel: mduvsr_forward.28
= control target key start
LH: loop header
LB: loop body
LE: loop exit
PB: predicated region body
PF: predicated region fallthrough
CT: control target
= control target key end

     0   :  { %8 = vsyncpa [#allocation3], 0  ;;  %s312_s0 = inlined_call_operand.hbm [shape: f32[2,4], index: 0, kind: input, shape index: {}]   ;;  %s313_s1 = inlined_call_operand.hbm [shape: f32[4,108], index: 1, kind: input, shape index: {}]   ;;  %s314_s2 = inlined_call_operand.hbm [shape: f32[1,108], index: 2, kind: input, shape index: {}]   ;;  %s315_s3 = inlined_call_operand.hbm [shape: f32[2,108], index: 3, kind: output, shape index: {}]  }
   0x1   :  { %9 = vsyncpa [#allocation6], 0 }
   0x2   :  { %10 = vsyncpa [#allocation4], 0  ;;  %s238_s12 = smov [#allocation5]   ;;  %s239_s14 = smov [#allocation2]  }
   0x3   :  { %s27_s13 = sshll.u32 %s238_s12, 4  ;;  %s17_s15 = sshll.u32 %s239_s14, 4  ;;  %s28_s13 = int_to_ptr.vmem [resolvable:$true] %s27_s13  ;;  %s18_s15 = int_to_ptr.vmem [resolvable:$true] %s17_s15 }
   0x4   :  { %s144_s18 = scalar_lea.hbm %s313_s1, 64 }
   0x5   :  { %p145_p0 = scmp.ne.s32.totalorder %s313_s1, %s144_s18  ;;  %p148_p1 = scmp.lt.u32.totalorder %s144_s18, %s313_s1 }
   0x7   :  { %p150_p2 = pnand %p148_p1, %p145_p0 }
   0x9   :  { %153 = shalt.err (!%p150_p2)
}
   0xa   :  { %s154_s23 = scalar_lea.vmem %s28_s13, 64  ;;  %p159_p4 = scmp.lt.s32.totalorder %s28_s13, %s28_s13 }
   0xb   :  { %p155_p3 = scmp.ne.s32.totalorder %s28_s13, %s154_s23  ;;  %p160_p5 = scmp.lt.s32.totalorder %s154_s23, %s154_s23 }
   0xd   :  { %p161_p6 = por %p160_p5, %p159_p4 }
   0xf   :  { %p162_p7 = pnand %p161_p6, %p155_p3 }
  0x11   :  { %165 = shalt.err (!%p162_p7)
}
  0x12   :  { %30 = dma.hbm_to_vmem [thread:$0]  %s313_s1, 64, %s28_s13, [#allocation6]  }
  0x13   :  { %s166_s28 = scalar_lea.hbm %s312_s0, 32 }
  0x14   :  { %p167_p8 = scmp.ne.s32.totalorder %s312_s0, %s166_s28  ;;  %p170_p9 = scmp.lt.u32.totalorder %s166_s28, %s312_s0 }
  0x16   :  { %p172_p10 = pnand %p170_p9, %p167_p8 }
  0x18   :  { %175 = shalt.err (!%p172_p10)
}
  0x19   :  { %s176_s6 = scalar_lea.vmem %s18_s15, 32  ;;  %p181_p12 = scmp.lt.s32.totalorder %s18_s15, %s18_s15 }
  0x1a   :  { %p177_p11 = scmp.ne.s32.totalorder %s18_s15, %s176_s6  ;;  %p182_p13 = scmp.lt.s32.totalorder %s176_s6, %s176_s6 }
  0x1c   :  { %p183_p0 = por %p182_p13, %p181_p12 }
  0x1e   :  { %p184_p1 = pnand %p183_p0, %p177_p11 }
  0x20   :  { %187 = shalt.err (!%p184_p1)
}
  0x21   :  { %20 = dma.hbm_to_vmem [thread:$0]  %s312_s0, 32, %s18_s15, [#allocation3]  }
  0x22   :  { %s240_s8 = smov [#allocation7]   ;;  %s188_s12 = scalar_lea.hbm %s314_s2, 16 }
  0x23   :  { %s37_s9 = sshll.u32 %s240_s8, 4  ;;  %p189_p2 = scmp.ne.s32.totalorder %s314_s2, %s188_s12  ;;  %s38_s9 = int_to_ptr.vmem [resolvable:$true] %s37_s9 }
  0x24   :  { %p192_p3 = scmp.lt.u32.totalorder %s188_s12, %s314_s2 }
  0x26   :  { %p194_p4 = pnand %p192_p3, %p189_p2 }
  0x28   :  { %197 = shalt.err (!%p194_p4)
}
  0x29   :  { %s198_s18 = scalar_lea.vmem %s38_s9, 16  ;;  %s202_s0 = scalar_lea.vmem %s38_s9, 32 }
  0x2a   :  { %p199_p5 = scmp.ne.s32.totalorder %s38_s9, %s198_s18  ;;  %p203_p6 = scmp.lt.s32.totalorder %s38_s9, %s38_s9 }
  0x2b   :  { %p204_p7 = scmp.lt.s32.totalorder %s202_s0, %s198_s18 }
  0x2d   :  { %p205_p8 = por %p204_p7, %p203_p6 }
  0x2f   :  { %p206_p9 = pnand %p205_p8, %p199_p5 }
  0x31   :  { %209 = shalt.err (!%p206_p9)
}
  0x32   :  { %40 = dma.hbm_to_vmem [thread:$0]  %s314_s2, 16, %s38_s9, [#allocation6]  }
  0x33   :  { %232 = dma.done.wait [#allocation3], 32  }
  0x34   :  { %233 = vsyncadd [#allocation3], 4294967264 }
  0x35   :  { %234 = dma.done.wait [#allocation6], 80  }
  0x36   :  { %235 = vsyncadd [#allocation6], 4294967216  ;;  %v241_v0 = vmov 0.0   ;;  %vm242_vm0 = vmmov 0   ;;  %v53_v1 = vld [vmem:[#allocation5] sm:$0xf] }
  0x37   :  { %132 = vmatprep.subr.bf16.mxu0 %v241_v0  ;;  %134 = vmatprep.mubr.msk.bf16.mxu0 %vm242_vm0, %v241_v0  ;;  %vm66_vm1 = vcmask 1041408   ;;  %v51_v2 = vld [vmem:[#allocation2] sm:$0x3]  ;;  %v54_v3 = vpack.c.bf16 %v53_v1, %v53_v1  ;;  %vm62_vm2 = vcmask 31744   ;;  %v128_v6 = vld [vmem:[#allocation7] ss:$0 sm:$0xff] }
  0x38   :  { %v52_v5 = vpack.c.bf16 %v51_v2, %v51_v2  ;;  %s243_s20 = smov [#allocation8]   ;;  %vm110_vm3 = vcmask 877568  }
  0x39   :  { %v68_v4 = vsel %vm66_vm1, %v54_v3, 0  ;;  %s118_s2 = sshll.u32 %s243_s20, 4  ;;  %s119_s2 = int_to_ptr.vmem [resolvable:$true] %s118_s2 }
  0x3a   :  { %133 = vmatpush3.bf16.msra.mxu0 %v68_v4  ;;  %s210_s21 = scalar_lea.vmem %s119_s2, 32  ;;  %p215_p11 = scmp.lt.s32.totalorder %s119_s2, %s119_s2 }
  0x3b   :  { %p211_p10 = scmp.ne.s32.totalorder %s119_s2, %s210_s21  ;;  %p216_p12 = scmp.lt.s32.totalorder %s210_s21, %s210_s21 }
  0x3d   :  { %135 = vmatmul.mubr.msk.bf16.vlgmr.msra.gmra.mrb[0].mxu0 %vm62_vm2, %v52_v5  ;;  %p217_p13 = por %p216_p12, %p215_p11 }
  0x3f   :  { %p218_p0 = pnand %p217_p13, %p211_p10 }
 0x110   :  { %v104_v7 = vpop.f32.mrb[0].mxu0 }
 0x111   :  { %v105_v8 = vadd.f32 %v128_v6, %v104_v7  ;;  %v136_v9 = vpop.f32.mrb[1].mxu0 }
 0x112   :  { %v107_v10 = vpop.f32.mrb[2].mxu0 }
 0x113   :  { %v137_v11 = vpop.f32.mrb[3].mxu0  ;;  %111 = vst.msk [vmem:[#allocation8] sm:$0x3] %vm110_vm3, %v105_v8 }
 0x114   :  { %221 = shalt.err (!%p218_p0)
}
 0x115   :  { %s222_s24 = scalar_lea.hbm %s315_s3, 32 }
 0x116   :  { %p223_p1 = scmp.ne.s32.totalorder %s315_s3, %s222_s24  ;;  %p226_p2 = scmp.lt.u32.totalorder %s222_s24, %s315_s3 }
 0x118   :  { %p228_p3 = pnand %p226_p2, %p223_p1 }
 0x11a   :  { %231 = shalt.err (!%p228_p3)
}
 0x11b   :  { %121 = dma.vmem_to_hbm [thread:$0]  %s119_s2, 32, %s315_s3, [#allocation4]  }
 0x11c   :  { %236 = dma.done.wait [#allocation4], 32  }
 0x11d   :  { %237 = vsyncadd [#allocation4], 4294967264 }
 0x11e   :  { %125 = vsyncpa [#allocation3], 1 }
 0x11f   :  { %126 = vsyncpa [#allocation6], 1 }
 0x120   :  { %127 = vsyncpa [#allocation4], 1 }

// kernel: mduvsr_forward.27
= control target key start
LH: loop header
LB: loop body
LE: loop exit
PB: predicated region body
PF: predicated region fallthrough
CT: control target
= control target key end

     0   :  { %8 = vsyncpa [#allocation3], 0  ;;  %s318_s0 = inlined_call_operand.hbm [shape: f32[2,3], index: 0, kind: input, shape index: {}]   ;;  %s319_s1 = inlined_call_operand.hbm [shape: f32[3,4], index: 1, kind: input, shape index: {}]   ;;  %s320_s2 = inlined_call_operand.hbm [shape: f32[1,4], index: 2, kind: input, shape index: {}]   ;;  %s321_s3 = inlined_call_operand.hbm [shape: f32[2,4], index: 3, kind: output, shape index: {}]  }
   0x1   :  { %9 = vsyncpa [#allocation6], 0 }
   0x2   :  { %10 = vsyncpa [#allocation4], 0  ;;  %s243_s12 = smov [#allocation5]   ;;  %s244_s14 = smov [#allocation2]  }
   0x3   :  { %s27_s13 = sshll.u32 %s243_s12, 4  ;;  %s17_s15 = sshll.u32 %s244_s14, 4  ;;  %s28_s13 = int_to_ptr.vmem [resolvable:$true] %s27_s13  ;;  %s18_s15 = int_to_ptr.vmem [resolvable:$true] %s17_s15 }
   0x4   :  { %s149_s18 = scalar_lea.hbm %s319_s1, 64 }
   0x5   :  { %p150_p0 = scmp.ne.s32.totalorder %s319_s1, %s149_s18  ;;  %p153_p1 = scmp.lt.u32.totalorder %s149_s18, %s319_s1 }
   0x7   :  { %p155_p2 = pnand %p153_p1, %p150_p0 }
   0x9   :  { %158 = shalt.err (!%p155_p2)
}
   0xa   :  { %s159_s23 = scalar_lea.vmem %s28_s13, 64  ;;  %p164_p4 = scmp.lt.s32.totalorder %s28_s13, %s28_s13 }
   0xb   :  { %p160_p3 = scmp.ne.s32.totalorder %s28_s13, %s159_s23  ;;  %p165_p5 = scmp.lt.s32.totalorder %s159_s23, %s159_s23 }
   0xd   :  { %p166_p6 = por %p165_p5, %p164_p4 }
   0xf   :  { %p167_p7 = pnand %p166_p6, %p160_p3 }
  0x11   :  { %170 = shalt.err (!%p167_p7)
}
  0x12   :  { %30 = dma.hbm_to_vmem [thread:$0]  %s319_s1, 64, %s28_s13, [#allocation6]  }
  0x13   :  { %s171_s28 = scalar_lea.hbm %s318_s0, 32 }
  0x14   :  { %p172_p8 = scmp.ne.s32.totalorder %s318_s0, %s171_s28  ;;  %p175_p9 = scmp.lt.u32.totalorder %s171_s28, %s318_s0 }
  0x16   :  { %p177_p10 = pnand %p175_p9, %p172_p8 }
  0x18   :  { %180 = shalt.err (!%p177_p10)
}
  0x19   :  { %s181_s6 = scalar_lea.vmem %s18_s15, 32  ;;  %p186_p12 = scmp.lt.s32.totalorder %s18_s15, %s18_s15 }
  0x1a   :  { %p182_p11 = scmp.ne.s32.totalorder %s18_s15, %s181_s6  ;;  %p187_p13 = scmp.lt.s32.totalorder %s181_s6, %s181_s6 }
  0x1c   :  { %p188_p0 = por %p187_p13, %p186_p12 }
  0x1e   :  { %p189_p1 = pnand %p188_p0, %p182_p11 }
  0x20   :  { %192 = shalt.err (!%p189_p1)
}
  0x21   :  { %20 = dma.hbm_to_vmem [thread:$0]  %s318_s0, 32, %s18_s15, [#allocation3]  }
  0x22   :  { %s245_s8 = smov [#allocation7]   ;;  %s193_s12 = scalar_lea.hbm %s320_s2, 16 }
  0x23   :  { %s37_s9 = sshll.u32 %s245_s8, 4  ;;  %p194_p2 = scmp.ne.s32.totalorder %s320_s2, %s193_s12  ;;  %s38_s9 = int_to_ptr.vmem [resolvable:$true] %s37_s9 }
  0x24   :  { %p197_p3 = scmp.lt.u32.totalorder %s193_s12, %s320_s2 }
  0x26   :  { %p199_p4 = pnand %p197_p3, %p194_p2 }
  0x28   :  { %202 = shalt.err (!%p199_p4)
}
  0x29   :  { %s203_s18 = scalar_lea.vmem %s38_s9, 16  ;;  %s207_s0 = scalar_lea.vmem %s38_s9, 32 }
  0x2a   :  { %p204_p5 = scmp.ne.s32.totalorder %s38_s9, %s203_s18  ;;  %p208_p6 = scmp.lt.s32.totalorder %s38_s9, %s38_s9 }
  0x2b   :  { %p209_p7 = scmp.lt.s32.totalorder %s207_s0, %s203_s18 }
  0x2d   :  { %p210_p8 = por %p209_p7, %p208_p6 }
  0x2f   :  { %p211_p9 = pnand %p210_p8, %p204_p5 }
  0x31   :  { %214 = shalt.err (!%p211_p9)
}
  0x32   :  { %40 = dma.hbm_to_vmem [thread:$0]  %s320_s2, 16, %s38_s9, [#allocation6]  }
  0x33   :  { %237 = dma.done.wait [#allocation3], 32  }
  0x34   :  { %238 = vsyncadd [#allocation3], 4294967264 }
  0x35   :  { %239 = dma.done.wait [#allocation6], 80  }
  0x36   :  { %240 = vsyncadd [#allocation6], 4294967216  ;;  %v246_v0 = vmov 0.0   ;;  %vm66_vm0 = vcmask 1040384   ;;  %vm247_vm1 = vmmov 0   ;;  %vm67_vm2 = vcmask 1041408  }
  0x37   :  { %136 = vmatprep.subr.bf16.mxu0 %v246_v0  ;;  %138 = vmatprep.mubr.msk.bf16.mxu0 %vm247_vm1, %v246_v0  ;;  %v248_v1 = vmov 65535   ;;  %v53_v3 = vld [vmem:[#allocation5] sm:$0x7]  ;;  %v51_v6 = vld [vmem:[#allocation2] sm:$0x3]  ;;  %vm62_vm3 = vcmask 23552  }
  0x38   :  { %v68_v2 = vsel %vm66_vm0, 4294967295, %v248_v1  ;;  %v54_v5 = vpack.c.bf16 %v53_v3, %v53_v3  ;;  %v52_v8 = vpack.c.bf16 %v51_v6, %v51_v6  ;;  %v132_v9 = vld [vmem:[#allocation7] ss:$0 sm:$0xff]  ;;  %s249_s2 = smov [#allocation8]   ;;  %vm114_vm4 = vcmask 25600  }
  0x39   :  { %v69_v4 = vsel %vm67_vm2, %v68_v2, 0  ;;  %s122_s20 = sshll.u32 %s249_s2, 4  ;;  %s123_s20 = int_to_ptr.vmem [resolvable:$true] %s122_s20 }
  0x3a   :  { %v71_v7 = vand.u32 %v69_v4, %v54_v5  ;;  %s215_s21 = scalar_lea.vmem %s123_s20, 32  ;;  %p220_p11 = scmp.lt.s32.totalorder %s123_s20, %s123_s20 }
  0x3b   :  { %p216_p10 = scmp.ne.s32.totalorder %s123_s20, %s215_s21  ;;  %p221_p12 = scmp.lt.s32.totalorder %s215_s21, %s215_s21 }
  0x3c   :  { %137 = vmatpush3.bf16.msra.mxu0 %v71_v7 }
  0x3d   :  { %p222_p13 = por %p221_p12, %p220_p11 }
  0x3f   :  { %139 = vmatmul.mubr.msk.bf16.vlgmr.msra.gmra.mrb[0].mxu0 %vm62_vm3, %v52_v8  ;;  %p223_p0 = pnand %p222_p13, %p216_p10 }
 0x112   :  { %v107_v10 = vpop.f32.mrb[0].mxu0 }
 0x113   :  { %v108_v11 = vadd.f32 %v132_v9, %v107_v10  ;;  %v140_v12 = vpop.f32.mrb[1].mxu0 }
 0x114   :  { %v110_v13 = vpop.f32.mrb[2].mxu0 }
 0x115   :  { %v113_v14 = vmax.f32 %v108_v11, 0.0  ;;  %v141_v15 = vpop.f32.mrb[3].mxu0 }
 0x117   :  { %115 = vst.msk [vmem:[#allocation8] sm:$0x3] %vm114_vm4, %v113_v14 }
 0x118   :  { %226 = shalt.err (!%p223_p0)
}
 0x119   :  { %s227_s24 = scalar_lea.hbm %s321_s3, 32 }
 0x11a   :  { %p228_p1 = scmp.ne.s32.totalorder %s321_s3, %s227_s24  ;;  %p231_p2 = scmp.lt.u32.totalorder %s227_s24, %s321_s3 }
 0x11c   :  { %p233_p3 = pnand %p231_p2, %p228_p1 }
 0x11e   :  { %236 = shalt.err (!%p233_p3)
}
 0x11f   :  { %125 = dma.vmem_to_hbm [thread:$0]  %s123_s20, 32, %s321_s3, [#allocation4]  }
 0x120   :  { %241 = dma.done.wait [#allocation4], 32  }
 0x121   :  { %242 = vsyncadd [#allocation4], 4294967264 }
 0x122   :  { %129 = vsyncpa [#allocation3], 1 }
 0x123   :  { %130 = vsyncpa [#allocation6], 1 }
 0x124   :  { %131 = vsyncpa [#allocation4], 1 }

// kernel: mduvsr_forward.29
= control target key start
LH: loop header
LB: loop body
LE: loop exit
PB: predicated region body
PF: predicated region fallthrough
CT: control target
= control target key end

     0   :  { %s3607_s0 = inlined_call_operand.hbm [shape: f32[2,3,10,10], index: 0, kind: input, shape index: {}]   ;;  %s3608_s1 = inlined_call_operand.hbm [shape: f32[2,4,9,8,8], index: 1, kind: input, shape index: {}]   ;;  %s3609_s2 = inlined_call_operand.hbm [shape: f32[2,4,3,9], index: 2, kind: input, shape index: {}]   ;;  %s3610_s3 = inlined_call_operand.hbm [shape: f32[2,4,3,8,8], index: 3, kind: output, shape index: {}]  }
   0x1   :  { %3633 = sst [smem:[#allocation25_spill]] %s3608_s1 }
   0x2   :  { %8 = vsyncpa [#allocation3], 0 }
   0x3   :  { %10 = vsyncpa [#allocation3 + $0x1], 0 }
   0x4   :  { %11 = vsyncpa [#allocation6], 0 }
   0x5   :  { %13 = vsyncpa [#allocation6 + $0x1], 0 }
   0x6   :  { %14 = vsyncpa [#allocation4], 0 }
   0x7   :  { %16 = vsyncpa [#allocation4 + $0x1], 0  ;;  %s2477_s12 = smov 0   ;;  %s2479_s13 = smov 0  }
   0x8   :  { %s2481_s14 = smov 0   ;;  %s2483_s15 = smov 0  }
   0x9 LB: > { %3634 = sst [smem:[#allocation12_spill]] %s2427_s14  ;;  %s2498_s16 = sadd.s32 4294967295, %s2431_s15   ;;  %s2431_s15 = sphi %s2483_s15, %s3683_s15   ;;  %s2427_s14 = sphi %s2481_s14, %s3680_s14   ;;  %s2423_s13 = sphi %s2479_s13, %s3682_s13   ;;  %s2419_s12 = sphi %s2477_s12, %s3681_s12  }
   0xa   : > { %s2066_s17 = sadd.s32 4294967294, %s2431_s15   ;;  %s2502_s18 = sadd.s32 1, %s2431_s15  }
   0xb   : > { %s29_s19 = sadd.s32 1, %s2427_s14  ;;  %s26_s20 = ssub.s32 %s2431_s15, %s2502_s18 }
   0xc   : > { %p36_p0 = scmp.ne.s32.totalorder %s2427_s14, %s2423_s13  ;;  %p27_p1 = scmp.eq.s32.totalorder %s26_s20, 0 }
   0xd   : > { %p37_p2 = scmp.eq.s32.totalorder %s2431_s15, 0  ;;  %p42_p3 = scmp.ne.s32.totalorder %s2423_s13, %s2419_s12 }
   0xe   : > { %p43_p4 = scmp.eq.s32.totalorder %s2498_s16, 0  ;;  %p118_p7 = scmp.eq.s32.totalorder %s2498_s16, 1 }
   0xf   : > { %s2514_s21 = scalar_select %p27_p1, %s2427_s14, %s29_s19  }
  0x10   : > { %p38_p5 = por %p37_p2, %p36_p0  ;;  %p2516_p6 = por %p43_p4, %p42_p3 }
  0x11   : > { %3635 = sst [smem:[#allocation13_spill]] %s2514_s21  ;;  %p124_p8 = scmp.eq.s32.totalorder %s2066_s17, 1 }
  0x12   : > { %s3636_s22 = scalar_select %p2516_p6, 1, 0 }
  0x13   : > { %p2153_p10 = scmp.lt.s32.totalorder %s2431_s15, 2  ;;  %p2523_p11 = por %p118_p7, %p36_p0 }
  0x14   : > { %p2527_p12 = por %p124_p8, %p42_p3  ;;  %s2532_s25 = sand.u32 1, %s2427_s14  }
  0x15   : > { %s3637_s23 = scalar_select %p2523_p11, 1, 0 }
  0x16   : > { %s3638_s24 = scalar_select %p2527_p12, 1, 0 }
  0x17   : > { %p2534_p13 = pnand %p2153_p10, %p38_p5  ;;  %s165_s27 = sand.u32 1, %s2431_s15  }
  0x18   : > { %s2125_s28 = smul.u32 288, %s2532_s25  ;;  %p2074_p1 = scmp.ge.s32.totalorder %s2431_s15, 1 }
  0x19   : > { %s2126_s29 = smul.u32 4608, %s2431_s15  ;;  %p205_p0 = scmp.lt.s32.totalorder %s2431_s15, 3 }
  0x1a   : > { %s3640_s1 = sld [smem:[#allocation25_spill]]  ;;  %s169_s6 = scalar_lea.vmem [#allocation5], %s2125_s28 }
  0x1b   : > { %s176_s7 = sshll.u32 %s169_s6, 4  ;;  %p2550_p2 = pnand %p2074_p1, %p205_p0  ;;  %s2548_s7 = int_to_ptr.vmem [resolvable:$true] %s176_s7 }
  0x1c   : > { %s2554_s9 = scalar_lea.sflag [#allocation6], %s165_s27  ;;  %p2560_p4 = pneg %p2534_p13 }
  0x1d   : > { %s3641_s8 = scalar_select %p2550_p2, 1, 0 }
  0x20   : > { %s2546_s5 = scalar_lea.hbm %s3640_s1, %s2126_s29  ;;  %s2276_s20 = scalar_lea.hbm %s3640_s1, 9216 }
  0x21   : > { %s2271_s10 = scalar_lea.hbm %s2546_s5, 4608  ;;  %p2277_p8 = scmp.lt.u32.totalorder %s2546_s5, %s3640_s1 }
  0x22   : > { %p2272_p3 = scmp.ne.s32.totalorder %s2546_s5, %s2271_s10  ;;  %p2278_p10 = scmp.lt.u32.totalorder %s2276_s20, %s2271_s10 }
  0x23   : > { %p2280_p0 = scmp.lt.u32.totalorder %s2271_s10, %s2546_s5 }
  0x24   : > { %p2274_p5 = pnand %p2560_p4, %p2272_p3  ;;  %p2279_p1 = por %p2278_p10, %p2277_p8 }
  0x26   : > { %p2275_p7 = pneg %p2274_p5  ;;  %p2281_p9 = por %p2280_p0, %p2279_p1 }
  0x28   : > { %p2282_p12 = pnand %p2281_p9, %p2275_p7 }
  0x2a   : > { %2285 = shalt.err (!%p2282_p12)
}
  0x2b   : > { %s2286_s27 = scalar_lea.vmem %s2548_s7, 4608  ;;  %s2433_s30 = smov [#allocation5]  }
  0x2c   : > { %p2287_p3 = scmp.ne.s32.totalorder %s2548_s7, %s2286_s27  ;;  %s2291_s4 = sshll.u32 %s2433_s30, 4  ;;  %s2292_s4 = int_to_ptr.vmem [resolvable:$false] %s2291_s4 }
  0x2d   : > { %s2293_s6 = scalar_lea.vmem %s2292_s4, 9216  ;;  %p2294_p6 = scmp.lt.s32.totalorder %s2548_s7, %s2292_s4 }
  0x2e   : > { %p2289_p5 = pnand %p2287_p3, %p2560_p4  ;;  %p2295_p2 = scmp.lt.s32.totalorder %s2293_s6, %s2286_s27 }
  0x30   : > { %p2290_p11 = pneg %p2289_p5  ;;  %p2296_p8 = por %p2295_p2, %p2294_p6 }
  0x32   : > { %p2297_p10 = pnand %p2296_p8, %p2290_p11 }
  0x34   : > { %2300 = shalt.err (!%p2297_p10)
}
  0x35   : > { %s2434_s10 = smov 128   ;;  %s2435_s17 = smov 8  }
  0x36   : > { %2145 = dma.hbm_to_vmem [thread:$0]  (!%p2534_p13), %s2546_s5, 4608, %s2548_s7, %s2554_s9, %s2434_s10, %s2434_s10, %s2435_s17  }
  0x37   : > { %s2123_s19 = smul.u32 48, %s2532_s25  ;;  %s2071_s28 = sshll.u32 %s2532_s25, 4 }
  0x38   : > { %s2124_s20 = smul.u32 768, %s2431_s15  ;;  %s2122_s1 = sshll.u32 %s2431_s15, 8 }
  0x39   : > { %s148_s4 = scalar_lea.vmem [#allocation2], %s2123_s19  ;;  %s145_s21 = scalar_lea.sflag [#allocation3], %s2532_s25 }
  0x3a   : > { %s2593_s30 = scalar_lea.hbm %s3607_s0, %s2124_s20  ;;  %s155_s6 = sshll.u32 %s148_s4, 4  ;;  %s2595_s6 = int_to_ptr.vmem [resolvable:$true] %s155_s6 }
  0x3b   : > { %s2301_s14 = scalar_lea.hbm %s2593_s30, 768  ;;  %s2306_s20 = scalar_lea.hbm %s3607_s0, 1536 }
  0x3c   : > { %p2302_p6 = scmp.ne.s32.totalorder %s2593_s30, %s2301_s14  ;;  %p2307_p12 = scmp.lt.u32.totalorder %s2593_s30, %s3607_s0 }
  0x3d   : > { %p2308_p2 = scmp.lt.u32.totalorder %s2306_s20, %s2301_s14  ;;  %p2310_p1 = scmp.lt.u32.totalorder %s2301_s14, %s2593_s30 }
  0x3e   : > { %p2304_p9 = pnand %p2302_p6, %p2560_p4 }
  0x3f   : > { %p2309_p7 = por %p2308_p2, %p2307_p12 }
  0x40   : > { %p2305_p11 = pneg %p2304_p9 }
  0x41   : > { %p2311_p0 = por %p2310_p1, %p2309_p7 }
  0x43   : > { %p2312_p3 = pnand %p2311_p0, %p2305_p11 }
  0x45   : > { %2315 = shalt.err (!%p2312_p3)
}
  0x46   : > { %s2316_s19 = scalar_lea.vmem %s2595_s6, 768  ;;  %s2436_s4 = smov [#allocation2]  }
  0x47   : > { %p2317_p5 = scmp.ne.s32.totalorder %s2595_s6, %s2316_s19  ;;  %s2321_s5 = sshll.u32 %s2436_s4, 4  ;;  %s2322_s5 = int_to_ptr.vmem [resolvable:$false] %s2321_s5 }
  0x48   : > { %s2323_s7 = scalar_lea.vmem %s2322_s5, 1536  ;;  %p2324_p6 = scmp.lt.s32.totalorder %s2595_s6, %s2322_s5 }
  0x49   : > { %p2319_p8 = pnand %p2317_p5, %p2560_p4  ;;  %p2325_p9 = scmp.lt.s32.totalorder %s2323_s7, %s2316_s19 }
  0x4b   : > { %p2320_p10 = pneg %p2319_p8  ;;  %p2326_p12 = por %p2325_p9, %p2324_p6 }
  0x4d   : > { %p2327_p2 = pnand %p2326_p12, %p2320_p10 }
  0x4f   : > { %2330 = shalt.err (!%p2327_p2)
}
  0x50   : > { %2142 = dma.hbm_to_vmem [thread:$0]  (!%p2534_p13), %s2593_s30, 768, %s2595_s6, %s145_s21, %s2434_s10, %s2434_s10, %s2435_s17  }
  0x51   : > { %s2630_s29 = scalar_lea.hbm %s3609_s2, %s2122_s1  ;;  %s190_s27 = scalar_lea.vmem [#allocation7], %s2071_s28 }
  0x52   : > { %s197_s19 = sshll.u32 %s190_s27, 4  ;;  %s2331_s4 = scalar_lea.hbm %s2630_s29, 256  ;;  %s2634_s19 = int_to_ptr.vmem [resolvable:$true] %s197_s19 }
  0x53   : > { %p2332_p11 = scmp.ne.s32.totalorder %s2630_s29, %s2331_s4  ;;  %s2336_s17 = scalar_lea.hbm %s3609_s2, 512 }
  0x54   : > { %p2337_p0 = scmp.lt.u32.totalorder %s2630_s29, %s3609_s2  ;;  %p2338_p3 = scmp.lt.u32.totalorder %s2336_s17, %s2331_s4 }
  0x55   : > { %p2334_p7 = pnand %p2332_p11, %p2560_p4  ;;  %p2340_p8 = scmp.lt.u32.totalorder %s2331_s4, %s2630_s29 }
  0x56   : > { %p2339_p5 = por %p2338_p3, %p2337_p0 }
  0x57   : > { %p2335_p1 = pneg %p2334_p7 }
  0x58   : > { %p2341_p10 = por %p2340_p8, %p2339_p5 }
  0x5a   : > { %p2342_p6 = pnand %p2341_p10, %p2335_p1 }
  0x5c   : > { %2345 = shalt.err (!%p2342_p6)
}
  0x5d   : > { %s2346_s25 = scalar_lea.vmem %s2634_s19, 256  ;;  %s2437_s28 = smov [#allocation7]  }
  0x5e   : > { %p2347_p9 = scmp.ne.s32.totalorder %s2634_s19, %s2346_s25  ;;  %s2351_s6 = sshll.u32 %s2437_s28, 4  ;;  %s2352_s6 = int_to_ptr.vmem [resolvable:$false] %s2351_s6 }
  0x5f   : > { %s2353_s5 = scalar_lea.vmem %s2352_s6, 512  ;;  %p2354_p11 = scmp.lt.s32.totalorder %s2634_s19, %s2352_s6 }
  0x60   : > { %p2349_p12 = pnand %p2347_p9, %p2560_p4  ;;  %p2355_p7 = scmp.lt.s32.totalorder %s2353_s5, %s2346_s25 }
  0x62   : > { %p2350_p2 = pneg %p2349_p12  ;;  %p2356_p0 = por %p2355_p7, %p2354_p11 }
  0x64   : > { %p2357_p3 = pnand %p2356_p0, %p2350_p2 }
  0x66   : > { %2360 = shalt.err (!%p2357_p3)
}
  0x67   : > { %s2438_s7 = smov 64   ;;  %s2439_s14 = smov 4  }
  0x68   : > { %2148 = dma.hbm_to_vmem [thread:$0]  (!%p2534_p13), %s2630_s29, 256, %s2634_s19, %s2554_s9, %s2438_s7, %s2438_s7, %s2439_s14  }
  0x69   : > { %p3643_p4 = scmp.ne.s32.totalorder %s3641_s8, 0 }
  0x6b   : > { %209 = sbr.rel (%p3643_p4) target bundleno = 2946 (0xb82), region = 32 }
  0x72   : > { %s2661_s11 = sand.u32 1, %s2423_s13   ;;  %p3644_p1 = scmp.ne.s32.totalorder %s3636_s22, 0 }
  0x73   : > { %s2127_s20 = smul.u32 48, %s2661_s11  ;;  %s212_s27 = scalar_lea.sflag [#allocation3], %s2661_s11 }
  0x75   : > { %s2665_s4 = scalar_lea.vmem [#allocation2], %s2127_s20 }
  0x76   : > { %2406 = dma.done.wait (%p3644_p1), %s212_s27, 768  }
  0x77   : > { %2408 = vsyncadd (%p3644_p1), %s212_s27, 4294966528  ;;  %s220_s26 = sand.u32 1, %s2498_s16   ;;  %s2128_s8 = smul.u32 288, %s2661_s11 }
  0x78   : > { %s221_s9 = scalar_lea.sflag [#allocation6], %s220_s26 }
  0x79   : > { %s2673_s29 = scalar_lea.vmem [#allocation5], %s2128_s8 }
  0x7a   : > { %2410 = dma.done.wait (%p3644_p1), %s221_s9, 4864  }
  0x7b   : > { %2412 = vsyncadd (%p3644_p1), %s221_s9, 4294962432  ;;  %v288_v0 = vlaneseq  ;;  %v3628_v1 = vmov 1   ;;  %s2075_s19 = sshll.u32 %s2661_s11, 4  ;;  %v2441_v2 = vmov 1966171168   ;;  %v3622_v4 = vmov 5  }
  0x7c   : > { %2207 = vset.pattern.permute.xlu1 %v3628_v1  ;;  %v286_v3 = vunpack.c.l.s4 %v2441_v2  ;;  %2215 = vset.pattern.permute.xlu0 %v3622_v4  ;;  %s2686_s21 = scalar_lea.vmem [#allocation7], %s2075_s19  ;;  %v3630_v16 = vmov 2   ;;  %v3618_v17 = vmov 7   ;;  %v3614_v20 = vmov 0   ;;  %v2752_v32 = vld [vmem:[%s2673_s29 + $0x8] sm:$0xff]  ;;  %s2450_s22 = smov 1  }
  0x7d   : > { %v289_v5 = vshrl.u32 %v288_v0, 7  ;;  %v2076_v9 = vld.sshfl [vmem:[%s2686_s21] sm:$0x13 pattern:$0x75316420]  ;;  %v3616_v22 = vmov 8  }
  0x7e   : > { %v287_v6 = vunpack.c.0.s8 %v286_v3  ;;  %v284_v11 = vcombine.high %v2076_v9, %v2076_v9  ;;  %v2087_v19 = vld.sshfl [vmem:[%s2686_s21 + $0x4] sm:$0x13 pattern:$0x75316420]  ;;  %v3626_v25 = vmov 3   ;;  %v3624_v26 = vmov 4  }
  0x7f   : > { %v2684_v8 = vsub.s32 0, %v289_v5  ;;  %v702_v21 = vcombine.high %v2087_v19, %v2087_v19  ;;  %v3620_v27 = vmov 6   ;;  %v2757_v36 = vld [vmem:[%s2673_s29 + $0x10] sm:$0xff]  ;;  %s2451_s10 = smov 2   ;;  %v270_v52 = vld [vmem:[%s2673_s29 + $0x20] sm:$0xff]  ;;  %v271_v54 = vld [vmem:[%s2673_s29 + $0x28] sm:$0xff] }
  0x80   : > { %v2682_v7 = vsub.s32 %v287_v6, %v289_v5  ;;  %v273_v60 = vld [vmem:[%s2673_s29 + $0x38] sm:$0xff]  ;;  %v274_v62 = vld [vmem:[%s2673_s29 + $0x40] sm:$0xff]  ;;  %v2078_v3 = vld [vmem:[%s2673_s29 + $0x50] sm:$0xff]  ;;  %s2452_s17 = smov 127   ;;  %s2453_s1 = smov 126   ;;  %vm678_vm0 = vcmask 64512  }
  0x81   : > { %s2129_s30 = smul.u32 96, %s2661_s11  ;;  %p3676_p5 = scmp.ne.s32.totalorder %s3637_s23, 0 }
  0x82   : > { %v291_v10 = vrot.slane %v2076_v9, %v2682_v7  ;;  %v298_v13 = vrot.slane %v284_v11, %v2682_v7  ;;  %v716_v23 = vrot.slane %v702_v21, %v2682_v7  ;;  %v709_v28 = vrot.slane %v2087_v19, %v2682_v7  ;;  %v2079_v9 = vld [vmem:[%s2673_s29 + $0x58] sm:$0xff]  ;;  %s2130_s28 = smul.u32 1536, %s2498_s16  ;;  %s1937_s16 = scalar_lea.sflag [#allocation4], %s2661_s11 }
  0x83   : > { %s3075_s25 = scalar_lea.vmem [#allocation8], %s2129_s30  ;;  %s2454_s27 = smov [#allocation8]  }
  0x84   : > { %v2691_v12 = vrot.slane %v291_v10, %v2684_v8  ;;  %v2696_v14 = vrot.slane %v298_v13, %v2684_v8  ;;  %v299_v15 = vcombine.high %v291_v10, %v291_v10  ;;  %v2713_v24 = vrot.slane %v716_v23, %v2684_v8  ;;  %s1950_s6 = sshll.u32 %s3075_s25, 4  ;;  %s3557_s14 = scalar_lea.hbm %s3610_s3, %s2130_s28  ;;  %s3559_s6 = int_to_ptr.vmem [resolvable:$true] %s1950_s6 }
  0x85   : > { %v2736_v29 = vrot.slane %v709_v28, %v2684_v8  ;;  %v717_v30 = vcombine.high %v709_v28, %v709_v28  ;;  %s2361_s20 = scalar_lea.vmem %s3559_s6, 1536 }
  0x86   : > { %337 = vperm.xlu1 %2207, %v2691_v12   ;;  %509 = vperm.xlu0 %2215, %v2696_v14   ;;  %v311_v18 = vrot.slane %v299_v15, %v2684_v8  ;;  %p2362_p13 = scmp.ne.s32.totalorder %s3559_s6, %s2361_s20 }
  0x87   : > { %v2741_v31 = vrot.slane %v717_v30, %v2684_v8 }
  0x88   : > { %p2363_p8 = pnand %p2362_p13, %p3676_p5 }
  0x8a   : > { %2208 = vset.pattern.permute.xlu1 %v3630_v16  ;;  %2218 = vset.pattern.permute.xlu0 %v3618_v17  ;;  %p2364_p10 = pneg %p2363_p8 }
  0x8b   : > { %385 = vperm.xlu1 %2208, %v2691_v12   ;;  %581 = vperm.xlu0 %2218, %v2696_v14  }
  0x8f   : > { %2209 = vset.pattern.permute.xlu1 %v3614_v20  ;;  %2220 = vset.pattern.permute.xlu0 %v3616_v22 }
  0x90   : > { %321 = vperm.xlu1 %2209, %v311_v18   ;;  %629 = vperm.xlu0 %2220, %v2696_v14  }
  0x94   : > { %2210 = vset.pattern.permute.xlu1 %v3628_v1  ;;  %2221 = vset.pattern.permute.xlu0 %v3628_v1 }
  0x95   : > { %345 = vperm.xlu1 %2210, %v311_v18   ;;  %341 = vperm.xlu0 %2221, %v2696_v14  }
  0x99   : > { %2211 = vset.pattern.permute.xlu1 %v3630_v16  ;;  %759 = vperm.xlu0 %2221, %v2713_v24  }
  0x9a   : > { %393 = vperm.xlu1 %2211, %v311_v18  }
  0x9d   : > { %2224 = vset.pattern.permute.xlu0 %v3630_v16 }
  0x9e   : > { %2212 = vset.pattern.permute.xlu1 %v3626_v25  ;;  %389 = vperm.xlu0 %2224, %v2696_v14  }
  0x9f   : > { %433 = vperm.xlu1 %2212, %v2691_v12  }
  0xa2   : > { %807 = vperm.xlu0 %2224, %v2713_v24  }
  0xa3   : > { %441 = vperm.xlu1 %2212, %v311_v18  }
  0xa6   : > { %2226 = vset.pattern.permute.xlu0 %v3624_v26 }
  0xa7   : > { %2213 = vset.pattern.permute.xlu1 %v3624_v26  ;;  %461 = vperm.xlu0 %2226, %v2696_v14  }
  0xa8   : > { %457 = vperm.xlu1 %2213, %v2691_v12  }
  0xac   : > { %465 = vperm.xlu1 %2213, %v311_v18  }
  0xb0   : > { %2214 = vset.pattern.permute.xlu1 %v3622_v4 }
  0xb1   : > { %505 = vperm.xlu1 %2214, %v2691_v12  }
  0xb5   : > { %513 = vperm.xlu1 %2214, %v311_v18  }
  0xb9   : > { %2216 = vset.pattern.permute.xlu1 %v3620_v27 }
  0xba   : > { %553 = vperm.xlu1 %2216, %v2691_v12  }
  0xbe   : > { %561 = vperm.xlu1 %2216, %v311_v18  }
  0xc2   : > { %2217 = vset.pattern.permute.xlu1 %v3618_v17 }
  0xc3   : > { %577 = vperm.xlu1 %2217, %v2691_v12  }
  0xc7   : > { %585 = vperm.xlu1 %2217, %v311_v18  }
  0xcb   : > { %2219 = vset.pattern.permute.xlu1 %v3616_v22 }
  0xcc   : > { %625 = vperm.xlu1 %2219, %v2691_v12  }
  0xd0   : > { %633 = vperm.xlu1 %2219, %v311_v18  }
  0xd4   : > { %2222 = vset.pattern.permute.xlu1 %v3614_v20 }
  0xd5   : > { %731 = vperm.xlu1 %2222, %v2736_v29  }
  0xd9   : > { %739 = vperm.xlu1 %2222, %v2741_v31  }
  0xdd   : > { %2223 = vset.pattern.permute.xlu1 %v3628_v1 }
  0xde   : > { %755 = vperm.xlu1 %2223, %v2736_v29  }
  0xe2   : > { %763 = vperm.xlu1 %2223, %v2741_v31  }
  0xe6   : > { %2225 = vset.pattern.permute.xlu1 %v3630_v16 }
  0xe7   : > { %803 = vperm.xlu1 %2225, %v2736_v29  }
  0xeb   : > { %811 = vperm.xlu1 %2225, %v2741_v31  }
  0xef   : > { %2227 = vset.pattern.permute.xlu1 %v3626_v25 }
 0x105   : > { %v338_v33 = vpop.permute.xlu1 %337  ;;  %v510_v35 = vpop.permute.xlu0 %509 }
 0x106   : > { %v348_v34 = vadd.f32 %v338_v33, %v2752_v32  ;;  %v517_v58 = vadd.f32 %v510_v35, %v271_v54 }
 0x108   : > { %357 = vrot.lane.b32.xlu1 %v348_v34, %s2450_s22 }
 0x10a   : > { %v386_v37 = vpop.permute.xlu1 %385  ;;  %v582_v39 = vpop.permute.xlu0 %581 }
 0x10b   : > { %v396_v38 = vadd.f32 %v386_v37, %v2757_v36  ;;  %v589_v61 = vadd.f32 %v582_v39, %v273_v60 }
 0x10d   : > { %405 = vrot.lane.b32.xlu1 %v396_v38, %s2451_s10 }
 0x10f   : > { %v2761_v40 = vpop.permute.xlu1 %321  ;;  %v630_v41 = vpop.permute.xlu0 %629 }
 0x110   : > { %v637_v2 = vadd.f32 %v630_v41, %v274_v62 }
 0x114   : > { %v346_v42 = vpop.permute.xlu1 %345  ;;  %v342_v43 = vpop.permute.xlu0 %341 }
 0x115   : > { %v349_v44 = vadd.f32 %v342_v43, %v2752_v32  ;;  %v350_v37 = vadd.f32 %v346_v42, %v2752_v32 }
 0x117   : > { %359 = vrot.lane.b32.xlu0 %v349_v44, %s2450_s22 }
 0x118   : > { %v760_v46 = vpop.permute.xlu0 %759 }
 0x119   : > { %v394_v45 = vpop.permute.xlu1 %393  ;;  %v767_v6 = vadd.f32 %v2078_v3, %v760_v46 }
 0x11a   : > { %v398_v38 = vadd.f32 %v394_v45, %v2757_v36 }
 0x11d   : > { %v390_v48 = vpop.permute.xlu0 %389 }
 0x11e   : > { %v2765_v47 = vpop.permute.xlu1 %433  ;;  %v397_v49 = vadd.f32 %v390_v48, %v2757_v36 }
 0x120   : > { %407 = vrot.lane.b32.xlu0 %v397_v49, %s2451_s10 }
 0x121   : > { %v808_v51 = vpop.permute.xlu0 %807 }
 0x122   : > { %v2768_v50 = vpop.permute.xlu1 %441  ;;  %v815_v11 = vadd.f32 %v2079_v9, %v808_v51 }
 0x126   : > { %v462_v56 = vpop.permute.xlu0 %461 }
 0x127   : > { %v458_v53 = vpop.permute.xlu1 %457  ;;  %v469_v57 = vadd.f32 %v462_v56, %v270_v52 }
 0x128   : > { %v468_v55 = vadd.f32 %v458_v53, %v270_v52 }
 0x129   : > { %479 = vrot.lane.b32.xlu0 %v469_v57, %s2450_s22 }
 0x12a   : > { %477 = vrot.lane.b32.xlu1 %v468_v55, %s2450_s22 }
 0x12b   : > { %v466_v59 = vpop.permute.xlu1 %465 }
 0x12c   : > { %v470_v39 = vadd.f32 %v466_v59, %v270_v52 }
 0x12d   : > { %527 = vrot.lane.b32.xlu0 %v517_v58, %s2451_s10 }
 0x130   : > { %v506_v63 = vpop.permute.xlu1 %505 }
 0x131   : > { %v516_v0 = vadd.f32 %v506_v63, %v271_v54  ;;  %599 = vrot.lane.b32.xlu0 %v589_v61, %s2450_s22 }
 0x133   : > { %525 = vrot.lane.b32.xlu1 %v516_v0, %s2451_s10 }
 0x134   : > { %v514_v5 = vpop.permute.xlu1 %513 }
 0x135   : > { %647 = vrot.lane.b32.xlu0 %v637_v2, %s2451_s10  ;;  %v518_v41 = vadd.f32 %v514_v5, %v271_v54 }
 0x139   : > { %v2783_v10 = vpop.permute.xlu1 %553  ;;  %777 = vrot.lane.b32.xlu0 %v767_v6, %s2450_s22 }
 0x13d   : > { %v2786_v13 = vpop.permute.xlu1 %561  ;;  %825 = vrot.lane.b32.xlu0 %v815_v11, %s2451_s10 }
 0x141   : > { %879 = vperm.xlu0 %2226, %v2713_v24  }
 0x142   : > { %v578_v15 = vpop.permute.xlu1 %577 }
 0x143   : > { %v588_v18 = vadd.f32 %v578_v15, %v273_v60 }
 0x145   : > { %597 = vrot.lane.b32.xlu1 %v588_v18, %s2450_s22  ;;  %2230 = vset.pattern.permute.xlu0 %v3622_v4 }
 0x146   : > { %v586_v19 = vpop.permute.xlu1 %585 }
 0x147   : > { %v590_v43 = vadd.f32 %v586_v19, %v273_v60  ;;  %v2081_v60 = vld [vmem:[%s2673_s29 + $0x68] sm:$0xff] }
 0x14b   : > { %v626_v21 = vpop.permute.xlu1 %625 }
 0x14c   : > { %v636_v23 = vadd.f32 %v626_v21, %v274_v62 }
 0x14e   : > { %645 = vrot.lane.b32.xlu1 %v636_v23, %s2451_s10 }
 0x14f   : > { %v634_v28 = vpop.permute.xlu1 %633 }
 0x150   : > { %v638_v44 = vadd.f32 %v634_v28, %v274_v62 }
 0x154   : > { %v2793_v30 = vpop.permute.xlu1 %731 }
 0x158   : > { %v2795_v33 = vpop.permute.xlu1 %739 }
 0x15d   : > { %v756_v34 = vpop.permute.xlu1 %755 }
 0x15e   : > { %v766_v35 = vadd.f32 %v2078_v3, %v756_v34 }
 0x160   : > { %775 = vrot.lane.b32.xlu1 %v766_v35, %s2450_s22 }
 0x161   : > { %v764_v46 = vpop.permute.xlu1 %763 }
 0x162   : > { %v768_v32 = vadd.f32 %v2078_v3, %v764_v46 }
 0x164   : > { %361 = vrot.lane.b32.xlu1 %v350_v37, %s2450_s22 }
 0x166   : > { %v804_v42 = vpop.permute.xlu1 %803 }
 0x167   : > { %v814_v48 = vadd.f32 %v2079_v9, %v804_v42 }
 0x168   : > { %409 = vrot.lane.b32.xlu1 %v398_v38, %s2451_s10 }
 0x16a   : > { %v812_v36 = vpop.permute.xlu1 %811 }
 0x16b   : > { %v816_v45 = vadd.f32 %v2079_v9, %v812_v36 }
 0x16c   : > { %481 = vrot.lane.b32.xlu1 %v470_v39, %s2450_s22 }
 0x170   : > { %529 = vrot.lane.b32.xlu1 %v518_v41, %s2451_s10 }
 0x174   : > { %601 = vrot.lane.b32.xlu1 %v590_v43, %s2450_s22 }
 0x178   : > { %649 = vrot.lane.b32.xlu1 %v638_v44, %s2451_s10  ;;  %v2082_v44 = vld [vmem:[%s2673_s29 + $0x70] sm:$0xff] }
 0x17a   : > { %v358_v57 = vpop.permute.xlu1 %357 }
 0x17c   : > { %779 = vrot.lane.b32.xlu1 %v768_v32, %s2450_s22 }
 0x17f   : > { %v406_v59 = vpop.permute.xlu1 %405 }
 0x180   : > { %823 = vrot.lane.b32.xlu1 %v814_v48, %s2451_s10 }
 0x184   : > { %827 = vrot.lane.b32.xlu1 %v816_v45, %s2451_s10 }
 0x188   : > { %851 = vperm.xlu1 %2227, %v2736_v29  }
 0x189   : > { %v2813_v49 = vpop.permute.xlu0 %359 }
 0x18c   : > { %859 = vperm.xlu1 %2227, %v2741_v31  }
 0x190   : > { %2228 = vset.pattern.permute.xlu1 %v3624_v26  ;;  %v3069_v26 = vld [vmem:[%s2673_s29 + $0x30] sm:$0xff] }
 0x191   : > { %875 = vperm.xlu1 %2228, %v2736_v29  }
 0x192   : > { %v2816_v51 = vpop.permute.xlu0 %407 }
 0x195   : > { %883 = vperm.xlu1 %2228, %v2741_v31  }
 0x199   : > { %2229 = vset.pattern.permute.xlu1 %v3622_v4 }
 0x19b   : > { %v2819_v52 = vpop.permute.xlu0 %479 }
 0x19c   : > { %v2832_v61 = vpop.permute.xlu1 %477 }
 0x19f   : > { %v2821_v53 = vpop.permute.xlu0 %527 }
 0x1a3   : > { %v2823_v54 = vpop.permute.xlu0 %599 }
 0x1a5   : > { %v526_v0 = vpop.permute.xlu1 %525 }
 0x1a7   : > { %v2825_v55 = vpop.permute.xlu0 %647 }
 0x1ab   : > { %v2827_v56 = vpop.permute.xlu0 %777 }
 0x1af   : > { %v2829_v58 = vpop.permute.xlu0 %825 }
 0x1b7   : > { %v2836_v2 = vpop.permute.xlu1 %597 }
 0x1c0   : > { %v880_v62 = vpop.permute.xlu0 %879  ;;  %v2839_v3 = vpop.permute.xlu1 %645 }
 0x1c1   : > { %v887_v63 = vadd.f32 %v2081_v60, %v880_v62 }
 0x1c3   : > { %897 = vrot.lane.b32.xlu0 %v887_v63, %s2450_s22 }
 0x1c7   : > { %927 = vperm.xlu0 %2230, %v2713_v24  }
 0x1cb   : > { %2233 = vset.pattern.permute.xlu0 %v3618_v17 }
 0x1d2   : > { %v2841_v5 = vpop.permute.xlu1 %775 }
 0x1d6   : > { %v2843_v6 = vpop.permute.xlu1 %361 }
 0x1da   : > { %v2845_v9 = vpop.permute.xlu1 %409 }
 0x1de   : > { %v2847_v11 = vpop.permute.xlu1 %481 }
 0x1e2   : > { %v2849_v15 = vpop.permute.xlu1 %529 }
 0x1e6   : > { %v2851_v18 = vpop.permute.xlu1 %601 }
 0x1ea   : > { %v2853_v19 = vpop.permute.xlu1 %649 }
 0x1ee   : > { %v2855_v21 = vpop.permute.xlu1 %779 }
 0x1f2   : > { %v824_v23 = vpop.permute.xlu1 %823 }
 0x1f6   : > { %v2857_v28 = vpop.permute.xlu1 %827 }
 0x207   : > { %v2859_v34 = vpop.permute.xlu1 %851 }
 0x20b   : > { %v2861_v35 = vpop.permute.xlu1 %859 }
 0x210   : > { %v876_v37 = vpop.permute.xlu1 %875 }
 0x211   : > { %v886_v38 = vadd.f32 %v2081_v60, %v876_v37  ;;  %v2084_v37 = vld [vmem:[%s2673_s29 + $0x80] sm:$0xff] }
 0x213   : > { %895 = vrot.lane.b32.xlu1 %v886_v38, %s2450_s22 }
 0x214   : > { %v884_v39 = vpop.permute.xlu1 %883 }
 0x215   : > { %v888_v41 = vadd.f32 %v2081_v60, %v884_v39 }
 0x217   : > { %899 = vrot.lane.b32.xlu1 %v888_v41, %s2450_s22  ;;  %v2887_v41 = vld [vmem:[%s2665_s4] sm:$0xff] }
 0x21b   : > { %923 = vperm.xlu1 %2229, %v2736_v29  }
 0x21f   : > { %931 = vperm.xlu1 %2229, %v2741_v31  }
 0x223   : > { %2231 = vset.pattern.permute.xlu1 %v3620_v27 }
 0x235   : > { %v2868_v43 = vpop.permute.xlu0 %897 }
 0x246   : > { %v928_v46 = vpop.permute.xlu0 %927 }
 0x247   : > { %v935_v32 = vadd.f32 %v2082_v44, %v928_v46  ;;  %v414_v46 = vmul.f32 %v406_v59, %v2887_v41 }
 0x249   : > { %945 = vrot.lane.b32.xlu0 %v935_v32, %s2451_s10  ;;  %v2894_v32 = vld [vmem:[%s2665_s4 + $0x1] sm:$0xff] }
 0x24d   : > { %999 = vperm.xlu0 %2233, %v2713_v24  }
 0x251   : > { %2235 = vset.pattern.permute.xlu0 %v3616_v22 }
 0x285   : > { %v896_v42 = vpop.permute.xlu1 %895 }
 0x289   : > { %v2874_v48 = vpop.permute.xlu1 %899 }
 0x29a   : > { %v924_v36 = vpop.permute.xlu1 %923 }
 0x29b   : > { %v934_v45 = vadd.f32 %v2082_v44, %v924_v36  ;;  %v486_v36 = vmul.f32 %v2832_v61, %v2894_v32  ;;  %v784_v61 = vmul.f32 %v2841_v5, %v2887_v41 }
 0x29d   : > { %943 = vrot.lane.b32.xlu1 %v934_v45, %s2451_s10  ;;  %v534_v45 = vmul.f32 %v526_v0, %v2894_v32  ;;  %v832_v0 = vmul.f32 %v824_v23, %v2887_v41 }
 0x29e   : > { %v932_v60 = vpop.permute.xlu1 %931 }
 0x29f   : > { %v936_v62 = vadd.f32 %v2082_v44, %v932_v60  ;;  %v366_v44 = vmul.f32 %v358_v57, %v2887_v41  ;;  %v2902_v57 = vld [vmem:[%s2665_s4 + $0x2] sm:$0xff] }
 0x2a0   : > { %v606_v60 = vmul.f32 %v2836_v2, %v2902_v57  ;;  %v654_v59 = vmul.f32 %v2839_v3, %v2902_v57 }
 0x2a1   : > { %947 = vrot.lane.b32.xlu1 %v936_v62, %s2451_s10  ;;  %v904_v62 = vmul.f32 %v896_v42, %v2894_v32 }
 0x2a5   : > { %971 = vperm.xlu1 %2231, %v2736_v29  }
 0x2a9   : > { %979 = vperm.xlu1 %2231, %v2741_v31  }
 0x2ad   : > { %2232 = vset.pattern.permute.xlu1 %v3618_v17 }
 0x2ae   : > { %995 = vperm.xlu1 %2232, %v2736_v29  }
 0x2b2   : > { %1003 = vperm.xlu1 %2232, %v2741_v31  }
 0x2b6   : > { %2234 = vset.pattern.permute.xlu1 %v3616_v22 }
 0x2bb   : > { %v946_v63 = vpop.permute.xlu0 %945 }
 0x2cc   : > { %v1000_v38 = vpop.permute.xlu0 %999 }
 0x2cd   : > { %v1007_v39 = vadd.f32 %v2084_v37, %v1000_v38 }
 0x2cf   : > { %1017 = vrot.lane.b32.xlu0 %v1007_v39, %s2450_s22 }
 0x2d3   : > { %372 = vrot.lane.b32.xlu0 %v366_v44, %s2452_s17 }
 0x2d7   : > { %420 = vrot.lane.b32.xlu0 %v414_v46, %s2453_s1 }
 0x2db   : > { %492 = vrot.lane.b32.xlu0 %v486_v36, %s2452_s17  ;;  %v2927_v36 = vld [vmem:[%s2665_s4 + $0x10] sm:$0xff] }
 0x2df   : > { %540 = vrot.lane.b32.xlu0 %v534_v45, %s2453_s1  ;;  %v367_v45 = vmul.f32 %v2813_v49, %v2927_v36 }
 0x2e3   : > { %612 = vrot.lane.b32.xlu0 %v606_v60, %s2452_s17  ;;  %v415_v60 = vmul.f32 %v2816_v51, %v2927_v36 }
 0x2e7   : > { %660 = vrot.lane.b32.xlu0 %v654_v59, %s2453_s1  ;;  %v2937_v59 = vld [vmem:[%s2665_s4 + $0x11] sm:$0xff] }
 0x2eb   : > { %790 = vrot.lane.b32.xlu0 %v784_v61, %s2452_s17  ;;  %v487_v61 = vmul.f32 %v2819_v52, %v2937_v59  ;;  %v785_v52 = vmul.f32 %v2827_v56, %v2927_v36 }
 0x2ef   : > { %838 = vrot.lane.b32.xlu0 %v832_v0, %s2453_s1  ;;  %v2945_v0 = vld [vmem:[%s2665_s4 + $0x12] sm:$0xff] }
 0x2f0   : > { %v607_v49 = vmul.f32 %v2823_v54, %v2945_v0  ;;  %v655_v51 = vmul.f32 %v2825_v55, %v2945_v0  ;;  %v905_v54 = vmul.f32 %v2868_v43, %v2937_v59  ;;  %v953_v55 = vmul.f32 %v946_v63, %v2937_v59  ;;  %v2973_v43 = vld [vmem:[%s2665_s4 + $0x20] sm:$0xff] }
 0x2f3   : > { %910 = vrot.lane.b32.xlu0 %v904_v62, %s2452_s17 }
 0x30f   : > { %v944_v2 = vpop.permute.xlu1 %943 }
 0x310   : > { %v952_v38 = vmul.f32 %v944_v2, %v2894_v32 }
 0x312   : > { %958 = vrot.lane.b32.xlu0 %v952_v38, %s2453_s1  ;;  %v368_v38 = vmul.f32 %v2843_v6, %v2973_v43 }
 0x313   : > { %v2919_v3 = vpop.permute.xlu1 %947 }
 0x324   : > { %v2921_v5 = vpop.permute.xlu1 %971 }
 0x328   : > { %v2923_v39 = vpop.permute.xlu1 %979 }
 0x32d   : > { %v996_v23 = vpop.permute.xlu1 %995 }
 0x32e   : > { %v1006_v44 = vadd.f32 %v2084_v37, %v996_v23  ;;  %v2986_v23 = vld [vmem:[%s2665_s4 + $0x21] sm:$0xff] }
 0x32f   : > { %v536_v6 = vmul.f32 %v2849_v15, %v2986_v23  ;;  %v786_v15 = vmul.f32 %v2855_v21, %v2973_v43  ;;  %v954_v21 = vmul.f32 %v2919_v3, %v2986_v23 }
 0x330   : > { %1015 = vrot.lane.b32.xlu1 %v1006_v44, %s2450_s22 }
 0x331   : > { %v1004_v42 = vpop.permute.xlu1 %1003 }
 0x332   : > { %v1008_v46 = vadd.f32 %v2084_v37, %v1004_v42  ;;  %v535_v37 = vmul.f32 %v2821_v53, %v2937_v59  ;;  %v833_v53 = vmul.f32 %v2829_v58, %v2927_v36  ;;  %v488_v42 = vmul.f32 %v2847_v11, %v2986_v23 }
 0x334   : > { %1019 = vrot.lane.b32.xlu1 %v1008_v46, %s2450_s22 }
 0x338   : > { %374 = vrot.lane.b32.xlu1 %v367_v45, %s2452_s17  ;;  %v2999_v45 = vld [vmem:[%s2665_s4 + $0x22] sm:$0xff] }
 0x339   : > { %v656_v11 = vmul.f32 %v2853_v19, %v2999_v45  ;;  %v906_v19 = vmul.f32 %v2874_v48, %v2986_v23 }
 0x33c   : > { %422 = vrot.lane.b32.xlu1 %v415_v60, %s2453_s1  ;;  %v608_v60 = vmul.f32 %v2851_v18, %v2999_v45  ;;  %v834_v18 = vmul.f32 %v2857_v28, %v2973_v43 }
 0x340   : > { %494 = vrot.lane.b32.xlu1 %v487_v61, %s2452_s17 }
 0x341   : > { %v1018_v62 = vpop.permute.xlu0 %1017 }
 0x342   : > { %v1025_v2 = vmul.f32 %v1018_v62, %v2945_v0 }
 0x344   : > { %542 = vrot.lane.b32.xlu1 %v535_v37, %s2453_s1 }
 0x348   : > { %614 = vrot.lane.b32.xlu1 %v607_v49, %s2452_s17 }
 0x34c   : > { %662 = vrot.lane.b32.xlu1 %v655_v51, %s2453_s1 }
 0x350   : > { %792 = vrot.lane.b32.xlu1 %v785_v52, %s2452_s17 }
 0x354   : > { %840 = vrot.lane.b32.xlu1 %v833_v53, %s2453_s1  ;;  %v3037_v53 = vpop.permute.xlu0 %372 }
 0x358   : > { %912 = vrot.lane.b32.xlu1 %v905_v54, %s2452_s17  ;;  %v2085_v54 = vld [vmem:[%s2673_s29 + $0x88] sm:$0xff]  ;;  %v3040_v62 = vpop.permute.xlu0 %420 }
 0x35c   : > { %960 = vrot.lane.b32.xlu1 %v953_v55, %s2453_s1 }
 0x360   : > { %1032 = vrot.lane.b32.xlu1 %v1025_v2, %s2452_s17 }
 0x364   : > { %1043 = vperm.xlu1 %2234, %v2736_v29  }
 0x368   : > { %1051 = vperm.xlu1 %2234, %v2741_v31   ;;  %v416_v31 = vmul.f32 %v2845_v9, %v2973_v43 }
 0x36c   : > { %2236 = vset.pattern.permute.xlu1 %v3614_v20 }
 0x3a2   : > { %v1016_v56 = vpop.permute.xlu1 %1015 }
 0x3a3   : > { %v1024_v58 = vmul.f32 %v1016_v56, %v2902_v57 }
 0x3a5   : > { %1030 = vrot.lane.b32.xlu0 %v1024_v58, %s2452_s17  ;;  %v3044_v58 = vpop.permute.xlu0 %492 }
 0x3a6   : > { %v2975_v63 = vpop.permute.xlu1 %1019 }
 0x3a9   : > { %376 = vrot.lane.b32.xlu0 %v368_v38, %s2452_s17  ;;  %v3046_v38 = vpop.permute.xlu0 %540 }
 0x3aa   : > { %v2980_v29 = vpop.permute.xlu1 %374 }
 0x3ad   : > { %424 = vrot.lane.b32.xlu0 %v416_v31, %s2453_s1  ;;  %v3048_v31 = vpop.permute.xlu0 %612 }
 0x3ae   : > { %v2988_v44 = vpop.permute.xlu1 %422 }
 0x3b1   : > { %496 = vrot.lane.b32.xlu0 %v488_v42, %s2452_s17  ;;  %v3050_v42 = vpop.permute.xlu0 %660 }
 0x3b2   : > { %v2993_v46 = vpop.permute.xlu1 %494 }
 0x3b3   : > { %3645 = vst [vmem:[#allocation14_spill] sm:$0xff] %v2993_v46 }
 0x3b5   : > { %544 = vrot.lane.b32.xlu0 %v536_v6, %s2453_s1  ;;  %v791_v6 = vpop.permute.xlu0 %790 }
 0x3b6   : > { %v3001_v9 = vpop.permute.xlu1 %542 }
 0x3b7   : > { %3646 = vst [vmem:[#allocation15_spill] sm:$0xff] %v3001_v9 }
 0x3b9   : > { %616 = vrot.lane.b32.xlu0 %v608_v60, %s2452_s17  ;;  %v839_v60 = vpop.permute.xlu0 %838 }
 0x3ba   : > { %v3008_v61 = vpop.permute.xlu1 %614 }
 0x3bb   : > { %3647 = vst [vmem:[#allocation16_spill] sm:$0xff] %v3008_v61 }
 0x3bd   : > { %664 = vrot.lane.b32.xlu0 %v656_v11, %s2453_s1  ;;  %v911_v11 = vpop.permute.xlu0 %910 }
 0x3be   : > { %v3013_v37 = vpop.permute.xlu1 %662 }
 0x3bf   : > { %3648 = vst [vmem:[#allocation17_spill] sm:$0xff] %v3013_v37 }
 0x3c1   : > { %794 = vrot.lane.b32.xlu0 %v786_v15, %s2452_s17  ;;  %v3052_v15 = vpop.permute.xlu0 %958 }
 0x3c2   : > { %v3021_v49 = vpop.permute.xlu1 %792 }
 0x3c5   : > { %842 = vrot.lane.b32.xlu0 %v834_v18, %s2453_s1  ;;  %v3055_v18 = vld [vmem:[%s2673_s29] sm:$0xff] }
 0x3c6   : > { %v3026_v51 = vpop.permute.xlu1 %840 }
 0x3c9   : > { %914 = vrot.lane.b32.xlu0 %v906_v19, %s2452_s17 }
 0x3ca   : > { %v3030_v52 = vpop.permute.xlu1 %912 }
 0x3cb   : > { %3649 = vst [vmem:[#allocation18_spill] sm:$0xff] %v3030_v52 }
 0x3cd   : > { %962 = vrot.lane.b32.xlu0 %v954_v21, %s2453_s1  ;;  %v326_v21 = vadd.f32 %v2761_v40, %v3055_v18  ;;  %v566_v40 = vadd.f32 %v2786_v13, %v3069_v26  ;;  %v2101_v13 = vld.sshfl [vmem:[%s2686_s21 + $0x8] sm:$0x13 pattern:$0x75316420] }
 0x3ce   : > { %v3033_v28 = vpop.permute.xlu1 %960 }
 0x3cf   : > { %3650 = vst [vmem:[#allocation19_spill] sm:$0xff] %v3033_v28 }
 0x3d1   : > { %1047 = vperm.xlu0 %2235, %v2713_v24  }
 0x3d2   : > { %v3035_v48 = vpop.permute.xlu1 %1032 }
 0x3d3   : > { %3651 = vst [vmem:[#allocation20_spill] sm:$0xff] %v3035_v48  ;;  %v572_v48 = vmul.f32 %v2999_v45, %v566_v40  ;;  %v1026_v40 = vmul.f32 %v2975_v63, %v2999_v45 }
 0x3d5   : > { %2238 = vset.pattern.permute.xlu0 %v3628_v1 }
 0x3e3   : > { %v1044_v55 = vpop.permute.xlu1 %1043 }
 0x3e4   : > { %v1054_v3 = vadd.f32 %v2085_v54, %v1044_v55  ;;  %v3062_v55 = vld [vmem:[%s2673_s29 + $0x18] sm:$0xff] }
 0x3e6   : > { %1063 = vrot.lane.b32.xlu1 %v1054_v3, %s2451_s10 }
 0x3e7   : > { %v1052_v2 = vpop.permute.xlu1 %1051 }
 0x3e8   : > { %v1056_v56 = vadd.f32 %v2085_v54, %v1052_v2  ;;  %v446_v2 = vadd.f32 %v2768_v50, %v3062_v55 }
 0x3ea   : > { %1067 = vrot.lane.b32.xlu1 %v1056_v56, %s2451_s10  ;;  %v332_v56 = vmul.f32 %v2973_v43, %v326_v21  ;;  %v452_v17 = vmul.f32 %v2986_v23, %v446_v2 }
 0x417   : > { %v3057_v19 = vpop.permute.xlu0 %1030 }
 0x41b   : > { %v377_v3 = vpop.permute.xlu0 %376 }
 0x41c   : > { %v383_v20 = vadd.f32 %v377_v3, %v332_v56 }
 0x41f   : > { %v425_v22 = vpop.permute.xlu0 %424 }
 0x420   : > { %v431_v27 = vadd.f32 %v425_v22, %v383_v20 }
 0x422   : > { %v455_v4 = vadd.f32 %v452_v17, %v431_v27 }
 0x423   : > { %v497_v25 = vpop.permute.xlu0 %496 }
 0x424   : > { %v503_v1 = vadd.f32 %v497_v25, %v455_v4 }
 0x427   : > { %v545_v16 = vpop.permute.xlu0 %544 }
 0x428   : > { %v551_v50 = vadd.f32 %v545_v16, %v503_v1 }
 0x42a   : > { %v575_v37 = vadd.f32 %v572_v48, %v551_v50 }
 0x42b   : > { %v617_v21 = vpop.permute.xlu0 %616 }
 0x42c   : > { %v623_v28 = vadd.f32 %v617_v21, %v575_v37  ;;  %v1120_v37 = vcombine.high %v2101_v13, %v2101_v13  ;;  %v3101_v21 = vld [vmem:[%s2673_s29 + $0x48] sm:$0xff] }
 0x42e   : > { %v1134_v56 = vrot.slane %v1120_v37, %v2682_v7 }
 0x42f   : > { %v665_v3 = vpop.permute.xlu0 %664 }
 0x430   : > { %v671_v2 = vadd.f32 %v665_v3, %v623_v28  ;;  %v3096_v50 = vrot.slane %v1134_v56, %v2684_v8  ;;  %v742_v3 = vadd.f32 %v3101_v21, %v2793_v30  ;;  %v1127_v30 = vrot.slane %v2101_v13, %v2682_v7 }
 0x432   : > { %v674_v20 = vmax.f32 %v671_v2, 0.0  ;;  %v3106_v2 = vld [vmem:[%s2673_s29 + $0x60] sm:$0xff] }
 0x433   : > { %v3079_v4 = vpop.permute.xlu0 %794  ;;  %v862_v63 = vadd.f32 %v3106_v2, %v2859_v34 }
 0x434   : > { %v677_v17 = vmin.f32 %v674_v20, 255.0  ;;  %v748_v20 = vmul.f32 %v742_v3, %v2887_v41 }
 0x436   : > { %681 = vst.msk [vmem:[%s3075_s25 + $0x10] sm:$0xff] %vm678_vm0, %v677_v17  ;;  %v799_v17 = vadd.f32 %v791_v6, %v748_v20  ;;  %v3123_v6 = vrot.slane %v1127_v30, %v2684_v8 }
 0x437   : > { %v3081_v22 = vpop.permute.xlu0 %842 }
 0x43b   : > { %v3083_v1 = vpop.permute.xlu0 %914 }
 0x43f   : > { %v3085_v16 = vpop.permute.xlu0 %962 }
 0x450   : > { %v1048_v25 = vpop.permute.xlu0 %1047 }
 0x451   : > { %v1055_v27 = vadd.f32 %v2085_v54, %v1048_v25  ;;  %v3652_v54 = vmov 2   ;;  %v847_v25 = vadd.f32 %v839_v60, %v799_v17  ;;  %v1135_v60 = vcombine.high %v1127_v30, %v1127_v30  ;;  %v2092_v17 = vld [vmem:[%s2673_s29 + $0x98] sm:$0xff] }
 0x453   : > { %1065 = vrot.lane.b32.xlu0 %v1055_v27, %s2451_s10  ;;  %v868_v27 = vmul.f32 %v862_v63, %v2894_v32 }
 0x455   : > { %v871_v37 = vadd.f32 %v868_v27, %v847_v25 }
 0x457   : > { %v919_v56 = vadd.f32 %v911_v11, %v871_v37  ;;  %v3128_v11 = vrot.slane %v1135_v60, %v2684_v8 }
 0x458   : > { %v1064_v28 = vpop.permute.xlu1 %1063 }
 0x459   : > { %v1072_v48 = vmul.f32 %v1064_v28, %v2902_v57  ;;  %v3113_v28 = vld [vmem:[%s2673_s29 + $0x78] sm:$0xff]  ;;  %v967_v3 = vadd.f32 %v3052_v15, %v919_v56 }
 0x45a   : > { %3653 = vst [vmem:[#allocation21_spill] sm:$0xff] %v3113_v28 }
 0x45b   : > { %1078 = vrot.lane.b32.xlu0 %v1072_v48, %s2453_s1  ;;  %v982_v48 = vadd.f32 %v3113_v28, %v2921_v5 }
 0x45c   : > { %v1068_v37 = vpop.permute.xlu1 %1067 }
 0x45d   : > { %v988_v34 = vmul.f32 %v982_v48, %v2902_v57 }
 0x45f   : > { %1034 = vrot.lane.b32.xlu0 %v1026_v40, %s2452_s17  ;;  %v991_v20 = vadd.f32 %v988_v34, %v967_v3 }
 0x461   : > { %v1039_v5 = vadd.f32 %v3057_v19, %v991_v20 }
 0x463   : > { %1177 = vperm.xlu0 %2238, %v3096_v50  }
 0x467   : > { %2240 = vset.pattern.permute.xlu0 %v3652_v54 }
 0x4c5   : > { %v1066_v40 = vpop.permute.xlu0 %1065 }
 0x4c6   : > { %v1073_v61 = vmul.f32 %v1066_v40, %v2945_v0 }
 0x4c8   : > { %1080 = vrot.lane.b32.xlu1 %v1073_v61, %s2453_s1  ;;  %v3654_v61 = vmov 1  }
 0x4cc   : > { %1149 = vperm.xlu1 %2236, %v3123_v6  }
 0x4cd   : > { %v1079_v15 = vpop.permute.xlu0 %1078 }
 0x4ce   : > { %v1087_v13 = vadd.f32 %v1079_v15, %v1039_v5  ;;  %v3656_v15 = vmov 3  }
 0x4d0   : > { %v1090_v63 = vmax.f32 %v1087_v13, 0.0  ;;  %1157 = vperm.xlu1 %2236, %v3128_v11  }
 0x4d1   : > { %v1035_v19 = vpop.permute.xlu0 %1034 }
 0x4d2   : > { %v1093_v57 = vmin.f32 %v1090_v63, 255.0 }
 0x4d4   : > { %2088 = vst.msk [vmem:[%s3075_s25 + $0x18] sm:$0xff] %vm678_vm0, %v1093_v57  ;;  %2237 = vset.pattern.permute.xlu1 %v3654_v61  ;;  %v1074_v57 = vmul.f32 %v1068_v37, %v2999_v45 }
 0x4d5   : > { %1173 = vperm.xlu1 %2237, %v3123_v6  }
 0x4d9   : > { %1181 = vperm.xlu1 %2237, %v3128_v11  }
 0x4dd   : > { %2239 = vset.pattern.permute.xlu1 %v3652_v54 }
 0x4e2   : > { %v1178_v25 = vpop.permute.xlu0 %1177 }
 0x4e3   : > { %v1185_v27 = vadd.f32 %v2092_v17, %v1178_v25 }
 0x4e5   : > { %1195 = vrot.lane.b32.xlu0 %v1185_v27, %s2450_s22 }
 0x53a   : > { %v3139_v48 = vpop.permute.xlu1 %1080 }
 0x53b   : > { %3655 = vst [vmem:[#allocation22_spill] sm:$0xff] %v3139_v48 }
 0x54b   : > { %v3141_v56 = vpop.permute.xlu1 %1149 }
 0x54f   : > { %v3143_v30 = vpop.permute.xlu1 %1157 }
 0x554   : > { %v1174_v40 = vpop.permute.xlu1 %1173 }
 0x555   : > { %v1184_v3 = vadd.f32 %v2092_v17, %v1174_v40  ;;  %v3657_v40 = vmov 4  }
 0x557   : > { %1193 = vrot.lane.b32.xlu1 %v1184_v3, %s2450_s22  ;;  %v1196_v60 = vpop.permute.xlu0 %1195  ;;  %v2093_v3 = vld [vmem:[%s2673_s29 + $0xa0] sm:$0xff] }
 0x558   : > { %v1182_v34 = vpop.permute.xlu1 %1181  ;;  %v1203_v5 = vmul.f32 %v1196_v60, %v2927_v36 }
 0x559   : > { %v1186_v20 = vadd.f32 %v2092_v17, %v1182_v34 }
 0x55b   : > { %1197 = vrot.lane.b32.xlu1 %v1186_v20, %s2450_s22 }
 0x55f   : > { %1210 = vrot.lane.b32.xlu1 %v1203_v5, %s2452_s17  ;;  %v744_v5 = vadd.f32 %v3101_v21, %v2795_v33 }
 0x563   : > { %1221 = vperm.xlu1 %2239, %v3123_v6  }
 0x567   : > { %1229 = vperm.xlu1 %2239, %v3128_v11  }
 0x56b   : > { %2241 = vset.pattern.permute.xlu1 %v3656_v15 }
 0x5c9   : > { %v1194_v13 = vpop.permute.xlu1 %1193 }
 0x5ca   : > { %v1202_v63 = vmul.f32 %v1194_v13, %v2887_v41  ;;  %v750_v13 = vmul.f32 %v744_v5, %v2973_v43 }
 0x5cc   : > { %1208 = vrot.lane.b32.xlu0 %v1202_v63, %s2452_s17  ;;  %v864_v63 = vadd.f32 %v3106_v2, %v2861_v35 }
 0x5cd   : > { %v1198_v17 = vpop.permute.xlu1 %1197 }
 0x5ce   : > { %v1204_v25 = vmul.f32 %v1198_v17, %v2973_v43 }
 0x5d0   : > { %1082 = vrot.lane.b32.xlu0 %v1074_v57, %s2453_s1  ;;  %v801_v57 = vadd.f32 %v3079_v4, %v750_v13 }
 0x5d1   : > { %v3159_v27 = vpop.permute.xlu1 %1210 }
 0x5d2   : > { %v849_v17 = vadd.f32 %v3081_v22, %v801_v57 }
 0x5d4   : > { %1212 = vrot.lane.b32.xlu0 %v1204_v25, %s2452_s17  ;;  %v870_v25 = vmul.f32 %v864_v63, %v2986_v23 }
 0x5d8   : > { %1225 = vperm.xlu0 %2240, %v3096_v50  }
 0x5dc   : > { %2243 = vset.pattern.permute.xlu0 %v3657_v40 }
 0x5e2   : > { %v1222_v34 = vpop.permute.xlu1 %1221 }
 0x5e3   : > { %v1232_v60 = vadd.f32 %v2093_v3, %v1222_v34  ;;  %v873_v34 = vadd.f32 %v870_v25, %v849_v17 }
 0x5e5   : > { %1241 = vrot.lane.b32.xlu1 %v1232_v60, %s2451_s10  ;;  %v984_v60 = vadd.f32 %v3113_v28, %v2923_v39 }
 0x5e6   : > { %v1230_v20 = vpop.permute.xlu1 %1229 }
 0x5e7   : > { %v1234_v37 = vadd.f32 %v2093_v3, %v1230_v20  ;;  %v921_v20 = vadd.f32 %v3083_v1, %v873_v34  ;;  %v2095_v34 = vld [vmem:[%s2673_s29 + $0xb0] sm:$0xff] }
 0x5e9   : > { %1245 = vrot.lane.b32.xlu1 %v1234_v37, %s2451_s10  ;;  %v969_v33 = vadd.f32 %v3085_v16, %v921_v20  ;;  %v990_v37 = vmul.f32 %v984_v60, %v2999_v45 }
 0x5eb   : > { %v993_v35 = vadd.f32 %v990_v37, %v969_v33 }
 0x5ed   : > { %v1041_v48 = vadd.f32 %v1035_v19, %v993_v35 }
 0x63e   : > { %v3178_v5 = vpop.permute.xlu0 %1208 }
 0x642   : > { %v1083_v9 = vpop.permute.xlu0 %1082 }
 0x643   : > { %v1089_v4 = vadd.f32 %v1083_v9, %v1041_v48  ;;  %v3658_v9 = vmov 5  }
 0x645   : > { %v1092_v13 = vmax.f32 %v1089_v4, 0.0 }
 0x646   : > { %v3182_v63 = vpop.permute.xlu0 %1212 }
 0x647   : > { %v1095_v22 = vmin.f32 %v1092_v13, 255.0 }
 0x649   : > { %2090 = vst.msk [vmem:[%s3075_s25 + $0x28] sm:$0xff] %vm678_vm0, %v1095_v22 }
 0x657   : > { %v1226_v57 = vpop.permute.xlu0 %1225  ;;  %v1242_v39 = vpop.permute.xlu1 %1241 }
 0x658   : > { %v1233_v17 = vadd.f32 %v2093_v3, %v1226_v57  ;;  %v1250_v1 = vmul.f32 %v1242_v39, %v2887_v41 }
 0x65a   : > { %1243 = vrot.lane.b32.xlu0 %v1233_v17, %s2451_s10  ;;  %v3659_v17 = vmov 6  }
 0x65b   : > { %v1246_v45 = vpop.permute.xlu1 %1245 }
 0x65c   : > { %v1252_v16 = vmul.f32 %v1246_v45, %v2973_v43 }
 0x65e   : > { %1256 = vrot.lane.b32.xlu0 %v1250_v1, %s2453_s1 }
 0x662   : > { %1260 = vrot.lane.b32.xlu0 %v1252_v16, %s2453_s1 }
 0x666   : > { %1297 = vperm.xlu0 %2243, %v3096_v50  }
 0x66a   : > { %2245 = vset.pattern.permute.xlu0 %v3658_v9 }
 0x6cc   : > { %v1244_v19 = vpop.permute.xlu0 %1243 }
 0x6cd   : > { %v1251_v48 = vmul.f32 %v1244_v19, %v2927_v36 }
 0x6cf   : > { %1258 = vrot.lane.b32.xlu1 %v1251_v48, %s2453_s1  ;;  %v3660_v48 = vmov 7  }
 0x6d0   : > { %v3195_v3 = vpop.permute.xlu0 %1256 }
 0x6d3   : > { %1269 = vperm.xlu1 %2241, %v3123_v6  }
 0x6d4   : > { %v3200_v25 = vpop.permute.xlu0 %1260 }
 0x6d7   : > { %1277 = vperm.xlu1 %2241, %v3128_v11  }
 0x6db   : > { %2242 = vset.pattern.permute.xlu1 %v3657_v40 }
 0x6dc   : > { %1293 = vperm.xlu1 %2242, %v3123_v6  }
 0x6e0   : > { %1301 = vperm.xlu1 %2242, %v3128_v11  }
 0x6e4   : > { %2244 = vset.pattern.permute.xlu1 %v3658_v9 }
 0x6e5   : > { %v1298_v36 = vpop.permute.xlu0 %1297 }
 0x6e6   : > { %v1305_v60 = vadd.f32 %v2095_v34, %v1298_v36  ;;  %v2096_v36 = vld [vmem:[%s2673_s29 + $0xb8] sm:$0xff] }
 0x6e8   : > { %1315 = vrot.lane.b32.xlu0 %v1305_v60, %s2450_s22 }
 0x741   : > { %v3205_v20 = vpop.permute.xlu1 %1258 }
 0x752   : > { %v3207_v33 = vpop.permute.xlu1 %1269 }
 0x756   : > { %v3209_v37 = vpop.permute.xlu1 %1277 }
 0x75a   : > { %v1316_v22 = vpop.permute.xlu0 %1315 }
 0x75b   : > { %v1294_v35 = vpop.permute.xlu1 %1293  ;;  %v1323_v39 = vmul.f32 %v1316_v22, %v2937_v59 }
 0x75c   : > { %v1304_v4 = vadd.f32 %v2095_v34, %v1294_v35 }
 0x75e   : > { %1313 = vrot.lane.b32.xlu1 %v1304_v4, %s2450_s22 }
 0x75f   : > { %v1302_v13 = vpop.permute.xlu1 %1301 }
 0x760   : > { %v1306_v57 = vadd.f32 %v2095_v34, %v1302_v13 }
 0x762   : > { %1317 = vrot.lane.b32.xlu1 %v1306_v57, %s2450_s22 }
 0x766   : > { %1330 = vrot.lane.b32.xlu1 %v1323_v39, %s2452_s17 }
 0x76a   : > { %1341 = vperm.xlu1 %2244, %v3123_v6  }
 0x76e   : > { %1349 = vperm.xlu1 %2244, %v3128_v11  }
 0x772   : > { %2246 = vset.pattern.permute.xlu1 %v3659_v17 }
 0x7d0   : > { %v1314_v1 = vpop.permute.xlu1 %1313 }
 0x7d1   : > { %v1322_v45 = vmul.f32 %v1314_v1, %v2894_v32 }
 0x7d3   : > { %1328 = vrot.lane.b32.xlu0 %v1322_v45, %s2452_s17  ;;  %v3230_v45 = vld [vmem:[%s2665_s4 + $0x1] sm:$0xff] }
 0x7d4   : > { %v1318_v16 = vpop.permute.xlu1 %1317 }
 0x7d5   : > { %v1324_v19 = vmul.f32 %v1318_v16, %v2986_v23 }
 0x7d7   : > { %1332 = vrot.lane.b32.xlu0 %v1324_v19, %s2452_s17 }
 0x7d8   : > { %v3224_v34 = vpop.permute.xlu1 %1330 }
 0x7d9   : > { %3661 = vst [vmem:[#allocation23_spill] sm:$0xff] %v3224_v34  ;;  %v3235_v34 = vld [vmem:[%s2665_s4 + $0x21] sm:$0xff] }
 0x7db   : > { %1345 = vperm.xlu0 %2245, %v3096_v50  }
 0x7df   : > { %2248 = vset.pattern.permute.xlu0 %v3660_v48 }
 0x7e9   : > { %v1342_v60 = vpop.permute.xlu1 %1341 }
 0x7ea   : > { %v1352_v35 = vadd.f32 %v2096_v36, %v1342_v60 }
 0x7ec   : > { %1361 = vrot.lane.b32.xlu1 %v1352_v35, %s2451_s10 }
 0x7ed   : > { %v1350_v4 = vpop.permute.xlu1 %1349 }
 0x7ee   : > { %v1354_v13 = vadd.f32 %v2096_v36, %v1350_v4 }
 0x7f0   : > { %1365 = vrot.lane.b32.xlu1 %v1354_v13, %s2451_s10 }
 0x845   : > { %v1329_v22 = vpop.permute.xlu0 %1328 }
 0x849   : > { %v1333_v57 = vpop.permute.xlu0 %1332 }
 0x85a   : > { %v1346_v39 = vpop.permute.xlu0 %1345 }
 0x85b   : > { %v1353_v1 = vadd.f32 %v2096_v36, %v1346_v39 }
 0x85d   : > { %1363 = vrot.lane.b32.xlu0 %v1353_v1, %s2451_s10  ;;  %v2098_v1 = vld [vmem:[%s2673_s29 + $0xc8] sm:$0xff] }
 0x85e   : > { %v1362_v16 = vpop.permute.xlu1 %1361 }
 0x85f   : > { %v1370_v19 = vmul.f32 %v1362_v16, %v3230_v45 }
 0x861   : > { %1376 = vrot.lane.b32.xlu0 %v1370_v19, %s2453_s1  ;;  %v3253_v19 = vld [vmem:[%s2673_s29 + $0x90] sm:$0xff] }
 0x862   : > { %v1366_v60 = vpop.permute.xlu1 %1365 }
 0x863   : > { %v1372_v35 = vmul.f32 %v1366_v60, %v3235_v34  ;;  %v3256_v60 = vld [vmem:[%s2673_s29 + $0xa8] sm:$0xff] }
 0x864   : > { %v1282_v28 = vadd.f32 %v3256_v60, %v3209_v37 }
 0x865   : > { %1380 = vrot.lane.b32.xlu0 %v1372_v35, %s2453_s1  ;;  %v1160_v35 = vadd.f32 %v3253_v19, %v3141_v56 }
 0x869   : > { %1417 = vperm.xlu0 %2248, %v3096_v50  }
 0x86d   : > { %2249 = vset.pattern.permute.xlu0 %v3654_v61 }
 0x8cf   : > { %v1364_v36 = vpop.permute.xlu0 %1363 }
 0x8d0   : > { %v1371_v4 = vmul.f32 %v1364_v36, %v2937_v59  ;;  %v1280_v36 = vadd.f32 %v3256_v60, %v3207_v33  ;;  %v3274_v33 = vld [vmem:[%s2673_s29 + $0xc0] sm:$0xff] }
 0x8d2   : > { %1378 = vrot.lane.b32.xlu1 %v1371_v4, %s2453_s1  ;;  %v1162_v4 = vadd.f32 %v3253_v19, %v3143_v30 }
 0x8d3   : > { %v1377_v13 = vpop.permute.xlu0 %1376 }
 0x8d4   : > { %v1168_v56 = vmul.f32 %v1162_v4, %v2973_v43  ;;  %v3285_v4 = vld [vmem:[%s2665_s4 + $0x22] sm:$0xff] }
 0x8d6   : > { %1389 = vperm.xlu1 %2246, %v3123_v6   ;;  %v1219_v30 = vadd.f32 %v3182_v63, %v1168_v56 }
 0x8d7   : > { %v1381_v39 = vpop.permute.xlu0 %1380 }
 0x8d8   : > { %v1267_v37 = vadd.f32 %v3200_v25, %v1219_v30  ;;  %v2115_v25 = vld.sshfl [vmem:[%s2686_s21 + $0xc] sm:$0x13 pattern:$0x75316420] }
 0x8da   : > { %1397 = vperm.xlu1 %2246, %v3128_v11  }
 0x8de   : > { %2247 = vset.pattern.permute.xlu1 %v3660_v48 }
 0x8df   : > { %1413 = vperm.xlu1 %2247, %v3123_v6  }
 0x8e3   : > { %1421 = vperm.xlu1 %2247, %v3128_v11  }
 0x8e7   : > { %2250 = vset.pattern.permute.xlu1 %v3654_v61  ;;  %v1166_v61 = vmul.f32 %v1160_v35, %v2887_v41  ;;  %v1288_v41 = vmul.f32 %v1282_v28, %v2986_v23 }
 0x8e8   : > { %v1418_v16 = vpop.permute.xlu0 %1417 }
 0x8e9   : > { %v1425_v59 = vadd.f32 %v2098_v1, %v1418_v16  ;;  %v1217_v16 = vadd.f32 %v3178_v5, %v1166_v61  ;;  %v3279_v5 = vld [vmem:[%s2665_s4 + $0x2] sm:$0xff] }
 0x8eb   : > { %1435 = vrot.lane.b32.xlu0 %v1425_v59, %s2450_s22  ;;  %v1286_v59 = vmul.f32 %v1280_v36, %v2894_v32  ;;  %v1265_v46 = vadd.f32 %v3195_v3, %v1217_v16 }
 0x8ed   : > { %v1289_v35 = vadd.f32 %v1286_v59, %v1265_v46 }
 0x8ef   : > { %v1337_v36 = vadd.f32 %v1329_v22, %v1289_v35 }
 0x8f1   : > { %v1385_v43 = vadd.f32 %v1377_v13, %v1337_v36  ;;  %v1538_v13 = vcombine.high %v2115_v25, %v2115_v25 }
 0x944   : > { %v3269_v52 = vpop.permute.xlu1 %1378 }
 0x945   : > { %3662 = vst [vmem:[#allocation24_spill] sm:$0xff] %v3269_v52  ;;  %v1291_v52 = vadd.f32 %v1288_v41, %v1267_v37 }
 0x947   : > { %v1339_v63 = vadd.f32 %v1333_v57, %v1291_v52  ;;  %v1552_v57 = vrot.slane %v1538_v13, %v2682_v7  ;;  %v2107_v13 = vld [vmem:[%s2673_s29 + $0xe8] sm:$0xff] }
 0x949   : > { %v1387_v28 = vadd.f32 %v1381_v39, %v1339_v63  ;;  %v1545_v39 = vrot.slane %v2115_v25, %v2682_v7  ;;  %v3301_v37 = vrot.slane %v1552_v57, %v2684_v8  ;;  %v3663_v7 = vmov 8   ;;  %v2109_v57 = vld [vmem:[%s2673_s29 + $0xf8] sm:$0xff] }
 0x94b   : > { %v1553_v36 = vcombine.high %v1545_v39, %v1545_v39 }
 0x955   : > { %v1390_v32 = vpop.permute.xlu1 %1389 }
 0x956   : > { %v1400_v61 = vadd.f32 %v3274_v33, %v1390_v32 }
 0x958   : > { %v1406_v3 = vmul.f32 %v3279_v5, %v1400_v61  ;;  %v3305_v61 = vrot.slane %v1553_v36, %v2684_v8 }
 0x959   : > { %v1398_v16 = vpop.permute.xlu1 %1397 }
 0x95a   : > { %v1402_v23 = vadd.f32 %v3274_v33, %v1398_v16  ;;  %v3288_v46 = vadd.f32 %v1406_v3, %v1385_v43  ;;  %v3328_v3 = vrot.slane %v1545_v39, %v2684_v8 }
 0x95c   : > { %v1408_v59 = vmul.f32 %v3285_v4, %v1402_v23 }
 0x95d   : > { %v1436_v35 = vpop.permute.xlu0 %1435 }
 0x95e   : > { %v1414_v56 = vpop.permute.xlu1 %1413  ;;  %v3292_v22 = vadd.f32 %v1408_v59, %v1387_v28  ;;  %v1443_v52 = vmul.f32 %v1436_v35, %v2945_v0  ;;  %v3664_v0 = vmov 0  }
 0x95f   : > { %v1424_v30 = vadd.f32 %v2098_v1, %v1414_v56 }
 0x961   : > { %1433 = vrot.lane.b32.xlu1 %v1424_v30, %s2450_s22 }
 0x962   : > { %v1422_v41 = vpop.permute.xlu1 %1421 }
 0x963   : > { %v1426_v32 = vadd.f32 %v2098_v1, %v1422_v41 }
 0x965   : > { %1437 = vrot.lane.b32.xlu1 %v1426_v32, %s2450_s22 }
 0x969   : > { %1450 = vrot.lane.b32.xlu1 %v1443_v52, %s2452_s17 }
 0x96d   : > { %1595 = vperm.xlu1 %2250, %v3301_v37  }
 0x971   : > { %1599 = vperm.xlu1 %2250, %v3305_v61  }
 0x975   : > { %2252 = vset.pattern.permute.xlu1 %v3652_v54 }
 0x976   : > { %1643 = vperm.xlu1 %2252, %v3301_v37  }
 0x97a   : > { %1647 = vperm.xlu1 %2252, %v3305_v61  }
 0x97e   : > { %2254 = vset.pattern.permute.xlu1 %v3657_v40 }
 0x97f   : > { %1715 = vperm.xlu1 %2254, %v3301_v37  }
 0x983   : > { %1719 = vperm.xlu1 %2254, %v3305_v61  }
 0x987   : > { %2256 = vset.pattern.permute.xlu1 %v3658_v9 }
 0x988   : > { %1763 = vperm.xlu1 %2256, %v3301_v37  }
 0x98c   : > { %1767 = vperm.xlu1 %2256, %v3305_v61  }
 0x990   : > { %2258 = vset.pattern.permute.xlu1 %v3660_v48 }
 0x991   : > { %1835 = vperm.xlu1 %2258, %v3301_v37  }
 0x995   : > { %1839 = vperm.xlu1 %2258, %v3305_v61  }
 0x999   : > { %2260 = vset.pattern.permute.xlu1 %v3663_v7 }
 0x99a   : > { %1465 = vperm.xlu1 %2260, %v3096_v50  }
 0x99e   : > { %1469 = vperm.xlu1 %2260, %v3128_v11   ;;  %v2106_v11 = vld [vmem:[%s2673_s29 + $0xe0] sm:$0xff] }
 0x9a2   : > { %1883 = vperm.xlu1 %2260, %v3301_v37  }
 0x9a6   : > { %2263 = vset.pattern.permute.xlu1 %v3664_v0 }
 0x9d3   : > { %v1434_v1 = vpop.permute.xlu1 %1433 }
 0x9d4   : > { %v1442_v43 = vmul.f32 %v1434_v1, %v3279_v5 }
 0x9d6   : > { %1448 = vrot.lane.b32.xlu0 %v1442_v43, %s2452_s17  ;;  %v2110_v43 = vld [vmem:[%s2673_s29 + $0x100] sm:$0xff] }
 0x9d7   : > { %v3345_v8 = vpop.permute.xlu1 %1437 }
 0x9da   : > { %1591 = vperm.xlu0 %2249, %v3328_v3  }
 0x9de   : > { %2251 = vset.pattern.permute.xlu0 %v3652_v54  ;;  %v3348_v54 = vpop.permute.xlu1 %1450 }
 0x9df   : > { %1639 = vperm.xlu0 %2251, %v3328_v3  }
 0x9e3   : > { %2253 = vset.pattern.permute.xlu0 %v3657_v40 }
 0x9e4   : > { %1711 = vperm.xlu0 %2253, %v3328_v3  }
 0x9e8   : > { %2255 = vset.pattern.permute.xlu0 %v3658_v9 }
 0x9e9   : > { %1759 = vperm.xlu0 %2255, %v3328_v3  }
 0x9ec   : > { %v1596_v40 = vpop.permute.xlu1 %1595 }
 0x9ed   : > { %2257 = vset.pattern.permute.xlu0 %v3660_v48 }
 0x9ee   : > { %1831 = vperm.xlu0 %2257, %v3328_v3  }
 0x9f0   : > { %v1600_v9 = vpop.permute.xlu1 %1599 }
 0x9f1   : > { %v1604_v30 = vadd.f32 %v2106_v11, %v1600_v9 }
 0x9f2   : > { %2259 = vset.pattern.permute.xlu0 %v3663_v7 }
 0x9f3   : > { %1461 = vperm.xlu0 %2259, %v3123_v6   ;;  %v1603_v6 = vadd.f32 %v2106_v11, %v1596_v40 }
 0x9f5   : > { %v1644_v48 = vpop.permute.xlu1 %1643 }
 0x9f7   : > { %1879 = vperm.xlu0 %2259, %v3328_v3  }
 0x9f9   : > { %v1648_v16 = vpop.permute.xlu1 %1647 }
 0x9fa   : > { %v1652_v52 = vadd.f32 %v2107_v13, %v1648_v16 }
 0x9fb   : > { %1887 = vperm.xlu0 %2259, %v3305_v61  }
 0x9fe   : > { %v1716_v23 = vpop.permute.xlu1 %1715 }
 0x9ff   : > { %2261 = vset.pattern.permute.xlu0 %v3664_v0  ;;  %v1723_v1 = vadd.f32 %v2109_v57, %v1716_v23 }
 0xa00   : > { %313 = vperm.xlu0 %2261, %v2691_v12  }
 0xa02   : > { %v1720_v28 = vpop.permute.xlu1 %1719 }
 0xa04   : > { %317 = vperm.xlu0 %2261, %v2696_v14  }
 0xa07   : > { %v1764_v59 = vpop.permute.xlu1 %1763 }
 0xa08   : > { %735 = vperm.xlu0 %2261, %v2713_v24  }
 0xa0b   : > { %v1768_v35 = vpop.permute.xlu1 %1767 }
 0xa0c   : > { %1153 = vperm.xlu0 %2261, %v3096_v50  }
 0xa10   : > { %1613 = vrot.lane.b32.xlu0 %v1603_v6, %s2450_s22  ;;  %v1836_v0 = vpop.permute.xlu1 %1835  ;;  %v1724_v6 = vadd.f32 %v2109_v57, %v1720_v28 }
 0xa14   : > { %v1840_v9 = vpop.permute.xlu1 %1839 }
 0xa19   : > { %v1466_v23 = vpop.permute.xlu1 %1465 }
 0xa48   : > { %v1449_v12 = vpop.permute.xlu0 %1448 }
 0xa49   : > { %v3355_v63 = vadd.f32 %v1449_v12, %v3288_v46  ;;  %v1651_v46 = vadd.f32 %v2107_v13, %v1644_v48  ;;  %v2112_v48 = vld [vmem:[%s2673_s29 + $0x110] sm:$0xff]  ;;  %v1771_v12 = vadd.f32 %v2110_v43, %v1764_v59  ;;  %v1470_v59 = vpop.permute.xlu1 %1469 }
 0xa59   : > { %v1592_v56 = vpop.permute.xlu0 %1591 }
 0xa5a   : > { %v1602_v25 = vadd.f32 %v2106_v11, %v1592_v56  ;;  %v1772_v56 = vadd.f32 %v2110_v43, %v1768_v35 }
 0xa5c   : > { %1611 = vrot.lane.b32.xlu1 %v1602_v25, %s2450_s22 }
 0xa5e   : > { %v1640_v41 = vpop.permute.xlu0 %1639 }
 0xa5f   : > { %v1650_v32 = vadd.f32 %v2107_v13, %v1640_v41  ;;  %v2099_v13 = vld [vmem:[%s2673_s29 + $0xd0] sm:$0xff] }
 0xa60   : > { %1615 = vrot.lane.b32.xlu1 %v1604_v30, %s2450_s22  ;;  %v1843_v30 = vadd.f32 %v2112_v48, %v1836_v0  ;;  %v1473_v35 = vadd.f32 %v2099_v13, %v1466_v23  ;;  %v564_v23 = vadd.f32 %v2783_v10, %v3069_v26 }
 0xa61   : > { %1659 = vrot.lane.b32.xlu0 %v1650_v32, %s2451_s10  ;;  %v1844_v32 = vadd.f32 %v2112_v48, %v1840_v9 }
 0xa63   : > { %v1712_v39 = vpop.permute.xlu0 %1711 }
 0xa64   : > { %1661 = vrot.lane.b32.xlu1 %v1651_v46, %s2451_s10  ;;  %v1722_v36 = vadd.f32 %v2109_v57, %v1712_v39  ;;  %v2113_v39 = vld [vmem:[%s2673_s29 + $0x118] sm:$0xff] }
 0xa65   : > { %1663 = vrot.lane.b32.xlu0 %v1652_v52, %s2451_s10  ;;  %v1474_v52 = vadd.f32 %v2099_v13, %v1470_v59 }
 0xa68   : > { %1731 = vrot.lane.b32.xlu1 %v1722_v36, %s2450_s22  ;;  %v1760_v11 = vpop.permute.xlu0 %1759  ;;  %v1884_v36 = vpop.permute.xlu1 %1883 }
 0xa69   : > { %1733 = vrot.lane.b32.xlu0 %v1723_v1, %s2450_s22  ;;  %v1770_v40 = vadd.f32 %v2110_v43, %v1760_v11  ;;  %v1891_v1 = vadd.f32 %v2113_v39, %v1884_v36  ;;  %v3381_v43 = vld [vmem:[%s2665_s4] sm:$0xff] }
 0xa6c   : > { %1735 = vrot.lane.b32.xlu1 %v1724_v6, %s2450_s22  ;;  %v444_v6 = vadd.f32 %v2765_v47, %v3062_v55 }
 0xa6d   : > { %1779 = vrot.lane.b32.xlu0 %v1770_v40, %s2451_s10  ;;  %v1832_v16 = vpop.permute.xlu0 %1831 }
 0xa6e   : > { %v1842_v25 = vadd.f32 %v2112_v48, %v1832_v16 }
 0xa70   : > { %1781 = vrot.lane.b32.xlu1 %v1771_v12, %s2451_s10  ;;  %v2268_v12 = vld [vmem:[%s2665_s4 + $0x1] sm:$0xff] }
 0xa71   : > { %1783 = vrot.lane.b32.xlu0 %v1772_v56, %s2451_s10  ;;  %v450_v56 = vmul.f32 %v2268_v12, %v444_v6 }
 0xa72   : > { %v1462_v41 = vpop.permute.xlu0 %1461 }
 0xa73   : > { %v1472_v28 = vadd.f32 %v2099_v13, %v1462_v41  ;;  %v2269_v13 = vld [vmem:[%s2665_s4 + $0x2] sm:$0xff] }
 0xa74   : > { %1851 = vrot.lane.b32.xlu1 %v1842_v25, %s2450_s22  ;;  %v570_v41 = vmul.f32 %v2269_v13, %v564_v23  ;;  %v1444_v23 = vmul.f32 %v3345_v8, %v3285_v4  ;;  %v3465_v13 = vld [vmem:[%s2665_s4 + $0x12] sm:$0xff] }
 0xa75   : > { %1853 = vrot.lane.b32.xlu0 %v1843_v30, %s2450_s22 }
 0xa76   : > { %v1880_v46 = vpop.permute.xlu0 %1879 }
 0xa77   : > { %v1890_v0 = vadd.f32 %v2113_v39, %v1880_v46 }
 0xa78   : > { %1855 = vrot.lane.b32.xlu1 %v1844_v32, %s2450_s22 }
 0xa79   : > { %1481 = vrot.lane.b32.xlu0 %v1472_v28, %s2451_s10 }
 0xa7a   : > { %v1888_v57 = vpop.permute.xlu0 %1887 }
 0xa7b   : > { %v1892_v9 = vadd.f32 %v2113_v39, %v1888_v57  ;;  %v3446_v57 = vld [vmem:[%s2665_s4 + $0x11] sm:$0xff] }
 0xa7c   : > { %1483 = vrot.lane.b32.xlu1 %v1473_v35, %s2451_s10 }
 0xa7d   : > { %1485 = vrot.lane.b32.xlu0 %v1474_v52, %s2451_s10 }
 0xa7f   : > { %v314_v11 = vpop.permute.xlu0 %313 }
 0xa80   : > { %v324_v40 = vadd.f32 %v314_v11, %v3055_v18  ;;  %1899 = vrot.lane.b32.xlu1 %v1890_v0, %s2451_s10 }
 0xa81   : > { %1901 = vrot.lane.b32.xlu0 %v1891_v1, %s2451_s10 }
 0xa82   : > { %v330_v48 = vmul.f32 %v3381_v43, %v324_v40 }
 0xa84   : > { %v381_v16 = vadd.f32 %v3037_v53, %v330_v48  ;;  %1903 = vrot.lane.b32.xlu1 %v1892_v9, %s2451_s10  ;;  %v3400_v53 = vpop.permute.xlu0 %317 }
 0xa85   : > { %1567 = vperm.xlu0 %2261, %v3328_v3  }
 0xa86   : > { %v429_v25 = vadd.f32 %v3040_v62, %v381_v16 }
 0xa88   : > { %v453_v30 = vadd.f32 %v450_v56, %v429_v25  ;;  %1571 = vperm.xlu1 %2263, %v3301_v37   ;;  %v3408_v10 = vpop.permute.xlu0 %735 }
 0xa89   : > { %2262 = vset.pattern.permute.xlu0 %v3656_v15 }
 0xa8a   : > { %v501_v47 = vadd.f32 %v3044_v58, %v453_v30  ;;  %437 = vperm.xlu0 %2262, %v2696_v14  }
 0xa8c   : > { %v549_v28 = vadd.f32 %v3046_v38, %v501_v47  ;;  %1575 = vperm.xlu1 %2263, %v3305_v61   ;;  %v3415_v46 = vpop.permute.xlu0 %1153 }
 0xa8e   : > { %v573_v62 = vadd.f32 %v570_v41, %v549_v28  ;;  %855 = vperm.xlu0 %2262, %v2713_v24  }
 0xa90   : > { %v621_v26 = vadd.f32 %v3048_v31, %v573_v62  ;;  %2265 = vset.pattern.permute.xlu1 %v3656_v15  ;;  %v1614_v31 = vpop.permute.xlu0 %1613 }
 0xa91   : > { %1691 = vperm.xlu1 %2265, %v3301_v37  }
 0xa92   : > { %v669_v58 = vadd.f32 %v3050_v42, %v621_v26  ;;  %1273 = vperm.xlu0 %2262, %v3096_v50   ;;  %v3424_v42 = vld [vmem:[%s2665_s4 + $0x10] sm:$0xff] }
 0xa93   : > { %v1621_v15 = vmul.f32 %v1614_v31, %v3424_v42 }
 0xa94   : > { %v672_v32 = vmax.f32 %v669_v58, 0.0 }
 0xa95   : > { %1695 = vperm.xlu1 %2265, %v3305_v61  }
 0xa96   : > { %v675_v38 = vmin.f32 %v672_v32, 255.0  ;;  %1687 = vperm.xlu0 %2262, %v3328_v3  }
 0xa98   : > { %679 = vst.msk [vmem:[%s3075_s25] sm:$0xff] %vm678_vm0, %v675_v38 }
 0xa99   : > { %2266 = vset.pattern.permute.xlu1 %v3659_v17 }
 0xa9a   : > { %2264 = vset.pattern.permute.xlu0 %v3659_v17  ;;  %1811 = vperm.xlu1 %2266, %v3301_v37   ;;  %v3435_v37 = vld [vmem:[%s2665_s4 + $0x20] sm:$0xff]  ;;  %s2365_s4 = sshll.u32 %s2454_s27, 4  ;;  %s2366_s4 = int_to_ptr.vmem [resolvable:$false] %s2365_s4 }
 0xa9b   : > { %557 = vperm.xlu0 %2264, %v2696_v14   ;;  %s2367_s26 = scalar_lea.vmem %s2366_s4, 3072  ;;  %p2368_p6 = scmp.lt.s32.totalorder %s3559_s6, %s2366_s4 }
 0xa9c   : > { %p2369_p9 = scmp.lt.s32.totalorder %s2367_s26, %s2361_s20 }
 0xa9e   : > { %1815 = vperm.xlu1 %2266, %v3305_v61   ;;  %p2370_p12 = por %p2369_p9, %p2368_p6 }
 0xa9f   : > { %975 = vperm.xlu0 %2264, %v2713_v24  }
 0xaa0   : > { %p2371_p2 = pnand %p2370_p12, %p2364_p10 }
 0xaa2   : > { %1628 = vrot.lane.b32.xlu1 %v1621_v15, %s2452_s17 }
 0xaa3   : > { %1393 = vperm.xlu0 %2264, %v3096_v50  }
 0xaa7   : > { %1807 = vperm.xlu0 %2264, %v3328_v3  }
 0xaab   : > { %2267 = vset.pattern.permute.xlu0 %v3663_v7 }
 0xace   : > { %v1612_v17 = vpop.permute.xlu1 %1611 }
 0xacf   : > { %v1620_v14 = vmul.f32 %v1612_v17, %v3381_v43 }
 0xad1   : > { %1626 = vrot.lane.b32.xlu0 %v1620_v14, %s2452_s17 }
 0xad2   : > { %v1616_v61 = vpop.permute.xlu1 %1615 }
 0xad3   : > { %v1622_v59 = vmul.f32 %v1616_v61, %v3435_v37  ;;  %v1660_v24 = vpop.permute.xlu0 %1659 }
 0xad4   : > { %v1668_v35 = vmul.f32 %v1660_v24, %v3381_v43 }
 0xad5   : > { %1630 = vrot.lane.b32.xlu0 %v1622_v59, %s2452_s17 }
 0xad6   : > { %1674 = vrot.lane.b32.xlu1 %v1668_v35, %s2453_s1  ;;  %v1662_v50 = vpop.permute.xlu1 %1661 }
 0xad7   : > { %v1669_v7 = vmul.f32 %v1662_v50, %v3424_v42  ;;  %v1664_v3 = vpop.permute.xlu0 %1663  ;;  %v325_v50 = vadd.f32 %v3400_v53, %v3055_v18 }
 0xad8   : > { %v1670_v52 = vmul.f32 %v1664_v3, %v3435_v37 }
 0xad9   : > { %1676 = vrot.lane.b32.xlu0 %v1669_v7, %s2453_s1  ;;  %v1161_v7 = vadd.f32 %v3253_v19, %v3415_v46 }
 0xada   : > { %1678 = vrot.lane.b32.xlu1 %v1670_v52, %s2453_s1  ;;  %v1732_v39 = vpop.permute.xlu1 %1731  ;;  %v331_v52 = vmul.f32 %v3424_v42, %v325_v50 }
 0xadb   : > { %v1740_v36 = vmul.f32 %v1732_v39, %v3230_v45  ;;  %v1734_v0 = vpop.permute.xlu0 %1733  ;;  %v743_v39 = vadd.f32 %v3101_v21, %v3408_v10 }
 0xadc   : > { %v1741_v1 = vmul.f32 %v1734_v0, %v3446_v57 }
 0xadd   : > { %1746 = vrot.lane.b32.xlu0 %v1740_v36, %s2452_s17  ;;  %v1167_v36 = vmul.f32 %v1161_v7, %v3424_v42 }
 0xade   : > { %1748 = vrot.lane.b32.xlu1 %v1741_v1, %s2452_s17  ;;  %v1736_v11 = vpop.permute.xlu1 %1735 }
 0xadf   : > { %v1742_v40 = vmul.f32 %v1736_v11, %v3235_v34  ;;  %v1780_v6 = vpop.permute.xlu0 %1779  ;;  %v382_v11 = vadd.f32 %v2980_v29, %v331_v52  ;;  %v1218_v18 = vadd.f32 %v3159_v27, %v1167_v36  ;;  %v3673_v52 = vld [vmem:[#allocation20_spill] sm:$0xff] }
 0xae0   : > { %v1788_v9 = vmul.f32 %v1780_v6, %v3230_v45 }
 0xae1   : > { %1750 = vrot.lane.b32.xlu0 %v1742_v40, %s2452_s17  ;;  %v749_v40 = vmul.f32 %v743_v39, %v3424_v42  ;;  %v430_v10 = vadd.f32 %v2988_v44, %v382_v11  ;;  %v3667_v44 = vld [vmem:[#allocation15_spill] sm:$0xff] }
 0xae2   : > { %1794 = vrot.lane.b32.xlu1 %v1788_v9, %s2453_s1  ;;  %v1782_v48 = vpop.permute.xlu1 %1781 }
 0xae3   : > { %v1789_v16 = vmul.f32 %v1782_v48, %v3446_v57  ;;  %v1784_v12 = vpop.permute.xlu0 %1783  ;;  %v800_v21 = vadd.f32 %v3021_v49, %v749_v40  ;;  %v3666_v49 = vld [vmem:[#allocation18_spill] sm:$0xff] }
 0xae4   : > { %v1790_v56 = vmul.f32 %v1784_v12, %v3235_v34 }
 0xae5   : > { %1796 = vrot.lane.b32.xlu0 %v1789_v16, %s2453_s1  ;;  %v848_v12 = vadd.f32 %v3026_v51, %v800_v21  ;;  %v3670_v51 = vld [vmem:[#allocation16_spill] sm:$0xff] }
 0xae6   : > { %1798 = vrot.lane.b32.xlu1 %v1790_v56, %s2453_s1  ;;  %v1852_v25 = vpop.permute.xlu1 %1851  ;;  %v3665_v56 = vld [vmem:[#allocation14_spill] sm:$0xff] }
 0xae7   : > { %v1860_v30 = vmul.f32 %v1852_v25, %v3279_v5  ;;  %v1854_v47 = vpop.permute.xlu0 %1853 }
 0xae8   : > { %v1861_v28 = vmul.f32 %v1854_v47, %v3465_v13 }
 0xae9   : > { %1452 = vrot.lane.b32.xlu0 %v1444_v23, %s2452_s17 }
 0xaea   : > { %1866 = vrot.lane.b32.xlu1 %v1860_v30, %s2452_s17  ;;  %v1856_v41 = vpop.permute.xlu1 %1855 }
 0xaeb   : > { %v1862_v62 = vmul.f32 %v1856_v41, %v3285_v4  ;;  %v1482_v26 = vpop.permute.xlu0 %1481 }
 0xaec   : > { %v1490_v58 = vmul.f32 %v1482_v26, %v3279_v5  ;;  %v3668_v26 = vld [vmem:[#allocation21_spill] sm:$0xff] }
 0xaed   : > { %1868 = vrot.lane.b32.xlu0 %v1861_v28, %s2452_s17 }
 0xaee   : > { %1870 = vrot.lane.b32.xlu1 %v1862_v62, %s2452_s17  ;;  %v1484_v8 = vpop.permute.xlu1 %1483 }
 0xaef   : > { %v1491_v32 = vmul.f32 %v3465_v13, %v1484_v8  ;;  %v1486_v38 = vpop.permute.xlu0 %1485 }
 0xaf0   : > { %v1492_v15 = vmul.f32 %v1486_v38, %v3285_v4 }
 0xaf1   : > { %1496 = vrot.lane.b32.xlu0 %v1490_v58, %s2453_s1 }
 0xaf2   : > { %1498 = vrot.lane.b32.xlu1 %v1491_v32, %s2453_s1  ;;  %v1900_v31 = vpop.permute.xlu1 %1899  ;;  %v3669_v32 = vld [vmem:[#allocation23_spill] sm:$0xff] }
 0xaf3   : > { %v1908_v17 = vmul.f32 %v1900_v31, %v3279_v5  ;;  %v1902_v14 = vpop.permute.xlu0 %1901 }
 0xaf4   : > { %v1909_v59 = vmul.f32 %v1902_v14, %v3465_v13 }
 0xaf5   : > { %1500 = vrot.lane.b32.xlu0 %v1492_v15, %s2453_s1  ;;  %v3671_v15 = vld [vmem:[#allocation19_spill] sm:$0xff] }
 0xaf6   : > { %1914 = vrot.lane.b32.xlu1 %v1908_v17, %s2453_s1  ;;  %v1904_v61 = vpop.permute.xlu1 %1903 }
 0xaf7   : > { %v1910_v24 = vmul.f32 %v1904_v61, %v3285_v4 }
 0xaf9   : > { %1916 = vrot.lane.b32.xlu0 %v1909_v59, %s2453_s1  ;;  %v3672_v59 = vld [vmem:[#allocation17_spill] sm:$0xff] }
 0xafa   : > { %1918 = vrot.lane.b32.xlu1 %v1910_v24, %s2453_s1 }
 0xb04   : > { %v3485_v35 = vpop.permute.xlu0 %1567 }
 0xb07   : > { %v1572_v8 = vpop.permute.xlu1 %1571 }
 0xb09   : > { %v438_v3 = vpop.permute.xlu0 %437 }
 0xb0a   : > { %v445_v0 = vadd.f32 %v438_v3, %v3062_v55  ;;  %v1266_v55 = vadd.f32 %v3205_v20, %v1218_v18  ;;  %v3675_v18 = vld [vmem:[#allocation22_spill] sm:$0xff] }
 0xb0b   : > { %v1576_v11 = vpop.permute.xlu1 %1575 }
 0xb0c   : > { %v451_v53 = vmul.f32 %v3446_v57, %v445_v0  ;;  %v3674_v0 = vld [vmem:[#allocation24_spill] sm:$0xff] }
 0xb0d   : > { %v856_v1 = vpop.permute.xlu0 %855 }
 0xb0e   : > { %v863_v19 = vadd.f32 %v3106_v2, %v856_v1  ;;  %v454_v9 = vadd.f32 %v451_v53, %v430_v10 }
 0xb10   : > { %v869_v48 = vmul.f32 %v3446_v57, %v863_v19  ;;  %v502_v2 = vadd.f32 %v3665_v56, %v454_v9  ;;  %v1692_v21 = vpop.permute.xlu1 %1691 }
 0xb11   : > { %v1274_v46 = vpop.permute.xlu0 %1273 }
 0xb12   : > { %v1281_v6 = vadd.f32 %v3256_v60, %v1274_v46  ;;  %v872_v25 = vadd.f32 %v869_v48, %v848_v12  ;;  %v2270_v60 = vld [vmem:[%s2673_s29 + $0x30] sm:$0xff]  ;;  %v550_v41 = vadd.f32 %v3667_v44, %v502_v2 }
 0xb14   : > { %v1287_v29 = vmul.f32 %v3446_v57, %v1281_v6  ;;  %v920_v47 = vadd.f32 %v3666_v49, %v872_v25 }
 0xb15   : > { %v1688_v27 = vpop.permute.xlu0 %1687 }
 0xb16   : > { %v1290_v16 = vadd.f32 %v1287_v29, %v1266_v55  ;;  %v968_v17 = vadd.f32 %v3671_v15, %v920_v47  ;;  %v2105_v55 = vld [vmem:[%s2673_s29 + $0xd8] sm:$0xff] }
 0xb17   : > { %v1578_v48 = vadd.f32 %v2105_v55, %v3485_v35  ;;  %v1579_v56 = vadd.f32 %v2105_v55, %v1572_v8 }
 0xb18   : > { %v1338_v38 = vadd.f32 %v3669_v32, %v1290_v16  ;;  %v2108_v16 = vld [vmem:[%s2673_s29 + $0xf0] sm:$0xff] }
 0xb19   : > { %v1698_v25 = vadd.f32 %v2108_v16, %v1688_v27  ;;  %v1585_v49 = vmul.f32 %v1579_v56, %v3424_v42  ;;  %v1580_v42 = vadd.f32 %v2105_v55, %v1576_v11 }
 0xb1a   : > { %v558_v23 = vpop.permute.xlu0 %557  ;;  %v1386_v1 = vadd.f32 %v3674_v0, %v1338_v38  ;;  %v2111_v38 = vld [vmem:[%s2673_s29 + $0x108] sm:$0xff] }
 0xb1b   : > { %v565_v30 = vadd.f32 %v2270_v60, %v558_v23  ;;  %v1584_v23 = vmul.f32 %v1578_v48, %v3381_v43  ;;  %v1704_v44 = vmul.f32 %v1698_v25, %v3230_v45 }
 0xb1d   : > { %v571_v20 = vmul.f32 %v3465_v13, %v565_v30 }
 0xb1e   : > { %v976_v28 = vpop.permute.xlu0 %975 }
 0xb1f   : > { %v574_v62 = vadd.f32 %v571_v20, %v550_v41  ;;  %v983_v58 = vadd.f32 %v3668_v26, %v976_v28 }
 0xb21   : > { %v622_v31 = vadd.f32 %v3670_v51, %v574_v62  ;;  %v989_v14 = vmul.f32 %v3465_v13, %v983_v58  ;;  %v1699_v62 = vadd.f32 %v2108_v16, %v1692_v21 }
 0xb22   : > { %v1394_v61 = vpop.permute.xlu0 %1393 }
 0xb23   : > { %v670_v24 = vadd.f32 %v3672_v59, %v622_v31  ;;  %v992_v50 = vadd.f32 %v989_v14, %v968_v17  ;;  %v1401_v7 = vadd.f32 %v3274_v33, %v1394_v61  ;;  %v1696_v33 = vpop.permute.xlu1 %1695  ;;  %v1705_v27 = vmul.f32 %v3446_v57, %v1699_v62 }
 0xb25   : > { %v673_v3 = vmax.f32 %v670_v24, 0.0  ;;  %v1040_v39 = vadd.f32 %v3673_v52, %v992_v50  ;;  %v1407_v36 = vmul.f32 %v3465_v13, %v1401_v7  ;;  %v1586_v24 = vmul.f32 %v3435_v37, %v1580_v42 }
 0xb26   : > { %v1808_v9 = vpop.permute.xlu0 %1807  ;;  %v1700_v7 = vadd.f32 %v2108_v16, %v1696_v33 }
 0xb27   : > { %v676_v40 = vmin.f32 %v673_v3, 255.0  ;;  %v1088_v53 = vadd.f32 %v3675_v18, %v1040_v39  ;;  %v1410_v19 = vadd.f32 %v1407_v36, %v1386_v1  ;;  %v1812_v10 = vpop.permute.xlu1 %1811  ;;  %v1818_v0 = vadd.f32 %v2111_v38, %v1808_v9 }
 0xb28   : > { %v1819_v31 = vadd.f32 %v2111_v38, %v1812_v10  ;;  %v1706_v36 = vmul.f32 %v1700_v7, %v3235_v34 }
 0xb29   : > { %680 = vst.msk [vmem:[%s3075_s25 + $0x8] sm:$0xff] %vm678_vm0, %v676_v40  ;;  %v1091_v46 = vmax.f32 %v1088_v53, 0.0  ;;  %v1458_v37 = vadd.f32 %v3348_v54, %v1410_v19 }
 0xb2a   : > { %v1825_v45 = vmul.f32 %v3465_v13, %v1819_v31  ;;  %v1824_v13 = vmul.f32 %v1818_v0, %v3279_v5 }
 0xb2b   : > { %v1094_v6 = vmin.f32 %v1091_v46, 255.0  ;;  %v1816_v29 = vpop.permute.xlu1 %1815 }
 0xb2c   : > { %v1820_v46 = vadd.f32 %v2111_v38, %v1816_v29 }
 0xb2d   : > { %2089 = vst.msk [vmem:[%s3075_s25 + $0x20] sm:$0xff] %vm678_vm0, %v1094_v6 }
 0xb2f   : > { %v1629_v2 = vpop.permute.xlu1 %1628 }
 0xb30   : > { %v1636_v35 = vadd.f32 %v1629_v2, %v1585_v49 }
 0xb43   : > { %v1627_v12 = vpop.permute.xlu0 %1626 }
 0xb44   : > { %v1635_v60 = vadd.f32 %v1627_v12, %v1584_v23  ;;  %v1826_v12 = vmul.f32 %v1820_v46, %v3285_v4 }
 0xb47   : > { %v1631_v30 = vpop.permute.xlu0 %1630 }
 0xb48   : > { %v1675_v47 = vpop.permute.xlu1 %1674  ;;  %v1637_v3 = vadd.f32 %v1631_v30, %v1586_v24 }
 0xb49   : > { %v1683_v41 = vadd.f32 %v1675_v47, %v1635_v60 }
 0xb4b   : > { %v1677_v20 = vpop.permute.xlu0 %1676  ;;  %v1707_v28 = vadd.f32 %v1704_v44, %v1683_v41 }
 0xb4c   : > { %v1679_v26 = vpop.permute.xlu1 %1678  ;;  %v1684_v58 = vadd.f32 %v1677_v20, %v1636_v35 }
 0xb4d   : > { %v1685_v39 = vadd.f32 %v1679_v26, %v1637_v3 }
 0xb4e   : > { %v1708_v43 = vadd.f32 %v1705_v27, %v1684_v58 }
 0xb4f   : > { %v1747_v8 = vpop.permute.xlu0 %1746  ;;  %v1709_v18 = vadd.f32 %v1706_v36, %v1685_v39 }
 0xb50   : > { %v1749_v32 = vpop.permute.xlu1 %1748  ;;  %v1755_v1 = vadd.f32 %v1747_v8, %v1707_v28 }
 0xb51   : > { %v1756_v17 = vadd.f32 %v1749_v32, %v1708_v43 }
 0xb53   : > { %v1751_v51 = vpop.permute.xlu0 %1750 }
 0xb54   : > { %v1795_v15 = vpop.permute.xlu1 %1794  ;;  %v1757_v6 = vadd.f32 %v1751_v51, %v1709_v18 }
 0xb55   : > { %v1803_v53 = vadd.f32 %v1795_v15, %v1755_v1 }
 0xb57   : > { %v1797_v14 = vpop.permute.xlu0 %1796  ;;  %v1827_v48 = vadd.f32 %v1824_v13, %v1803_v53 }
 0xb58   : > { %v1804_v61 = vadd.f32 %v1797_v14, %v1756_v17  ;;  %v1799_v59 = vpop.permute.xlu1 %1798 }
 0xb59   : > { %v1805_v55 = vadd.f32 %v1799_v59, %v1757_v6 }
 0xb5a   : > { %v1828_v50 = vadd.f32 %v1825_v45, %v1804_v61 }
 0xb5b   : > { %v1453_v52 = vpop.permute.xlu0 %1452  ;;  %v1829_v19 = vadd.f32 %v1826_v12, %v1805_v55 }
 0xb5c   : > { %v1867_v57 = vpop.permute.xlu1 %1866  ;;  %v1459_v9 = vadd.f32 %v1453_v52, %v3292_v22 }
 0xb5d   : > { %v1875_v29 = vadd.f32 %v1867_v57, %v1827_v48 }
 0xb5f   : > { %v1869_v40 = vpop.permute.xlu0 %1868 }
 0xb60   : > { %v1871_v11 = vpop.permute.xlu1 %1870  ;;  %v1876_v60 = vadd.f32 %v1869_v40, %v1828_v50 }
 0xb61   : > { %v1877_v30 = vadd.f32 %v1871_v11, %v1829_v19 }
 0xb63   : > { %v1497_v21 = vpop.permute.xlu0 %1496 }
 0xb64   : > { %v1505_v33 = vadd.f32 %v1497_v21, %v3355_v63  ;;  %v1499_v10 = vpop.permute.xlu1 %1498 }
 0xb65   : > { %v1506_v34 = vadd.f32 %v1499_v10, %v1458_v37 }
 0xb66   : > { %v1508_v16 = vmax.f32 %v1505_v33, 0.0 }
 0xb67   : > { %v1509_v56 = vmax.f32 %v1506_v34, 0.0  ;;  %v1501_v5 = vpop.permute.xlu0 %1500 }
 0xb68   : > { %v1511_v2 = vmin.f32 %v1508_v16, 255.0  ;;  %v1507_v25 = vadd.f32 %v1501_v5, %v1459_v9  ;;  %v1915_v54 = vpop.permute.xlu1 %1914 }
 0xb69   : > { %v1512_v63 = vmin.f32 %v1509_v56, 255.0  ;;  %v1923_v23 = vadd.f32 %v1915_v54, %v1875_v29 }
 0xb6a   : > { %2102 = vst.msk [vmem:[%s3075_s25 + $0x30] sm:$0xff] %vm678_vm0, %v1511_v2  ;;  %v1510_v22 = vmax.f32 %v1507_v25, 0.0 }
 0xb6b   : > { %2103 = vst.msk [vmem:[%s3075_s25 + $0x38] sm:$0xff] %vm678_vm0, %v1512_v63  ;;  %v1926_v4 = vmax.f32 %v1923_v23, 0.0  ;;  %v1917_v49 = vpop.permute.xlu0 %1916 }
 0xb6c   : > { %v1513_v47 = vmin.f32 %v1510_v22, 255.0  ;;  %v1924_v44 = vadd.f32 %v1917_v49, %v1876_v60  ;;  %v1919_v41 = vpop.permute.xlu1 %1918 }
 0xb6d   : > { %v1929_v20 = vmin.f32 %v1926_v4, 255.0  ;;  %v1925_v28 = vadd.f32 %v1919_v41, %v1877_v30 }
 0xb6e   : > { %2104 = vst.msk [vmem:[%s3075_s25 + $0x40] sm:$0xff] %vm678_vm0, %v1513_v47  ;;  %v1927_v62 = vmax.f32 %v1924_v44, 0.0 }
 0xb6f   : > { %2116 = vst.msk [vmem:[%s3075_s25 + $0x48] sm:$0xff] %vm678_vm0, %v1929_v20  ;;  %v1928_v35 = vmax.f32 %v1925_v28, 0.0 }
 0xb70   : > { %v1930_v26 = vmin.f32 %v1927_v62, 255.0 }
 0xb71   : > { %v1931_v58 = vmin.f32 %v1928_v35, 255.0 }
 0xb72   : > { %2117 = vst.msk [vmem:[%s3075_s25 + $0x50] sm:$0xff] %vm678_vm0, %v1930_v26 }
 0xb73   : > { %2118 = vst.msk [vmem:[%s3075_s25 + $0x58] sm:$0xff] %vm678_vm0, %v1931_v58 }
 0xb74   : > { %2374 = shalt.err (!%p2371_p2)
}
 0xb75   : > { %s2375_s8 = scalar_lea.hbm %s3557_s14, 1536  ;;  %s2379_s19 = scalar_lea.hbm %s3610_s3, 3072 }
 0xb76   : > { %p2376_p11 = scmp.ne.s32.totalorder %s3557_s14, %s2375_s8  ;;  %p2380_p3 = scmp.lt.u32.totalorder %s3557_s14, %s3610_s3 }
 0xb77   : > { %p2381_p4 = scmp.lt.u32.totalorder %s2379_s19, %s2375_s8  ;;  %p2383_p13 = scmp.lt.u32.totalorder %s2375_s8, %s3557_s14 }
 0xb78   : > { %p2377_p7 = pnand %p2376_p11, %p3676_p5 }
 0xb79   : > { %p2382_p1 = por %p2381_p4, %p2380_p3 }
 0xb7a   : > { %p2378_p0 = pneg %p2377_p7 }
 0xb7b   : > { %p2384_p8 = por %p2383_p13, %p2382_p1 }
 0xb7d   : > { %p2385_p10 = pnand %p2384_p8, %p2378_p0 }
 0xb7f   : > { %2388 = shalt.err (!%p2385_p10)
}
 0xb80   : > { %s2455_s10 = smov 128   ;;  %s2456_s17 = smov 8  }
 0xb81   : > { %2137 = dma.vmem_to_hbm [thread:$0]  (%p3676_p5), %s3559_s6, 1536, %s3557_s14, %s1937_s16, %s2455_s10, %s2455_s10, %s2456_s17  }
 0xb82 PF: > { %s1965_s1 = sand.u32 1, %s2419_s12   ;;  %p3677_p6 = scmp.ne.s32.totalorder %s3638_s24, 0 }
 0xb83   : > { %p3678_p9 = scmp.ge.s32.totalorder %s2431_s15, 2  ;;  %s1966_s30 = scalar_lea.sflag [#allocation4], %s1965_s1 }
 0xb85   : > { %p2150_p12 = pnand %p3678_p9, %p3677_p6 }
 0xb87   : > { %2414 = dma.done.wait (!%p2150_p12), %s1966_s30, 1536  }
 0xb88   : > { %2416 = vsyncadd (!%p2150_p12), %s1966_s30, 4294965760  ;;  %s3679_s25 = sld [smem:[#allocation12_spill]]  ;;  %s3680_s14 = sld [smem:[#allocation13_spill]] }
 0xb89   : > { %p19_p2 = scmp.ge.s32.totalorder %s2502_s18, 4   ;;  %s3681_s12 = smov %s2423_s13 }
 0xb8a   : > { %s3683_s15 = smov %s2502_s18 }
 0xb8b   :  { %21 = sbr.rel (!%p19_p2) target bundleno = 9 (0x9), region = 110 }
 0xb8e   : > { %s3682_s13 = smov %s3679_s25 }
 0xb92   :  { %1971 = vsyncpa [#allocation3], 1 }
 0xb93   :  { %1973 = vsyncpa [#allocation3 + $0x1], 1 }
 0xb94   :  { %1974 = vsyncpa [#allocation6], 1 }
 0xb95   :  { %1976 = vsyncpa [#allocation6 + $0x1], 1 }
 0xb96   :  { %1977 = vsyncpa [#allocation4], 1 }
 0xb97   :  { %1979 = vsyncpa [#allocation4 + $0x1], 1 }

</bundles_post_ra>
